<compile_context>
chip_gen: v7x
topology: tpu7x:2x2x1
jax: 0.10.0
libtpu: 0.0.40
codegen_flags: <defaults>
</compile_context>

<pallas_src>
import functools

import jax
import jax.numpy as jnp
from jax.experimental import pallas as pl
from jax.experimental.pallas import tpu as pltpu

FEAT_ORDER = ('full_res_input', 'stem', 'res2', 'res3', 'res4', 'res5')


def _lane_pad(w):
    # Head/tail zero padding (in lanes) of the flat conv scratch; keeps interior
    # stores lane-aligned and is always >= w + 1 (one pad row + one element).
    return ((w + 1 + 127) // 128) * 128


def _blob_offsets(C, out_dim):
    # Lane layout of the packed per-level weight blob (rows = C):
    #   [ w1 taps (9*cin1) | b1 | w2 taps (9*C) | b2 | wr (2C, rows 0..out_dim) | br ]
    cin1 = C + out_dim
    n1, n2 = 9 * cin1, 9 * C
    off_b1 = n1
    off_w2 = n1 + 1
    off_b2 = n1 + 1 + n2
    off_wr = n1 + n2 + 2
    off_br = off_wr + 2 * C
    total = off_br + 1
    return off_b1, off_w2, off_b2, off_wr, off_br, total


# --------------------------- Pallas kernel -----------------------------------

def _refine_level(motion, feat_ref, wconv_ref, u_ref, pad_ref, *, h, w, C, out_dim):
    """One decoder level, fully in VMEM. Returns the new motion field (out_dim, h*w)."""
    hw = h * w
    cin1 = C + out_dim
    lp = _lane_pad(w)
    f32 = jnp.float32
    off_b1, off_w2, off_b2, off_wr, off_br, _ = _blob_offsets(C, out_dim)

    # --- bilinear upsample of previous motion field
    if u_ref is None:
        # previous level was 1x1 -> bilinear upsample is a pure broadcast
        up = jnp.broadcast_to(motion, (out_dim, hw))
    else:
        up = jnp.dot(motion, u_ref[...], preferred_element_type=f32)     # (out_dim, hw)

    # --- column masks (kill the row-wrap of the +-1 horizontal taps), built in-kernel
    col = jax.lax.broadcasted_iota(jnp.int32, (1, hw), 1)
    if w & (w - 1) == 0:                      # power-of-two width: cheap bitwise path
        colw = jnp.bitwise_and(col, w - 1)
    else:
        colw = col % w
    mask_l = (colw != 0).astype(f32)          # (1, hw): col != 0
    mask_r = (colw != (w - 1)).astype(f32)    # (1, hw): col != w-1

    # --- zero ONLY the border stripes, then store feat + up in the interior.
    #     rows: [feat (C) -> later x1 (C), motion (out_dim) -> later x2 (C)]
    pad_ref[pl.ds(0, cin1), pl.ds(0, lp)] = jnp.zeros((cin1, lp), f32)
    pad_ref[pl.ds(0, cin1), pl.ds(lp + hw, lp)] = jnp.zeros((cin1, lp), f32)
    pad_ref[pl.ds(0, C), pl.ds(lp, hw)] = feat_ref[...].astype(f32)
    pad_ref[pl.ds(C, out_dim), pl.ds(lp, hw)] = up

    def conv3x3(off_w, off_b, cin, relu):
        # 9 taps = 9 whole-plane (C, cin) @ (cin, hw) MXU matmuls, grouped by dx so
        # each wrap mask is applied once per group sum.
        total = None
        for dx in range(3):
            grp = None
            for dy in range(3):
                t = dy * 3 + dx
                start = lp + (dy - 1) * w + (dx - 1)
                rhs = pad_ref[pl.ds(0, cin), pl.ds(start, hw)]
                lhs = wconv_ref[:, pl.ds(off_w + t * cin, cin)]
                c = jnp.dot(lhs, rhs, preferred_element_type=f32)
                grp = c if grp is None else grp + c
            if dx == 0:
                grp = grp * mask_l
            elif dx == 2:
                grp = grp * mask_r
            total = grp if total is None else total + grp
        total = total + wconv_ref[:, pl.ds(off_b, 1)]          # bias (C, 1) broadcast
        return jnp.maximum(total, 0.0) if relu else total

    x1 = conv3x3(0, off_b1, cin1, relu=False)                  # conv[:-2]
    pad_ref[pl.ds(0, C), pl.ds(lp, hw)] = x1                   # reuse zero-bordered scratch
    x2 = conv3x3(off_w2, off_b2, C, relu=True)                 # conv[-2:]
    pad_ref[pl.ds(C, C), pl.ds(lp, hw)] = x2                   # stack x2 below x1

    # --- fused 1x1 reduce over cat(x1, x2) + bias + residual (upsampled motion)
    wr = wconv_ref[pl.ds(0, out_dim), pl.ds(off_wr, 2 * C)]    # (out_dim, 2C)
    br = wconv_ref[pl.ds(0, out_dim), pl.ds(off_br, 1)]        # (out_dim, 1)
    out = (jnp.dot(wr, pad_ref[pl.ds(0, 2 * C), pl.ds(lp, hw)],
                   preferred_element_type=f32)
           + br + up)
    return out


def _decoder_kernel(*refs, dims, out_dim, out_offs):
    # refs layout: [m0] + per level [feat, weight-blob, (upsample matrix if any)]
    #              + [packed output] + [shared pad scratch]
    n = len(dims)
    m0_ref = refs[0]
    idx = 1
    lvl_refs = []
    for (_, _, _, has_u) in dims:
        cnt = 3 if has_u else 2
        lvl_refs.append(refs[idx:idx + cnt])
        idx += cnt
    out_ref = refs[idx]
    pad_ref = refs[idx + 1]

    motion = m0_ref[...].astype(jnp.float32)                   # (out_dim, 1)
    for l in range(n):
        h, w, C, has_u = dims[l]
        r = lvl_refs[l]
        feat_ref, wconv_ref = r[0], r[1]
        u_ref = r[2] if has_u else None
        motion = _refine_level(motion, feat_ref, wconv_ref, u_ref, pad_ref,
                               h=h, w=w, C=C, out_dim=out_dim)
        if out_offs[l] is not None:                            # only requested scales
            out_ref[:, pl.ds(out_offs[l], h * w)] = motion.astype(out_ref.dtype)


# --------------------------- host-side prep ----------------------------------

def _bilinear_matrix(out_size, in_size):
    # PyTorch F.interpolate(mode='bilinear', align_corners=False) sampling weights
    # (used for upsampling only, out_size >= in_size).
    o = jnp.arange(out_size, dtype=jnp.float32)
    s = (o + 0.5) * (float(in_size) / float(out_size)) - 0.5
    s = jnp.maximum(s, 0.0)
    i0 = jnp.minimum(jnp.floor(s).astype(jnp.int32), in_size - 1)
    i1 = jnp.minimum(i0 + 1, in_size - 1)
    lam = s - i0.astype(jnp.float32)
    return (jax.nn.one_hot(i0, in_size, dtype=jnp.float32) * (1.0 - lam)[:, None]
            + jax.nn.one_hot(i1, in_size, dtype=jnp.float32) * lam[:, None])


def _upsample_matrix(h, w, hp, wp):
    # U^T such that up_flat = motion_flat @ U^T ; U^T[i*wp+j, y*w+x] = Wh[y,i]*Ww[x,j]
    wh = _bilinear_matrix(h, hp)      # (h, hp)
    ww = _bilinear_matrix(w, wp)      # (w, wp)
    return jnp.einsum('ya,xb->abyx', wh, ww).reshape(hp * wp, h * w)


def _pack_level_weights(p, C, out_dim):
    # One lane-dense (C, total) blob per level, layout given by _blob_offsets.
    cin1 = C + out_dim
    # conv1 weight HWIO (3,3,cin1,C): torch cin order [motion, feat] -> buffer [feat, motion]
    w1 = jnp.concatenate([p['w1'][:, :, out_dim:, :], p['w1'][:, :, :out_dim, :]], axis=2)
    w1b = jnp.transpose(w1, (3, 0, 1, 2)).reshape(C, 9 * cin1)        # [cout, tap*cin]
    w2b = jnp.transpose(p['w2'], (3, 0, 1, 2)).reshape(C, 9 * C)
    b1 = p['b1'].reshape(C, 1)
    b2 = p['b2'].reshape(C, 1)
    red = jnp.concatenate([p['wr'].T, p['br'].reshape(out_dim, 1)], axis=1)   # (out_dim, 2C+1)
    red_pad = jnp.zeros((C, 2 * C + 1), jnp.float32).at[:out_dim].set(red)
    return jnp.concatenate([w1b, b1, w2b, b2, red_pad], axis=1)


# --------------------------- forward (Pallas) ---------------------------------

def motion_decoder_forward(params, pose_feat, ego_motion, *, scales, out_dim):
    feats = [pose_feat['motion_input'][k] for k in FEAT_ORDER]        # NCHW
    n = len(feats)
    level_feats = [feats[n - 1 - ii] for ii in range(n)]              # res5 ... full_res_input
    B = ego_motion.shape[0]

    # residual translation: 1x1 conv on 100*ego_motion (36 MACs) -> plain JAX
    eg = (100.0 * ego_motion).reshape(B, 6)
    m0 = (eg @ params['res_trans']['w'] + params['res_trans']['b']).reshape(B, out_dim, 1)

    needed = {n - 1 - s for s in scales}

    dims, out_offs = [], []
    args = [m0]
    in_specs = [pl.BlockSpec((None, out_dim, 1), lambda i: (i, 0, 0))]
    off = 0
    flops = 0
    ph, pw = 1, 1
    for ii in range(n):
        f = level_feats[ii]
        _, C, h, w = f.shape
        hw = h * w
        has_u = (ph * pw) > 1
        dims.append((h, w, C, has_u))

        feat = f.reshape(B, C, hw)
        args.append(feat)
        in_specs.append(pl.BlockSpec((None, C, hw), lambda i: (i, 0, 0)))

        wblob = _pack_level_weights(params['levels'][ii], C, out_dim)
        args.append(wblob)
        in_specs.append(pl.BlockSpec(wblob.shape, lambda i: (0, 0)))

        if has_u:
            u = _upsample_matrix(h, w, ph, pw)
            args.append(u)
            in_specs.append(pl.BlockSpec(u.shape, lambda i: (0, 0)))
            flops += 2 * out_dim * (ph * pw) * hw * B

        cin1 = C + out_dim
        flops += (2 * 9 * C * cin1 * hw + 2 * 9 * C * C * hw
                  + 2 * out_dim * 2 * C * hw) * B

        if ii in needed:
            out_offs.append(off)
            off += max(((hw + 127) // 128) * 128, 128)     # 128-aligned per-level slot
        else:
            out_offs.append(None)
        ph, pw = h, w

    tot = max(off, 128)
    rows_max = max(max(2 * C, C + out_dim) for (_, _, C, _) in dims)
    lanes_max = max(2 * _lane_pad(w) + h * w for (h, w, _, _) in dims)

    out_shape = jax.ShapeDtypeStruct((B, out_dim, tot), jnp.float32)
    out_spec = pl.BlockSpec((None, out_dim, tot), lambda i: (i, 0, 0))

    bytes_accessed = int(sum(a.size * a.dtype.itemsize for a in args)) \
        + B * out_dim * tot * 4

    kern = functools.partial(_decoder_kernel, dims=tuple(dims), out_dim=out_dim,
                             out_offs=tuple(out_offs))
    packed = pl.pallas_call(
        kern,
        out_shape=out_shape,
        grid=(B,),
        in_specs=in_specs,
        out_specs=out_spec,
        scratch_shapes=[pltpu.VMEM((rows_max, lanes_max), jnp.float32)],
        compiler_params=pltpu.CompilerParams(dimension_semantics=("parallel",)),
        cost_estimate=pl.CostEstimate(flops=int(flops), transcendentals=0,
                                      bytes_accessed=int(bytes_accessed)),
    )(*args)

    outputs = {}
    for scale in scales:
        ii = n - 1 - scale
        h, w, _, _ = dims[ii]
        o = out_offs[ii]
        m_raw = 0.01 * packed[:, :, o:o + h * w].reshape(B, out_dim, h, w)
        if out_dim == 1:
            outputs[('motion_prob', scale)] = m_raw
            outputs[('motion_mask', scale)] = jax.nn.sigmoid(m_raw)
        elif out_dim == 3:
            outputs[('complete_flow', scale)] = m_raw
        else:
            raise Exception(f'out_dim={out_dim} not excepted.')
    return outputs


# --------------------------- parameters --------------------------------------

def init_params(key, chans, out_dim):
    params = {'levels': []}
    k_rt, key = jax.random.split(key)
    params['res_trans'] = {
        'w': jax.random.normal(k_rt, (6, out_dim), jnp.float32) / (6.0 ** 0.5),
        'b': 0.01 * jax.random.normal(jax.random.fold_in(k_rt, 1), (1, out_dim), jnp.float32),
    }
    for C in chans:
        k1, k2, k3, key = jax.random.split(key, 4)
        params['levels'].append({
            'w1': jax.random.normal(k1, (3, 3, C + out_dim, C), jnp.float32) / ((9.0 * (C + out_dim)) ** 0.5),
            'b1': 0.01 * jax.random.normal(jax.random.fold_in(k1, 1), (1, C), jnp.float32),
            'w2': jax.random.normal(k2, (3, 3, C, C), jnp.float32) / ((9.0 * C) ** 0.5),
            'b2': 0.01 * jax.random.normal(jax.random.fold_in(k2, 1), (1, C), jnp.float32),
            'wr': jax.random.normal(k3, (2 * C, out_dim), jnp.float32) / ((2.0 * C) ** 0.5),
            'br': 0.01 * jax.random.normal(jax.random.fold_in(k3, 1), (1, out_dim), jnp.float32),
        })
    return params


# --------------------------- pure-JAX reference -------------------------------

def motion_decoder_forward_ref(params, pose_feat, ego_motion, *, scales, out_dim):
    feats_nhwc = [jnp.transpose(pose_feat['motion_input'][k], (0, 2, 3, 1)) for k in FEAT_ORDER]
    n_levels = len(feats_nhwc)

    def conv3_ref(x, w, b, relu):
        y = jax.lax.conv_general_dilated(x, w, (1, 1), 'SAME',
                                         dimension_numbers=('NHWC', 'HWIO', 'NHWC'))
        y = y + b.reshape(1, 1, 1, -1)
        return jnp.maximum(y, 0.0) if relu else y

    def conv1_ref(x, w, b):
        return jnp.einsum('bhwc,cd->bhwd', x, w) + b.reshape(1, 1, 1, -1)

    def up_ref(m, h, w):
        wh = _bilinear_matrix(h, m.shape[2])
        ww = _bilinear_matrix(w, m.shape[3])
        t = jnp.einsum('oi,bciw->bcow', wh, m)
        return jnp.einsum('pj,bcoj->bcop', ww, t)

    x = jnp.transpose(100.0 * ego_motion, (0, 2, 3, 1))
    motion = jnp.transpose(conv1_ref(x, params['res_trans']['w'], params['res_trans']['b']),
                           (0, 3, 1, 2))
    level_out = []
    for ii in range(n_levels):
        feat = feats_nhwc[n_levels - 1 - ii]
        h, w = feat.shape[1], feat.shape[2]
        up = up_ref(motion, h, w)
        up_nhwc = jnp.transpose(up, (0, 2, 3, 1))
        conv_in = jnp.concatenate([up_nhwc, feat], axis=-1)
        p = params['levels'][ii]
        x1 = conv3_ref(conv_in, p['w1'], p['b1'], relu=False)
        x2 = conv3_ref(x1, p['w2'], p['b2'], relu=True)
        out_nhwc = conv1_ref(jnp.concatenate([x1, x2], -1), p['wr'], p['br']) + up_nhwc
        motion = jnp.transpose(out_nhwc, (0, 3, 1, 2))
        level_out.append(motion)

    outputs = {}
    for scale in scales:
        ii = n_levels - 1 - scale
        m_raw = 0.01 * level_out[ii]
        if out_dim == 1:
            outputs[('motion_prob', scale)] = m_raw
            outputs[('motion_mask', scale)] = jax.nn.sigmoid(m_raw)
        else:
            outputs[('complete_flow', scale)] = m_raw
    return outputs


# --------------------------- main ---------------------------------------------

if __name__ == "__main__":
    key = jax.random.PRNGKey(0)
    B, Hf, Wf = 2, 32, 32
    out_dim = 3
    scales = (0, 1, 2, 3)
    enc_chans = [8, 8, 16, 16, 32]                 # num_inp_feat arg (stem..res5)
    org_in_ch = 2 * (3 + 1)                        # num_input_images * (3 + inp_disp)
    chans = enc_chans[::-1] + [org_in_ch]          # == self.num_inp_feat

    k_feat, k_ego, k_par = jax.random.split(key, 3)
    feat_shapes = {
        'full_res_input': (B, org_in_ch, Hf, Wf),
        'stem': (B, enc_chans[0], Hf // 2, Wf // 2),
        'res2': (B, enc_chans[1], Hf // 4, Wf // 4),
        'res3': (B, enc_chans[2], Hf // 8, Wf // 8),
        'res4': (B, enc_chans[3], Hf // 16, Wf // 16),
        'res5': (B, enc_chans[4], Hf // 32, Wf // 32),
    }
    fk = jax.random.split(k_feat, len(feat_shapes))
    pose_feat = {'motion_input': {
        name: jax.random.normal(fk[i], shp, jnp.float32)
        for i, (name, shp) in enumerate(feat_shapes.items())
    }}
    ego_motion = 0.01 * jax.random.normal(k_ego, (B, 6, 1, 1), jnp.float32)

    params = init_params(k_par, chans, out_dim)

    fwd = jax.jit(motion_decoder_forward, static_argnames=('scales', 'out_dim'))
    out = fwd(params, pose_feat, ego_motion, scales=scales, out_dim=out_dim)
    out = jax.tree_util.tree_map(jax.block_until_ready, out)

    ref = motion_decoder_forward_ref(params, pose_feat, ego_motion, scales=scales, out_dim=out_dim)
    for k in out:
        assert out[k].shape == ref[k].shape, (k, out[k].shape, ref[k].shape)
        assert bool(jnp.allclose(out[k], ref[k], atol=1e-4, rtol=1e-3)), k

    print("KERNEL_OK")
</pallas_src>

<mosaic_0001>
module attributes {stable_mosaic.version = 11 : i64} {
  func.func @_decoder_kernel(%arg0: i32, %arg1: memref<1x3x1xf32, #tpu.memory_space<vmem>>, %arg2: memref<1x32x1xf32, #tpu.memory_space<vmem>>, %arg3: memref<32x670xf32, #tpu.memory_space<vmem>>, %arg4: memref<1x16x4xf32, #tpu.memory_space<vmem>>, %arg5: memref<16x350xf32, #tpu.memory_space<vmem>>, %arg6: memref<1x16x16xf32, #tpu.memory_space<vmem>>, %arg7: memref<16x350xf32, #tpu.memory_space<vmem>>, %arg8: memref<4x16xf32, #tpu.memory_space<vmem>>, %arg9: memref<1x8x64xf32, #tpu.memory_space<vmem>>, %arg10: memref<8x190xf32, #tpu.memory_space<vmem>>, %arg11: memref<16x64xf32, #tpu.memory_space<vmem>>, %arg12: memref<1x8x256xf32, #tpu.memory_space<vmem>>, %arg13: memref<8x190xf32, #tpu.memory_space<vmem>>, %arg14: memref<64x256xf32, #tpu.memory_space<vmem>>, %arg15: memref<1x8x1024xf32, #tpu.memory_space<vmem>>, %arg16: memref<8x190xf32, #tpu.memory_space<vmem>>, %arg17: memref<256x1024xf32, #tpu.memory_space<vmem>>, %arg18: memref<1x3x1536xf32, #tpu.memory_space<vmem>>, %arg19: memref<64x1280xf32, #tpu.memory_space<vmem>>) attributes {dimension_semantics = [#tpu.dimension_semantics<parallel>], iteration_bounds = array<i64: 2>, scalar_prefetch = 0 : i64, scratch_operands = 1 : i64, tpu.core_type = #tpu.core_type<tc>, window_params = [{transform_indices = @transform_0, window_bounds = array<i64: 1, 3, 1>}, {transform_indices = @transform_1, window_bounds = array<i64: 1, 32, 1>}, {pipeline_mode = #tpu.pipeline_mode<synchronous>, transform_indices = @transform_2, window_bounds = array<i64: 32, 670>}, {transform_indices = @transform_3, window_bounds = array<i64: 1, 16, 4>}, {pipeline_mode = #tpu.pipeline_mode<synchronous>, transform_indices = @transform_4, window_bounds = array<i64: 16, 350>}, {transform_indices = @transform_5, window_bounds = array<i64: 1, 16, 16>}, {pipeline_mode = #tpu.pipeline_mode<synchronous>, transform_indices = @transform_6, window_bounds = array<i64: 16, 350>}, {pipeline_mode = #tpu.pipeline_mode<synchronous>, transform_indices = @transform_7, window_bounds = array<i64: 4, 16>}, {transform_indices = @transform_8, window_bounds = array<i64: 1, 8, 64>}, {pipeline_mode = #tpu.pipeline_mode<synchronous>, transform_indices = @transform_9, window_bounds = array<i64: 8, 190>}, {pipeline_mode = #tpu.pipeline_mode<synchronous>, transform_indices = @transform_10, window_bounds = array<i64: 16, 64>}, {transform_indices = @transform_11, window_bounds = array<i64: 1, 8, 256>}, {pipeline_mode = #tpu.pipeline_mode<synchronous>, transform_indices = @transform_12, window_bounds = array<i64: 8, 190>}, {pipeline_mode = #tpu.pipeline_mode<synchronous>, transform_indices = @transform_13, window_bounds = array<i64: 64, 256>}, {transform_indices = @transform_14, window_bounds = array<i64: 1, 8, 1024>}, {pipeline_mode = #tpu.pipeline_mode<synchronous>, transform_indices = @transform_15, window_bounds = array<i64: 8, 190>}, {pipeline_mode = #tpu.pipeline_mode<synchronous>, transform_indices = @transform_16, window_bounds = array<i64: 256, 1024>}, {transform_indices = @transform_17, window_bounds = array<i64: 1, 3, 1536>}]} {
    %c0 = arith.constant 0 : index
    %c0_0 = arith.constant 0 : index
    %c0_1 = arith.constant 0 : index
    %0 = vector.load %arg1[%c0, %c0_0, %c0_1] : memref<1x3x1xf32, #tpu.memory_space<vmem>>, vector<1x3x1xf32>
    %1 = vector.shape_cast %0 : vector<1x3x1xf32> to vector<3x1xf32>
    %2 = tpu.iota {dimensions = array<i32: 1>} : vector<1x1xi32>
    %c0_i32 = arith.constant 0 : i32
    %3 = vector.broadcast %c0_i32 : i32 to vector<1x1xi32>
    %4 = arith.andi %2, %3 : vector<1x1xi32>
    %c0_i32_2 = arith.constant 0 : i32
    %5 = vector.broadcast %c0_i32_2 : i32 to vector<1x1xi32>
    %6 = arith.cmpi ne, %4, %5 : vector<1x1xi32>
    %7 = arith.extui %6 : vector<1x1xi1> to vector<1x1xi32>
    %8 = arith.sitofp %7 : vector<1x1xi32> to vector<1x1xf32>
    %c0_i32_3 = arith.constant 0 : i32
    %9 = vector.broadcast %c0_i32_3 : i32 to vector<1x1xi32>
    %10 = arith.cmpi ne, %4, %9 : vector<1x1xi32>
    %11 = arith.extui %10 : vector<1x1xi1> to vector<1x1xi32>
    %12 = arith.sitofp %11 : vector<1x1xi32> to vector<1x1xf32>
    %cst = arith.constant 0.000000e+00 : f32
    %13 = vector.broadcast %cst : f32 to vector<35x128xf32>
    %c0_4 = arith.constant 0 : index
    %c0_5 = arith.constant 0 : index
    %14 = vector.load %arg19[%c0_4, %c0_5] : memref<64x1280xf32, #tpu.memory_space<vmem>>, vector<35x128xf32>
    tpu.vector_store %arg19[%c0_4, %c0_5], %13 {strides = array<i32>} : memref<64x1280xf32, #tpu.memory_space<vmem>>, vector<35x128xf32>,
    %cst_6 = arith.constant 0.000000e+00 : f32
    %15 = vector.broadcast %cst_6 : f32 to vector<35x128xf32>
    %c0_7 = arith.constant 0 : index
    %c129 = arith.constant 129 : index
    %16 = vector.load %arg19[%c0_7, %c129] : memref<64x1280xf32, #tpu.memory_space<vmem>>, vector<35x128xf32>
    tpu.vector_store %arg19[%c0_7, %c129], %15 {strides = array<i32>} : memref<64x1280xf32, #tpu.memory_space<vmem>>, vector<35x128xf32>,
    %c0_8 = arith.constant 0 : index
    %c0_9 = arith.constant 0 : index
    %c0_10 = arith.constant 0 : index
    %17 = vector.load %arg2[%c0_8, %c0_9, %c0_10] : memref<1x32x1xf32, #tpu.memory_space<vmem>>, vector<1x32x1xf32>
    %18 = vector.shape_cast %17 : vector<1x32x1xf32> to vector<32x1xf32>
    %c0_11 = arith.constant 0 : index
    %c128 = arith.constant 128 : index
    %19 = vector.load %arg19[%c0_11, %c128] : memref<64x1280xf32, #tpu.memory_space<vmem>>, vector<32x1xf32>
    tpu.vector_store %arg19[%c0_11, %c128], %18 {strides = array<i32>} : memref<64x1280xf32, #tpu.memory_space<vmem>>, vector<32x1xf32>,
    %c32 = arith.constant 32 : index
    %c128_12 = arith.constant 128 : index
    %20 = vector.load %arg19[%c32, %c128_12] : memref<64x1280xf32, #tpu.memory_space<vmem>>, vector<3x1xf32>
    tpu.vector_store %arg19[%c32, %c128_12], %1 {strides = array<i32>} : memref<64x1280xf32, #tpu.memory_space<vmem>>, vector<3x1xf32>,
    %c0_13 = arith.constant 0 : index
    %c126 = arith.constant 126 : index
    %21 = vector.load %arg19[%c0_13, %c126] : memref<64x1280xf32, #tpu.memory_space<vmem>>, vector<35x1xf32>
    %c0_14 = arith.constant 0 : index
    %c0_15 = arith.constant 0 : index
    %22 = vector.load %arg3[%c0_14, %c0_15] : memref<32x670xf32, #tpu.memory_space<vmem>>, vector<32x35xf32>
    %cst_16 = arith.constant dense<0.000000e+00> : vector<32x1xf32>
    %23 = tpu.matmul %22, %21, %cst_16 {dimension_numbers = #tpu.dot_dimension_numbers<[1], [0], [0], [1], [0, 0, 1, 1], [], []>} : vector<32x35xf32>, vector<35x1xf32>, vector<32x1xf32> -> vector<32x1xf32>
    %c0_17 = arith.constant 0 : index
    %c127 = arith.constant 127 : index
    %24 = vector.load %arg19[%c0_17, %c127] : memref<64x1280xf32, #tpu.memory_space<vmem>>, vector<35x1xf32>
    %c0_18 = arith.constant 0 : index
    %c105 = arith.constant 105 : index
    %25 = vector.load %arg3[%c0_18, %c105] : memref<32x670xf32, #tpu.memory_space<vmem>>, vector<32x35xf32>
    %cst_19 = arith.constant dense<0.000000e+00> : vector<32x1xf32>
    %26 = tpu.matmul %25, %24, %cst_19 {dimension_numbers = #tpu.dot_dimension_numbers<[1], [0], [0], [1], [0, 0, 1, 1], [], []>} : vector<32x35xf32>, vector<35x1xf32>, vector<32x1xf32> -> vector<32x1xf32>
    %27 = arith.addf %23, %26 : vector<32x1xf32>
    %c0_20 = arith.constant 0 : index
    %c128_21 = arith.constant 128 : index
    %28 = vector.load %arg19[%c0_20, %c128_21] : memref<64x1280xf32, #tpu.memory_space<vmem>>, vector<35x1xf32>
    %c0_22 = arith.constant 0 : index
    %c210 = arith.constant 210 : index
    %29 = vector.load %arg3[%c0_22, %c210] : memref<32x670xf32, #tpu.memory_space<vmem>>, vector<32x35xf32>
    %cst_23 = arith.constant dense<0.000000e+00> : vector<32x1xf32>
    %30 = tpu.matmul %29, %28, %cst_23 {dimension_numbers = #tpu.dot_dimension_numbers<[1], [0], [0], [1], [0, 0, 1, 1], [], []>} : vector<32x35xf32>, vector<35x1xf32>, vector<32x1xf32> -> vector<32x1xf32>
    %31 = arith.addf %27, %30 : vector<32x1xf32>
    %32 = vector.broadcast %8 : vector<1x1xf32> to vector<32x1xf32>
    %33 = arith.mulf %31, %32 : vector<32x1xf32>
    %c0_24 = arith.constant 0 : index
    %c127_25 = arith.constant 127 : index
    %34 = vector.load %arg19[%c0_24, %c127_25] : memref<64x1280xf32, #tpu.memory_space<vmem>>, vector<35x1xf32>
    %c0_26 = arith.constant 0 : index
    %c35 = arith.constant 35 : index
    %35 = vector.load %arg3[%c0_26, %c35] : memref<32x670xf32, #tpu.memory_space<vmem>>, vector<32x35xf32>
    %cst_27 = arith.constant dense<0.000000e+00> : vector<32x1xf32>
    %36 = tpu.matmul %35, %34, %cst_27 {dimension_numbers = #tpu.dot_dimension_numbers<[1], [0], [0], [1], [0, 0, 1, 1], [], []>} : vector<32x35xf32>, vector<35x1xf32>, vector<32x1xf32> -> vector<32x1xf32>
    %c0_28 = arith.constant 0 : index
    %c128_29 = arith.constant 128 : index
    %37 = vector.load %arg19[%c0_28, %c128_29] : memref<64x1280xf32, #tpu.memory_space<vmem>>, vector<35x1xf32>
    %c0_30 = arith.constant 0 : index
    %c140 = arith.constant 140 : index
    %38 = vector.load %arg3[%c0_30, %c140] : memref<32x670xf32, #tpu.memory_space<vmem>>, vector<32x35xf32>
    %cst_31 = arith.constant dense<0.000000e+00> : vector<32x1xf32>
    %39 = tpu.matmul %38, %37, %cst_31 {dimension_numbers = #tpu.dot_dimension_numbers<[1], [0], [0], [1], [0, 0, 1, 1], [], []>} : vector<32x35xf32>, vector<35x1xf32>, vector<32x1xf32> -> vector<32x1xf32>
    %40 = arith.addf %36, %39 : vector<32x1xf32>
    %c0_32 = arith.constant 0 : index
    %c129_33 = arith.constant 129 : index
    %41 = vector.load %arg19[%c0_32, %c129_33] : memref<64x1280xf32, #tpu.memory_space<vmem>>, vector<35x1xf32>
    %c0_34 = arith.constant 0 : index
    %c245 = arith.constant 245 : index
    %42 = vector.load %arg3[%c0_34, %c245] : memref<32x670xf32, #tpu.memory_space<vmem>>, vector<32x35xf32>
    %cst_35 = arith.constant dense<0.000000e+00> : vector<32x1xf32>
    %43 = tpu.matmul %42, %41, %cst_35 {dimension_numbers = #tpu.dot_dimension_numbers<[1], [0], [0], [1], [0, 0, 1, 1], [], []>} : vector<32x35xf32>, vector<35x1xf32>, vector<32x1xf32> -> vector<32x1xf32>
    %44 = arith.addf %40, %43 : vector<32x1xf32>
    %45 = arith.addf %33, %44 : vector<32x1xf32>
    %c0_36 = arith.constant 0 : index
    %c128_37 = arith.constant 128 : index
    %46 = vector.load %arg19[%c0_36, %c128_37] : memref<64x1280xf32, #tpu.memory_space<vmem>>, vector<35x1xf32>
    %c0_38 = arith.constant 0 : index
    %c70 = arith.constant 70 : index
    %47 = vector.load %arg3[%c0_38, %c70] : memref<32x670xf32, #tpu.memory_space<vmem>>, vector<32x35xf32>
    %cst_39 = arith.constant dense<0.000000e+00> : vector<32x1xf32>
    %48 = tpu.matmul %47, %46, %cst_39 {dimension_numbers = #tpu.dot_dimension_numbers<[1], [0], [0], [1], [0, 0, 1, 1], [], []>} : vector<32x35xf32>, vector<35x1xf32>, vector<32x1xf32> -> vector<32x1xf32>
    %c0_40 = arith.constant 0 : index
    %c129_41 = arith.constant 129 : index
    %49 = vector.load %arg19[%c0_40, %c129_41] : memref<64x1280xf32, #tpu.memory_space<vmem>>, vector<35x1xf32>
    %c0_42 = arith.constant 0 : index
    %c175 = arith.constant 175 : index
    %50 = vector.load %arg3[%c0_42, %c175] : memref<32x670xf32, #tpu.memory_space<vmem>>, vector<32x35xf32>
    %cst_43 = arith.constant dense<0.000000e+00> : vector<32x1xf32>
    %51 = tpu.matmul %50, %49, %cst_43 {dimension_numbers = #tpu.dot_dimension_numbers<[1], [0], [0], [1], [0, 0, 1, 1], [], []>} : vector<32x35xf32>, vector<35x1xf32>, vector<32x1xf32> -> vector<32x1xf32>
    %52 = arith.addf %48, %51 : vector<32x1xf32>
    %c0_44 = arith.constant 0 : index
    %c130 = arith.constant 130 : index
    %53 = vector.load %arg19[%c0_44, %c130] : memref<64x1280xf32, #tpu.memory_space<vmem>>, vector<35x1xf32>
    %c0_45 = arith.constant 0 : index
    %c280 = arith.constant 280 : index
    %54 = vector.load %arg3[%c0_45, %c280] : memref<32x670xf32, #tpu.memory_space<vmem>>, vector<32x35xf32>
    %cst_46 = arith.constant dense<0.000000e+00> : vector<32x1xf32>
    %55 = tpu.matmul %54, %53, %cst_46 {dimension_numbers = #tpu.dot_dimension_numbers<[1], [0], [0], [1], [0, 0, 1, 1], [], []>} : vector<32x35xf32>, vector<35x1xf32>, vector<32x1xf32> -> vector<32x1xf32>
    %56 = arith.addf %52, %55 : vector<32x1xf32>
    %57 = vector.broadcast %12 : vector<1x1xf32> to vector<32x1xf32>
    %58 = arith.mulf %56, %57 : vector<32x1xf32>
    %59 = arith.addf %45, %58 : vector<32x1xf32>
    %c0_47 = arith.constant 0 : index
    %c315 = arith.constant 315 : index
    %60 = vector.load %arg3[%c0_47, %c315] : memref<32x670xf32, #tpu.memory_space<vmem>>, vector<32x1xf32>
    %61 = arith.addf %59, %60 : vector<32x1xf32>
    %c0_48 = arith.constant 0 : index
    %c128_49 = arith.constant 128 : index
    %62 = vector.load %arg19[%c0_48, %c128_49] : memref<64x1280xf32, #tpu.memory_space<vmem>>, vector<32x1xf32>
    tpu.vector_store %arg19[%c0_48, %c128_49], %61 {strides = array<i32>} : memref<64x1280xf32, #tpu.memory_space<vmem>>, vector<32x1xf32>,
    %c0_50 = arith.constant 0 : index
    %c126_51 = arith.constant 126 : index
    %63 = vector.load %arg19[%c0_50, %c126_51] : memref<64x1280xf32, #tpu.memory_space<vmem>>, vector<32x1xf32>
    %c0_52 = arith.constant 0 : index
    %c316 = arith.constant 316 : index
    %64 = vector.load %arg3[%c0_52, %c316] : memref<32x670xf32, #tpu.memory_space<vmem>>, vector<32x32xf32>
    %cst_53 = arith.constant dense<0.000000e+00> : vector<32x1xf32>
    %65 = tpu.matmul %64, %63, %cst_53 {dimension_numbers = #tpu.dot_dimension_numbers<[1], [0], [0], [1], [0, 0, 1, 1], [], []>} : vector<32x32xf32>, vector<32x1xf32>, vector<32x1xf32> -> vector<32x1xf32>
    %c0_54 = arith.constant 0 : index
    %c127_55 = arith.constant 127 : index
    %66 = vector.load %arg19[%c0_54, %c127_55] : memref<64x1280xf32, #tpu.memory_space<vmem>>, vector<32x1xf32>
    %c0_56 = arith.constant 0 : index
    %c412 = arith.constant 412 : index
    %67 = vector.load %arg3[%c0_56, %c412] : memref<32x670xf32, #tpu.memory_space<vmem>>, vector<32x32xf32>
    %cst_57 = arith.constant dense<0.000000e+00> : vector<32x1xf32>
    %68 = tpu.matmul %67, %66, %cst_57 {dimension_numbers = #tpu.dot_dimension_numbers<[1], [0], [0], [1], [0, 0, 1, 1], [], []>} : vector<32x32xf32>, vector<32x1xf32>, vector<32x1xf32> -> vector<32x1xf32>
    %69 = arith.addf %65, %68 : vector<32x1xf32>
    %c0_58 = arith.constant 0 : index
    %c128_59 = arith.constant 128 : index
    %70 = vector.load %arg19[%c0_58, %c128_59] : memref<64x1280xf32, #tpu.memory_space<vmem>>, vector<32x1xf32>
    %c0_60 = arith.constant 0 : index
    %c508 = arith.constant 508 : index
    %71 = vector.load %arg3[%c0_60, %c508] : memref<32x670xf32, #tpu.memory_space<vmem>>, vector<32x32xf32>
    %cst_61 = arith.constant dense<0.000000e+00> : vector<32x1xf32>
    %72 = tpu.matmul %71, %70, %cst_61 {dimension_numbers = #tpu.dot_dimension_numbers<[1], [0], [0], [1], [0, 0, 1, 1], [], []>} : vector<32x32xf32>, vector<32x1xf32>, vector<32x1xf32> -> vector<32x1xf32>
    %73 = arith.addf %69, %72 : vector<32x1xf32>
    %74 = vector.broadcast %8 : vector<1x1xf32> to vector<32x1xf32>
    %75 = arith.mulf %73, %74 : vector<32x1xf32>
    %c0_62 = arith.constant 0 : index
    %c127_63 = arith.constant 127 : index
    %76 = vector.load %arg19[%c0_62, %c127_63] : memref<64x1280xf32, #tpu.memory_space<vmem>>, vector<32x1xf32>
    %c0_64 = arith.constant 0 : index
    %c348 = arith.constant 348 : index
    %77 = vector.load %arg3[%c0_64, %c348] : memref<32x670xf32, #tpu.memory_space<vmem>>, vector<32x32xf32>
    %cst_65 = arith.constant dense<0.000000e+00> : vector<32x1xf32>
    %78 = tpu.matmul %77, %76, %cst_65 {dimension_numbers = #tpu.dot_dimension_numbers<[1], [0], [0], [1], [0, 0, 1, 1], [], []>} : vector<32x32xf32>, vector<32x1xf32>, vector<32x1xf32> -> vector<32x1xf32>
    %c0_66 = arith.constant 0 : index
    %c128_67 = arith.constant 128 : index
    %79 = vector.load %arg19[%c0_66, %c128_67] : memref<64x1280xf32, #tpu.memory_space<vmem>>, vector<32x1xf32>
    %c0_68 = arith.constant 0 : index
    %c444 = arith.constant 444 : index
    %80 = vector.load %arg3[%c0_68, %c444] : memref<32x670xf32, #tpu.memory_space<vmem>>, vector<32x32xf32>
    %cst_69 = arith.constant dense<0.000000e+00> : vector<32x1xf32>
    %81 = tpu.matmul %80, %79, %cst_69 {dimension_numbers = #tpu.dot_dimension_numbers<[1], [0], [0], [1], [0, 0, 1, 1], [], []>} : vector<32x32xf32>, vector<32x1xf32>, vector<32x1xf32> -> vector<32x1xf32>
    %82 = arith.addf %78, %81 : vector<32x1xf32>
    %c0_70 = arith.constant 0 : index
    %c129_71 = arith.constant 129 : index
    %83 = vector.load %arg19[%c0_70, %c129_71] : memref<64x1280xf32, #tpu.memory_space<vmem>>, vector<32x1xf32>
    %c0_72 = arith.constant 0 : index
    %c540 = arith.constant 540 : index
    %84 = vector.load %arg3[%c0_72, %c540] : memref<32x670xf32, #tpu.memory_space<vmem>>, vector<32x32xf32>
    %cst_73 = arith.constant dense<0.000000e+00> : vector<32x1xf32>
    %85 = tpu.matmul %84, %83, %cst_73 {dimension_numbers = #tpu.dot_dimension_numbers<[1], [0], [0], [1], [0, 0, 1, 1], [], []>} : vector<32x32xf32>, vector<32x1xf32>, vector<32x1xf32> -> vector<32x1xf32>
    %86 = arith.addf %82, %85 : vector<32x1xf32>
    %87 = arith.addf %75, %86 : vector<32x1xf32>
    %c0_74 = arith.constant 0 : index
    %c128_75 = arith.constant 128 : index
    %88 = vector.load %arg19[%c0_74, %c128_75] : memref<64x1280xf32, #tpu.memory_space<vmem>>, vector<32x1xf32>
    %c0_76 = arith.constant 0 : index
    %c380 = arith.constant 380 : index
    %89 = vector.load %arg3[%c0_76, %c380] : memref<32x670xf32, #tpu.memory_space<vmem>>, vector<32x32xf32>
    %cst_77 = arith.constant dense<0.000000e+00> : vector<32x1xf32>
    %90 = tpu.matmul %89, %88, %cst_77 {dimension_numbers = #tpu.dot_dimension_numbers<[1], [0], [0], [1], [0, 0, 1, 1], [], []>} : vector<32x32xf32>, vector<32x1xf32>, vector<32x1xf32> -> vector<32x1xf32>
    %c0_78 = arith.constant 0 : index
    %c129_79 = arith.constant 129 : index
    %91 = vector.load %arg19[%c0_78, %c129_79] : memref<64x1280xf32, #tpu.memory_space<vmem>>, vector<32x1xf32>
    %c0_80 = arith.constant 0 : index
    %c476 = arith.constant 476 : index
    %92 = vector.load %arg3[%c0_80, %c476] : memref<32x670xf32, #tpu.memory_space<vmem>>, vector<32x32xf32>
    %cst_81 = arith.constant dense<0.000000e+00> : vector<32x1xf32>
    %93 = tpu.matmul %92, %91, %cst_81 {dimension_numbers = #tpu.dot_dimension_numbers<[1], [0], [0], [1], [0, 0, 1, 1], [], []>} : vector<32x32xf32>, vector<32x1xf32>, vector<32x1xf32> -> vector<32x1xf32>
    %94 = arith.addf %90, %93 : vector<32x1xf32>
    %c0_82 = arith.constant 0 : index
    %c130_83 = arith.constant 130 : index
    %95 = vector.load %arg19[%c0_82, %c130_83] : memref<64x1280xf32, #tpu.memory_space<vmem>>, vector<32x1xf32>
    %c0_84 = arith.constant 0 : index
    %c572 = arith.constant 572 : index
    %96 = vector.load %arg3[%c0_84, %c572] : memref<32x670xf32, #tpu.memory_space<vmem>>, vector<32x32xf32>
    %cst_85 = arith.constant dense<0.000000e+00> : vector<32x1xf32>
    %97 = tpu.matmul %96, %95, %cst_85 {dimension_numbers = #tpu.dot_dimension_numbers<[1], [0], [0], [1], [0, 0, 1, 1], [], []>} : vector<32x32xf32>, vector<32x1xf32>, vector<32x1xf32> -> vector<32x1xf32>
    %98 = arith.addf %94, %97 : vector<32x1xf32>
    %99 = vector.broadcast %12 : vector<1x1xf32> to vector<32x1xf32>
    %100 = arith.mulf %98, %99 : vector<32x1xf32>
    %101 = arith.addf %87, %100 : vector<32x1xf32>
    %c0_86 = arith.constant 0 : index
    %c604 = arith.constant 604 : index
    %102 = vector.load %arg3[%c0_86, %c604] : memref<32x670xf32, #tpu.memory_space<vmem>>, vector<32x1xf32>
    %103 = arith.addf %101, %102 : vector<32x1xf32>
    %cst_87 = arith.constant 0.000000e+00 : f32
    %104 = vector.broadcast %cst_87 : f32 to vector<32x1xf32>
    %105 = arith.maximumf %103, %104 : vector<32x1xf32>
    %c32_88 = arith.constant 32 : index
    %c128_89 = arith.constant 128 : index
    %106 = vector.load %arg19[%c32_88, %c128_89] : memref<64x1280xf32, #tpu.memory_space<vmem>>, vector<32x1xf32>
    tpu.vector_store %arg19[%c32_88, %c128_89], %105 {strides = array<i32>} : memref<64x1280xf32, #tpu.memory_space<vmem>>, vector<32x1xf32>,
    %c0_90 = arith.constant 0 : index
    %c605 = arith.constant 605 : index
    %107 = vector.load %arg3[%c0_90, %c605] : memref<32x670xf32, #tpu.memory_space<vmem>>, vector<3x64xf32>
    %c0_91 = arith.constant 0 : index
    %c669 = arith.constant 669 : index
    %108 = vector.load %arg3[%c0_91, %c669] : memref<32x670xf32, #tpu.memory_space<vmem>>, vector<3x1xf32>
    %c0_92 = arith.constant 0 : index
    %c128_93 = arith.constant 128 : index
    %109 = vector.load %arg19[%c0_92, %c128_93] : memref<64x1280xf32, #tpu.memory_space<vmem>>, vector<64x1xf32>
    %cst_94 = arith.constant dense<0.000000e+00> : vector<3x1xf32>
    %110 = tpu.matmul %107, %109, %cst_94 {dimension_numbers = #tpu.dot_dimension_numbers<[1], [0], [0], [1], [0, 0, 1, 1], [], []>} : vector<3x64xf32>, vector<64x1xf32>, vector<3x1xf32> -> vector<3x1xf32>
    %111 = arith.addf %110, %108 : vector<3x1xf32>
    %112 = arith.addf %111, %1 : vector<3x1xf32>
    %113 = vector.shape_cast %112 : vector<3x1xf32> to vector<3x1xf32>
    %114 = vector.broadcast %113 : vector<3x1xf32> to vector<3x4xf32>
    %115 = tpu.iota {dimensions = array<i32: 1>} : vector<1x4xi32>
    %c1_i32 = arith.constant 1 : i32
    %116 = vector.broadcast %c1_i32 : i32 to vector<1x4xi32>
    %117 = arith.andi %115, %116 : vector<1x4xi32>
    %c0_i32_95 = arith.constant 0 : i32
    %118 = vector.broadcast %c0_i32_95 : i32 to vector<1x4xi32>
    %119 = arith.cmpi ne, %117, %118 : vector<1x4xi32>
    %120 = arith.extui %119 : vector<1x4xi1> to vector<1x4xi32>
    %121 = arith.sitofp %120 : vector<1x4xi32> to vector<1x4xf32>
    %c1_i32_96 = arith.constant 1 : i32
    %122 = vector.broadcast %c1_i32_96 : i32 to vector<1x4xi32>
    %123 = arith.cmpi ne, %117, %122 : vector<1x4xi32>
    %124 = arith.extui %123 : vector<1x4xi1> to vector<1x4xi32>
    %125 = arith.sitofp %124 : vector<1x4xi32> to vector<1x4xf32>
    %cst_97 = arith.constant 0.000000e+00 : f32
    %126 = vector.broadcast %cst_97 : f32 to vector<19x128xf32>
    %c0_98 = arith.constant 0 : index
    %c0_99 = arith.constant 0 : index
    %127 = vector.load %arg19[%c0_98, %c0_99] : memref<64x1280xf32, #tpu.memory_space<vmem>>, vector<19x128xf32>
    tpu.vector_store %arg19[%c0_98, %c0_99], %126 {strides = array<i32>} : memref<64x1280xf32, #tpu.memory_space<vmem>>, vector<19x128xf32>,
    %cst_100 = arith.constant 0.000000e+00 : f32
    %128 = vector.broadcast %cst_100 : f32 to vector<19x128xf32>
    %c0_101 = arith.constant 0 : index
    %c132 = arith.constant 132 : index
    %129 = vector.load %arg19[%c0_101, %c132] : memref<64x1280xf32, #tpu.memory_space<vmem>>, vector<19x128xf32>
    tpu.vector_store %arg19[%c0_101, %c132], %128 {strides = array<i32>} : memref<64x1280xf32, #tpu.memory_space<vmem>>, vector<19x128xf32>,
    %c0_102 = arith.constant 0 : index
    %c0_103 = arith.constant 0 : index
    %c0_104 = arith.constant 0 : index
    %130 = vector.load %arg4[%c0_102, %c0_103, %c0_104] : memref<1x16x4xf32, #tpu.memory_space<vmem>>, vector<1x16x4xf32>
    %131 = vector.shape_cast %130 : vector<1x16x4xf32> to vector<16x4xf32>
    %c0_105 = arith.constant 0 : index
    %c128_106 = arith.constant 128 : index
    %132 = vector.load %arg19[%c0_105, %c128_106] : memref<64x1280xf32, #tpu.memory_space<vmem>>, vector<16x4xf32>
    tpu.vector_store %arg19[%c0_105, %c128_106], %131 {strides = array<i32>} : memref<64x1280xf32, #tpu.memory_space<vmem>>, vector<16x4xf32>,
    %c16 = arith.constant 16 : index
    %c128_107 = arith.constant 128 : index
    %133 = vector.load %arg19[%c16, %c128_107] : memref<64x1280xf32, #tpu.memory_space<vmem>>, vector<3x4xf32>
    tpu.vector_store %arg19[%c16, %c128_107], %114 {strides = array<i32>} : memref<64x1280xf32, #tpu.memory_space<vmem>>, vector<3x4xf32>,
    %c0_108 = arith.constant 0 : index
    %c125 = arith.constant 125 : index
    %134 = vector.load %arg19[%c0_108, %c125] : memref<64x1280xf32, #tpu.memory_space<vmem>>, vector<19x4xf32>
    %c0_109 = arith.constant 0 : index
    %c0_110 = arith.constant 0 : index
    %135 = vector.load %arg5[%c0_109, %c0_110] : memref<16x350xf32, #tpu.memory_space<vmem>>, vector<16x19xf32>
    %cst_111 = arith.constant dense<0.000000e+00> : vector<16x4xf32>
    %136 = tpu.matmul %135, %134, %cst_111 {dimension_numbers = #tpu.dot_dimension_numbers<[1], [0], [0], [1], [0, 0, 1, 1], [], []>} : vector<16x19xf32>, vector<19x4xf32>, vector<16x4xf32> -> vector<16x4xf32>
    %c0_112 = arith.constant 0 : index
    %c127_113 = arith.constant 127 : index
    %137 = vector.load %arg19[%c0_112, %c127_113] : memref<64x1280xf32, #tpu.memory_space<vmem>>, vector<19x4xf32>
    %c0_114 = arith.constant 0 : index
    %c57 = arith.constant 57 : index
    %138 = vector.load %arg5[%c0_114, %c57] : memref<16x350xf32, #tpu.memory_space<vmem>>, vector<16x19xf32>
    %cst_115 = arith.constant dense<0.000000e+00> : vector<16x4xf32>
    %139 = tpu.matmul %138, %137, %cst_115 {dimension_numbers = #tpu.dot_dimension_numbers<[1], [0], [0], [1], [0, 0, 1, 1], [], []>} : vector<16x19xf32>, vector<19x4xf32>, vector<16x4xf32> -> vector<16x4xf32>
    %140 = arith.addf %136, %139 : vector<16x4xf32>
    %c0_116 = arith.constant 0 : index
    %c129_117 = arith.constant 129 : index
    %141 = vector.load %arg19[%c0_116, %c129_117] : memref<64x1280xf32, #tpu.memory_space<vmem>>, vector<19x4xf32>
    %c0_118 = arith.constant 0 : index
    %c114 = arith.constant 114 : index
    %142 = vector.load %arg5[%c0_118, %c114] : memref<16x350xf32, #tpu.memory_space<vmem>>, vector<16x19xf32>
    %cst_119 = arith.constant dense<0.000000e+00> : vector<16x4xf32>
    %143 = tpu.matmul %142, %141, %cst_119 {dimension_numbers = #tpu.dot_dimension_numbers<[1], [0], [0], [1], [0, 0, 1, 1], [], []>} : vector<16x19xf32>, vector<19x4xf32>, vector<16x4xf32> -> vector<16x4xf32>
    %144 = arith.addf %140, %143 : vector<16x4xf32>
    %145 = vector.broadcast %121 : vector<1x4xf32> to vector<16x4xf32>
    %146 = arith.mulf %144, %145 : vector<16x4xf32>
    %c0_120 = arith.constant 0 : index
    %c126_121 = arith.constant 126 : index
    %147 = vector.load %arg19[%c0_120, %c126_121] : memref<64x1280xf32, #tpu.memory_space<vmem>>, vector<19x4xf32>
    %c0_122 = arith.constant 0 : index
    %c19 = arith.constant 19 : index
    %148 = vector.load %arg5[%c0_122, %c19] : memref<16x350xf32, #tpu.memory_space<vmem>>, vector<16x19xf32>
    %cst_123 = arith.constant dense<0.000000e+00> : vector<16x4xf32>
    %149 = tpu.matmul %148, %147, %cst_123 {dimension_numbers = #tpu.dot_dimension_numbers<[1], [0], [0], [1], [0, 0, 1, 1], [], []>} : vector<16x19xf32>, vector<19x4xf32>, vector<16x4xf32> -> vector<16x4xf32>
    %c0_124 = arith.constant 0 : index
    %c128_125 = arith.constant 128 : index
    %150 = vector.load %arg19[%c0_124, %c128_125] : memref<64x1280xf32, #tpu.memory_space<vmem>>, vector<19x4xf32>
    %c0_126 = arith.constant 0 : index
    %c76 = arith.constant 76 : index
    %151 = vector.load %arg5[%c0_126, %c76] : memref<16x350xf32, #tpu.memory_space<vmem>>, vector<16x19xf32>
    %cst_127 = arith.constant dense<0.000000e+00> : vector<16x4xf32>
    %152 = tpu.matmul %151, %150, %cst_127 {dimension_numbers = #tpu.dot_dimension_numbers<[1], [0], [0], [1], [0, 0, 1, 1], [], []>} : vector<16x19xf32>, vector<19x4xf32>, vector<16x4xf32> -> vector<16x4xf32>
    %153 = arith.addf %149, %152 : vector<16x4xf32>
    %c0_128 = arith.constant 0 : index
    %c130_129 = arith.constant 130 : index
    %154 = vector.load %arg19[%c0_128, %c130_129] : memref<64x1280xf32, #tpu.memory_space<vmem>>, vector<19x4xf32>
    %c0_130 = arith.constant 0 : index
    %c133 = arith.constant 133 : index
    %155 = vector.load %arg5[%c0_130, %c133] : memref<16x350xf32, #tpu.memory_space<vmem>>, vector<16x19xf32>
    %cst_131 = arith.constant dense<0.000000e+00> : vector<16x4xf32>
    %156 = tpu.matmul %155, %154, %cst_131 {dimension_numbers = #tpu.dot_dimension_numbers<[1], [0], [0], [1], [0, 0, 1, 1], [], []>} : vector<16x19xf32>, vector<19x4xf32>, vector<16x4xf32> -> vector<16x4xf32>
    %157 = arith.addf %153, %156 : vector<16x4xf32>
    %158 = arith.addf %146, %157 : vector<16x4xf32>
    %c0_132 = arith.constant 0 : index
    %c127_133 = arith.constant 127 : index
    %159 = vector.load %arg19[%c0_132, %c127_133] : memref<64x1280xf32, #tpu.memory_space<vmem>>, vector<19x4xf32>
    %c0_134 = arith.constant 0 : index
    %c38 = arith.constant 38 : index
    %160 = vector.load %arg5[%c0_134, %c38] : memref<16x350xf32, #tpu.memory_space<vmem>>, vector<16x19xf32>
    %cst_135 = arith.constant dense<0.000000e+00> : vector<16x4xf32>
    %161 = tpu.matmul %160, %159, %cst_135 {dimension_numbers = #tpu.dot_dimension_numbers<[1], [0], [0], [1], [0, 0, 1, 1], [], []>} : vector<16x19xf32>, vector<19x4xf32>, vector<16x4xf32> -> vector<16x4xf32>
    %c0_136 = arith.constant 0 : index
    %c129_137 = arith.constant 129 : index
    %162 = vector.load %arg19[%c0_136, %c129_137] : memref<64x1280xf32, #tpu.memory_space<vmem>>, vector<19x4xf32>
    %c0_138 = arith.constant 0 : index
    %c95 = arith.constant 95 : index
    %163 = vector.load %arg5[%c0_138, %c95] : memref<16x350xf32, #tpu.memory_space<vmem>>, vector<16x19xf32>
    %cst_139 = arith.constant dense<0.000000e+00> : vector<16x4xf32>
    %164 = tpu.matmul %163, %162, %cst_139 {dimension_numbers = #tpu.dot_dimension_numbers<[1], [0], [0], [1], [0, 0, 1, 1], [], []>} : vector<16x19xf32>, vector<19x4xf32>, vector<16x4xf32> -> vector<16x4xf32>
    %165 = arith.addf %161, %164 : vector<16x4xf32>
    %c0_140 = arith.constant 0 : index
    %c131 = arith.constant 131 : index
    %166 = vector.load %arg19[%c0_140, %c131] : memref<64x1280xf32, #tpu.memory_space<vmem>>, vector<19x4xf32>
    %c0_141 = arith.constant 0 : index
    %c152 = arith.constant 152 : index
    %167 = vector.load %arg5[%c0_141, %c152] : memref<16x350xf32, #tpu.memory_space<vmem>>, vector<16x19xf32>
    %cst_142 = arith.constant dense<0.000000e+00> : vector<16x4xf32>
    %168 = tpu.matmul %167, %166, %cst_142 {dimension_numbers = #tpu.dot_dimension_numbers<[1], [0], [0], [1], [0, 0, 1, 1], [], []>} : vector<16x19xf32>, vector<19x4xf32>, vector<16x4xf32> -> vector<16x4xf32>
    %169 = arith.addf %165, %168 : vector<16x4xf32>
    %170 = vector.broadcast %125 : vector<1x4xf32> to vector<16x4xf32>
    %171 = arith.mulf %169, %170 : vector<16x4xf32>
    %172 = arith.addf %158, %171 : vector<16x4xf32>
    %c0_143 = arith.constant 0 : index
    %c171 = arith.constant 171 : index
    %173 = vector.load %arg5[%c0_143, %c171] : memref<16x350xf32, #tpu.memory_space<vmem>>, vector<16x1xf32>
    %174 = vector.broadcast %173 : vector<16x1xf32> to vector<16x4xf32>
    %175 = arith.addf %172, %174 : vector<16x4xf32>
    %c0_144 = arith.constant 0 : index
    %c128_145 = arith.constant 128 : index
    %176 = vector.load %arg19[%c0_144, %c128_145] : memref<64x1280xf32, #tpu.memory_space<vmem>>, vector<16x4xf32>
    tpu.vector_store %arg19[%c0_144, %c128_145], %175 {strides = array<i32>} : memref<64x1280xf32, #tpu.memory_space<vmem>>, vector<16x4xf32>,
    %c0_146 = arith.constant 0 : index
    %c125_147 = arith.constant 125 : index
    %177 = vector.load %arg19[%c0_146, %c125_147] : memref<64x1280xf32, #tpu.memory_space<vmem>>, vector<16x4xf32>
    %c0_148 = arith.constant 0 : index
    %c172 = arith.constant 172 : index
    %178 = vector.load %arg5[%c0_148, %c172] : memref<16x350xf32, #tpu.memory_space<vmem>>, vector<16x16xf32>
    %cst_149 = arith.constant dense<0.000000e+00> : vector<16x4xf32>
    %179 = tpu.matmul %178, %177, %cst_149 {dimension_numbers = #tpu.dot_dimension_numbers<[1], [0], [0], [1], [0, 0, 1, 1], [], []>} : vector<16x16xf32>, vector<16x4xf32>, vector<16x4xf32> -> vector<16x4xf32>
    %c0_150 = arith.constant 0 : index
    %c127_151 = arith.constant 127 : index
    %180 = vector.load %arg19[%c0_150, %c127_151] : memref<64x1280xf32, #tpu.memory_space<vmem>>, vector<16x4xf32>
    %c0_152 = arith.constant 0 : index
    %c220 = arith.constant 220 : index
    %181 = vector.load %arg5[%c0_152, %c220] : memref<16x350xf32, #tpu.memory_space<vmem>>, vector<16x16xf32>
    %cst_153 = arith.constant dense<0.000000e+00> : vector<16x4xf32>
    %182 = tpu.matmul %181, %180, %cst_153 {dimension_numbers = #tpu.dot_dimension_numbers<[1], [0], [0], [1], [0, 0, 1, 1], [], []>} : vector<16x16xf32>, vector<16x4xf32>, vector<16x4xf32> -> vector<16x4xf32>
    %183 = arith.addf %179, %182 : vector<16x4xf32>
    %c0_154 = arith.constant 0 : index
    %c129_155 = arith.constant 129 : index
    %184 = vector.load %arg19[%c0_154, %c129_155] : memref<64x1280xf32, #tpu.memory_space<vmem>>, vector<16x4xf32>
    %c0_156 = arith.constant 0 : index
    %c268 = arith.constant 268 : index
    %185 = vector.load %arg5[%c0_156, %c268] : memref<16x350xf32, #tpu.memory_space<vmem>>, vector<16x16xf32>
    %cst_157 = arith.constant dense<0.000000e+00> : vector<16x4xf32>
    %186 = tpu.matmul %185, %184, %cst_157 {dimension_numbers = #tpu.dot_dimension_numbers<[1], [0], [0], [1], [0, 0, 1, 1], [], []>} : vector<16x16xf32>, vector<16x4xf32>, vector<16x4xf32> -> vector<16x4xf32>
    %187 = arith.addf %183, %186 : vector<16x4xf32>
    %188 = vector.broadcast %121 : vector<1x4xf32> to vector<16x4xf32>
    %189 = arith.mulf %187, %188 : vector<16x4xf32>
    %c0_158 = arith.constant 0 : index
    %c126_159 = arith.constant 126 : index
    %190 = vector.load %arg19[%c0_158, %c126_159] : memref<64x1280xf32, #tpu.memory_space<vmem>>, vector<16x4xf32>
    %c0_160 = arith.constant 0 : index
    %c188 = arith.constant 188 : index
    %191 = vector.load %arg5[%c0_160, %c188] : memref<16x350xf32, #tpu.memory_space<vmem>>, vector<16x16xf32>
    %cst_161 = arith.constant dense<0.000000e+00> : vector<16x4xf32>
    %192 = tpu.matmul %191, %190, %cst_161 {dimension_numbers = #tpu.dot_dimension_numbers<[1], [0], [0], [1], [0, 0, 1, 1], [], []>} : vector<16x16xf32>, vector<16x4xf32>, vector<16x4xf32> -> vector<16x4xf32>
    %c0_162 = arith.constant 0 : index
    %c128_163 = arith.constant 128 : index
    %193 = vector.load %arg19[%c0_162, %c128_163] : memref<64x1280xf32, #tpu.memory_space<vmem>>, vector<16x4xf32>
    %c0_164 = arith.constant 0 : index
    %c236 = arith.constant 236 : index
    %194 = vector.load %arg5[%c0_164, %c236] : memref<16x350xf32, #tpu.memory_space<vmem>>, vector<16x16xf32>
    %cst_165 = arith.constant dense<0.000000e+00> : vector<16x4xf32>
    %195 = tpu.matmul %194, %193, %cst_165 {dimension_numbers = #tpu.dot_dimension_numbers<[1], [0], [0], [1], [0, 0, 1, 1], [], []>} : vector<16x16xf32>, vector<16x4xf32>, vector<16x4xf32> -> vector<16x4xf32>
    %196 = arith.addf %192, %195 : vector<16x4xf32>
    %c0_166 = arith.constant 0 : index
    %c130_167 = arith.constant 130 : index
    %197 = vector.load %arg19[%c0_166, %c130_167] : memref<64x1280xf32, #tpu.memory_space<vmem>>, vector<16x4xf32>
    %c0_168 = arith.constant 0 : index
    %c284 = arith.constant 284 : index
    %198 = vector.load %arg5[%c0_168, %c284] : memref<16x350xf32, #tpu.memory_space<vmem>>, vector<16x16xf32>
    %cst_169 = arith.constant dense<0.000000e+00> : vector<16x4xf32>
    %199 = tpu.matmul %198, %197, %cst_169 {dimension_numbers = #tpu.dot_dimension_numbers<[1], [0], [0], [1], [0, 0, 1, 1], [], []>} : vector<16x16xf32>, vector<16x4xf32>, vector<16x4xf32> -> vector<16x4xf32>
    %200 = arith.addf %196, %199 : vector<16x4xf32>
    %201 = arith.addf %189, %200 : vector<16x4xf32>
    %c0_170 = arith.constant 0 : index
    %c127_171 = arith.constant 127 : index
    %202 = vector.load %arg19[%c0_170, %c127_171] : memref<64x1280xf32, #tpu.memory_space<vmem>>, vector<16x4xf32>
    %c0_172 = arith.constant 0 : index
    %c204 = arith.constant 204 : index
    %203 = vector.load %arg5[%c0_172, %c204] : memref<16x350xf32, #tpu.memory_space<vmem>>, vector<16x16xf32>
    %cst_173 = arith.constant dense<0.000000e+00> : vector<16x4xf32>
    %204 = tpu.matmul %203, %202, %cst_173 {dimension_numbers = #tpu.dot_dimension_numbers<[1], [0], [0], [1], [0, 0, 1, 1], [], []>} : vector<16x16xf32>, vector<16x4xf32>, vector<16x4xf32> -> vector<16x4xf32>
    %c0_174 = arith.constant 0 : index
    %c129_175 = arith.constant 129 : index
    %205 = vector.load %arg19[%c0_174, %c129_175] : memref<64x1280xf32, #tpu.memory_space<vmem>>, vector<16x4xf32>
    %c0_176 = arith.constant 0 : index
    %c252 = arith.constant 252 : index
    %206 = vector.load %arg5[%c0_176, %c252] : memref<16x350xf32, #tpu.memory_space<vmem>>, vector<16x16xf32>
    %cst_177 = arith.constant dense<0.000000e+00> : vector<16x4xf32>
    %207 = tpu.matmul %206, %205, %cst_177 {dimension_numbers = #tpu.dot_dimension_numbers<[1], [0], [0], [1], [0, 0, 1, 1], [], []>} : vector<16x16xf32>, vector<16x4xf32>, vector<16x4xf32> -> vector<16x4xf32>
    %208 = arith.addf %204, %207 : vector<16x4xf32>
    %c0_178 = arith.constant 0 : index
    %c131_179 = arith.constant 131 : index
    %209 = vector.load %arg19[%c0_178, %c131_179] : memref<64x1280xf32, #tpu.memory_space<vmem>>, vector<16x4xf32>
    %c0_180 = arith.constant 0 : index
    %c300 = arith.constant 300 : index
    %210 = vector.load %arg5[%c0_180, %c300] : memref<16x350xf32, #tpu.memory_space<vmem>>, vector<16x16xf32>
    %cst_181 = arith.constant dense<0.000000e+00> : vector<16x4xf32>
    %211 = tpu.matmul %210, %209, %cst_181 {dimension_numbers = #tpu.dot_dimension_numbers<[1], [0], [0], [1], [0, 0, 1, 1], [], []>} : vector<16x16xf32>, vector<16x4xf32>, vector<16x4xf32> -> vector<16x4xf32>
    %212 = arith.addf %208, %211 : vector<16x4xf32>
    %213 = vector.broadcast %125 : vector<1x4xf32> to vector<16x4xf32>
    %214 = arith.mulf %212, %213 : vector<16x4xf32>
    %215 = arith.addf %201, %214 : vector<16x4xf32>
    %c0_182 = arith.constant 0 : index
    %c316_183 = arith.constant 316 : index
    %216 = vector.load %arg5[%c0_182, %c316_183] : memref<16x350xf32, #tpu.memory_space<vmem>>, vector<16x1xf32>
    %217 = vector.broadcast %216 : vector<16x1xf32> to vector<16x4xf32>
    %218 = arith.addf %215, %217 : vector<16x4xf32>
    %cst_184 = arith.constant 0.000000e+00 : f32
    %219 = vector.broadcast %cst_184 : f32 to vector<16x4xf32>
    %220 = arith.maximumf %218, %219 : vector<16x4xf32>
    %c16_185 = arith.constant 16 : index
    %c128_186 = arith.constant 128 : index
    %221 = vector.load %arg19[%c16_185, %c128_186] : memref<64x1280xf32, #tpu.memory_space<vmem>>, vector<16x4xf32>
    tpu.vector_store %arg19[%c16_185, %c128_186], %220 {strides = array<i32>} : memref<64x1280xf32, #tpu.memory_space<vmem>>, vector<16x4xf32>,
    %c0_187 = arith.constant 0 : index
    %c317 = arith.constant 317 : index
    %222 = vector.load %arg5[%c0_187, %c317] : memref<16x350xf32, #tpu.memory_space<vmem>>, vector<3x32xf32>
    %c0_188 = arith.constant 0 : index
    %c349 = arith.constant 349 : index
    %223 = vector.load %arg5[%c0_188, %c349] : memref<16x350xf32, #tpu.memory_space<vmem>>, vector<3x1xf32>
    %c0_189 = arith.constant 0 : index
    %c128_190 = arith.constant 128 : index
    %224 = vector.load %arg19[%c0_189, %c128_190] : memref<64x1280xf32, #tpu.memory_space<vmem>>, vector<32x4xf32>
    %cst_191 = arith.constant dense<0.000000e+00> : vector<3x4xf32>
    %225 = tpu.matmul %222, %224, %cst_191 {dimension_numbers = #tpu.dot_dimension_numbers<[1], [0], [0], [1], [0, 0, 1, 1], [], []>} : vector<3x32xf32>, vector<32x4xf32>, vector<3x4xf32> -> vector<3x4xf32>
    %226 = vector.broadcast %223 : vector<3x1xf32> to vector<3x4xf32>
    %227 = arith.addf %225, %226 : vector<3x4xf32>
    %228 = arith.addf %227, %114 : vector<3x4xf32>
    %c0_192 = arith.constant 0 : index
    %c0_193 = arith.constant 0 : index
    %229 = vector.load %arg8[%c0_192, %c0_193] : memref<4x16xf32, #tpu.memory_space<vmem>>, vector<4x16xf32>
    %cst_194 = arith.constant dense<0.000000e+00> : vector<3x16xf32>
    %230 = tpu.matmul %228, %229, %cst_194 {dimension_numbers = #tpu.dot_dimension_numbers<[1], [0], [0], [1], [0, 0, 1, 1], [], []>} : vector<3x4xf32>, vector<4x16xf32>, vector<3x16xf32> -> vector<3x16xf32>
    %231 = tpu.iota {dimensions = array<i32: 1>} : vector<1x16xi32>
    %c3_i32 = arith.constant 3 : i32
    %232 = vector.broadcast %c3_i32 : i32 to vector<1x16xi32>
    %233 = arith.andi %231, %232 : vector<1x16xi32>
    %c0_i32_195 = arith.constant 0 : i32
    %234 = vector.broadcast %c0_i32_195 : i32 to vector<1x16xi32>
    %235 = arith.cmpi ne, %233, %234 : vector<1x16xi32>
    %236 = arith.extui %235 : vector<1x16xi1> to vector<1x16xi32>
    %237 = arith.sitofp %236 : vector<1x16xi32> to vector<1x16xf32>
    %c3_i32_196 = arith.constant 3 : i32
    %238 = vector.broadcast %c3_i32_196 : i32 to vector<1x16xi32>
    %239 = arith.cmpi ne, %233, %238 : vector<1x16xi32>
    %240 = arith.extui %239 : vector<1x16xi1> to vector<1x16xi32>
    %241 = arith.sitofp %240 : vector<1x16xi32> to vector<1x16xf32>
    %cst_197 = arith.constant 0.000000e+00 : f32
    %242 = vector.broadcast %cst_197 : f32 to vector<19x128xf32>
    %c0_198 = arith.constant 0 : index
    %c0_199 = arith.constant 0 : index
    %243 = vector.load %arg19[%c0_198, %c0_199] : memref<64x1280xf32, #tpu.memory_space<vmem>>, vector<19x128xf32>
    tpu.vector_store %arg19[%c0_198, %c0_199], %242 {strides = array<i32>} : memref<64x1280xf32, #tpu.memory_space<vmem>>, vector<19x128xf32>,
    %cst_200 = arith.constant 0.000000e+00 : f32
    %244 = vector.broadcast %cst_200 : f32 to vector<19x128xf32>
    %c0_201 = arith.constant 0 : index
    %c144 = arith.constant 144 : index
    %245 = vector.load %arg19[%c0_201, %c144] : memref<64x1280xf32, #tpu.memory_space<vmem>>, vector<19x128xf32>
    tpu.vector_store %arg19[%c0_201, %c144], %244 {strides = array<i32>} : memref<64x1280xf32, #tpu.memory_space<vmem>>, vector<19x128xf32>,
    %c0_202 = arith.constant 0 : index
    %c0_203 = arith.constant 0 : index
    %c0_204 = arith.constant 0 : index
    %246 = vector.load %arg6[%c0_202, %c0_203, %c0_204] : memref<1x16x16xf32, #tpu.memory_space<vmem>>, vector<1x16x16xf32>
    %247 = vector.shape_cast %246 : vector<1x16x16xf32> to vector<16x16xf32>
    %c0_205 = arith.constant 0 : index
    %c128_206 = arith.constant 128 : index
    %248 = vector.load %arg19[%c0_205, %c128_206] : memref<64x1280xf32, #tpu.memory_space<vmem>>, vector<16x16xf32>
    tpu.vector_store %arg19[%c0_205, %c128_206], %247 {strides = array<i32>} : memref<64x1280xf32, #tpu.memory_space<vmem>>, vector<16x16xf32>,
    %c16_207 = arith.constant 16 : index
    %c128_208 = arith.constant 128 : index
    %249 = vector.load %arg19[%c16_207, %c128_208] : memref<64x1280xf32, #tpu.memory_space<vmem>>, vector<3x16xf32>
    tpu.vector_store %arg19[%c16_207, %c128_208], %230 {strides = array<i32>} : memref<64x1280xf32, #tpu.memory_space<vmem>>, vector<3x16xf32>,
    %c0_209 = arith.constant 0 : index
    %c123 = arith.constant 123 : index
    %250 = vector.load %arg19[%c0_209, %c123] : memref<64x1280xf32, #tpu.memory_space<vmem>>, vector<19x16xf32>
    %c0_210 = arith.constant 0 : index
    %c0_211 = arith.constant 0 : index
    %251 = vector.load %arg7[%c0_210, %c0_211] : memref<16x350xf32, #tpu.memory_space<vmem>>, vector<16x19xf32>
    %cst_212 = arith.constant dense<0.000000e+00> : vector<16x16xf32>
    %252 = tpu.matmul %251, %250, %cst_212 {dimension_numbers = #tpu.dot_dimension_numbers<[1], [0], [0], [1], [0, 0, 1, 1], [], []>} : vector<16x19xf32>, vector<19x16xf32>, vector<16x16xf32> -> vector<16x16xf32>
    %c0_213 = arith.constant 0 : index
    %c127_214 = arith.constant 127 : index
    %253 = vector.load %arg19[%c0_213, %c127_214] : memref<64x1280xf32, #tpu.memory_space<vmem>>, vector<19x16xf32>
    %c0_215 = arith.constant 0 : index
    %c57_216 = arith.constant 57 : index
    %254 = vector.load %arg7[%c0_215, %c57_216] : memref<16x350xf32, #tpu.memory_space<vmem>>, vector<16x19xf32>
    %cst_217 = arith.constant dense<0.000000e+00> : vector<16x16xf32>
    %255 = tpu.matmul %254, %253, %cst_217 {dimension_numbers = #tpu.dot_dimension_numbers<[1], [0], [0], [1], [0, 0, 1, 1], [], []>} : vector<16x19xf32>, vector<19x16xf32>, vector<16x16xf32> -> vector<16x16xf32>
    %256 = arith.addf %252, %255 : vector<16x16xf32>
    %c0_218 = arith.constant 0 : index
    %c131_219 = arith.constant 131 : index
    %257 = vector.load %arg19[%c0_218, %c131_219] : memref<64x1280xf32, #tpu.memory_space<vmem>>, vector<19x16xf32>
    %c0_220 = arith.constant 0 : index
    %c114_221 = arith.constant 114 : index
    %258 = vector.load %arg7[%c0_220, %c114_221] : memref<16x350xf32, #tpu.memory_space<vmem>>, vector<16x19xf32>
    %cst_222 = arith.constant dense<0.000000e+00> : vector<16x16xf32>
    %259 = tpu.matmul %258, %257, %cst_222 {dimension_numbers = #tpu.dot_dimension_numbers<[1], [0], [0], [1], [0, 0, 1, 1], [], []>} : vector<16x19xf32>, vector<19x16xf32>, vector<16x16xf32> -> vector<16x16xf32>
    %260 = arith.addf %256, %259 : vector<16x16xf32>
    %261 = vector.broadcast %237 : vector<1x16xf32> to vector<16x16xf32>
    %262 = arith.mulf %260, %261 : vector<16x16xf32>
    %c0_223 = arith.constant 0 : index
    %c124 = arith.constant 124 : index
    %263 = vector.load %arg19[%c0_223, %c124] : memref<64x1280xf32, #tpu.memory_space<vmem>>, vector<19x16xf32>
    %c0_224 = arith.constant 0 : index
    %c19_225 = arith.constant 19 : index
    %264 = vector.load %arg7[%c0_224, %c19_225] : memref<16x350xf32, #tpu.memory_space<vmem>>, vector<16x19xf32>
    %cst_226 = arith.constant dense<0.000000e+00> : vector<16x16xf32>
    %265 = tpu.matmul %264, %263, %cst_226 {dimension_numbers = #tpu.dot_dimension_numbers<[1], [0], [0], [1], [0, 0, 1, 1], [], []>} : vector<16x19xf32>, vector<19x16xf32>, vector<16x16xf32> -> vector<16x16xf32>
    %c0_227 = arith.constant 0 : index
    %c128_228 = arith.constant 128 : index
    %266 = vector.load %arg19[%c0_227, %c128_228] : memref<64x1280xf32, #tpu.memory_space<vmem>>, vector<19x16xf32>
    %c0_229 = arith.constant 0 : index
    %c76_230 = arith.constant 76 : index
    %267 = vector.load %arg7[%c0_229, %c76_230] : memref<16x350xf32, #tpu.memory_space<vmem>>, vector<16x19xf32>
    %cst_231 = arith.constant dense<0.000000e+00> : vector<16x16xf32>
    %268 = tpu.matmul %267, %266, %cst_231 {dimension_numbers = #tpu.dot_dimension_numbers<[1], [0], [0], [1], [0, 0, 1, 1], [], []>} : vector<16x19xf32>, vector<19x16xf32>, vector<16x16xf32> -> vector<16x16xf32>
    %269 = arith.addf %265, %268 : vector<16x16xf32>
    %c0_232 = arith.constant 0 : index
    %c132_233 = arith.constant 132 : index
    %270 = vector.load %arg19[%c0_232, %c132_233] : memref<64x1280xf32, #tpu.memory_space<vmem>>, vector<19x16xf32>
    %c0_234 = arith.constant 0 : index
    %c133_235 = arith.constant 133 : index
    %271 = vector.load %arg7[%c0_234, %c133_235] : memref<16x350xf32, #tpu.memory_space<vmem>>, vector<16x19xf32>
    %cst_236 = arith.constant dense<0.000000e+00> : vector<16x16xf32>
    %272 = tpu.matmul %271, %270, %cst_236 {dimension_numbers = #tpu.dot_dimension_numbers<[1], [0], [0], [1], [0, 0, 1, 1], [], []>} : vector<16x19xf32>, vector<19x16xf32>, vector<16x16xf32> -> vector<16x16xf32>
    %273 = arith.addf %269, %272 : vector<16x16xf32>
    %274 = arith.addf %262, %273 : vector<16x16xf32>
    %c0_237 = arith.constant 0 : index
    %c125_238 = arith.constant 125 : index
    %275 = vector.load %arg19[%c0_237, %c125_238] : memref<64x1280xf32, #tpu.memory_space<vmem>>, vector<19x16xf32>
    %c0_239 = arith.constant 0 : index
    %c38_240 = arith.constant 38 : index
    %276 = vector.load %arg7[%c0_239, %c38_240] : memref<16x350xf32, #tpu.memory_space<vmem>>, vector<16x19xf32>
    %cst_241 = arith.constant dense<0.000000e+00> : vector<16x16xf32>
    %277 = tpu.matmul %276, %275, %cst_241 {dimension_numbers = #tpu.dot_dimension_numbers<[1], [0], [0], [1], [0, 0, 1, 1], [], []>} : vector<16x19xf32>, vector<19x16xf32>, vector<16x16xf32> -> vector<16x16xf32>
    %c0_242 = arith.constant 0 : index
    %c129_243 = arith.constant 129 : index
    %278 = vector.load %arg19[%c0_242, %c129_243] : memref<64x1280xf32, #tpu.memory_space<vmem>>, vector<19x16xf32>
    %c0_244 = arith.constant 0 : index
    %c95_245 = arith.constant 95 : index
    %279 = vector.load %arg7[%c0_244, %c95_245] : memref<16x350xf32, #tpu.memory_space<vmem>>, vector<16x19xf32>
    %cst_246 = arith.constant dense<0.000000e+00> : vector<16x16xf32>
    %280 = tpu.matmul %279, %278, %cst_246 {dimension_numbers = #tpu.dot_dimension_numbers<[1], [0], [0], [1], [0, 0, 1, 1], [], []>} : vector<16x19xf32>, vector<19x16xf32>, vector<16x16xf32> -> vector<16x16xf32>
    %281 = arith.addf %277, %280 : vector<16x16xf32>
    %c0_247 = arith.constant 0 : index
    %c133_248 = arith.constant 133 : index
    %282 = vector.load %arg19[%c0_247, %c133_248] : memref<64x1280xf32, #tpu.memory_space<vmem>>, vector<19x16xf32>
    %c0_249 = arith.constant 0 : index
    %c152_250 = arith.constant 152 : index
    %283 = vector.load %arg7[%c0_249, %c152_250] : memref<16x350xf32, #tpu.memory_space<vmem>>, vector<16x19xf32>
    %cst_251 = arith.constant dense<0.000000e+00> : vector<16x16xf32>
    %284 = tpu.matmul %283, %282, %cst_251 {dimension_numbers = #tpu.dot_dimension_numbers<[1], [0], [0], [1], [0, 0, 1, 1], [], []>} : vector<16x19xf32>, vector<19x16xf32>, vector<16x16xf32> -> vector<16x16xf32>
    %285 = arith.addf %281, %284 : vector<16x16xf32>
    %286 = vector.broadcast %241 : vector<1x16xf32> to vector<16x16xf32>
    %287 = arith.mulf %285, %286 : vector<16x16xf32>
    %288 = arith.addf %274, %287 : vector<16x16xf32>
    %c0_252 = arith.constant 0 : index
    %c171_253 = arith.constant 171 : index
    %289 = vector.load %arg7[%c0_252, %c171_253] : memref<16x350xf32, #tpu.memory_space<vmem>>, vector<16x1xf32>
    %290 = vector.broadcast %289 : vector<16x1xf32> to vector<16x16xf32>
    %291 = arith.addf %288, %290 : vector<16x16xf32>
    %c0_254 = arith.constant 0 : index
    %c128_255 = arith.constant 128 : index
    %292 = vector.load %arg19[%c0_254, %c128_255] : memref<64x1280xf32, #tpu.memory_space<vmem>>, vector<16x16xf32>
    tpu.vector_store %arg19[%c0_254, %c128_255], %291 {strides = array<i32>} : memref<64x1280xf32, #tpu.memory_space<vmem>>, vector<16x16xf32>,
    %c0_256 = arith.constant 0 : index
    %c123_257 = arith.constant 123 : index
    %293 = vector.load %arg19[%c0_256, %c123_257] : memref<64x1280xf32, #tpu.memory_space<vmem>>, vector<16x16xf32>
    %c0_258 = arith.constant 0 : index
    %c172_259 = arith.constant 172 : index
    %294 = vector.load %arg7[%c0_258, %c172_259] : memref<16x350xf32, #tpu.memory_space<vmem>>, vector<16x16xf32>
    %cst_260 = arith.constant dense<0.000000e+00> : vector<16x16xf32>
    %295 = tpu.matmul %294, %293, %cst_260 {dimension_numbers = #tpu.dot_dimension_numbers<[1], [0], [0], [1], [0, 0, 1, 1], [], []>} : vector<16x16xf32>, vector<16x16xf32>, vector<16x16xf32> -> vector<16x16xf32>
    %c0_261 = arith.constant 0 : index
    %c127_262 = arith.constant 127 : index
    %296 = vector.load %arg19[%c0_261, %c127_262] : memref<64x1280xf32, #tpu.memory_space<vmem>>, vector<16x16xf32>
    %c0_263 = arith.constant 0 : index
    %c220_264 = arith.constant 220 : index
    %297 = vector.load %arg7[%c0_263, %c220_264] : memref<16x350xf32, #tpu.memory_space<vmem>>, vector<16x16xf32>
    %cst_265 = arith.constant dense<0.000000e+00> : vector<16x16xf32>
    %298 = tpu.matmul %297, %296, %cst_265 {dimension_numbers = #tpu.dot_dimension_numbers<[1], [0], [0], [1], [0, 0, 1, 1], [], []>} : vector<16x16xf32>, vector<16x16xf32>, vector<16x16xf32> -> vector<16x16xf32>
    %299 = arith.addf %295, %298 : vector<16x16xf32>
    %c0_266 = arith.constant 0 : index
    %c131_267 = arith.constant 131 : index
    %300 = vector.load %arg19[%c0_266, %c131_267] : memref<64x1280xf32, #tpu.memory_space<vmem>>, vector<16x16xf32>
    %c0_268 = arith.constant 0 : index
    %c268_269 = arith.constant 268 : index
    %301 = vector.load %arg7[%c0_268, %c268_269] : memref<16x350xf32, #tpu.memory_space<vmem>>, vector<16x16xf32>
    %cst_270 = arith.constant dense<0.000000e+00> : vector<16x16xf32>
    %302 = tpu.matmul %301, %300, %cst_270 {dimension_numbers = #tpu.dot_dimension_numbers<[1], [0], [0], [1], [0, 0, 1, 1], [], []>} : vector<16x16xf32>, vector<16x16xf32>, vector<16x16xf32> -> vector<16x16xf32>
    %303 = arith.addf %299, %302 : vector<16x16xf32>
    %304 = vector.broadcast %237 : vector<1x16xf32> to vector<16x16xf32>
    %305 = arith.mulf %303, %304 : vector<16x16xf32>
    %c0_271 = arith.constant 0 : index
    %c124_272 = arith.constant 124 : index
    %306 = vector.load %arg19[%c0_271, %c124_272] : memref<64x1280xf32, #tpu.memory_space<vmem>>, vector<16x16xf32>
    %c0_273 = arith.constant 0 : index
    %c188_274 = arith.constant 188 : index
    %307 = vector.load %arg7[%c0_273, %c188_274] : memref<16x350xf32, #tpu.memory_space<vmem>>, vector<16x16xf32>
    %cst_275 = arith.constant dense<0.000000e+00> : vector<16x16xf32>
    %308 = tpu.matmul %307, %306, %cst_275 {dimension_numbers = #tpu.dot_dimension_numbers<[1], [0], [0], [1], [0, 0, 1, 1], [], []>} : vector<16x16xf32>, vector<16x16xf32>, vector<16x16xf32> -> vector<16x16xf32>
    %c0_276 = arith.constant 0 : index
    %c128_277 = arith.constant 128 : index
    %309 = vector.load %arg19[%c0_276, %c128_277] : memref<64x1280xf32, #tpu.memory_space<vmem>>, vector<16x16xf32>
    %c0_278 = arith.constant 0 : index
    %c236_279 = arith.constant 236 : index
    %310 = vector.load %arg7[%c0_278, %c236_279] : memref<16x350xf32, #tpu.memory_space<vmem>>, vector<16x16xf32>
    %cst_280 = arith.constant dense<0.000000e+00> : vector<16x16xf32>
    %311 = tpu.matmul %310, %309, %cst_280 {dimension_numbers = #tpu.dot_dimension_numbers<[1], [0], [0], [1], [0, 0, 1, 1], [], []>} : vector<16x16xf32>, vector<16x16xf32>, vector<16x16xf32> -> vector<16x16xf32>
    %312 = arith.addf %308, %311 : vector<16x16xf32>
    %c0_281 = arith.constant 0 : index
    %c132_282 = arith.constant 132 : index
    %313 = vector.load %arg19[%c0_281, %c132_282] : memref<64x1280xf32, #tpu.memory_space<vmem>>, vector<16x16xf32>
    %c0_283 = arith.constant 0 : index
    %c284_284 = arith.constant 284 : index
    %314 = vector.load %arg7[%c0_283, %c284_284] : memref<16x350xf32, #tpu.memory_space<vmem>>, vector<16x16xf32>
    %cst_285 = arith.constant dense<0.000000e+00> : vector<16x16xf32>
    %315 = tpu.matmul %314, %313, %cst_285 {dimension_numbers = #tpu.dot_dimension_numbers<[1], [0], [0], [1], [0, 0, 1, 1], [], []>} : vector<16x16xf32>, vector<16x16xf32>, vector<16x16xf32> -> vector<16x16xf32>
    %316 = arith.addf %312, %315 : vector<16x16xf32>
    %317 = arith.addf %305, %316 : vector<16x16xf32>
    %c0_286 = arith.constant 0 : index
    %c125_287 = arith.constant 125 : index
    %318 = vector.load %arg19[%c0_286, %c125_287] : memref<64x1280xf32, #tpu.memory_space<vmem>>, vector<16x16xf32>
    %c0_288 = arith.constant 0 : index
    %c204_289 = arith.constant 204 : index
    %319 = vector.load %arg7[%c0_288, %c204_289] : memref<16x350xf32, #tpu.memory_space<vmem>>, vector<16x16xf32>
    %cst_290 = arith.constant dense<0.000000e+00> : vector<16x16xf32>
    %320 = tpu.matmul %319, %318, %cst_290 {dimension_numbers = #tpu.dot_dimension_numbers<[1], [0], [0], [1], [0, 0, 1, 1], [], []>} : vector<16x16xf32>, vector<16x16xf32>, vector<16x16xf32> -> vector<16x16xf32>
    %c0_291 = arith.constant 0 : index
    %c129_292 = arith.constant 129 : index
    %321 = vector.load %arg19[%c0_291, %c129_292] : memref<64x1280xf32, #tpu.memory_space<vmem>>, vector<16x16xf32>
    %c0_293 = arith.constant 0 : index
    %c252_294 = arith.constant 252 : index
    %322 = vector.load %arg7[%c0_293, %c252_294] : memref<16x350xf32, #tpu.memory_space<vmem>>, vector<16x16xf32>
    %cst_295 = arith.constant dense<0.000000e+00> : vector<16x16xf32>
    %323 = tpu.matmul %322, %321, %cst_295 {dimension_numbers = #tpu.dot_dimension_numbers<[1], [0], [0], [1], [0, 0, 1, 1], [], []>} : vector<16x16xf32>, vector<16x16xf32>, vector<16x16xf32> -> vector<16x16xf32>
    %324 = arith.addf %320, %323 : vector<16x16xf32>
    %c0_296 = arith.constant 0 : index
    %c133_297 = arith.constant 133 : index
    %325 = vector.load %arg19[%c0_296, %c133_297] : memref<64x1280xf32, #tpu.memory_space<vmem>>, vector<16x16xf32>
    %c0_298 = arith.constant 0 : index
    %c300_299 = arith.constant 300 : index
    %326 = vector.load %arg7[%c0_298, %c300_299] : memref<16x350xf32, #tpu.memory_space<vmem>>, vector<16x16xf32>
    %cst_300 = arith.constant dense<0.000000e+00> : vector<16x16xf32>
    %327 = tpu.matmul %326, %325, %cst_300 {dimension_numbers = #tpu.dot_dimension_numbers<[1], [0], [0], [1], [0, 0, 1, 1], [], []>} : vector<16x16xf32>, vector<16x16xf32>, vector<16x16xf32> -> vector<16x16xf32>
    %328 = arith.addf %324, %327 : vector<16x16xf32>
    %329 = vector.broadcast %241 : vector<1x16xf32> to vector<16x16xf32>
    %330 = arith.mulf %328, %329 : vector<16x16xf32>
    %331 = arith.addf %317, %330 : vector<16x16xf32>
    %c0_301 = arith.constant 0 : index
    %c316_302 = arith.constant 316 : index
    %332 = vector.load %arg7[%c0_301, %c316_302] : memref<16x350xf32, #tpu.memory_space<vmem>>, vector<16x1xf32>
    %333 = vector.broadcast %332 : vector<16x1xf32> to vector<16x16xf32>
    %334 = arith.addf %331, %333 : vector<16x16xf32>
    %cst_303 = arith.constant 0.000000e+00 : f32
    %335 = vector.broadcast %cst_303 : f32 to vector<16x16xf32>
    %336 = arith.maximumf %334, %335 : vector<16x16xf32>
    %c16_304 = arith.constant 16 : index
    %c128_305 = arith.constant 128 : index
    %337 = vector.load %arg19[%c16_304, %c128_305] : memref<64x1280xf32, #tpu.memory_space<vmem>>, vector<16x16xf32>
    tpu.vector_store %arg19[%c16_304, %c128_305], %336 {strides = array<i32>} : memref<64x1280xf32, #tpu.memory_space<vmem>>, vector<16x16xf32>,
    %c0_306 = arith.constant 0 : index
    %c317_307 = arith.constant 317 : index
    %338 = vector.load %arg7[%c0_306, %c317_307] : memref<16x350xf32, #tpu.memory_space<vmem>>, vector<3x32xf32>
    %c0_308 = arith.constant 0 : index
    %c349_309 = arith.constant 349 : index
    %339 = vector.load %arg7[%c0_308, %c349_309] : memref<16x350xf32, #tpu.memory_space<vmem>>, vector<3x1xf32>
    %c0_310 = arith.constant 0 : index
    %c128_311 = arith.constant 128 : index
    %340 = vector.load %arg19[%c0_310, %c128_311] : memref<64x1280xf32, #tpu.memory_space<vmem>>, vector<32x16xf32>
    %cst_312 = arith.constant dense<0.000000e+00> : vector<3x16xf32>
    %341 = tpu.matmul %338, %340, %cst_312 {dimension_numbers = #tpu.dot_dimension_numbers<[1], [0], [0], [1], [0, 0, 1, 1], [], []>} : vector<3x32xf32>, vector<32x16xf32>, vector<3x16xf32> -> vector<3x16xf32>
    %342 = vector.broadcast %339 : vector<3x1xf32> to vector<3x16xf32>
    %343 = arith.addf %341, %342 : vector<3x16xf32>
    %344 = arith.addf %343, %230 : vector<3x16xf32>
    %c0_313 = arith.constant 0 : index
    %c0_314 = arith.constant 0 : index
    %c0_315 = arith.constant 0 : index
    %345 = vector.load %arg18[%c0_313, %c0_314, %c0_315] : memref<1x3x1536xf32, #tpu.memory_space<vmem>>, vector<1x3x16xf32>
    %346 = vector.shape_cast %345 : vector<1x3x16xf32> to vector<3x16xf32>
    %347 = vector.shape_cast %344 : vector<3x16xf32> to vector<1x3x16xf32>
    tpu.vector_store %arg18[%c0_313, %c0_314, %c0_315], %347 {strides = array<i32>} : memref<1x3x1536xf32, #tpu.memory_space<vmem>>, vector<1x3x16xf32>,
    %c0_316 = arith.constant 0 : index
    %c0_317 = arith.constant 0 : index
    %348 = vector.load %arg11[%c0_316, %c0_317] : memref<16x64xf32, #tpu.memory_space<vmem>>, vector<16x64xf32>
    %cst_318 = arith.constant dense<0.000000e+00> : vector<3x64xf32>
    %349 = tpu.matmul %344, %348, %cst_318 {dimension_numbers = #tpu.dot_dimension_numbers<[1], [0], [0], [1], [0, 0, 1, 1], [], []>} : vector<3x16xf32>, vector<16x64xf32>, vector<3x64xf32> -> vector<3x64xf32>
    %350 = tpu.iota {dimensions = array<i32: 1>} : vector<1x64xi32>
    %c7_i32 = arith.constant 7 : i32
    %351 = vector.broadcast %c7_i32 : i32 to vector<1x64xi32>
    %352 = arith.andi %350, %351 : vector<1x64xi32>
    %c0_i32_319 = arith.constant 0 : i32
    %353 = vector.broadcast %c0_i32_319 : i32 to vector<1x64xi32>
    %354 = arith.cmpi ne, %352, %353 : vector<1x64xi32>
    %355 = arith.extui %354 : vector<1x64xi1> to vector<1x64xi32>
    %356 = arith.sitofp %355 : vector<1x64xi32> to vector<1x64xf32>
    %c7_i32_320 = arith.constant 7 : i32
    %357 = vector.broadcast %c7_i32_320 : i32 to vector<1x64xi32>
    %358 = arith.cmpi ne, %352, %357 : vector<1x64xi32>
    %359 = arith.extui %358 : vector<1x64xi1> to vector<1x64xi32>
    %360 = arith.sitofp %359 : vector<1x64xi32> to vector<1x64xf32>
    %cst_321 = arith.constant 0.000000e+00 : f32
    %361 = vector.broadcast %cst_321 : f32 to vector<11x128xf32>
    %c0_322 = arith.constant 0 : index
    %c0_323 = arith.constant 0 : index
    %362 = vector.load %arg19[%c0_322, %c0_323] : memref<64x1280xf32, #tpu.memory_space<vmem>>, vector<11x128xf32>
    tpu.vector_store %arg19[%c0_322, %c0_323], %361 {strides = array<i32>} : memref<64x1280xf32, #tpu.memory_space<vmem>>, vector<11x128xf32>,
    %cst_324 = arith.constant 0.000000e+00 : f32
    %363 = vector.broadcast %cst_324 : f32 to vector<11x128xf32>
    %c0_325 = arith.constant 0 : index
    %c192 = arith.constant 192 : index
    %364 = vector.load %arg19[%c0_325, %c192] : memref<64x1280xf32, #tpu.memory_space<vmem>>, vector<11x128xf32>
    tpu.vector_store %arg19[%c0_325, %c192], %363 {strides = array<i32>} : memref<64x1280xf32, #tpu.memory_space<vmem>>, vector<11x128xf32>,
    %c0_326 = arith.constant 0 : index
    %c0_327 = arith.constant 0 : index
    %c0_328 = arith.constant 0 : index
    %365 = vector.load %arg9[%c0_326, %c0_327, %c0_328] : memref<1x8x64xf32, #tpu.memory_space<vmem>>, vector<1x8x64xf32>
    %366 = vector.shape_cast %365 : vector<1x8x64xf32> to vector<8x64xf32>
    %c0_329 = arith.constant 0 : index
    %c128_330 = arith.constant 128 : index
    %367 = vector.load %arg19[%c0_329, %c128_330] : memref<64x1280xf32, #tpu.memory_space<vmem>>, vector<8x64xf32>
    tpu.vector_store %arg19[%c0_329, %c128_330], %366 {strides = array<i32>} : memref<64x1280xf32, #tpu.memory_space<vmem>>, vector<8x64xf32>,
    %c8 = arith.constant 8 : index
    %c128_331 = arith.constant 128 : index
    %368 = vector.load %arg19[%c8, %c128_331] : memref<64x1280xf32, #tpu.memory_space<vmem>>, vector<3x64xf32>
    tpu.vector_store %arg19[%c8, %c128_331], %349 {strides = array<i32>} : memref<64x1280xf32, #tpu.memory_space<vmem>>, vector<3x64xf32>,
    %c0_332 = arith.constant 0 : index
    %c119 = arith.constant 119 : index
    %369 = vector.load %arg19[%c0_332, %c119] : memref<64x1280xf32, #tpu.memory_space<vmem>>, vector<11x64xf32>
    %c0_333 = arith.constant 0 : index
    %c0_334 = arith.constant 0 : index
    %370 = vector.load %arg10[%c0_333, %c0_334] : memref<8x190xf32, #tpu.memory_space<vmem>>, vector<8x11xf32>
    %cst_335 = arith.constant dense<0.000000e+00> : vector<8x64xf32>
    %371 = tpu.matmul %370, %369, %cst_335 {dimension_numbers = #tpu.dot_dimension_numbers<[1], [0], [0], [1], [0, 0, 1, 1], [], []>} : vector<8x11xf32>, vector<11x64xf32>, vector<8x64xf32> -> vector<8x64xf32>
    %c0_336 = arith.constant 0 : index
    %c127_337 = arith.constant 127 : index
    %372 = vector.load %arg19[%c0_336, %c127_337] : memref<64x1280xf32, #tpu.memory_space<vmem>>, vector<11x64xf32>
    %c0_338 = arith.constant 0 : index
    %c33 = arith.constant 33 : index
    %373 = vector.load %arg10[%c0_338, %c33] : memref<8x190xf32, #tpu.memory_space<vmem>>, vector<8x11xf32>
    %cst_339 = arith.constant dense<0.000000e+00> : vector<8x64xf32>
    %374 = tpu.matmul %373, %372, %cst_339 {dimension_numbers = #tpu.dot_dimension_numbers<[1], [0], [0], [1], [0, 0, 1, 1], [], []>} : vector<8x11xf32>, vector<11x64xf32>, vector<8x64xf32> -> vector<8x64xf32>
    %375 = arith.addf %371, %374 : vector<8x64xf32>
    %c0_340 = arith.constant 0 : index
    %c135 = arith.constant 135 : index
    %376 = vector.load %arg19[%c0_340, %c135] : memref<64x1280xf32, #tpu.memory_space<vmem>>, vector<11x64xf32>
    %c0_341 = arith.constant 0 : index
    %c66 = arith.constant 66 : index
    %377 = vector.load %arg10[%c0_341, %c66] : memref<8x190xf32, #tpu.memory_space<vmem>>, vector<8x11xf32>
    %cst_342 = arith.constant dense<0.000000e+00> : vector<8x64xf32>
    %378 = tpu.matmul %377, %376, %cst_342 {dimension_numbers = #tpu.dot_dimension_numbers<[1], [0], [0], [1], [0, 0, 1, 1], [], []>} : vector<8x11xf32>, vector<11x64xf32>, vector<8x64xf32> -> vector<8x64xf32>
    %379 = arith.addf %375, %378 : vector<8x64xf32>
    %380 = vector.broadcast %356 : vector<1x64xf32> to vector<8x64xf32>
    %381 = arith.mulf %379, %380 : vector<8x64xf32>
    %c0_343 = arith.constant 0 : index
    %c120 = arith.constant 120 : index
    %382 = vector.load %arg19[%c0_343, %c120] : memref<64x1280xf32, #tpu.memory_space<vmem>>, vector<11x64xf32>
    %c0_344 = arith.constant 0 : index
    %c11 = arith.constant 11 : index
    %383 = vector.load %arg10[%c0_344, %c11] : memref<8x190xf32, #tpu.memory_space<vmem>>, vector<8x11xf32>
    %cst_345 = arith.constant dense<0.000000e+00> : vector<8x64xf32>
    %384 = tpu.matmul %383, %382, %cst_345 {dimension_numbers = #tpu.dot_dimension_numbers<[1], [0], [0], [1], [0, 0, 1, 1], [], []>} : vector<8x11xf32>, vector<11x64xf32>, vector<8x64xf32> -> vector<8x64xf32>
    %c0_346 = arith.constant 0 : index
    %c128_347 = arith.constant 128 : index
    %385 = vector.load %arg19[%c0_346, %c128_347] : memref<64x1280xf32, #tpu.memory_space<vmem>>, vector<11x64xf32>
    %c0_348 = arith.constant 0 : index
    %c44 = arith.constant 44 : index
    %386 = vector.load %arg10[%c0_348, %c44] : memref<8x190xf32, #tpu.memory_space<vmem>>, vector<8x11xf32>
    %cst_349 = arith.constant dense<0.000000e+00> : vector<8x64xf32>
    %387 = tpu.matmul %386, %385, %cst_349 {dimension_numbers = #tpu.dot_dimension_numbers<[1], [0], [0], [1], [0, 0, 1, 1], [], []>} : vector<8x11xf32>, vector<11x64xf32>, vector<8x64xf32> -> vector<8x64xf32>
    %388 = arith.addf %384, %387 : vector<8x64xf32>
    %c0_350 = arith.constant 0 : index
    %c136 = arith.constant 136 : index
    %389 = vector.load %arg19[%c0_350, %c136] : memref<64x1280xf32, #tpu.memory_space<vmem>>, vector<11x64xf32>
    %c0_351 = arith.constant 0 : index
    %c77 = arith.constant 77 : index
    %390 = vector.load %arg10[%c0_351, %c77] : memref<8x190xf32, #tpu.memory_space<vmem>>, vector<8x11xf32>
    %cst_352 = arith.constant dense<0.000000e+00> : vector<8x64xf32>
    %391 = tpu.matmul %390, %389, %cst_352 {dimension_numbers = #tpu.dot_dimension_numbers<[1], [0], [0], [1], [0, 0, 1, 1], [], []>} : vector<8x11xf32>, vector<11x64xf32>, vector<8x64xf32> -> vector<8x64xf32>
    %392 = arith.addf %388, %391 : vector<8x64xf32>
    %393 = arith.addf %381, %392 : vector<8x64xf32>
    %c0_353 = arith.constant 0 : index
    %c121 = arith.constant 121 : index
    %394 = vector.load %arg19[%c0_353, %c121] : memref<64x1280xf32, #tpu.memory_space<vmem>>, vector<11x64xf32>
    %c0_354 = arith.constant 0 : index
    %c22 = arith.constant 22 : index
    %395 = vector.load %arg10[%c0_354, %c22] : memref<8x190xf32, #tpu.memory_space<vmem>>, vector<8x11xf32>
    %cst_355 = arith.constant dense<0.000000e+00> : vector<8x64xf32>
    %396 = tpu.matmul %395, %394, %cst_355 {dimension_numbers = #tpu.dot_dimension_numbers<[1], [0], [0], [1], [0, 0, 1, 1], [], []>} : vector<8x11xf32>, vector<11x64xf32>, vector<8x64xf32> -> vector<8x64xf32>
    %c0_356 = arith.constant 0 : index
    %c129_357 = arith.constant 129 : index
    %397 = vector.load %arg19[%c0_356, %c129_357] : memref<64x1280xf32, #tpu.memory_space<vmem>>, vector<11x64xf32>
    %c0_358 = arith.constant 0 : index
    %c55 = arith.constant 55 : index
    %398 = vector.load %arg10[%c0_358, %c55] : memref<8x190xf32, #tpu.memory_space<vmem>>, vector<8x11xf32>
    %cst_359 = arith.constant dense<0.000000e+00> : vector<8x64xf32>
    %399 = tpu.matmul %398, %397, %cst_359 {dimension_numbers = #tpu.dot_dimension_numbers<[1], [0], [0], [1], [0, 0, 1, 1], [], []>} : vector<8x11xf32>, vector<11x64xf32>, vector<8x64xf32> -> vector<8x64xf32>
    %400 = arith.addf %396, %399 : vector<8x64xf32>
    %c0_360 = arith.constant 0 : index
    %c137 = arith.constant 137 : index
    %401 = vector.load %arg19[%c0_360, %c137] : memref<64x1280xf32, #tpu.memory_space<vmem>>, vector<11x64xf32>
    %c0_361 = arith.constant 0 : index
    %c88 = arith.constant 88 : index
    %402 = vector.load %arg10[%c0_361, %c88] : memref<8x190xf32, #tpu.memory_space<vmem>>, vector<8x11xf32>
    %cst_362 = arith.constant dense<0.000000e+00> : vector<8x64xf32>
    %403 = tpu.matmul %402, %401, %cst_362 {dimension_numbers = #tpu.dot_dimension_numbers<[1], [0], [0], [1], [0, 0, 1, 1], [], []>} : vector<8x11xf32>, vector<11x64xf32>, vector<8x64xf32> -> vector<8x64xf32>
    %404 = arith.addf %400, %403 : vector<8x64xf32>
    %405 = vector.broadcast %360 : vector<1x64xf32> to vector<8x64xf32>
    %406 = arith.mulf %404, %405 : vector<8x64xf32>
    %407 = arith.addf %393, %406 : vector<8x64xf32>
    %c0_363 = arith.constant 0 : index
    %c99 = arith.constant 99 : index
    %408 = vector.load %arg10[%c0_363, %c99] : memref<8x190xf32, #tpu.memory_space<vmem>>, vector<8x1xf32>
    %409 = vector.broadcast %408 : vector<8x1xf32> to vector<8x64xf32>
    %410 = arith.addf %407, %409 : vector<8x64xf32>
    %c0_364 = arith.constant 0 : index
    %c128_365 = arith.constant 128 : index
    %411 = vector.load %arg19[%c0_364, %c128_365] : memref<64x1280xf32, #tpu.memory_space<vmem>>, vector<8x64xf32>
    tpu.vector_store %arg19[%c0_364, %c128_365], %410 {strides = array<i32>} : memref<64x1280xf32, #tpu.memory_space<vmem>>, vector<8x64xf32>,
    %c0_366 = arith.constant 0 : index
    %c119_367 = arith.constant 119 : index
    %412 = vector.load %arg19[%c0_366, %c119_367] : memref<64x1280xf32, #tpu.memory_space<vmem>>, vector<8x64xf32>
    %c0_368 = arith.constant 0 : index
    %c100 = arith.constant 100 : index
    %413 = vector.load %arg10[%c0_368, %c100] : memref<8x190xf32, #tpu.memory_space<vmem>>, vector<8x8xf32>
    %cst_369 = arith.constant dense<0.000000e+00> : vector<8x64xf32>
    %414 = tpu.matmul %413, %412, %cst_369 {dimension_numbers = #tpu.dot_dimension_numbers<[1], [0], [0], [1], [0, 0, 1, 1], [], []>} : vector<8x8xf32>, vector<8x64xf32>, vector<8x64xf32> -> vector<8x64xf32>
    %c0_370 = arith.constant 0 : index
    %c127_371 = arith.constant 127 : index
    %415 = vector.load %arg19[%c0_370, %c127_371] : memref<64x1280xf32, #tpu.memory_space<vmem>>, vector<8x64xf32>
    %c0_372 = arith.constant 0 : index
    %c124_373 = arith.constant 124 : index
    %416 = vector.load %arg10[%c0_372, %c124_373] : memref<8x190xf32, #tpu.memory_space<vmem>>, vector<8x8xf32>
    %cst_374 = arith.constant dense<0.000000e+00> : vector<8x64xf32>
    %417 = tpu.matmul %416, %415, %cst_374 {dimension_numbers = #tpu.dot_dimension_numbers<[1], [0], [0], [1], [0, 0, 1, 1], [], []>} : vector<8x8xf32>, vector<8x64xf32>, vector<8x64xf32> -> vector<8x64xf32>
    %418 = arith.addf %414, %417 : vector<8x64xf32>
    %c0_375 = arith.constant 0 : index
    %c135_376 = arith.constant 135 : index
    %419 = vector.load %arg19[%c0_375, %c135_376] : memref<64x1280xf32, #tpu.memory_space<vmem>>, vector<8x64xf32>
    %c0_377 = arith.constant 0 : index
    %c148 = arith.constant 148 : index
    %420 = vector.load %arg10[%c0_377, %c148] : memref<8x190xf32, #tpu.memory_space<vmem>>, vector<8x8xf32>
    %cst_378 = arith.constant dense<0.000000e+00> : vector<8x64xf32>
    %421 = tpu.matmul %420, %419, %cst_378 {dimension_numbers = #tpu.dot_dimension_numbers<[1], [0], [0], [1], [0, 0, 1, 1], [], []>} : vector<8x8xf32>, vector<8x64xf32>, vector<8x64xf32> -> vector<8x64xf32>
    %422 = arith.addf %418, %421 : vector<8x64xf32>
    %423 = vector.broadcast %356 : vector<1x64xf32> to vector<8x64xf32>
    %424 = arith.mulf %422, %423 : vector<8x64xf32>
    %c0_379 = arith.constant 0 : index
    %c120_380 = arith.constant 120 : index
    %425 = vector.load %arg19[%c0_379, %c120_380] : memref<64x1280xf32, #tpu.memory_space<vmem>>, vector<8x64xf32>
    %c0_381 = arith.constant 0 : index
    %c108 = arith.constant 108 : index
    %426 = vector.load %arg10[%c0_381, %c108] : memref<8x190xf32, #tpu.memory_space<vmem>>, vector<8x8xf32>
    %cst_382 = arith.constant dense<0.000000e+00> : vector<8x64xf32>
    %427 = tpu.matmul %426, %425, %cst_382 {dimension_numbers = #tpu.dot_dimension_numbers<[1], [0], [0], [1], [0, 0, 1, 1], [], []>} : vector<8x8xf32>, vector<8x64xf32>, vector<8x64xf32> -> vector<8x64xf32>
    %c0_383 = arith.constant 0 : index
    %c128_384 = arith.constant 128 : index
    %428 = vector.load %arg19[%c0_383, %c128_384] : memref<64x1280xf32, #tpu.memory_space<vmem>>, vector<8x64xf32>
    %c0_385 = arith.constant 0 : index
    %c132_386 = arith.constant 132 : index
    %429 = vector.load %arg10[%c0_385, %c132_386] : memref<8x190xf32, #tpu.memory_space<vmem>>, vector<8x8xf32>
    %cst_387 = arith.constant dense<0.000000e+00> : vector<8x64xf32>
    %430 = tpu.matmul %429, %428, %cst_387 {dimension_numbers = #tpu.dot_dimension_numbers<[1], [0], [0], [1], [0, 0, 1, 1], [], []>} : vector<8x8xf32>, vector<8x64xf32>, vector<8x64xf32> -> vector<8x64xf32>
    %431 = arith.addf %427, %430 : vector<8x64xf32>
    %c0_388 = arith.constant 0 : index
    %c136_389 = arith.constant 136 : index
    %432 = vector.load %arg19[%c0_388, %c136_389] : memref<64x1280xf32, #tpu.memory_space<vmem>>, vector<8x64xf32>
    %c0_390 = arith.constant 0 : index
    %c156 = arith.constant 156 : index
    %433 = vector.load %arg10[%c0_390, %c156] : memref<8x190xf32, #tpu.memory_space<vmem>>, vector<8x8xf32>
    %cst_391 = arith.constant dense<0.000000e+00> : vector<8x64xf32>
    %434 = tpu.matmul %433, %432, %cst_391 {dimension_numbers = #tpu.dot_dimension_numbers<[1], [0], [0], [1], [0, 0, 1, 1], [], []>} : vector<8x8xf32>, vector<8x64xf32>, vector<8x64xf32> -> vector<8x64xf32>
    %435 = arith.addf %431, %434 : vector<8x64xf32>
    %436 = arith.addf %424, %435 : vector<8x64xf32>
    %c0_392 = arith.constant 0 : index
    %c121_393 = arith.constant 121 : index
    %437 = vector.load %arg19[%c0_392, %c121_393] : memref<64x1280xf32, #tpu.memory_space<vmem>>, vector<8x64xf32>
    %c0_394 = arith.constant 0 : index
    %c116 = arith.constant 116 : index
    %438 = vector.load %arg10[%c0_394, %c116] : memref<8x190xf32, #tpu.memory_space<vmem>>, vector<8x8xf32>
    %cst_395 = arith.constant dense<0.000000e+00> : vector<8x64xf32>
    %439 = tpu.matmul %438, %437, %cst_395 {dimension_numbers = #tpu.dot_dimension_numbers<[1], [0], [0], [1], [0, 0, 1, 1], [], []>} : vector<8x8xf32>, vector<8x64xf32>, vector<8x64xf32> -> vector<8x64xf32>
    %c0_396 = arith.constant 0 : index
    %c129_397 = arith.constant 129 : index
    %440 = vector.load %arg19[%c0_396, %c129_397] : memref<64x1280xf32, #tpu.memory_space<vmem>>, vector<8x64xf32>
    %c0_398 = arith.constant 0 : index
    %c140_399 = arith.constant 140 : index
    %441 = vector.load %arg10[%c0_398, %c140_399] : memref<8x190xf32, #tpu.memory_space<vmem>>, vector<8x8xf32>
    %cst_400 = arith.constant dense<0.000000e+00> : vector<8x64xf32>
    %442 = tpu.matmul %441, %440, %cst_400 {dimension_numbers = #tpu.dot_dimension_numbers<[1], [0], [0], [1], [0, 0, 1, 1], [], []>} : vector<8x8xf32>, vector<8x64xf32>, vector<8x64xf32> -> vector<8x64xf32>
    %443 = arith.addf %439, %442 : vector<8x64xf32>
    %c0_401 = arith.constant 0 : index
    %c137_402 = arith.constant 137 : index
    %444 = vector.load %arg19[%c0_401, %c137_402] : memref<64x1280xf32, #tpu.memory_space<vmem>>, vector<8x64xf32>
    %c0_403 = arith.constant 0 : index
    %c164 = arith.constant 164 : index
    %445 = vector.load %arg10[%c0_403, %c164] : memref<8x190xf32, #tpu.memory_space<vmem>>, vector<8x8xf32>
    %cst_404 = arith.constant dense<0.000000e+00> : vector<8x64xf32>
    %446 = tpu.matmul %445, %444, %cst_404 {dimension_numbers = #tpu.dot_dimension_numbers<[1], [0], [0], [1], [0, 0, 1, 1], [], []>} : vector<8x8xf32>, vector<8x64xf32>, vector<8x64xf32> -> vector<8x64xf32>
    %447 = arith.addf %443, %446 : vector<8x64xf32>
    %448 = vector.broadcast %360 : vector<1x64xf32> to vector<8x64xf32>
    %449 = arith.mulf %447, %448 : vector<8x64xf32>
    %450 = arith.addf %436, %449 : vector<8x64xf32>
    %c0_405 = arith.constant 0 : index
    %c172_406 = arith.constant 172 : index
    %451 = vector.load %arg10[%c0_405, %c172_406] : memref<8x190xf32, #tpu.memory_space<vmem>>, vector<8x1xf32>
    %452 = vector.broadcast %451 : vector<8x1xf32> to vector<8x64xf32>
    %453 = arith.addf %450, %452 : vector<8x64xf32>
    %cst_407 = arith.constant 0.000000e+00 : f32
    %454 = vector.broadcast %cst_407 : f32 to vector<8x64xf32>
    %455 = arith.maximumf %453, %454 : vector<8x64xf32>
    %c8_408 = arith.constant 8 : index
    %c128_409 = arith.constant 128 : index
    %456 = vector.load %arg19[%c8_408, %c128_409] : memref<64x1280xf32, #tpu.memory_space<vmem>>, vector<8x64xf32>
    tpu.vector_store %arg19[%c8_408, %c128_409], %455 {strides = array<i32>} : memref<64x1280xf32, #tpu.memory_space<vmem>>, vector<8x64xf32>,
    %c0_410 = arith.constant 0 : index
    %c173 = arith.constant 173 : index
    %457 = vector.load %arg10[%c0_410, %c173] : memref<8x190xf32, #tpu.memory_space<vmem>>, vector<3x16xf32>
    %c0_411 = arith.constant 0 : index
    %c189 = arith.constant 189 : index
    %458 = vector.load %arg10[%c0_411, %c189] : memref<8x190xf32, #tpu.memory_space<vmem>>, vector<3x1xf32>
    %c0_412 = arith.constant 0 : index
    %c128_413 = arith.constant 128 : index
    %459 = vector.load %arg19[%c0_412, %c128_413] : memref<64x1280xf32, #tpu.memory_space<vmem>>, vector<16x64xf32>
    %cst_414 = arith.constant dense<0.000000e+00> : vector<3x64xf32>
    %460 = tpu.matmul %457, %459, %cst_414 {dimension_numbers = #tpu.dot_dimension_numbers<[1], [0], [0], [1], [0, 0, 1, 1], [], []>} : vector<3x16xf32>, vector<16x64xf32>, vector<3x64xf32> -> vector<3x64xf32>
    %461 = vector.broadcast %458 : vector<3x1xf32> to vector<3x64xf32>
    %462 = arith.addf %460, %461 : vector<3x64xf32>
    %463 = arith.addf %462, %349 : vector<3x64xf32>
    %c0_415 = arith.constant 0 : index
    %c0_416 = arith.constant 0 : index
    %c128_417 = arith.constant 128 : index
    %464 = vector.load %arg18[%c0_415, %c0_416, %c128_417] : memref<1x3x1536xf32, #tpu.memory_space<vmem>>, vector<1x3x64xf32>
    %465 = vector.shape_cast %464 : vector<1x3x64xf32> to vector<3x64xf32>
    %466 = vector.shape_cast %463 : vector<3x64xf32> to vector<1x3x64xf32>
    tpu.vector_store %arg18[%c0_415, %c0_416, %c128_417], %466 {strides = array<i32>} : memref<1x3x1536xf32, #tpu.memory_space<vmem>>, vector<1x3x64xf32>,
    %c0_418 = arith.constant 0 : index
    %c0_419 = arith.constant 0 : index
    %467 = vector.load %arg14[%c0_418, %c0_419] : memref<64x256xf32, #tpu.memory_space<vmem>>, vector<64x256xf32>
    %cst_420 = arith.constant dense<0.000000e+00> : vector<3x256xf32>
    %468 = tpu.matmul %463, %467, %cst_420 {dimension_numbers = #tpu.dot_dimension_numbers<[1], [0], [0], [1], [0, 0, 1, 1], [], []>} : vector<3x64xf32>, vector<64x256xf32>, vector<3x256xf32> -> vector<3x256xf32>
    %469 = tpu.iota {dimensions = array<i32: 1>} : vector<1x256xi32>
    %c15_i32 = arith.constant 15 : i32
    %470 = vector.broadcast %c15_i32 : i32 to vector<1x256xi32>
    %471 = arith.andi %469, %470 : vector<1x256xi32>
    %c0_i32_421 = arith.constant 0 : i32
    %472 = vector.broadcast %c0_i32_421 : i32 to vector<1x256xi32>
    %473 = arith.cmpi ne, %471, %472 : vector<1x256xi32>
    %474 = arith.extui %473 : vector<1x256xi1> to vector<1x256xi32>
    %475 = arith.sitofp %474 : vector<1x256xi32> to vector<1x256xf32>
    %c15_i32_422 = arith.constant 15 : i32
    %476 = vector.broadcast %c15_i32_422 : i32 to vector<1x256xi32>
    %477 = arith.cmpi ne, %471, %476 : vector<1x256xi32>
    %478 = arith.extui %477 : vector<1x256xi1> to vector<1x256xi32>
    %479 = arith.sitofp %478 : vector<1x256xi32> to vector<1x256xf32>
    %cst_423 = arith.constant 0.000000e+00 : f32
    %480 = vector.broadcast %cst_423 : f32 to vector<11x128xf32>
    %c0_424 = arith.constant 0 : index
    %c0_425 = arith.constant 0 : index
    %481 = vector.load %arg19[%c0_424, %c0_425] : memref<64x1280xf32, #tpu.memory_space<vmem>>, vector<11x128xf32>
    tpu.vector_store %arg19[%c0_424, %c0_425], %480 {strides = array<i32>} : memref<64x1280xf32, #tpu.memory_space<vmem>>, vector<11x128xf32>,
    %cst_426 = arith.constant 0.000000e+00 : f32
    %482 = vector.broadcast %cst_426 : f32 to vector<11x128xf32>
    %c0_427 = arith.constant 0 : index
    %c384 = arith.constant 384 : index
    %483 = vector.load %arg19[%c0_427, %c384] : memref<64x1280xf32, #tpu.memory_space<vmem>>, vector<11x128xf32>
    tpu.vector_store %arg19[%c0_427, %c384], %482 {strides = array<i32>} : memref<64x1280xf32, #tpu.memory_space<vmem>>, vector<11x128xf32>,
    %c0_428 = arith.constant 0 : index
    %c0_429 = arith.constant 0 : index
    %c0_430 = arith.constant 0 : index
    %484 = vector.load %arg12[%c0_428, %c0_429, %c0_430] : memref<1x8x256xf32, #tpu.memory_space<vmem>>, vector<1x8x256xf32>
    %485 = vector.shape_cast %484 : vector<1x8x256xf32> to vector<8x256xf32>
    %c0_431 = arith.constant 0 : index
    %c128_432 = arith.constant 128 : index
    %486 = vector.load %arg19[%c0_431, %c128_432] : memref<64x1280xf32, #tpu.memory_space<vmem>>, vector<8x256xf32>
    tpu.vector_store %arg19[%c0_431, %c128_432], %485 {strides = array<i32>} : memref<64x1280xf32, #tpu.memory_space<vmem>>, vector<8x256xf32>,
    %c8_433 = arith.constant 8 : index
    %c128_434 = arith.constant 128 : index
    %487 = vector.load %arg19[%c8_433, %c128_434] : memref<64x1280xf32, #tpu.memory_space<vmem>>, vector<3x256xf32>
    tpu.vector_store %arg19[%c8_433, %c128_434], %468 {strides = array<i32>} : memref<64x1280xf32, #tpu.memory_space<vmem>>, vector<3x256xf32>,
    %c0_435 = arith.constant 0 : index
    %c111 = arith.constant 111 : index
    %488 = vector.load %arg19[%c0_435, %c111] : memref<64x1280xf32, #tpu.memory_space<vmem>>, vector<11x256xf32>
    %c0_436 = arith.constant 0 : index
    %c0_437 = arith.constant 0 : index
    %489 = vector.load %arg13[%c0_436, %c0_437] : memref<8x190xf32, #tpu.memory_space<vmem>>, vector<8x11xf32>
    %cst_438 = arith.constant dense<0.000000e+00> : vector<8x256xf32>
    %490 = tpu.matmul %489, %488, %cst_438 {dimension_numbers = #tpu.dot_dimension_numbers<[1], [0], [0], [1], [0, 0, 1, 1], [], []>} : vector<8x11xf32>, vector<11x256xf32>, vector<8x256xf32> -> vector<8x256xf32>
    %c0_439 = arith.constant 0 : index
    %c127_440 = arith.constant 127 : index
    %491 = vector.load %arg19[%c0_439, %c127_440] : memref<64x1280xf32, #tpu.memory_space<vmem>>, vector<11x256xf32>
    %c0_441 = arith.constant 0 : index
    %c33_442 = arith.constant 33 : index
    %492 = vector.load %arg13[%c0_441, %c33_442] : memref<8x190xf32, #tpu.memory_space<vmem>>, vector<8x11xf32>
    %cst_443 = arith.constant dense<0.000000e+00> : vector<8x256xf32>
    %493 = tpu.matmul %492, %491, %cst_443 {dimension_numbers = #tpu.dot_dimension_numbers<[1], [0], [0], [1], [0, 0, 1, 1], [], []>} : vector<8x11xf32>, vector<11x256xf32>, vector<8x256xf32> -> vector<8x256xf32>
    %494 = arith.addf %490, %493 : vector<8x256xf32>
    %c0_444 = arith.constant 0 : index
    %c143 = arith.constant 143 : index
    %495 = vector.load %arg19[%c0_444, %c143] : memref<64x1280xf32, #tpu.memory_space<vmem>>, vector<11x256xf32>
    %c0_445 = arith.constant 0 : index
    %c66_446 = arith.constant 66 : index
    %496 = vector.load %arg13[%c0_445, %c66_446] : memref<8x190xf32, #tpu.memory_space<vmem>>, vector<8x11xf32>
    %cst_447 = arith.constant dense<0.000000e+00> : vector<8x256xf32>
    %497 = tpu.matmul %496, %495, %cst_447 {dimension_numbers = #tpu.dot_dimension_numbers<[1], [0], [0], [1], [0, 0, 1, 1], [], []>} : vector<8x11xf32>, vector<11x256xf32>, vector<8x256xf32> -> vector<8x256xf32>
    %498 = arith.addf %494, %497 : vector<8x256xf32>
    %499 = vector.broadcast %475 : vector<1x256xf32> to vector<8x256xf32>
    %500 = arith.mulf %498, %499 : vector<8x256xf32>
    %c0_448 = arith.constant 0 : index
    %c112 = arith.constant 112 : index
    %501 = vector.load %arg19[%c0_448, %c112] : memref<64x1280xf32, #tpu.memory_space<vmem>>, vector<11x256xf32>
    %c0_449 = arith.constant 0 : index
    %c11_450 = arith.constant 11 : index
    %502 = vector.load %arg13[%c0_449, %c11_450] : memref<8x190xf32, #tpu.memory_space<vmem>>, vector<8x11xf32>
    %cst_451 = arith.constant dense<0.000000e+00> : vector<8x256xf32>
    %503 = tpu.matmul %502, %501, %cst_451 {dimension_numbers = #tpu.dot_dimension_numbers<[1], [0], [0], [1], [0, 0, 1, 1], [], []>} : vector<8x11xf32>, vector<11x256xf32>, vector<8x256xf32> -> vector<8x256xf32>
    %c0_452 = arith.constant 0 : index
    %c128_453 = arith.constant 128 : index
    %504 = vector.load %arg19[%c0_452, %c128_453] : memref<64x1280xf32, #tpu.memory_space<vmem>>, vector<11x256xf32>
    %c0_454 = arith.constant 0 : index
    %c44_455 = arith.constant 44 : index
    %505 = vector.load %arg13[%c0_454, %c44_455] : memref<8x190xf32, #tpu.memory_space<vmem>>, vector<8x11xf32>
    %cst_456 = arith.constant dense<0.000000e+00> : vector<8x256xf32>
    %506 = tpu.matmul %505, %504, %cst_456 {dimension_numbers = #tpu.dot_dimension_numbers<[1], [0], [0], [1], [0, 0, 1, 1], [], []>} : vector<8x11xf32>, vector<11x256xf32>, vector<8x256xf32> -> vector<8x256xf32>
    %507 = arith.addf %503, %506 : vector<8x256xf32>
    %c0_457 = arith.constant 0 : index
    %c144_458 = arith.constant 144 : index
    %508 = vector.load %arg19[%c0_457, %c144_458] : memref<64x1280xf32, #tpu.memory_space<vmem>>, vector<11x256xf32>
    %c0_459 = arith.constant 0 : index
    %c77_460 = arith.constant 77 : index
    %509 = vector.load %arg13[%c0_459, %c77_460] : memref<8x190xf32, #tpu.memory_space<vmem>>, vector<8x11xf32>
    %cst_461 = arith.constant dense<0.000000e+00> : vector<8x256xf32>
    %510 = tpu.matmul %509, %508, %cst_461 {dimension_numbers = #tpu.dot_dimension_numbers<[1], [0], [0], [1], [0, 0, 1, 1], [], []>} : vector<8x11xf32>, vector<11x256xf32>, vector<8x256xf32> -> vector<8x256xf32>
    %511 = arith.addf %507, %510 : vector<8x256xf32>
    %512 = arith.addf %500, %511 : vector<8x256xf32>
    %c0_462 = arith.constant 0 : index
    %c113 = arith.constant 113 : index
    %513 = vector.load %arg19[%c0_462, %c113] : memref<64x1280xf32, #tpu.memory_space<vmem>>, vector<11x256xf32>
    %c0_463 = arith.constant 0 : index
    %c22_464 = arith.constant 22 : index
    %514 = vector.load %arg13[%c0_463, %c22_464] : memref<8x190xf32, #tpu.memory_space<vmem>>, vector<8x11xf32>
    %cst_465 = arith.constant dense<0.000000e+00> : vector<8x256xf32>
    %515 = tpu.matmul %514, %513, %cst_465 {dimension_numbers = #tpu.dot_dimension_numbers<[1], [0], [0], [1], [0, 0, 1, 1], [], []>} : vector<8x11xf32>, vector<11x256xf32>, vector<8x256xf32> -> vector<8x256xf32>
    %c0_466 = arith.constant 0 : index
    %c129_467 = arith.constant 129 : index
    %516 = vector.load %arg19[%c0_466, %c129_467] : memref<64x1280xf32, #tpu.memory_space<vmem>>, vector<11x256xf32>
    %c0_468 = arith.constant 0 : index
    %c55_469 = arith.constant 55 : index
    %517 = vector.load %arg13[%c0_468, %c55_469] : memref<8x190xf32, #tpu.memory_space<vmem>>, vector<8x11xf32>
    %cst_470 = arith.constant dense<0.000000e+00> : vector<8x256xf32>
    %518 = tpu.matmul %517, %516, %cst_470 {dimension_numbers = #tpu.dot_dimension_numbers<[1], [0], [0], [1], [0, 0, 1, 1], [], []>} : vector<8x11xf32>, vector<11x256xf32>, vector<8x256xf32> -> vector<8x256xf32>
    %519 = arith.addf %515, %518 : vector<8x256xf32>
    %c0_471 = arith.constant 0 : index
    %c145 = arith.constant 145 : index
    %520 = vector.load %arg19[%c0_471, %c145] : memref<64x1280xf32, #tpu.memory_space<vmem>>, vector<11x256xf32>
    %c0_472 = arith.constant 0 : index
    %c88_473 = arith.constant 88 : index
    %521 = vector.load %arg13[%c0_472, %c88_473] : memref<8x190xf32, #tpu.memory_space<vmem>>, vector<8x11xf32>
    %cst_474 = arith.constant dense<0.000000e+00> : vector<8x256xf32>
    %522 = tpu.matmul %521, %520, %cst_474 {dimension_numbers = #tpu.dot_dimension_numbers<[1], [0], [0], [1], [0, 0, 1, 1], [], []>} : vector<8x11xf32>, vector<11x256xf32>, vector<8x256xf32> -> vector<8x256xf32>
    %523 = arith.addf %519, %522 : vector<8x256xf32>
    %524 = vector.broadcast %479 : vector<1x256xf32> to vector<8x256xf32>
    %525 = arith.mulf %523, %524 : vector<8x256xf32>
    %526 = arith.addf %512, %525 : vector<8x256xf32>
    %c0_475 = arith.constant 0 : index
    %c99_476 = arith.constant 99 : index
    %527 = vector.load %arg13[%c0_475, %c99_476] : memref<8x190xf32, #tpu.memory_space<vmem>>, vector<8x1xf32>
    %528 = vector.broadcast %527 : vector<8x1xf32> to vector<8x256xf32>
    %529 = arith.addf %526, %528 : vector<8x256xf32>
    %c0_477 = arith.constant 0 : index
    %c128_478 = arith.constant 128 : index
    %530 = vector.load %arg19[%c0_477, %c128_478] : memref<64x1280xf32, #tpu.memory_space<vmem>>, vector<8x256xf32>
    tpu.vector_store %arg19[%c0_477, %c128_478], %529 {strides = array<i32>} : memref<64x1280xf32, #tpu.memory_space<vmem>>, vector<8x256xf32>,
    %c0_479 = arith.constant 0 : index
    %c111_480 = arith.constant 111 : index
    %531 = vector.load %arg19[%c0_479, %c111_480] : memref<64x1280xf32, #tpu.memory_space<vmem>>, vector<8x256xf32>
    %c0_481 = arith.constant 0 : index
    %c100_482 = arith.constant 100 : index
    %532 = vector.load %arg13[%c0_481, %c100_482] : memref<8x190xf32, #tpu.memory_space<vmem>>, vector<8x8xf32>
    %cst_483 = arith.constant dense<0.000000e+00> : vector<8x256xf32>
    %533 = tpu.matmul %532, %531, %cst_483 {dimension_numbers = #tpu.dot_dimension_numbers<[1], [0], [0], [1], [0, 0, 1, 1], [], []>} : vector<8x8xf32>, vector<8x256xf32>, vector<8x256xf32> -> vector<8x256xf32>
    %c0_484 = arith.constant 0 : index
    %c127_485 = arith.constant 127 : index
    %534 = vector.load %arg19[%c0_484, %c127_485] : memref<64x1280xf32, #tpu.memory_space<vmem>>, vector<8x256xf32>
    %c0_486 = arith.constant 0 : index
    %c124_487 = arith.constant 124 : index
    %535 = vector.load %arg13[%c0_486, %c124_487] : memref<8x190xf32, #tpu.memory_space<vmem>>, vector<8x8xf32>
    %cst_488 = arith.constant dense<0.000000e+00> : vector<8x256xf32>
    %536 = tpu.matmul %535, %534, %cst_488 {dimension_numbers = #tpu.dot_dimension_numbers<[1], [0], [0], [1], [0, 0, 1, 1], [], []>} : vector<8x8xf32>, vector<8x256xf32>, vector<8x256xf32> -> vector<8x256xf32>
    %537 = arith.addf %533, %536 : vector<8x256xf32>
    %c0_489 = arith.constant 0 : index
    %c143_490 = arith.constant 143 : index
    %538 = vector.load %arg19[%c0_489, %c143_490] : memref<64x1280xf32, #tpu.memory_space<vmem>>, vector<8x256xf32>
    %c0_491 = arith.constant 0 : index
    %c148_492 = arith.constant 148 : index
    %539 = vector.load %arg13[%c0_491, %c148_492] : memref<8x190xf32, #tpu.memory_space<vmem>>, vector<8x8xf32>
    %cst_493 = arith.constant dense<0.000000e+00> : vector<8x256xf32>
    %540 = tpu.matmul %539, %538, %cst_493 {dimension_numbers = #tpu.dot_dimension_numbers<[1], [0], [0], [1], [0, 0, 1, 1], [], []>} : vector<8x8xf32>, vector<8x256xf32>, vector<8x256xf32> -> vector<8x256xf32>
    %541 = arith.addf %537, %540 : vector<8x256xf32>
    %542 = vector.broadcast %475 : vector<1x256xf32> to vector<8x256xf32>
    %543 = arith.mulf %541, %542 : vector<8x256xf32>
    %c0_494 = arith.constant 0 : index
    %c112_495 = arith.constant 112 : index
    %544 = vector.load %arg19[%c0_494, %c112_495] : memref<64x1280xf32, #tpu.memory_space<vmem>>, vector<8x256xf32>
    %c0_496 = arith.constant 0 : index
    %c108_497 = arith.constant 108 : index
    %545 = vector.load %arg13[%c0_496, %c108_497] : memref<8x190xf32, #tpu.memory_space<vmem>>, vector<8x8xf32>
    %cst_498 = arith.constant dense<0.000000e+00> : vector<8x256xf32>
    %546 = tpu.matmul %545, %544, %cst_498 {dimension_numbers = #tpu.dot_dimension_numbers<[1], [0], [0], [1], [0, 0, 1, 1], [], []>} : vector<8x8xf32>, vector<8x256xf32>, vector<8x256xf32> -> vector<8x256xf32>
    %c0_499 = arith.constant 0 : index
    %c128_500 = arith.constant 128 : index
    %547 = vector.load %arg19[%c0_499, %c128_500] : memref<64x1280xf32, #tpu.memory_space<vmem>>, vector<8x256xf32>
    %c0_501 = arith.constant 0 : index
    %c132_502 = arith.constant 132 : index
    %548 = vector.load %arg13[%c0_501, %c132_502] : memref<8x190xf32, #tpu.memory_space<vmem>>, vector<8x8xf32>
    %cst_503 = arith.constant dense<0.000000e+00> : vector<8x256xf32>
    %549 = tpu.matmul %548, %547, %cst_503 {dimension_numbers = #tpu.dot_dimension_numbers<[1], [0], [0], [1], [0, 0, 1, 1], [], []>} : vector<8x8xf32>, vector<8x256xf32>, vector<8x256xf32> -> vector<8x256xf32>
    %550 = arith.addf %546, %549 : vector<8x256xf32>
    %c0_504 = arith.constant 0 : index
    %c144_505 = arith.constant 144 : index
    %551 = vector.load %arg19[%c0_504, %c144_505] : memref<64x1280xf32, #tpu.memory_space<vmem>>, vector<8x256xf32>
    %c0_506 = arith.constant 0 : index
    %c156_507 = arith.constant 156 : index
    %552 = vector.load %arg13[%c0_506, %c156_507] : memref<8x190xf32, #tpu.memory_space<vmem>>, vector<8x8xf32>
    %cst_508 = arith.constant dense<0.000000e+00> : vector<8x256xf32>
    %553 = tpu.matmul %552, %551, %cst_508 {dimension_numbers = #tpu.dot_dimension_numbers<[1], [0], [0], [1], [0, 0, 1, 1], [], []>} : vector<8x8xf32>, vector<8x256xf32>, vector<8x256xf32> -> vector<8x256xf32>
    %554 = arith.addf %550, %553 : vector<8x256xf32>
    %555 = arith.addf %543, %554 : vector<8x256xf32>
    %c0_509 = arith.constant 0 : index
    %c113_510 = arith.constant 113 : index
    %556 = vector.load %arg19[%c0_509, %c113_510] : memref<64x1280xf32, #tpu.memory_space<vmem>>, vector<8x256xf32>
    %c0_511 = arith.constant 0 : index
    %c116_512 = arith.constant 116 : index
    %557 = vector.load %arg13[%c0_511, %c116_512] : memref<8x190xf32, #tpu.memory_space<vmem>>, vector<8x8xf32>
    %cst_513 = arith.constant dense<0.000000e+00> : vector<8x256xf32>
    %558 = tpu.matmul %557, %556, %cst_513 {dimension_numbers = #tpu.dot_dimension_numbers<[1], [0], [0], [1], [0, 0, 1, 1], [], []>} : vector<8x8xf32>, vector<8x256xf32>, vector<8x256xf32> -> vector<8x256xf32>
    %c0_514 = arith.constant 0 : index
    %c129_515 = arith.constant 129 : index
    %559 = vector.load %arg19[%c0_514, %c129_515] : memref<64x1280xf32, #tpu.memory_space<vmem>>, vector<8x256xf32>
    %c0_516 = arith.constant 0 : index
    %c140_517 = arith.constant 140 : index
    %560 = vector.load %arg13[%c0_516, %c140_517] : memref<8x190xf32, #tpu.memory_space<vmem>>, vector<8x8xf32>
    %cst_518 = arith.constant dense<0.000000e+00> : vector<8x256xf32>
    %561 = tpu.matmul %560, %559, %cst_518 {dimension_numbers = #tpu.dot_dimension_numbers<[1], [0], [0], [1], [0, 0, 1, 1], [], []>} : vector<8x8xf32>, vector<8x256xf32>, vector<8x256xf32> -> vector<8x256xf32>
    %562 = arith.addf %558, %561 : vector<8x256xf32>
    %c0_519 = arith.constant 0 : index
    %c145_520 = arith.constant 145 : index
    %563 = vector.load %arg19[%c0_519, %c145_520] : memref<64x1280xf32, #tpu.memory_space<vmem>>, vector<8x256xf32>
    %c0_521 = arith.constant 0 : index
    %c164_522 = arith.constant 164 : index
    %564 = vector.load %arg13[%c0_521, %c164_522] : memref<8x190xf32, #tpu.memory_space<vmem>>, vector<8x8xf32>
    %cst_523 = arith.constant dense<0.000000e+00> : vector<8x256xf32>
    %565 = tpu.matmul %564, %563, %cst_523 {dimension_numbers = #tpu.dot_dimension_numbers<[1], [0], [0], [1], [0, 0, 1, 1], [], []>} : vector<8x8xf32>, vector<8x256xf32>, vector<8x256xf32> -> vector<8x256xf32>
    %566 = arith.addf %562, %565 : vector<8x256xf32>
    %567 = vector.broadcast %479 : vector<1x256xf32> to vector<8x256xf32>
    %568 = arith.mulf %566, %567 : vector<8x256xf32>
    %569 = arith.addf %555, %568 : vector<8x256xf32>
    %c0_524 = arith.constant 0 : index
    %c172_525 = arith.constant 172 : index
    %570 = vector.load %arg13[%c0_524, %c172_525] : memref<8x190xf32, #tpu.memory_space<vmem>>, vector<8x1xf32>
    %571 = vector.broadcast %570 : vector<8x1xf32> to vector<8x256xf32>
    %572 = arith.addf %569, %571 : vector<8x256xf32>
    %cst_526 = arith.constant 0.000000e+00 : f32
    %573 = vector.broadcast %cst_526 : f32 to vector<8x256xf32>
    %574 = arith.maximumf %572, %573 : vector<8x256xf32>
    %c8_527 = arith.constant 8 : index
    %c128_528 = arith.constant 128 : index
    %575 = vector.load %arg19[%c8_527, %c128_528] : memref<64x1280xf32, #tpu.memory_space<vmem>>, vector<8x256xf32>
    tpu.vector_store %arg19[%c8_527, %c128_528], %574 {strides = array<i32>} : memref<64x1280xf32, #tpu.memory_space<vmem>>, vector<8x256xf32>,
    %c0_529 = arith.constant 0 : index
    %c173_530 = arith.constant 173 : index
    %576 = vector.load %arg13[%c0_529, %c173_530] : memref<8x190xf32, #tpu.memory_space<vmem>>, vector<3x16xf32>
    %c0_531 = arith.constant 0 : index
    %c189_532 = arith.constant 189 : index
    %577 = vector.load %arg13[%c0_531, %c189_532] : memref<8x190xf32, #tpu.memory_space<vmem>>, vector<3x1xf32>
    %c0_533 = arith.constant 0 : index
    %c128_534 = arith.constant 128 : index
    %578 = vector.load %arg19[%c0_533, %c128_534] : memref<64x1280xf32, #tpu.memory_space<vmem>>, vector<16x256xf32>
    %cst_535 = arith.constant dense<0.000000e+00> : vector<3x256xf32>
    %579 = tpu.matmul %576, %578, %cst_535 {dimension_numbers = #tpu.dot_dimension_numbers<[1], [0], [0], [1], [0, 0, 1, 1], [], []>} : vector<3x16xf32>, vector<16x256xf32>, vector<3x256xf32> -> vector<3x256xf32>
    %580 = vector.broadcast %577 : vector<3x1xf32> to vector<3x256xf32>
    %581 = arith.addf %579, %580 : vector<3x256xf32>
    %582 = arith.addf %581, %468 : vector<3x256xf32>
    %c0_536 = arith.constant 0 : index
    %c0_537 = arith.constant 0 : index
    %c256 = arith.constant 256 : index
    %583 = vector.load %arg18[%c0_536, %c0_537, %c256] : memref<1x3x1536xf32, #tpu.memory_space<vmem>>, vector<1x3x256xf32>
    %584 = vector.shape_cast %583 : vector<1x3x256xf32> to vector<3x256xf32>
    %585 = vector.shape_cast %582 : vector<3x256xf32> to vector<1x3x256xf32>
    tpu.vector_store %arg18[%c0_536, %c0_537, %c256], %585 {strides = array<i32>} : memref<1x3x1536xf32, #tpu.memory_space<vmem>>, vector<1x3x256xf32>,
    %c0_538 = arith.constant 0 : index
    %c0_539 = arith.constant 0 : index
    %586 = vector.load %arg17[%c0_538, %c0_539] : memref<256x1024xf32, #tpu.memory_space<vmem>>, vector<256x1024xf32>
    %cst_540 = arith.constant dense<0.000000e+00> : vector<3x1024xf32>
    %587 = tpu.matmul %582, %586, %cst_540 {dimension_numbers = #tpu.dot_dimension_numbers<[1], [0], [0], [1], [0, 0, 1, 1], [], []>} : vector<3x256xf32>, vector<256x1024xf32>, vector<3x1024xf32> -> vector<3x1024xf32>
    %588 = tpu.iota {dimensions = array<i32: 1>} : vector<1x1024xi32>
    %c31_i32 = arith.constant 31 : i32
    %589 = vector.broadcast %c31_i32 : i32 to vector<1x1024xi32>
    %590 = arith.andi %588, %589 : vector<1x1024xi32>
    %c0_i32_541 = arith.constant 0 : i32
    %591 = vector.broadcast %c0_i32_541 : i32 to vector<1x1024xi32>
    %592 = arith.cmpi ne, %590, %591 : vector<1x1024xi32>
    %593 = arith.extui %592 : vector<1x1024xi1> to vector<1x1024xi32>
    %594 = arith.sitofp %593 : vector<1x1024xi32> to vector<1x1024xf32>
    %c31_i32_542 = arith.constant 31 : i32
    %595 = vector.broadcast %c31_i32_542 : i32 to vector<1x1024xi32>
    %596 = arith.cmpi ne, %590, %595 : vector<1x1024xi32>
    %597 = arith.extui %596 : vector<1x1024xi1> to vector<1x1024xi32>
    %598 = arith.sitofp %597 : vector<1x1024xi32> to vector<1x1024xf32>
    %cst_543 = arith.constant 0.000000e+00 : f32
    %599 = vector.broadcast %cst_543 : f32 to vector<11x128xf32>
    %c0_544 = arith.constant 0 : index
    %c0_545 = arith.constant 0 : index
    %600 = vector.load %arg19[%c0_544, %c0_545] : memref<64x1280xf32, #tpu.memory_space<vmem>>, vector<11x128xf32>
    tpu.vector_store %arg19[%c0_544, %c0_545], %599 {strides = array<i32>} : memref<64x1280xf32, #tpu.memory_space<vmem>>, vector<11x128xf32>,
    %cst_546 = arith.constant 0.000000e+00 : f32
    %601 = vector.broadcast %cst_546 : f32 to vector<11x128xf32>
    %c0_547 = arith.constant 0 : index
    %c1152 = arith.constant 1152 : index
    %602 = vector.load %arg19[%c0_547, %c1152] : memref<64x1280xf32, #tpu.memory_space<vmem>>, vector<11x128xf32>
    tpu.vector_store %arg19[%c0_547, %c1152], %601 {strides = array<i32>} : memref<64x1280xf32, #tpu.memory_space<vmem>>, vector<11x128xf32>,
    %c0_548 = arith.constant 0 : index
    %c0_549 = arith.constant 0 : index
    %c0_550 = arith.constant 0 : index
    %603 = vector.load %arg15[%c0_548, %c0_549, %c0_550] : memref<1x8x1024xf32, #tpu.memory_space<vmem>>, vector<1x8x1024xf32>
    %604 = vector.shape_cast %603 : vector<1x8x1024xf32> to vector<8x1024xf32>
    %c0_551 = arith.constant 0 : index
    %c128_552 = arith.constant 128 : index
    %605 = vector.load %arg19[%c0_551, %c128_552] : memref<64x1280xf32, #tpu.memory_space<vmem>>, vector<8x1024xf32>
    tpu.vector_store %arg19[%c0_551, %c128_552], %604 {strides = array<i32>} : memref<64x1280xf32, #tpu.memory_space<vmem>>, vector<8x1024xf32>,
    %c8_553 = arith.constant 8 : index
    %c128_554 = arith.constant 128 : index
    %606 = vector.load %arg19[%c8_553, %c128_554] : memref<64x1280xf32, #tpu.memory_space<vmem>>, vector<3x1024xf32>
    tpu.vector_store %arg19[%c8_553, %c128_554], %587 {strides = array<i32>} : memref<64x1280xf32, #tpu.memory_space<vmem>>, vector<3x1024xf32>,
    %c0_555 = arith.constant 0 : index
    %c95_556 = arith.constant 95 : index
    %607 = vector.load %arg19[%c0_555, %c95_556] : memref<64x1280xf32, #tpu.memory_space<vmem>>, vector<11x1024xf32>
    %c0_557 = arith.constant 0 : index
    %c0_558 = arith.constant 0 : index
    %608 = vector.load %arg16[%c0_557, %c0_558] : memref<8x190xf32, #tpu.memory_space<vmem>>, vector<8x11xf32>
    %cst_559 = arith.constant dense<0.000000e+00> : vector<8x1024xf32>
    %609 = tpu.matmul %608, %607, %cst_559 {dimension_numbers = #tpu.dot_dimension_numbers<[1], [0], [0], [1], [0, 0, 1, 1], [], []>} : vector<8x11xf32>, vector<11x1024xf32>, vector<8x1024xf32> -> vector<8x1024xf32>
    %c0_560 = arith.constant 0 : index
    %c127_561 = arith.constant 127 : index
    %610 = vector.load %arg19[%c0_560, %c127_561] : memref<64x1280xf32, #tpu.memory_space<vmem>>, vector<11x1024xf32>
    %c0_562 = arith.constant 0 : index
    %c33_563 = arith.constant 33 : index
    %611 = vector.load %arg16[%c0_562, %c33_563] : memref<8x190xf32, #tpu.memory_space<vmem>>, vector<8x11xf32>
    %cst_564 = arith.constant dense<0.000000e+00> : vector<8x1024xf32>
    %612 = tpu.matmul %611, %610, %cst_564 {dimension_numbers = #tpu.dot_dimension_numbers<[1], [0], [0], [1], [0, 0, 1, 1], [], []>} : vector<8x11xf32>, vector<11x1024xf32>, vector<8x1024xf32> -> vector<8x1024xf32>
    %613 = arith.addf %609, %612 : vector<8x1024xf32>
    %c0_565 = arith.constant 0 : index
    %c159 = arith.constant 159 : index
    %614 = vector.load %arg19[%c0_565, %c159] : memref<64x1280xf32, #tpu.memory_space<vmem>>, vector<11x1024xf32>
    %c0_566 = arith.constant 0 : index
    %c66_567 = arith.constant 66 : index
    %615 = vector.load %arg16[%c0_566, %c66_567] : memref<8x190xf32, #tpu.memory_space<vmem>>, vector<8x11xf32>
    %cst_568 = arith.constant dense<0.000000e+00> : vector<8x1024xf32>
    %616 = tpu.matmul %615, %614, %cst_568 {dimension_numbers = #tpu.dot_dimension_numbers<[1], [0], [0], [1], [0, 0, 1, 1], [], []>} : vector<8x11xf32>, vector<11x1024xf32>, vector<8x1024xf32> -> vector<8x1024xf32>
    %617 = arith.addf %613, %616 : vector<8x1024xf32>
    %618 = vector.broadcast %594 : vector<1x1024xf32> to vector<8x1024xf32>
    %619 = arith.mulf %617, %618 : vector<8x1024xf32>
    %c0_569 = arith.constant 0 : index
    %c96 = arith.constant 96 : index
    %620 = vector.load %arg19[%c0_569, %c96] : memref<64x1280xf32, #tpu.memory_space<vmem>>, vector<11x1024xf32>
    %c0_570 = arith.constant 0 : index
    %c11_571 = arith.constant 11 : index
    %621 = vector.load %arg16[%c0_570, %c11_571] : memref<8x190xf32, #tpu.memory_space<vmem>>, vector<8x11xf32>
    %cst_572 = arith.constant dense<0.000000e+00> : vector<8x1024xf32>
    %622 = tpu.matmul %621, %620, %cst_572 {dimension_numbers = #tpu.dot_dimension_numbers<[1], [0], [0], [1], [0, 0, 1, 1], [], []>} : vector<8x11xf32>, vector<11x1024xf32>, vector<8x1024xf32> -> vector<8x1024xf32>
    %c0_573 = arith.constant 0 : index
    %c128_574 = arith.constant 128 : index
    %623 = vector.load %arg19[%c0_573, %c128_574] : memref<64x1280xf32, #tpu.memory_space<vmem>>, vector<11x1024xf32>
    %c0_575 = arith.constant 0 : index
    %c44_576 = arith.constant 44 : index
    %624 = vector.load %arg16[%c0_575, %c44_576] : memref<8x190xf32, #tpu.memory_space<vmem>>, vector<8x11xf32>
    %cst_577 = arith.constant dense<0.000000e+00> : vector<8x1024xf32>
    %625 = tpu.matmul %624, %623, %cst_577 {dimension_numbers = #tpu.dot_dimension_numbers<[1], [0], [0], [1], [0, 0, 1, 1], [], []>} : vector<8x11xf32>, vector<11x1024xf32>, vector<8x1024xf32> -> vector<8x1024xf32>
    %626 = arith.addf %622, %625 : vector<8x1024xf32>
    %c0_578 = arith.constant 0 : index
    %c160 = arith.constant 160 : index
    %627 = vector.load %arg19[%c0_578, %c160] : memref<64x1280xf32, #tpu.memory_space<vmem>>, vector<11x1024xf32>
    %c0_579 = arith.constant 0 : index
    %c77_580 = arith.constant 77 : index
    %628 = vector.load %arg16[%c0_579, %c77_580] : memref<8x190xf32, #tpu.memory_space<vmem>>, vector<8x11xf32>
    %cst_581 = arith.constant dense<0.000000e+00> : vector<8x1024xf32>
    %629 = tpu.matmul %628, %627, %cst_581 {dimension_numbers = #tpu.dot_dimension_numbers<[1], [0], [0], [1], [0, 0, 1, 1], [], []>} : vector<8x11xf32>, vector<11x1024xf32>, vector<8x1024xf32> -> vector<8x1024xf32>
    %630 = arith.addf %626, %629 : vector<8x1024xf32>
    %631 = arith.addf %619, %630 : vector<8x1024xf32>
    %c0_582 = arith.constant 0 : index
    %c97 = arith.constant 97 : index
    %632 = vector.load %arg19[%c0_582, %c97] : memref<64x1280xf32, #tpu.memory_space<vmem>>, vector<11x1024xf32>
    %c0_583 = arith.constant 0 : index
    %c22_584 = arith.constant 22 : index
    %633 = vector.load %arg16[%c0_583, %c22_584] : memref<8x190xf32, #tpu.memory_space<vmem>>, vector<8x11xf32>
    %cst_585 = arith.constant dense<0.000000e+00> : vector<8x1024xf32>
    %634 = tpu.matmul %633, %632, %cst_585 {dimension_numbers = #tpu.dot_dimension_numbers<[1], [0], [0], [1], [0, 0, 1, 1], [], []>} : vector<8x11xf32>, vector<11x1024xf32>, vector<8x1024xf32> -> vector<8x1024xf32>
    %c0_586 = arith.constant 0 : index
    %c129_587 = arith.constant 129 : index
    %635 = vector.load %arg19[%c0_586, %c129_587] : memref<64x1280xf32, #tpu.memory_space<vmem>>, vector<11x1024xf32>
    %c0_588 = arith.constant 0 : index
    %c55_589 = arith.constant 55 : index
    %636 = vector.load %arg16[%c0_588, %c55_589] : memref<8x190xf32, #tpu.memory_space<vmem>>, vector<8x11xf32>
    %cst_590 = arith.constant dense<0.000000e+00> : vector<8x1024xf32>
    %637 = tpu.matmul %636, %635, %cst_590 {dimension_numbers = #tpu.dot_dimension_numbers<[1], [0], [0], [1], [0, 0, 1, 1], [], []>} : vector<8x11xf32>, vector<11x1024xf32>, vector<8x1024xf32> -> vector<8x1024xf32>
    %638 = arith.addf %634, %637 : vector<8x1024xf32>
    %c0_591 = arith.constant 0 : index
    %c161 = arith.constant 161 : index
    %639 = vector.load %arg19[%c0_591, %c161] : memref<64x1280xf32, #tpu.memory_space<vmem>>, vector<11x1024xf32>
    %c0_592 = arith.constant 0 : index
    %c88_593 = arith.constant 88 : index
    %640 = vector.load %arg16[%c0_592, %c88_593] : memref<8x190xf32, #tpu.memory_space<vmem>>, vector<8x11xf32>
    %cst_594 = arith.constant dense<0.000000e+00> : vector<8x1024xf32>
    %641 = tpu.matmul %640, %639, %cst_594 {dimension_numbers = #tpu.dot_dimension_numbers<[1], [0], [0], [1], [0, 0, 1, 1], [], []>} : vector<8x11xf32>, vector<11x1024xf32>, vector<8x1024xf32> -> vector<8x1024xf32>
    %642 = arith.addf %638, %641 : vector<8x1024xf32>
    %643 = vector.broadcast %598 : vector<1x1024xf32> to vector<8x1024xf32>
    %644 = arith.mulf %642, %643 : vector<8x1024xf32>
    %645 = arith.addf %631, %644 : vector<8x1024xf32>
    %c0_595 = arith.constant 0 : index
    %c99_596 = arith.constant 99 : index
    %646 = vector.load %arg16[%c0_595, %c99_596] : memref<8x190xf32, #tpu.memory_space<vmem>>, vector<8x1xf32>
    %647 = vector.broadcast %646 : vector<8x1xf32> to vector<8x1024xf32>
    %648 = arith.addf %645, %647 : vector<8x1024xf32>
    %c0_597 = arith.constant 0 : index
    %c128_598 = arith.constant 128 : index
    %649 = vector.load %arg19[%c0_597, %c128_598] : memref<64x1280xf32, #tpu.memory_space<vmem>>, vector<8x1024xf32>
    tpu.vector_store %arg19[%c0_597, %c128_598], %648 {strides = array<i32>} : memref<64x1280xf32, #tpu.memory_space<vmem>>, vector<8x1024xf32>,
    %c0_599 = arith.constant 0 : index
    %c95_600 = arith.constant 95 : index
    %650 = vector.load %arg19[%c0_599, %c95_600] : memref<64x1280xf32, #tpu.memory_space<vmem>>, vector<8x1024xf32>
    %c0_601 = arith.constant 0 : index
    %c100_602 = arith.constant 100 : index
    %651 = vector.load %arg16[%c0_601, %c100_602] : memref<8x190xf32, #tpu.memory_space<vmem>>, vector<8x8xf32>
    %cst_603 = arith.constant dense<0.000000e+00> : vector<8x1024xf32>
    %652 = tpu.matmul %651, %650, %cst_603 {dimension_numbers = #tpu.dot_dimension_numbers<[1], [0], [0], [1], [0, 0, 1, 1], [], []>} : vector<8x8xf32>, vector<8x1024xf32>, vector<8x1024xf32> -> vector<8x1024xf32>
    %c0_604 = arith.constant 0 : index
    %c127_605 = arith.constant 127 : index
    %653 = vector.load %arg19[%c0_604, %c127_605] : memref<64x1280xf32, #tpu.memory_space<vmem>>, vector<8x1024xf32>
    %c0_606 = arith.constant 0 : index
    %c124_607 = arith.constant 124 : index
    %654 = vector.load %arg16[%c0_606, %c124_607] : memref<8x190xf32, #tpu.memory_space<vmem>>, vector<8x8xf32>
    %cst_608 = arith.constant dense<0.000000e+00> : vector<8x1024xf32>
    %655 = tpu.matmul %654, %653, %cst_608 {dimension_numbers = #tpu.dot_dimension_numbers<[1], [0], [0], [1], [0, 0, 1, 1], [], []>} : vector<8x8xf32>, vector<8x1024xf32>, vector<8x1024xf32> -> vector<8x1024xf32>
    %656 = arith.addf %652, %655 : vector<8x1024xf32>
    %c0_609 = arith.constant 0 : index
    %c159_610 = arith.constant 159 : index
    %657 = vector.load %arg19[%c0_609, %c159_610] : memref<64x1280xf32, #tpu.memory_space<vmem>>, vector<8x1024xf32>
    %c0_611 = arith.constant 0 : index
    %c148_612 = arith.constant 148 : index
    %658 = vector.load %arg16[%c0_611, %c148_612] : memref<8x190xf32, #tpu.memory_space<vmem>>, vector<8x8xf32>
    %cst_613 = arith.constant dense<0.000000e+00> : vector<8x1024xf32>
    %659 = tpu.matmul %658, %657, %cst_613 {dimension_numbers = #tpu.dot_dimension_numbers<[1], [0], [0], [1], [0, 0, 1, 1], [], []>} : vector<8x8xf32>, vector<8x1024xf32>, vector<8x1024xf32> -> vector<8x1024xf32>
    %660 = arith.addf %656, %659 : vector<8x1024xf32>
    %661 = vector.broadcast %594 : vector<1x1024xf32> to vector<8x1024xf32>
    %662 = arith.mulf %660, %661 : vector<8x1024xf32>
    %c0_614 = arith.constant 0 : index
    %c96_615 = arith.constant 96 : index
    %663 = vector.load %arg19[%c0_614, %c96_615] : memref<64x1280xf32, #tpu.memory_space<vmem>>, vector<8x1024xf32>
    %c0_616 = arith.constant 0 : index
    %c108_617 = arith.constant 108 : index
    %664 = vector.load %arg16[%c0_616, %c108_617] : memref<8x190xf32, #tpu.memory_space<vmem>>, vector<8x8xf32>
    %cst_618 = arith.constant dense<0.000000e+00> : vector<8x1024xf32>
    %665 = tpu.matmul %664, %663, %cst_618 {dimension_numbers = #tpu.dot_dimension_numbers<[1], [0], [0], [1], [0, 0, 1, 1], [], []>} : vector<8x8xf32>, vector<8x1024xf32>, vector<8x1024xf32> -> vector<8x1024xf32>
    %c0_619 = arith.constant 0 : index
    %c128_620 = arith.constant 128 : index
    %666 = vector.load %arg19[%c0_619, %c128_620] : memref<64x1280xf32, #tpu.memory_space<vmem>>, vector<8x1024xf32>
    %c0_621 = arith.constant 0 : index
    %c132_622 = arith.constant 132 : index
    %667 = vector.load %arg16[%c0_621, %c132_622] : memref<8x190xf32, #tpu.memory_space<vmem>>, vector<8x8xf32>
    %cst_623 = arith.constant dense<0.000000e+00> : vector<8x1024xf32>
    %668 = tpu.matmul %667, %666, %cst_623 {dimension_numbers = #tpu.dot_dimension_numbers<[1], [0], [0], [1], [0, 0, 1, 1], [], []>} : vector<8x8xf32>, vector<8x1024xf32>, vector<8x1024xf32> -> vector<8x1024xf32>
    %669 = arith.addf %665, %668 : vector<8x1024xf32>
    %c0_624 = arith.constant 0 : index
    %c160_625 = arith.constant 160 : index
    %670 = vector.load %arg19[%c0_624, %c160_625] : memref<64x1280xf32, #tpu.memory_space<vmem>>, vector<8x1024xf32>
    %c0_626 = arith.constant 0 : index
    %c156_627 = arith.constant 156 : index
    %671 = vector.load %arg16[%c0_626, %c156_627] : memref<8x190xf32, #tpu.memory_space<vmem>>, vector<8x8xf32>
    %cst_628 = arith.constant dense<0.000000e+00> : vector<8x1024xf32>
    %672 = tpu.matmul %671, %670, %cst_628 {dimension_numbers = #tpu.dot_dimension_numbers<[1], [0], [0], [1], [0, 0, 1, 1], [], []>} : vector<8x8xf32>, vector<8x1024xf32>, vector<8x1024xf32> -> vector<8x1024xf32>
    %673 = arith.addf %669, %672 : vector<8x1024xf32>
    %674 = arith.addf %662, %673 : vector<8x1024xf32>
    %c0_629 = arith.constant 0 : index
    %c97_630 = arith.constant 97 : index
    %675 = vector.load %arg19[%c0_629, %c97_630] : memref<64x1280xf32, #tpu.memory_space<vmem>>, vector<8x1024xf32>
    %c0_631 = arith.constant 0 : index
    %c116_632 = arith.constant 116 : index
    %676 = vector.load %arg16[%c0_631, %c116_632] : memref<8x190xf32, #tpu.memory_space<vmem>>, vector<8x8xf32>
    %cst_633 = arith.constant dense<0.000000e+00> : vector<8x1024xf32>
    %677 = tpu.matmul %676, %675, %cst_633 {dimension_numbers = #tpu.dot_dimension_numbers<[1], [0], [0], [1], [0, 0, 1, 1], [], []>} : vector<8x8xf32>, vector<8x1024xf32>, vector<8x1024xf32> -> vector<8x1024xf32>
    %c0_634 = arith.constant 0 : index
    %c129_635 = arith.constant 129 : index
    %678 = vector.load %arg19[%c0_634, %c129_635] : memref<64x1280xf32, #tpu.memory_space<vmem>>, vector<8x1024xf32>
    %c0_636 = arith.constant 0 : index
    %c140_637 = arith.constant 140 : index
    %679 = vector.load %arg16[%c0_636, %c140_637] : memref<8x190xf32, #tpu.memory_space<vmem>>, vector<8x8xf32>
    %cst_638 = arith.constant dense<0.000000e+00> : vector<8x1024xf32>
    %680 = tpu.matmul %679, %678, %cst_638 {dimension_numbers = #tpu.dot_dimension_numbers<[1], [0], [0], [1], [0, 0, 1, 1], [], []>} : vector<8x8xf32>, vector<8x1024xf32>, vector<8x1024xf32> -> vector<8x1024xf32>
    %681 = arith.addf %677, %680 : vector<8x1024xf32>
    %c0_639 = arith.constant 0 : index
    %c161_640 = arith.constant 161 : index
    %682 = vector.load %arg19[%c0_639, %c161_640] : memref<64x1280xf32, #tpu.memory_space<vmem>>, vector<8x1024xf32>
    %c0_641 = arith.constant 0 : index
    %c164_642 = arith.constant 164 : index
    %683 = vector.load %arg16[%c0_641, %c164_642] : memref<8x190xf32, #tpu.memory_space<vmem>>, vector<8x8xf32>
    %cst_643 = arith.constant dense<0.000000e+00> : vector<8x1024xf32>
    %684 = tpu.matmul %683, %682, %cst_643 {dimension_numbers = #tpu.dot_dimension_numbers<[1], [0], [0], [1], [0, 0, 1, 1], [], []>} : vector<8x8xf32>, vector<8x1024xf32>, vector<8x1024xf32> -> vector<8x1024xf32>
    %685 = arith.addf %681, %684 : vector<8x1024xf32>
    %686 = vector.broadcast %598 : vector<1x1024xf32> to vector<8x1024xf32>
    %687 = arith.mulf %685, %686 : vector<8x1024xf32>
    %688 = arith.addf %674, %687 : vector<8x1024xf32>
    %c0_644 = arith.constant 0 : index
    %c172_645 = arith.constant 172 : index
    %689 = vector.load %arg16[%c0_644, %c172_645] : memref<8x190xf32, #tpu.memory_space<vmem>>, vector<8x1xf32>
    %690 = vector.broadcast %689 : vector<8x1xf32> to vector<8x1024xf32>
    %691 = arith.addf %688, %690 : vector<8x1024xf32>
    %cst_646 = arith.constant 0.000000e+00 : f32
    %692 = vector.broadcast %cst_646 : f32 to vector<8x1024xf32>
    %693 = arith.maximumf %691, %692 : vector<8x1024xf32>
    %c8_647 = arith.constant 8 : index
    %c128_648 = arith.constant 128 : index
    %694 = vector.load %arg19[%c8_647, %c128_648] : memref<64x1280xf32, #tpu.memory_space<vmem>>, vector<8x1024xf32>
    tpu.vector_store %arg19[%c8_647, %c128_648], %693 {strides = array<i32>} : memref<64x1280xf32, #tpu.memory_space<vmem>>, vector<8x1024xf32>,
    %c0_649 = arith.constant 0 : index
    %c173_650 = arith.constant 173 : index
    %695 = vector.load %arg16[%c0_649, %c173_650] : memref<8x190xf32, #tpu.memory_space<vmem>>, vector<3x16xf32>
    %c0_651 = arith.constant 0 : index
    %c189_652 = arith.constant 189 : index
    %696 = vector.load %arg16[%c0_651, %c189_652] : memref<8x190xf32, #tpu.memory_space<vmem>>, vector<3x1xf32>
    %c0_653 = arith.constant 0 : index
    %c128_654 = arith.constant 128 : index
    %697 = vector.load %arg19[%c0_653, %c128_654] : memref<64x1280xf32, #tpu.memory_space<vmem>>, vector<16x1024xf32>
    %cst_655 = arith.constant dense<0.000000e+00> : vector<3x1024xf32>
    %698 = tpu.matmul %695, %697, %cst_655 {dimension_numbers = #tpu.dot_dimension_numbers<[1], [0], [0], [1], [0, 0, 1, 1], [], []>} : vector<3x16xf32>, vector<16x1024xf32>, vector<3x1024xf32> -> vector<3x1024xf32>
    %699 = vector.broadcast %696 : vector<3x1xf32> to vector<3x1024xf32>
    %700 = arith.addf %698, %699 : vector<3x1024xf32>
    %701 = arith.addf %700, %587 : vector<3x1024xf32>
    %c0_656 = arith.constant 0 : index
    %c0_657 = arith.constant 0 : index
    %c512 = arith.constant 512 : index
    %702 = vector.load %arg18[%c0_656, %c0_657, %c512] : memref<1x3x1536xf32, #tpu.memory_space<vmem>>, vector<1x3x1024xf32>
    %703 = vector.shape_cast %702 : vector<1x3x1024xf32> to vector<3x1024xf32>
    %704 = vector.shape_cast %701 : vector<3x1024xf32> to vector<1x3x1024xf32>
    tpu.vector_store %arg18[%c0_656, %c0_657, %c512], %704 {strides = array<i32>} : memref<1x3x1536xf32, #tpu.memory_space<vmem>>, vector<1x3x1024xf32>,
    return
  }
  func.func @transform_0(%arg0: i32) -> (i32, i32, i32) {
    %c0_i32 = arith.constant 0 : i32
    %c0_i32_0 = arith.constant 0 : i32
    %c0_i32_1 = arith.constant 0 : i32
    return %arg0, %c0_i32, %c0_i32_0 : i32, i32, i32
  }
  func.func @transform_1(%arg0: i32) -> (i32, i32, i32) {
    %c0_i32 = arith.constant 0 : i32
    %c0_i32_0 = arith.constant 0 : i32
    %c0_i32_1 = arith.constant 0 : i32
    return %arg0, %c0_i32, %c0_i32_0 : i32, i32, i32
  }
  func.func @transform_2(%arg0: i32) -> (i32, i32) {
    %c0_i32 = arith.constant 0 : i32
    %c0_i32_0 = arith.constant 0 : i32
    %c0_i32_1 = arith.constant 0 : i32
    return %c0_i32, %c0_i32_0 : i32, i32
  }
  func.func @transform_3(%arg0: i32) -> (i32, i32, i32) {
    %c0_i32 = arith.constant 0 : i32
    %c0_i32_0 = arith.constant 0 : i32
    %c0_i32_1 = arith.constant 0 : i32
    return %arg0, %c0_i32, %c0_i32_0 : i32, i32, i32
  }
  func.func @transform_4(%arg0: i32) -> (i32, i32) {
    %c0_i32 = arith.constant 0 : i32
    %c0_i32_0 = arith.constant 0 : i32
    %c0_i32_1 = arith.constant 0 : i32
    return %c0_i32, %c0_i32_0 : i32, i32
  }
  func.func @transform_5(%arg0: i32) -> (i32, i32, i32) {
    %c0_i32 = arith.constant 0 : i32
    %c0_i32_0 = arith.constant 0 : i32
    %c0_i32_1 = arith.constant 0 : i32
    return %arg0, %c0_i32, %c0_i32_0 : i32, i32, i32
  }
  func.func @transform_6(%arg0: i32) -> (i32, i32) {
    %c0_i32 = arith.constant 0 : i32
    %c0_i32_0 = arith.constant 0 : i32
    %c0_i32_1 = arith.constant 0 : i32
    return %c0_i32, %c0_i32_0 : i32, i32
  }
  func.func @transform_7(%arg0: i32) -> (i32, i32) {
    %c0_i32 = arith.constant 0 : i32
    %c0_i32_0 = arith.constant 0 : i32
    %c0_i32_1 = arith.constant 0 : i32
    return %c0_i32, %c0_i32_0 : i32, i32
  }
  func.func @transform_8(%arg0: i32) -> (i32, i32, i32) {
    %c0_i32 = arith.constant 0 : i32
    %c0_i32_0 = arith.constant 0 : i32
    %c0_i32_1 = arith.constant 0 : i32
    return %arg0, %c0_i32, %c0_i32_0 : i32, i32, i32
  }
  func.func @transform_9(%arg0: i32) -> (i32, i32) {
    %c0_i32 = arith.constant 0 : i32
    %c0_i32_0 = arith.constant 0 : i32
    %c0_i32_1 = arith.constant 0 : i32
    return %c0_i32, %c0_i32_0 : i32, i32
  }
  func.func @transform_10(%arg0: i32) -> (i32, i32) {
    %c0_i32 = arith.constant 0 : i32
    %c0_i32_0 = arith.constant 0 : i32
    %c0_i32_1 = arith.constant 0 : i32
    return %c0_i32, %c0_i32_0 : i32, i32
  }
  func.func @transform_11(%arg0: i32) -> (i32, i32, i32) {
    %c0_i32 = arith.constant 0 : i32
    %c0_i32_0 = arith.constant 0 : i32
    %c0_i32_1 = arith.constant 0 : i32
    return %arg0, %c0_i32, %c0_i32_0 : i32, i32, i32
  }
  func.func @transform_12(%arg0: i32) -> (i32, i32) {
    %c0_i32 = arith.constant 0 : i32
    %c0_i32_0 = arith.constant 0 : i32
    %c0_i32_1 = arith.constant 0 : i32
    return %c0_i32, %c0_i32_0 : i32, i32
  }
  func.func @transform_13(%arg0: i32) -> (i32, i32) {
    %c0_i32 = arith.constant 0 : i32
    %c0_i32_0 = arith.constant 0 : i32
    %c0_i32_1 = arith.constant 0 : i32
    return %c0_i32, %c0_i32_0 : i32, i32
  }
  func.func @transform_14(%arg0: i32) -> (i32, i32, i32) {
    %c0_i32 = arith.constant 0 : i32
    %c0_i32_0 = arith.constant 0 : i32
    %c0_i32_1 = arith.constant 0 : i32
    return %arg0, %c0_i32, %c0_i32_0 : i32, i32, i32
  }
  func.func @transform_15(%arg0: i32) -> (i32, i32) {
    %c0_i32 = arith.constant 0 : i32
    %c0_i32_0 = arith.constant 0 : i32
    %c0_i32_1 = arith.constant 0 : i32
    return %c0_i32, %c0_i32_0 : i32, i32
  }
  func.func @transform_16(%arg0: i32) -> (i32, i32) {
    %c0_i32 = arith.constant 0 : i32
    %c0_i32_0 = arith.constant 0 : i32
    %c0_i32_1 = arith.constant 0 : i32
    return %c0_i32, %c0_i32_0 : i32, i32
  }
  func.func @transform_17(%arg0: i32) -> (i32, i32, i32) {
    %c0_i32 = arith.constant 0 : i32
    %c0_i32_0 = arith.constant 0 : i32
    %c0_i32_1 = arith.constant 0 : i32
    return %arg0, %c0_i32, %c0_i32_0 : i32, i32, i32
  }
}

</mosaic_0001>

<bundles_post_ra>
// kernel: motion_decoder_forward.1
= control target key start
LH: loop header
LB: loop body
LE: loop exit
PB: predicated region body
PF: predicated region fallthrough
CT: control target
= control target key end

     0   :  { %s21680_s24 = smov 0   ;;  %s26165_s0 = inlined_call_operand.vmem [shape: f32[2,3,1], index: 0, kind: input, shape index: {}]   ;;  %s26166_s1 = inlined_call_operand.vmem [shape: f32[2,32,1], index: 1, kind: input, shape index: {}]   ;;  %s26167_s2 = inlined_call_operand.vmem [shape: f32[32,670], index: 2, kind: input, shape index: {}]   ;;  %s26168_s3 = inlined_call_operand.vmem [shape: f32[2,16,4], index: 3, kind: input, shape index: {}]   ;;  %s26169_s4 = inlined_call_operand.vmem [shape: f32[16,350], index: 4, kind: input, shape index: {}]   ;;  %s26170_s5 = inlined_call_operand.vmem [shape: f32[2,16,16], index: 5, kind: input, shape index: {}]   ;;  %s26171_s6 = inlined_call_operand.vmem [shape: f32[16,350], index: 6, kind: input, shape index: {}]   ;;  %s26172_s7 = inlined_call_operand.vmem [shape: f32[4,16], index: 7, kind: input, shape index: {}]   ;;  %s26173_s8 = inlined_call_operand.vmem [shape: f32[2,8,64], index: 8, kind: input, shape index: {}]   ;;  %s26174_s9 = inlined_call_operand.vmem [shape: f32[8,190], index: 9, kind: input, shape index: {}]   ;;  %s26175_s10 = inlined_call_operand.vmem [shape: f32[16,64], index: 10, kind: input, shape index: {}]   ;;  %s26176_s11 = inlined_call_operand.vmem [shape: f32[2,8,256], index: 11, kind: input, shape index: {}]   ;;  %s26177_s12 = inlined_call_operand.vmem [shape: f32[8,190], index: 12, kind: input, shape index: {}]   ;;  %s26178_s13 = inlined_call_operand.vmem [shape: f32[64,256], index: 13, kind: input, shape index: {}]   ;;  %s26179_s14 = inlined_call_operand.vmem [shape: f32[2,8,1024], index: 14, kind: input, shape index: {}]   ;;  %s26180_s15 = inlined_call_operand.vmem [shape: f32[8,190], index: 15, kind: input, shape index: {}]   ;;  %s26181_s16 = inlined_call_operand.vmem [shape: f32[256,1024], index: 16, kind: input, shape index: {}]   ;;  %s26182_s17 = inlined_call_operand.vmem [shape: f32[2,3,1536], index: 17, kind: output, shape index: {}]  }
   0x1   :  { %26294 = sst [smem:[#allocation21_spill]] %s26165_s0 }
   0x2   :  { %26295 = sst [smem:[#allocation22_spill]] %s26166_s1 }
   0x3   :  { %26296 = sst [smem:[#allocation23_spill]] %s26167_s2 }
   0x4   :  { %26297 = sst [smem:[#allocation24_spill]] %s26168_s3 }
   0x5   :  { %26298 = sst [smem:[#allocation25_spill]] %s26169_s4 }
   0x6   :  { %26299 = sst [smem:[#allocation26_spill]] %s26170_s5 }
   0x7   :  { %26300 = sst [smem:[#allocation27_spill]] %s26171_s6 }
   0x8   :  { %26301 = sst [smem:[#allocation28_spill]] %s26172_s7 }
   0x9   :  { %26302 = sst [smem:[#allocation29_spill]] %s26173_s8 }
   0xa   :  { %26303 = sst [smem:[#allocation30_spill]] %s26174_s9 }
   0xb   :  { %26304 = sst [smem:[#allocation31_spill]] %s26175_s10 }
   0xc   :  { %26305 = sst [smem:[#allocation32_spill]] %s26176_s11 }
   0xd   :  { %26306 = sst [smem:[#allocation33_spill]] %s26177_s12 }
   0xe   :  { %26307 = sst [smem:[#allocation34_spill]] %s26178_s13 }
   0xf   :  { %26308 = sst [smem:[#allocation35_spill]] %s26179_s14 }
  0x10   :  { %26309 = sst [smem:[#allocation36_spill]] %s26180_s15 }
  0x11   :  { %26310 = sst [smem:[#allocation37_spill]] %s26182_s17 }
  0x12 LB: > { %26311 = sst [smem:[#allocation3_spill]] %s21516_s24  ;;  %s17859_s25 = sadd.s32 4294967295, %s21516_s24   ;;  %s21516_s24 = sphi %s21680_s24, %s27_s24  }
  0x13   : > { %p17863_p0 = scmp.ge.s32.totalorder %s21516_s24, 1  ;;  %p545_p1 = scmp.lt.s32.totalorder %s21516_s24, 3 }
  0x15   : > { %p546_p2 = pnand %p17863_p0, %p545_p1 }
  0x17   : > { %549 = sbr.rel (%p546_p2) target bundleno = 7276 (0x1c6c), region = 88 }
  0x1e   : > { %s26312_s2 = sld [smem:[#allocation23_spill]]  ;;  %s21518_s0 = smov 23   ;;  %v21519_v2 = vmov 0.0   ;;  %vm669_vm0 = vcmask 1047560   ;;  %vm671_vm1 = vcmask 7168   ;;  %vm679_vm2 = vcmask 1042440  }
  0x1f   : > { %668 = vst [vmem:[#allocation2 + $0x140] sm:$0x7] %v21519_v2  ;;  %666 = vst [vmem:[#allocation2 + $0xa0] sm:$0xff] %v21519_v2  ;;  %p625_p3 = scmp.lt.s32.totalorder %s17859_s25, 1  ;;  %vm681_vm3 = vcmask 2048   ;;  %s26215_s30 = smov 1  }
  0x20   : > { %667 = vst [vmem:[#allocation2 + $0xf0] sm:$0xff] %v21519_v2  ;;  %8600 = vst [vmem:[#allocation2 + $0x68] sm:$0x7] %v21519_v2  ;;  %s26313_s21 = sld [smem:[#allocation22_spill]]  ;;  %s26314_s27 = sld [smem:[#allocation21_spill]]  ;;  %vm762_vm4 = vcmask 1042432  }
  0x21   : > { %11009 = vst [vmem:[#allocation2 + $0x98] sm:$0x7] %v21519_v2  ;;  %4922 = vst [vmem:[#allocation2 + $0x50] sm:$0xff] %v21519_v2  ;;  %s26455_s25 = smov (!%p625_p3, %s17859_s25), 1  ;;  %s26199_s1 = smov 127   ;;  %vm729_vm5 = vcmask 187392  }
  0x22   : > { %670 = vst.msk [vmem:[#allocation2 + $0x8] sm:$0xff] %vm669_vm0, %v21519_v2  ;;  %673 = vst.msk [vmem:[#allocation2 + $0x58] sm:$0xff] %vm669_vm0, %v21519_v2  ;;  %s18296_s18 = sshll.u32 %s26455_s25, 5  ;;  %s17864_s19 = sshll.u32 %s26455_s25, 2  ;;  %vm753_vm6 = vcmask 285696   ;;  %vm1310_vm7 = vcmask 89088  }
  0x23   : > { %672 = vst.msk [vmem:[#allocation2 + $0x10] sm:$0xff] %vm671_vm1, %v21519_v2  ;;  %674 = vst.msk [vmem:[#allocation2 + $0x60] sm:$0xff] %vm671_vm1, %v21519_v2  ;;  %s21523_s20 = smov 46   ;;  %s21527_s23 = smov 93   ;;  %vm26264_vm8 = vcmask 261120   ;;  %vm2074_vm9 = vcmask 31744  }
  0x24   : > { %v21691_v0 = vld [vmem:[%s26312_s2 + $0x8] sm:$0xff]  ;;  %v21696_v1 = vld [vmem:[%s26312_s2] sm:$0xff]  ;;  %675 = vst.msk [vmem:[#allocation2 + $0xa8] sm:$0xff] %vm669_vm0, %v21519_v2  ;;  %677 = vst.msk [vmem:[#allocation2 + $0xf8] sm:$0xff] %vm669_vm0, %v21519_v2  ;;  %s21528_s26 = smov 58   ;;  %s21529_s29 = smov 11  }
  0x25   : > { %715 = vrot.lane.b32.xlu1 %v21691_v0, %s21518_s0  ;;  %713 = vrot.lane.b32.xlu0 %v21696_v1, %s21518_s0  ;;  %2988 = vst [vmem:[#allocation2 + $0xa0] sm:$0x7] %v21519_v2  ;;  %6898 = vst [vmem:[#allocation2 + $0x50] sm:$0x7] %v21519_v2  ;;  %v21743_v8 = vld [vmem:[%s26312_s2 + $0x30] sm:$0xff]  ;;  %v21758_v10 = vld [vmem:[%s26312_s2 + $0x38] sm:$0xff] }
  0x26   : > { %680 = vst.msk [vmem:[#allocation2 + $0x148] sm:$0x7] %vm679_vm2, %v21519_v2  ;;  %s633_s22 = scalar_lea.vmem %s26313_s21, %s18296_s18  ;;  %s628_s28 = scalar_lea.vmem %s26314_s27, %s17864_s19  ;;  %v696_v3 = vld [vmem:[#allocation2 + $0x140] sm:$0x7]  ;;  %v703_v17 = vld [vmem:[%s26312_s2 + $0x68] sm:$0xff]  ;;  %v21784_v19 = vld [vmem:[%s26312_s2 + $0x90] sm:$0xff] }
  0x27   : > { %v683_v4 = vld [vmem:[%s633_s22] sm:$0xff]  ;;  %v684_v5 = vld [vmem:[%s633_s22 + $0x8] sm:$0xff]  ;;  %v685_v6 = vld [vmem:[%s633_s22 + $0x10] sm:$0xff]  ;;  %s21521_s19 = smov 2   ;;  %s21525_s21 = smov 81   ;;  %2991 = vst.msk [vmem:[#allocation2 + $0x10] sm:$0xff] %vm2074_vm9, %v21519_v2 }
  0x28   : > { %687 = vst.msk [vmem:[#allocation2 + $0x8] sm:$0xff] %vm671_vm1, %v683_v4  ;;  %688 = vst.msk [vmem:[#allocation2 + $0x58] sm:$0xff] %vm671_vm1, %v684_v5  ;;  %v686_v7 = vld [vmem:[%s633_s22 + $0x18] sm:$0xff]  ;;  %v21747_v9 = vld [vmem:[%s628_s28] sm:$0x7]  ;;  %s26219_s22 = smov 126  }
  0x29   : > { %20644 = vrot.lane.b32.xlu0 %v21519_v2, %s26215_s30  ;;  %747 = vrot.lane.b32.xlu1 %v696_v3, %s26215_s30  ;;  %689 = vst.msk [vmem:[#allocation2 + $0xa8] sm:$0xff] %vm671_vm1, %v685_v6  ;;  %690 = vst.msk [vmem:[#allocation2 + $0xf8] sm:$0xff] %vm671_vm1, %v686_v7  ;;  %v21769_v16 = vld [vmem:[%s26312_s2 + $0x60] sm:$0xff]  ;;  %v704_v20 = vld [vmem:[%s26312_s2 + $0x98] sm:$0xff]  ;;  %s21531_s18 = smov 69   ;;  %s26183_s27 = smov 100  }
  0x2a   : > { %691 = vst.msk [vmem:[#allocation2 + $0x148] sm:$0x7] %vm681_vm3, %v21747_v9  ;;  %v21828_v24 = vld [vmem:[%s26312_s2 + $0x10] sm:$0xff]  ;;  %v21838_v25 = vld [vmem:[%s26312_s2 + $0x40] sm:$0xff]  ;;  %v21874_v31 = vld [vmem:[%s26312_s2 + $0x18] sm:$0xff]  ;;  %s22192_s28 = sshll.u32 %s26455_s25, 4 }
  0x2b   : > { %v21848_v26 = vld [vmem:[%s26312_s2 + $0x70] sm:$0xff]  ;;  %v21854_v27 = vld [vmem:[%s26312_s2 + $0xa0] sm:$0xff]  ;;  %v21881_v33 = vld [vmem:[%s26312_s2 + $0x48] sm:$0xff]  ;;  %2993 = vst.msk [vmem:[#allocation2 + $0x60] sm:$0xff] %vm2074_vm9, %v21519_v2  ;;  %vm2989_vm10 = vcmask 1047584   ;;  %s26315_s3 = sld [smem:[#allocation24_spill]] }
  0x2c   : > { %v21894_v39 = vld [vmem:[%s26312_s2 + $0x78] sm:$0xff]  ;;  %v21908_v43 = vld [vmem:[%s26312_s2 + $0xa8] sm:$0xff]  ;;  %v21933_v58 = vld [vmem:[%s26312_s2 + $0x20] sm:$0xff]  ;;  %vm21538_vm11 = vmmov 0   ;;  %vm26293_vm12 = vcmask 130048   ;;  %vm2898_vm13 = vcmask 523264  }
  0x2d   : > { %20649 = vrot.lane.b32.xlu0 %v21519_v2, %s26215_s30  ;;  %20654 = vrot.lane.b32.xlu1 %v21519_v2, %s21521_s19  ;;  %v21946_v62 = vld [vmem:[%s26312_s2 + $0x50] sm:$0xff]  ;;  %s26316_s4 = sld [smem:[#allocation25_spill]]  ;;  %vm2994_vm14 = vcmask 1042464   ;;  %vm2996_vm15 = vcmask 26624   ;;  %vm3040_vm0 = vcmask 154624   ;;  %vm3434_vm2 = vcmask 15360  }
  0x2e   : > { %v21975_v7 = vld [vmem:[%s26312_s2 + $0xb0] sm:$0xff]  ;;  %vm3134_vm3 = vcmask 23552   ;;  %s26325_s5 = sld [smem:[#allocation26_spill]]  ;;  %s26330_s7 = sld [smem:[#allocation28_spill]] }
  0x2f   : > { %v959_v11 = vld [vmem:[#allocation2 + $0x8] sm:$0xff]  ;;  %v960_v12 = vld [vmem:[#allocation2 + $0x58] sm:$0xff]  ;;  %s26332_s6 = sld [smem:[#allocation27_spill]]  ;;  %s26333_s15 = smov 71  }
  0x30   : > { %v21764_v13 = vpack.c.bf16 %v960_v12, %v959_v11  ;;  %v961_v14 = vld [vmem:[#allocation2 + $0xa8] sm:$0xff]  ;;  %v962_v15 = vld [vmem:[#allocation2 + $0xf8] sm:$0xff]  ;;  %v20663_v21 = vpack.i.bf16 %v960_v12, %v959_v11  ;;  %s26231_s24 = smov 124   ;;  %s26341_s8 = sld [smem:[#allocation29_spill]] }
  0x31   : > { %717 = vrot.lane.b32.xlu0 %v21743_v8, %s21518_s0  ;;  %719 = vrot.lane.b32.xlu1 %v21758_v10, %s21518_s0  ;;  %v21774_v18 = vpack.c.bf16 %v962_v15, %v961_v14  ;;  %v21794_v22 = vld [vmem:[#allocation2 + $0x148] sm:$0x7]  ;;  %v20668_v23 = vpack.i.bf16 %v962_v15, %v961_v14  ;;  %s26343_s10 = sld [smem:[#allocation31_spill]]  ;;  %s26344_s17 = sld [smem:[#allocation37_spill]] }
  0x32   : > { %19439 = vmatprep.subr.bf16.mxu1 %v21764_v13  ;;  %s26345_s9 = sld [smem:[#allocation30_spill]]  ;;  %s26350_s13 = sld [smem:[#allocation34_spill]] }
  0x33   : > { %19441 = vmatpush3.bf16.msra.mxu1 %v21764_v13  ;;  %s26351_s12 = sld [smem:[#allocation33_spill]]  ;;  %s26352_s11 = sld [smem:[#allocation32_spill]] }
  0x34   : > { %19443 = vmatprep.subr.bf16.mxu1 %v21774_v18  ;;  %s26363_s14 = sld [smem:[#allocation35_spill]] }
  0x35   : > { %20659 = vrot.lane.b32.xlu0 %v21519_v2, %s21521_s19  ;;  %721 = vrot.lane.b32.xlu1 %v21769_v16, %s21518_s0 }
  0x37   : > { %19445 = vmatpush3.bf16.msra.mxu1 %v21774_v18 }
  0x38   : > { %18744 = vmatprep.subr.msk.mxu1 %vm762_vm4, %v21794_v22 }
  0x39   : > { %723 = vrot.lane.b32.xlu0 %v703_v17, %s21518_s0  ;;  %725 = vrot.lane.b32.xlu1 %v21784_v19, %s21518_s0 }
  0x3b   : > { %18745 = vmatpush3.msk.msra.mxu1 %vm762_vm4, %v21794_v22 }
  0x3d   : > { %727 = vrot.lane.b32.xlu0 %v704_v20, %s21518_s0  ;;  %858 = vrot.lane.b32.xlu1 %v696_v3, %s21521_s19  ;;  %s26189_s0 = smov 116  }
  0x41   : > { %20664 = vrot.lane.b32.xlu0 %v20663_v21, %s26199_s1  ;;  %964 = vrot.lane.b32.xlu1 %v21691_v0, %s21523_s20 }
  0x45   : > { %966 = vrot.lane.b32.xlu0 %v21758_v10, %s21523_s20  ;;  %20669 = vrot.lane.b32.xlu1 %v20668_v23, %s26199_s1 }
  0x49   : > { %968 = vrot.lane.b32.xlu0 %v703_v17, %s21523_s20  ;;  %970 = vrot.lane.b32.xlu1 %v704_v20, %s21523_s20  ;;  %s26213_s20 = smov 3  }
  0x4d   : > { %1327 = vrot.lane.b32.xlu0 %v21794_v22, %s26199_s1  ;;  %1076 = vrot.lane.b32.xlu1 %v21691_v0, %s26189_s0 }
  0x51   : > { %1436 = vrot.lane.b32.xlu0 %v21691_v0, %s21525_s21  ;;  %1078 = vrot.lane.b32.xlu1 %v21758_v10, %s26189_s0 }
  0x55   : > { %1438 = vrot.lane.b32.xlu0 %v21758_v10, %s21525_s21  ;;  %1080 = vrot.lane.b32.xlu1 %v703_v17, %s26189_s0 }
  0x59   : > { %1440 = vrot.lane.b32.xlu0 %v703_v17, %s21525_s21  ;;  %1082 = vrot.lane.b32.xlu1 %v704_v20, %s26189_s0  ;;  %s26193_s0 = smov 52  }
  0x5d   : > { %1442 = vrot.lane.b32.xlu0 %v704_v20, %s21525_s21  ;;  %20674 = vrot.lane.b32.xlu1 %v20663_v21, %s26219_s22  ;;  %s26197_s21 = smov 104  }
  0x61   : > { %1177 = vrot.lane.b32.xlu0 %v21696_v1, %s21527_s23  ;;  %1537 = vrot.lane.b32.xlu1 %v21696_v1, %s21528_s26 }
  0x65   : > { %1179 = vrot.lane.b32.xlu0 %v21743_v8, %s21527_s23  ;;  %1539 = vrot.lane.b32.xlu1 %v21743_v8, %s21528_s26 }
  0x69   : > { %20679 = vrot.lane.b32.xlu0 %v20668_v23, %s26219_s22  ;;  %1181 = vrot.lane.b32.xlu1 %v21769_v16, %s21527_s23 }
  0x6d   : > { %1541 = vrot.lane.b32.xlu0 %v21769_v16, %s21528_s26  ;;  %1183 = vrot.lane.b32.xlu1 %v21784_v19, %s21527_s23  ;;  %s26185_s23 = smov 68  }
  0x71   : > { %1543 = vrot.lane.b32.xlu0 %v21784_v19, %s21528_s26  ;;  %1294 = vrot.lane.b32.xlu1 %v21691_v0, %s21529_s29  ;;  %s26191_s26 = smov 36  }
  0x75   : > { %1296 = vrot.lane.b32.xlu0 %v21828_v24, %s21529_s29  ;;  %1654 = vrot.lane.b32.xlu1 %v21794_v22, %s26219_s22 }
  0x79   : > { %1298 = vrot.lane.b32.xlu0 %v21758_v10, %s21529_s29  ;;  %1300 = vrot.lane.b32.xlu1 %v21838_v25, %s21529_s29 }
  0x7d   : > { %1638 = vrot.lane.b32.xlu0 %v21828_v24, %s26197_s21  ;;  %1640 = vrot.lane.b32.xlu1 %v21838_v25, %s26197_s21 }
  0x81   : > { %1302 = vrot.lane.b32.xlu0 %v703_v17, %s21529_s29  ;;  %1304 = vrot.lane.b32.xlu1 %v21848_v26, %s21529_s29 }
  0x85   : > { %1306 = vrot.lane.b32.xlu0 %v704_v20, %s21529_s29  ;;  %1308 = vrot.lane.b32.xlu1 %v21854_v27, %s21529_s29  ;;  %s26209_s29 = smov 71  }
  0x89   : > { %1642 = vrot.lane.b32.xlu0 %v21848_v26, %s26197_s21  ;;  %1644 = vrot.lane.b32.xlu1 %v21854_v27, %s26197_s21  ;;  %s26217_s21 = smov 125  }
  0x8d   : > { %1767 = vrot.lane.b32.xlu0 %v21828_v24, %s21531_s18  ;;  %1769 = vrot.lane.b32.xlu1 %v21838_v25, %s21531_s18 }
  0x91   : > { %1771 = vrot.lane.b32.xlu0 %v21848_v26, %s21531_s18  ;;  %1773 = vrot.lane.b32.xlu1 %v21854_v27, %s21531_s18  ;;  %s26187_s18 = smov 4  }
  0x95   : > { %20684 = vrot.lane.b32.xlu0 %v21519_v2, %s26215_s30  ;;  %20689 = vrot.lane.b32.xlu1 %v21519_v2, %s26215_s30 }
  0x97   : > { %v716_v28 = vpop.permute.xlu1 %715  ;;  %v714_v29 = vpop.permute.xlu0 %713 }
  0x98   : > { %v730_v30 = vsel %vm729_vm5, %v714_v29, %v716_v28 }
  0x99   : > { %18698 = vmatprep.mubr.msk.f32.mxu0 %vm753_vm6, %v730_v30  ;;  %20694 = vrot.lane.b32.xlu0 %v21519_v2, %s21521_s19 }
  0x9a   : > { %1803 = vrot.lane.b32.xlu1 %v21874_v31, %s26183_s27 }
  0x9b   : > { %v20645_v32 = vpop.permute.xlu0 %20644  ;;  %v21889_v37 = vpop.permute.xlu1 %747 }
  0x9c   : > { %v20647_v34 = vunpack.i.h.bf16 %v20645_v32  ;;  %v20646_v35 = vunpack.i.l.bf16 %v20645_v32 }
  0x9d   : > { %1805 = vrot.lane.b32.xlu0 %v21881_v33, %s26183_s27 }
  0x9e   : > { %v21885_v36 = vpack.c.bf16 %v20647_v34, %v20646_v35  ;;  %20699 = vrot.lane.b32.xlu1 %v21519_v2, %s21521_s19 }
  0x9f   : > { %v20650_v38 = vpop.permute.xlu0 %20649  ;;  %v20655_v44 = vpop.permute.xlu1 %20654 }
  0xa0   : > { %v20652_v40 = vunpack.i.h.bf16 %v20650_v38  ;;  %v20651_v41 = vunpack.i.l.bf16 %v20650_v38  ;;  %19415 = vmatprep.subr.bf16.mxu0 %v21885_v36  ;;  %19447 = vmatprep.subr.bf16.mxu1 %v21885_v36  ;;  %v20657_v46 = vunpack.i.h.bf16 %v20655_v44  ;;  %v20656_v47 = vunpack.i.l.bf16 %v20655_v44 }
  0xa1   : > { %19417 = vmatpush3.bf16.msra.mxu0 %v21885_v36  ;;  %1807 = vrot.lane.b32.xlu0 %v21894_v39, %s26183_s27 }
  0xa2   : > { %v21901_v42 = vpack.c.bf16 %v20652_v40, %v20651_v41  ;;  %1809 = vrot.lane.b32.xlu1 %v21908_v43, %s26183_s27  ;;  %v19422_v53 = vpack.c.bf16 %v20657_v46, %v20656_v47 }
  0xa3   : > { %v718_v45 = vpop.permute.xlu0 %717  ;;  %v720_v48 = vpop.permute.xlu1 %719 }
  0xa4   : > { %19419 = vmatprep.subr.bf16.mxu0 %v21901_v42  ;;  %v731_v50 = vsel %vm729_vm5, %v718_v45, %v720_v48 }
  0xa5   : > { %19421 = vmatpush3.bf16.msra.mxu0 %v21901_v42  ;;  %1925 = vrot.lane.b32.xlu0 %v21828_v24, %s26185_s23 }
  0xa6   : > { %18696 = vmatprep.subr.msk.mxu0 %vm762_vm4, %v21889_v37  ;;  %1927 = vrot.lane.b32.xlu1 %v21838_v25, %s26185_s23 }
  0xa7   : > { %v20660_v49 = vpop.permute.xlu0 %20659  ;;  %v722_v55 = vpop.permute.xlu1 %721 }
  0xa8   : > { %v20662_v51 = vunpack.i.h.bf16 %v20660_v49  ;;  %v20661_v52 = vunpack.i.l.bf16 %v20660_v49 }
  0xa9   : > { %18697 = vmatpush3.msk.msra.mxu0 %vm762_vm4, %v21889_v37  ;;  %1929 = vrot.lane.b32.xlu0 %v21848_v26, %s26185_s23 }
  0xaa   : > { %18699 = vmatmul.mubr.msk.f32.vlgmr.msra.gmra.mrb[0].mxu0 %vm753_vm6, %v731_v50  ;;  %19423 = vmatprep.subr.bf16.mxu0 %v19422_v53  ;;  %v19426_v54 = vpack.c.bf16 %v20662_v51, %v20661_v52 }
  0xab   : > { %v724_v56 = vpop.permute.xlu0 %723  ;;  %19425 = vmatpush3.bf16.msra.mxu0 %v19422_v53  ;;  %1931 = vrot.lane.b32.xlu1 %v21854_v27, %s26185_s23  ;;  %v726_v59 = vpop.permute.xlu1 %725 }
  0xac   : > { %v732_v57 = vsel %vm729_vm5, %v722_v55, %v724_v56  ;;  %19427 = vmatprep.subr.bf16.mxu0 %v19426_v54 }
  0xad   : > { %18701 = vmatprep.mubr.msk.f32.mxu0 %vm753_vm6, %v732_v57  ;;  %2058 = vrot.lane.b32.xlu0 %v21874_v31, %s26187_s18 }
  0xaf   : > { %v728_v60 = vpop.permute.xlu0 %727  ;;  %19429 = vmatpush3.bf16.msra.mxu0 %v19426_v54  ;;  %2060 = vrot.lane.b32.xlu1 %v21933_v58, %s26187_s18  ;;  %v859_v63 = vpop.permute.xlu1 %858 }
  0xb0   : > { %v733_v61 = vsel %vm729_vm5, %v726_v59, %v728_v60  ;;  %18712 = vmatprep.subr.msk.mxu0 %vm762_vm4, %v859_v63  ;;  %vm3237_vm5 = vcmask 113664  }
  0xb1   : > { %18702 = vmatmul.mubr.msk.f32.gmra.mrb[2].mxu0 %vm753_vm6, %v733_v61  ;;  %2062 = vrot.lane.b32.xlu0 %v21881_v33, %s26187_s18 }
  0xb2   : > { %18714 = vmatprep.mubr.msk.f32.mxu0 %vm753_vm6, %v21696_v1  ;;  %v21960_v1 = vld [vmem:[%s26312_s2 + $0x80] sm:$0xff] }
  0xb3   : > { %v20665_v0 = vpop.permute.xlu0 %20664  ;;  %18713 = vmatpush3.msk.msra.mxu0 %vm762_vm4, %v859_v63  ;;  %2064 = vrot.lane.b32.xlu1 %v21946_v62, %s26187_s18  ;;  %v965_v3 = vpop.permute.xlu1 %964 }
  0xb4   : > { %19431 = vmatprep.subr.bf16.mxu0 %v21764_v13  ;;  %v20667_v5 = vunpack.i.h.bf16 %v20665_v0  ;;  %v20666_v6 = vunpack.i.l.bf16 %v20665_v0 }
  0xb5   : > { %18715 = vmatmul.mubr.msk.f32.vlgmr.msra.gmra.mrb[0].mxu0 %vm753_vm6, %v21743_v8  ;;  %2066 = vrot.lane.b32.xlu0 %v21894_v39, %s26187_s18 }
  0xb6   : > { %19433 = vmatpush3.bf16.msra.mxu0 %v21764_v13  ;;  %18717 = vmatprep.mubr.msk.f32.mxu0 %vm753_vm6, %v21769_v16  ;;  %v19454_v14 = vpack.c.bf16 %v20667_v5, %v20666_v6 }
  0xb7   : > { %v967_v4 = vpop.permute.xlu0 %966  ;;  %19435 = vmatprep.subr.bf16.mxu0 %v21774_v18  ;;  %2068 = vrot.lane.b32.xlu1 %v21960_v1, %s26187_s18  ;;  %v20670_v8 = vpop.permute.xlu1 %20669 }
  0xb8   : > { %v20672_v11 = vunpack.i.h.bf16 %v20670_v8  ;;  %v20671_v12 = vunpack.i.l.bf16 %v20670_v8 }
  0xb9   : > { %18718 = vmatmul.mubr.msk.f32.gmra.mrb[2].mxu0 %vm753_vm6, %v21784_v19  ;;  %2070 = vrot.lane.b32.xlu0 %v21908_v43, %s26187_s18 }
  0xba   : > { %19437 = vmatpush3.bf16.msra.mxu0 %v21774_v18  ;;  %18730 = vmatprep.mubr.msk.f32.mxu0 %vm753_vm6, %v965_v3  ;;  %v19458_v17 = vpack.c.bf16 %v20672_v11, %v20671_v12 }
  0xbb   : > { %v969_v10 = vpop.permute.xlu0 %968  ;;  %18728 = vmatprep.subr.msk.mxu0 %vm762_vm4, %v21794_v22  ;;  %2072 = vrot.lane.b32.xlu1 %v21975_v7, %s26187_s18  ;;  %v971_v15 = vpop.permute.xlu1 %970 }
  0xbd   : > { %2180 = vrot.lane.b32.xlu0 %v21874_v31, %s26185_s23 }
  0xbe   : > { %18729 = vmatpush3.msk.msra.mxu0 %vm762_vm4, %v21794_v22 }
  0xbf   : > { %v21987_v16 = vpop.permute.xlu0 %1327  ;;  %18731 = vmatmul.mubr.msk.f32.vlgmr.msra.gmra.mrb[0].mxu0 %vm753_vm6, %v967_v4  ;;  %19463 = vmatprep.subr.bf16.mxu0 %v19454_v14  ;;  %v1077_v19 = vpop.permute.xlu1 %1076 }
  0xc0   : > { %18733 = vmatprep.mubr.msk.f32.mxu0 %vm753_vm6, %v969_v10  ;;  %19465 = vmatpush3.bf16.msra.mxu0 %v19454_v14 }
  0xc1   : > { %19467 = vmatprep.subr.bf16.mxu0 %v19458_v17  ;;  %2182 = vrot.lane.b32.xlu1 %v21881_v33, %s26185_s23 }
  0xc2   : > { %18746 = vmatprep.mubr.msk.f32.mxu1 %vm753_vm6, %v1077_v19  ;;  %2184 = vrot.lane.b32.xlu0 %v21894_v39, %s26185_s23 }
  0xc3   : > { %v1437_v20 = vpop.permute.xlu0 %1436  ;;  %18734 = vmatmul.mubr.msk.f32.gmra.mrb[2].mxu0 %vm753_vm6, %v971_v15  ;;  %v1079_v21 = vpop.permute.xlu1 %1078 }
  0xc4   : > { %19469 = vmatpush3.bf16.msra.mxu0 %v19458_v17  ;;  %18794 = vmatprep.mubr.msk.f32.mxu0 %vm753_vm6, %v1437_v20 }
  0xc5   : > { %18792 = vmatprep.subr.msk.mxu0 %vm762_vm4, %v21987_v16  ;;  %2186 = vrot.lane.b32.xlu1 %v21908_v43, %s26185_s23 }
  0xc6   : > { %18747 = vmatmul.mubr.msk.f32.vlgmr.msra.gmra.mrb[0].mxu1 %vm753_vm6, %v1079_v21  ;;  %2283 = vrot.lane.b32.xlu0 %v21838_v25, %s26191_s26 }
  0xc7   : > { %v1439_v23 = vpop.permute.xlu0 %1438  ;;  %19449 = vmatpush3.bf16.msra.mxu1 %v21885_v36  ;;  %v1081_v28 = vpop.permute.xlu1 %1080 }
  0xc8   : > { %18793 = vmatpush3.msk.msra.mxu0 %vm762_vm4, %v21987_v16  ;;  %19451 = vmatprep.subr.bf16.mxu1 %v21901_v42 }
  0xc9   : > { %18795 = vmatmul.mubr.msk.f32.vlgmr.msra.gmra.mrb[4].mxu0 %vm753_vm6, %v1439_v23  ;;  %19471 = vmatprep.subr.bf16.mxu0 %v21764_v13 }
  0xca   : > { %18749 = vmatprep.mubr.msk.f32.mxu1 %vm753_vm6, %v1081_v28  ;;  %19473 = vmatpush3.bf16.msra.mxu0 %v21764_v13 }
  0xcb   : > { %v1441_v29 = vpop.permute.xlu0 %1440  ;;  %19453 = vmatpush3.bf16.msra.mxu1 %v21901_v42  ;;  %19475 = vmatprep.subr.bf16.mxu0 %v21774_v18  ;;  %v1083_v30 = vpop.permute.xlu1 %1082 }
  0xcc   : > { %18797 = vmatprep.mubr.msk.f32.mxu0 %vm753_vm6, %v1441_v29  ;;  %18760 = vmatprep.subr.msk.mxu1 %vm762_vm4, %v21889_v37 }
  0xcd   : > { %18750 = vmatmul.mubr.msk.f32.gmra.mrb[2].mxu1 %vm753_vm6, %v1083_v30  ;;  %2281 = vrot.lane.b32.xlu1 %v21828_v24, %s26191_s26 }
  0xce   : > { %19477 = vmatpush3.bf16.msra.mxu0 %v21774_v18  ;;  %2285 = vrot.lane.b32.xlu0 %v21848_v26, %s26191_s26 }
  0xcf   : > { %v1443_v32 = vpop.permute.xlu0 %1442  ;;  %18761 = vmatpush3.msk.msra.mxu1 %vm762_vm4, %v21889_v37  ;;  %18808 = vmatprep.subr.msk.mxu0 %vm762_vm4, %v21794_v22  ;;  %v20675_v13 = vpop.permute.xlu1 %20674 }
  0xd0   : > { %18798 = vmatmul.mubr.msk.f32.gmra.mrb[6].mxu0 %vm753_vm6, %v1443_v32  ;;  %19455 = vmatprep.subr.bf16.mxu1 %v19454_v14  ;;  %v20677_v35 = vunpack.i.h.bf16 %v20675_v13  ;;  %v20676_v36 = vunpack.i.l.bf16 %v20675_v13 }
  0xd1   : > { %2287 = vrot.lane.b32.xlu1 %v21854_v27, %s26191_s26 }
  0xd2   : > { %18809 = vmatpush3.msk.msra.mxu0 %vm762_vm4, %v21794_v22  ;;  %v19478_v38 = vpack.c.bf16 %v20677_v35, %v20676_v36  ;;  %2616 = vrot.lane.b32.xlu0 %v21828_v24, %s26187_s18 }
  0xd3   : > { %v1178_v34 = vpop.permute.xlu0 %1177  ;;  %v1538_v40 = vpop.permute.xlu1 %1537 }
  0xd4   : > { %18762 = vmatprep.mubr.msk.f32.mxu1 %vm753_vm6, %v1178_v34  ;;  %18810 = vmatprep.mubr.msk.f32.mxu0 %vm753_vm6, %v1538_v40 }
  0xd5   : > { %19479 = vmatprep.subr.bf16.mxu0 %v19478_v38  ;;  %2618 = vrot.lane.b32.xlu1 %v21874_v31, %s26187_s18 }
  0xd6   : > { %2620 = vrot.lane.b32.xlu0 %v21838_v25, %s26187_s18 }
  0xd7   : > { %v1180_v41 = vpop.permute.xlu0 %1179  ;;  %v1540_v18 = vpop.permute.xlu1 %1539 }
  0xd8   : > { %18763 = vmatmul.mubr.msk.f32.vlgmr.msra.gmra.mrb[0].mxu1 %vm753_vm6, %v1180_v41  ;;  %18811 = vmatmul.mubr.msk.f32.vlgmr.msra.gmra.mrb[4].mxu0 %vm753_vm6, %v1540_v18 }
  0xd9   : > { %19457 = vmatpush3.bf16.msra.mxu1 %v19454_v14  ;;  %19481 = vmatpush3.bf16.msra.mxu0 %v19478_v38 }
  0xda   : > { %19459 = vmatprep.subr.bf16.mxu1 %v19458_v17  ;;  %2382 = vrot.lane.b32.xlu1 %v21933_v58, %s26183_s27 }
  0xdb   : > { %v20680_v37 = vpop.permute.xlu0 %20679  ;;  %v1182_v22 = vpop.permute.xlu1 %1181  ;;  %2384 = vrot.lane.b32.xlu0 %v21946_v62, %s26183_s27 }
  0xdc   : > { %v20682_v42 = vunpack.i.h.bf16 %v20680_v37  ;;  %v20681_v44 = vunpack.i.l.bf16 %v20680_v37  ;;  %18765 = vmatprep.mubr.msk.f32.mxu1 %vm753_vm6, %v1182_v22 }
  0xdd   : > { %19461 = vmatpush3.bf16.msra.mxu1 %v19458_v17 }
  0xde   : > { %v19482_v45 = vpack.c.bf16 %v20682_v42, %v20681_v44  ;;  %18776 = vmatprep.subr.msk.mxu1 %vm762_vm4, %v21987_v16  ;;  %2622 = vrot.lane.b32.xlu1 %v21881_v33, %s26187_s18 }
  0xdf   : > { %v1542_v46 = vpop.permute.xlu0 %1541  ;;  %v1184_v47 = vpop.permute.xlu1 %1183  ;;  %2626 = vrot.lane.b32.xlu0 %v21894_v39, %s26187_s18 }
  0xe0   : > { %18813 = vmatprep.mubr.msk.f32.mxu0 %vm753_vm6, %v1542_v46  ;;  %19483 = vmatprep.subr.bf16.mxu0 %v19482_v45 }
  0xe1   : > { %18777 = vmatpush3.msk.msra.mxu1 %vm762_vm4, %v21987_v16  ;;  %19485 = vmatpush3.bf16.msra.mxu0 %v19482_v45 }
  0xe2   : > { %18766 = vmatmul.mubr.msk.f32.gmra.mrb[2].mxu1 %vm753_vm6, %v1184_v47  ;;  %2624 = vrot.lane.b32.xlu1 %v21848_v26, %s26187_s18 }
  0xe3   : > { %v1544_v48 = vpop.permute.xlu0 %1543  ;;  %v1295_v49 = vpop.permute.xlu1 %1294  ;;  %2386 = vrot.lane.b32.xlu0 %v21960_v1, %s26183_s27 }
  0xe4   : > { %18814 = vmatmul.mubr.msk.f32.gmra.mrb[6].mxu0 %vm753_vm6, %v1544_v48 }
  0xe6   : > { %2628 = vrot.lane.b32.xlu1 %v21854_v27, %s26187_s18 }
  0xe7   : > { %v1297_v50 = vpop.permute.xlu0 %1296  ;;  %v1655_v52 = vpop.permute.xlu1 %1654 }
  0xe8   : > { %v1311_v51 = vsel %vm1310_vm7, %v1295_v49, %v1297_v50  ;;  %18824 = vmatprep.subr.msk.mxu0 %vm762_vm4, %v1655_v52 }
  0xe9   : > { %18778 = vmatprep.mubr.msk.f32.mxu1 %vm753_vm6, %v1311_v51  ;;  %18825 = vmatpush3.msk.msra.mxu0 %vm762_vm4, %v1655_v52 }
  0xea   : > { %2388 = vrot.lane.b32.xlu1 %v21975_v7, %s26183_s27  ;;  %s638_s27 = scalar_lea.vmem %s26315_s3, %s22192_s28  ;;  %s26336_s3 = smov 3  }
  0xeb   : > { %v1299_v53 = vpop.permute.xlu0 %1298  ;;  %v1301_v54 = vpop.permute.xlu1 %1300 }
  0xec   : > { %v1312_v56 = vsel %vm1310_vm7, %v1299_v53, %v1301_v54 }
  0xed   : > { %18779 = vmatmul.mubr.msk.f32.vlgmr.msra.gmra.mrb[0].mxu1 %vm753_vm6, %v1312_v56 }
  0xef   : > { %v1639_v55 = vpop.permute.xlu0 %1638  ;;  %v1641_v57 = vpop.permute.xlu1 %1640 }
  0xf0   : > { %18826 = vmatprep.mubr.msk.f32.mxu0 %vm753_vm6, %v1639_v55 }
  0xf1   : > { %18827 = vmatmul.mubr.msk.f32.vlgmr.msra.gmra.mrb[4].mxu0 %vm753_vm6, %v1641_v57 }
  0xf3   : > { %v1303_v59 = vpop.permute.xlu0 %1302  ;;  %v1305_v60 = vpop.permute.xlu1 %1304 }
  0xf4   : > { %v1313_v63 = vsel %vm1310_vm7, %v1303_v59, %v1305_v60 }
  0xf5   : > { %18781 = vmatprep.mubr.msk.f32.mxu1 %vm753_vm6, %v1313_v63 }
  0xf7   : > { %v1307_v61 = vpop.permute.xlu0 %1306  ;;  %v1309_v0 = vpop.permute.xlu1 %1308 }
  0xf8   : > { %v1314_v4 = vsel %vm1310_vm7, %v1307_v61, %v1309_v0 }
  0xf9   : > { %18782 = vmatmul.mubr.msk.f32.gmra.mrb[2].mxu1 %vm753_vm6, %v1314_v4 }
  0xfb   : > { %v1643_v3 = vpop.permute.xlu0 %1642  ;;  %v1645_v5 = vpop.permute.xlu1 %1644 }
  0xfc   : > { %18829 = vmatprep.mubr.msk.f32.mxu0 %vm753_vm6, %v1643_v3 }
  0xfd   : > { %18830 = vmatmul.mubr.msk.f32.gmra.mrb[6].mxu0 %vm753_vm6, %v1645_v5 }
  0xff   : > { %v22083_v24 = vpop.permute.xlu0 %1767  ;;  %v22085_v25 = vpop.permute.xlu1 %1769 }
 0x103   : > { %v22087_v6 = vpop.permute.xlu0 %1771  ;;  %v22089_v8 = vpop.permute.xlu1 %1773 }
 0x107   : > { %v20685_v10 = vpop.permute.xlu0 %20684  ;;  %v20690_v14 = vpop.permute.xlu1 %20689 }
 0x108   : > { %v20687_v11 = vunpack.i.h.bf16 %v20685_v10  ;;  %v20686_v26 = vunpack.i.l.bf16 %v20685_v10  ;;  %v20692_v27 = vunpack.i.h.bf16 %v20690_v14  ;;  %v20691_v15 = vunpack.i.l.bf16 %v20690_v14 }
 0x10a   : > { %v22091_v12 = vpack.c.bf16 %v20687_v11, %v20686_v26  ;;  %v22095_v16 = vpack.c.bf16 %v20692_v27, %v20691_v15 }
 0x10b   : > { %v20695_v19 = vpop.permute.xlu0 %20694 }
 0x10c   : > { %19487 = vmatprep.subr.bf16.mxu1 %v22091_v12  ;;  %v1804_v17 = vpop.permute.xlu1 %1803  ;;  %v20697_v20 = vunpack.i.h.bf16 %v20695_v19  ;;  %v20696_v21 = vunpack.i.l.bf16 %v20695_v19 }
 0x10d   : > { %19489 = vmatpush3.bf16.msra.mxu1 %v22091_v12  ;;  %18840 = vmatprep.mubr.msk.f32.mxu1 %vm26264_vm8, %v1804_v17 }
 0x10e   : > { %19491 = vmatprep.subr.bf16.mxu1 %v22095_v16  ;;  %v19494_v23 = vpack.c.bf16 %v20697_v20, %v20696_v21 }
 0x10f   : > { %v1806_v29 = vpop.permute.xlu0 %1805 }
 0x110   : > { %v20700_v28 = vpop.permute.xlu1 %20699 }
 0x111   : > { %19493 = vmatpush3.bf16.msra.mxu1 %v22095_v16  ;;  %v20702_v30 = vunpack.i.h.bf16 %v20700_v28  ;;  %v20701_v32 = vunpack.i.l.bf16 %v20700_v28 }
 0x112   : > { %19495 = vmatprep.subr.bf16.mxu1 %v19494_v23 }
 0x113   : > { %v19498_v13 = vpack.c.bf16 %v20702_v30, %v20701_v32  ;;  %v1808_v34 = vpop.permute.xlu0 %1807 }
 0x114   : > { %18841 = vmatmul.mubr.msk.f32.vlgmr.msra.gmra.mrb[4].mxu1 %vm26264_vm8, %v1806_v29  ;;  %v1810_v35 = vpop.permute.xlu1 %1809 }
 0x115   : > { %19497 = vmatpush3.bf16.msra.mxu1 %v19494_v23  ;;  %18843 = vmatprep.mubr.msk.f32.mxu1 %vm26264_vm8, %v1808_v34 }
 0x116   : > { %19499 = vmatprep.subr.bf16.mxu1 %v19498_v13 }
 0x117   : > { %v1926_v36 = vpop.permute.xlu0 %1925 }
 0x118   : > { %18844 = vmatmul.mubr.msk.f32.gmra.mrb[6].mxu1 %vm26264_vm8, %v1810_v35  ;;  %v1928_v38 = vpop.permute.xlu1 %1927 }
 0x119   : > { %19501 = vmatpush3.bf16.msra.mxu1 %v19498_v13  ;;  %18854 = vmatprep.mubr.msk.f32.mxu1 %vm26264_vm8, %v1926_v36 }
 0x11b   : > { %v1930_v40 = vpop.permute.xlu0 %1929 }
 0x11c   : > { %18855 = vmatmul.mubr.msk.f32.vlgmr.msra.gmra.mrb[4].mxu1 %vm26264_vm8, %v1928_v38 }
 0x11d   : > { %v1932_v41 = vpop.permute.xlu1 %1931  ;;  %18857 = vmatprep.mubr.msk.f32.mxu1 %vm26264_vm8, %v1930_v40 }
 0x11f   : > { %v2059_v37 = vpop.permute.xlu0 %2058 }
 0x120   : > { %18858 = vmatmul.mubr.msk.f32.gmra.mrb[6].mxu1 %vm26264_vm8, %v1932_v41 }
 0x121   : > { %v2061_v18 = vpop.permute.xlu1 %2060 }
 0x122   : > { %v2075_v42 = vsel %vm2074_vm9, %v2059_v37, %v2061_v18 }
 0x123   : > { %18868 = vmatprep.mubr.msk.f32.mxu1 %vm26264_vm8, %v2075_v42  ;;  %v22115_v45 = vpop.permute.xlu0 %2062 }
 0x125   : > { %v22113_v44 = vpop.permute.xlu1 %2064 }
 0x127   : > { %v22119_v46 = vpop.permute.xlu0 %2066 }
 0x129   : > { %v22117_v22 = vpop.permute.xlu1 %2068 }
 0x12b   : > { %v22123_v48 = vpop.permute.xlu0 %2070 }
 0x12d   : > { %v22121_v47 = vpop.permute.xlu1 %2072 }
 0x12f   : > { %v22125_v49 = vpop.permute.xlu0 %2180 }
 0x133   : > { %v22127_v50 = vpop.permute.xlu1 %2182 }
 0x134   : > { %v22129_v51 = vpop.permute.xlu0 %2184 }
 0x137   : > { %v22131_v52 = vpop.permute.xlu1 %2186 }
 0x138   : > { %v22133_v53 = vpop.permute.xlu0 %2283 }
 0x13f   : > { %v22135_v54 = vpop.permute.xlu1 %2281 }
 0x140   : > { %v22137_v55 = vpop.permute.xlu0 %2285 }
 0x143   : > { %v22139_v56 = vpop.permute.xlu1 %2287 }
 0x144   : > { %v2617_v60 = vpop.permute.xlu0 %2616 }
 0x147   : > { %v2619_v61 = vpop.permute.xlu1 %2618 }
 0x148   : > { %v2632_v63 = vsel %vm2074_vm9, %v2617_v60, %v2619_v61  ;;  %v2621_v61 = vpop.permute.xlu0 %2620 }
 0x149   : > { %18938 = vmatprep.mubr.msk.f32.mxu0 %vm26264_vm8, %v2632_v63 }
 0x14c   : > { %v22158_v63 = vpop.permute.xlu1 %2382 }
 0x192   : > { %v18732_v57 = vpop.f32.mrb[0].mxu0 }
 0x193   : > { %v1049_v59 = vpop.f32.mrb[1].mxu0  ;;  %v1073_v4 = vmul.f32 0.0, %v18732_v57 }
 0x194   : > { %v1072_v5 = vmul.f32 0.0, %v1049_v59 }
 0x196   : > { %v18735_v0 = vpop.f32.mrb[2].mxu0 }
 0x197   : > { %v1059_v3 = vpop.f32.mrb[3].mxu0  ;;  %v1075_v29 = vmul.f32 0.0, %v18735_v0  ;;  %v22163_v0 = vpop.permute.xlu0 %2384 }
 0x198   : > { %v1074_v30 = vmul.f32 0.0, %v1059_v3  ;;  %v2623_v3 = vpop.permute.xlu1 %2622 }
 0x1c0   : > { %v18780_v10 = vpop.f32.mrb[0].mxu1 }
 0x1c1   : > { %v1433_v11 = vadd.f32 %v18780_v10, %v1073_v4  ;;  %v1409_v26 = vpop.f32.mrb[1].mxu1  ;;  %v2076_v10 = vsel %vm2074_vm9, %v22115_v45, %v22113_v44  ;;  %v2078_v45 = vsel %vm2074_vm9, %v22123_v48, %v22121_v47 }
 0x1c2   : > { %v1432_v14 = vadd.f32 %v1409_v26, %v1072_v5  ;;  %v2077_v26 = vsel %vm2074_vm9, %v22119_v46, %v22117_v22  ;;  %v2999_v22 = vld [vmem:[%s638_s27 + $0x8] sm:$0xff] }
 0x1c4   : > { %v18828_v27 = vpop.f32.mrb[4].mxu0 }
 0x1c5   : > { %v1760_v15 = vmul.f32 0.0, %v18828_v27  ;;  %v1736_v17 = vpop.f32.mrb[5].mxu0  ;;  %v2627_v27 = vpop.permute.xlu0 %2626 }
 0x1c6   : > { %v1759_v19 = vmul.f32 0.0, %v1736_v17 }
 0x1c7   : > { %v1764_v20 = vadd.f32 %v1760_v15, %v1433_v11  ;;  %v2625_v11 = vpop.permute.xlu1 %2624 }
 0x1c8   : > { %v1763_v21 = vadd.f32 %v1759_v19, %v1432_v14  ;;  %v2633_v14 = vsel %vm2074_vm9, %v2621_v61, %v2623_v3  ;;  %v2634_v44 = vsel %vm2074_vm9, %v2625_v11, %v2627_v27 }
 0x1c9   : > { %v1780_v23 = vadd.f32 %v22085_v25, %v1764_v20 }
 0x1ca   : > { %v1779_v28 = vadd.f32 %v22083_v24, %v1763_v21 }
 0x1cb   : > { %1784 = vst.msk [vmem:[#allocation2 + $0x58] sm:$0xff] %vm671_vm1, %v1780_v23 }
 0x1cc   : > { %1783 = vst.msk [vmem:[#allocation2 + $0x8] sm:$0xff] %vm671_vm1, %v1779_v28  ;;  %v18783_v32 = vpop.f32.mrb[2].mxu1 }
 0x1cd   : > { %v1435_v13 = vadd.f32 %v18783_v32, %v1075_v29  ;;  %v1419_v34 = vpop.f32.mrb[3].mxu1  ;;  %v21537_v29 = vmov 0.0|0.0  }
 0x1ce   : > { %v1434_v35 = vadd.f32 %v1419_v34, %v1074_v30 }
 0x1d0   : > { %v18831_v36 = vpop.f32.mrb[6].mxu0 }
 0x1d1   : > { %v1762_v38 = vmul.f32 0.0, %v18831_v36  ;;  %v1746_v40 = vpop.f32.mrb[7].mxu0 }
 0x1d2   : > { %v1761_v41 = vmul.f32 0.0, %v1746_v40  ;;  %v2039_v18 = vld [vmem:[#allocation2 + $0x58] sm:$0xff]  ;;  %v22278_v40 = vld [vmem:[#allocation2 + $0xf0] sm:$0xff] }
 0x1d3   : > { %v1766_v37 = vadd.f32 %v1762_v38, %v1435_v13  ;;  %v2038_v42 = vld [vmem:[#allocation2 + $0x8] sm:$0xff]  ;;  %2992 = vst.msk [vmem:[#allocation2 + $0x58] sm:$0xff] %vm2989_vm10, %v21519_v2 }
 0x1d4   : > { %v1765_v25 = vadd.f32 %v1761_v41, %v1434_v35  ;;  %v20703_v57 = vpack.i.bf16 %v2039_v18, %v2038_v42  ;;  %v22147_v24 = vpack.c.bf16 %v2039_v18, %v2038_v42  ;;  %2990 = vst.msk [vmem:[#allocation2 + $0x8] sm:$0xff] %vm2989_vm10, %v21519_v2  ;;  %v2878_v2 = vld [vmem:[%s26312_s2 + $0x20] sm:$0x7] }
 0x1d5   : > { %v1782_v59 = vadd.f32 %v22089_v8, %v1766_v37  ;;  %3001 = vst.msk [vmem:[#allocation2 + $0x58] sm:$0xff] %vm2074_vm9, %v2999_v22 }
 0x1d6   : > { %v1781_v60 = vadd.f32 %v22087_v6, %v1765_v25  ;;  %20704 = vrot.lane.b32.xlu0 %v20703_v57, %s26199_s1  ;;  %19503 = vmatprep.subr.bf16.mxu1 %v22147_v24  ;;  %4926 = vst.msk [vmem:[#allocation2 + $0x10] sm:$0xff] %vm26293_vm12, %v22278_v40  ;;  %4928 = vst.msk [vmem:[#allocation2 + $0x60] sm:$0xff] %vm26293_vm12, %v22278_v40 }
 0x1d7   : > { %1786 = vst.msk [vmem:[#allocation2 + $0xf8] sm:$0xff] %vm671_vm1, %v1782_v59  ;;  %19543 = vmatprep.subr.bf16.mxu0 %v22147_v24  ;;  %19505 = vmatpush3.bf16.msra.mxu1 %v22147_v24 }
 0x1d8   : > { %1785 = vst.msk [vmem:[#allocation2 + $0xa8] sm:$0xff] %vm671_vm1, %v1781_v60  ;;  %19545 = vmatpush3.bf16.msra.mxu0 %v22147_v24 }
 0x1d9   : > { %6901 = vst.msk [vmem:[#allocation2 + $0x10] sm:$0xff] %vm2898_vm13, %v22278_v40 }
 0x1da   : > { %2630 = vrot.lane.b32.xlu0 %v21908_v43, %s26187_s18  ;;  %s21536_s18 = smov 35  }
 0x1de   : > { %20709 = vrot.lane.b32.xlu0 %v20703_v57, %s26219_s22  ;;  %v2041_v6 = vld [vmem:[#allocation2 + $0xf8] sm:$0xff] }
 0x1df   : > { %v2040_v8 = vld [vmem:[#allocation2 + $0xa8] sm:$0xff] }
 0x1e0   : > { %v20713_v4 = vpack.i.bf16 %v2041_v6, %v2040_v8  ;;  %v22165_v5 = vpack.c.bf16 %v2041_v6, %v2040_v8  ;;  %2995 = vst.msk [vmem:[#allocation2 + $0xa8] sm:$0x7] %vm2994_vm14, %v22278_v40  ;;  %vm4924_vm14 = vcmask 1047680  }
 0x1e2   : > { %20714 = vrot.lane.b32.xlu1 %v20713_v4, %s26199_s1  ;;  %19507 = vmatprep.subr.bf16.mxu1 %v22165_v5 }
 0x1e3   : > { %19547 = vmatprep.subr.bf16.mxu0 %v22165_v5  ;;  %19509 = vmatpush3.bf16.msra.mxu1 %v22165_v5 }
 0x1e4   : > { %19549 = vmatpush3.bf16.msra.mxu0 %v22165_v5  ;;  %19511 = vmatprep.subr.bf16.mxu1 %v22147_v24 }
 0x1e5   : > { %2511 = vrot.lane.b32.xlu0 %v21874_v31, %s26191_s26  ;;  %v2998_v31 = vld [vmem:[%s638_s27] sm:$0xff]  ;;  %s26318_s27 = smov 104  }
 0x1e6   : > { %2729 = vrot.lane.b32.xlu1 %v21933_v58, %s26185_s23  ;;  %18869 = vmatmul.mubr.msk.f32.vlgmr.msra.gmra.mrb[4].mxu1 %vm26264_vm8, %v2076_v10  ;;  %3000 = vst.msk [vmem:[#allocation2 + $0x8] sm:$0xff] %vm2074_vm9, %v2998_v31 }
 0x1e7   : > { %19513 = vmatpush3.bf16.msra.mxu1 %v22147_v24  ;;  %18871 = vmatprep.mubr.msk.f32.mxu1 %vm26264_vm8, %v2077_v26 }
 0x1e8   : > { %19515 = vmatprep.subr.bf16.mxu1 %v22165_v5  ;;  %18939 = vmatmul.mubr.msk.f32.vlgmr.msra.gmra.mrb[8].mxu0 %vm26264_vm8, %v2633_v14 }
 0x1e9   : > { %2513 = vrot.lane.b32.xlu0 %v21881_v33, %s26191_s26  ;;  %18941 = vmatprep.mubr.msk.f32.mxu0 %vm26264_vm8, %v2634_v44  ;;  %v22256_v33 = vld [vmem:[%s26312_s2 + $0x28] sm:$0x7]  ;;  %s26334_s2 = smov 14  }
 0x1ea   : > { %20719 = vrot.lane.b32.xlu1 %v20713_v4, %s26219_s22  ;;  %18872 = vmatmul.mubr.msk.f32.gmra.mrb[6].mxu1 %vm26264_vm8, %v2078_v45 }
 0x1eb   : > { %19517 = vmatpush3.bf16.msra.mxu1 %v22165_v5  ;;  %18882 = vmatprep.mubr.msk.f32.mxu1 %vm26264_vm8, %v22125_v49 }
 0x1ec   : > { %19519 = vmatprep.subr.bf16.mxu1 %v22091_v12 }
 0x1ed   : > { %2515 = vrot.lane.b32.xlu0 %v21894_v39, %s26191_s26  ;;  %v2387_v39 = vpop.permute.xlu0 %2386 }
 0x1ee   : > { %2731 = vrot.lane.b32.xlu1 %v21946_v62, %s26185_s23  ;;  %18883 = vmatmul.mubr.msk.f32.vlgmr.msra.gmra.mrb[8].mxu1 %vm26264_vm8, %v22127_v50 }
 0x1ef   : > { %19521 = vmatpush3.bf16.msra.mxu1 %v22091_v12  ;;  %18885 = vmatprep.mubr.msk.f32.mxu1 %vm26264_vm8, %v22129_v51 }
 0x1f0   : > { %19523 = vmatprep.subr.bf16.mxu1 %v22095_v16 }
 0x1f1   : > { %2517 = vrot.lane.b32.xlu0 %v21908_v43, %s26191_s26 }
 0x1f2   : > { %2733 = vrot.lane.b32.xlu1 %v21960_v1, %s26185_s23  ;;  %18886 = vmatmul.mubr.msk.f32.gmra.mrb[10].mxu1 %vm26264_vm8, %v22131_v52 }
 0x1f3   : > { %19525 = vmatpush3.bf16.msra.mxu1 %v22095_v16  ;;  %18896 = vmatprep.mubr.msk.f32.mxu1 %vm26264_vm8, %v22135_v54 }
 0x1f5   : > { %2854 = vrot.lane.b32.xlu0 %v21933_v58, %s26191_s26  ;;  %v2629_v58 = vpop.permute.xlu1 %2628 }
 0x1f6   : > { %2735 = vrot.lane.b32.xlu1 %v21975_v7, %s26185_s23  ;;  %18897 = vmatmul.mubr.msk.f32.vlgmr.msra.gmra.mrb[8].mxu1 %vm26264_vm8, %v22133_v53  ;;  %s21539_s23 = smov 99  }
 0x1f7   : > { %18899 = vmatprep.mubr.msk.f32.mxu1 %vm26264_vm8, %v22137_v55 }
 0x1f9   : > { %2858 = vrot.lane.b32.xlu0 %v21960_v1, %s26191_s26  ;;  %v2389_v46 = vpop.permute.xlu1 %2388 }
 0x1fa   : > { %18900 = vmatmul.mubr.msk.f32.gmra.mrb[10].mxu1 %vm26264_vm8, %v22139_v56  ;;  %2856 = vrot.lane.b32.xlu1 %v21946_v62, %s26191_s26 }
 0x1fb   : > { %18910 = vmatprep.mubr.msk.f32.mxu1 %vm26264_vm8, %v22158_v63 }
 0x1fd   : > { %2890 = vrot.lane.b32.xlu0 %v2878_v2, %s21536_s18 }
 0x1fe   : > { %2860 = vrot.lane.b32.xlu1 %v21975_v7, %s26191_s26  ;;  %s26195_s26 = smov 109  }
 0x201   : > { %2895 = vrot.lane.b32.xlu0 %v22256_v33, %s21539_s23  ;;  %s26207_s23 = smov 14  }
 0x202   : > { %2892 = vrot.lane.b32.xlu1 %v22256_v33, %s21536_s18  ;;  %s26203_s18 = smov 90  }
 0x248   : > { %v20705_v43 = vpop.permute.xlu0 %20704 }
 0x249   : > { %v20707_v62 = vunpack.i.h.bf16 %v20705_v43  ;;  %v20706_v1 = vunpack.i.l.bf16 %v20705_v43 }
 0x24b   : > { %v19526_v12 = vpack.c.bf16 %v20707_v62, %v20706_v1 }
 0x24c   : > { %v2631_v7 = vpop.permute.xlu0 %2630 }
 0x24d   : > { %v2635_v16 = vsel %vm2074_vm9, %v2629_v58, %v2631_v7  ;;  %19527 = vmatprep.subr.bf16.mxu1 %v19526_v12 }
 0x24e   : > { %19529 = vmatpush3.bf16.msra.mxu1 %v19526_v12  ;;  %18942 = vmatmul.mubr.msk.f32.gmra.mrb[10].mxu0 %vm26264_vm8, %v2635_v16 }
 0x250   : > { %v20710_v47 = vpop.permute.xlu0 %20709 }
 0x251   : > { %v20712_v48 = vunpack.i.h.bf16 %v20710_v47  ;;  %v20711_v49 = vunpack.i.l.bf16 %v20710_v47 }
 0x253   : > { %v19550_v50 = vpack.c.bf16 %v20712_v48, %v20711_v49 }
 0x254   : > { %v20715_v51 = vpop.permute.xlu1 %20714 }
 0x255   : > { %v20717_v52 = vunpack.i.h.bf16 %v20715_v51  ;;  %v20716_v53 = vunpack.i.l.bf16 %v20715_v51  ;;  %19551 = vmatprep.subr.bf16.mxu0 %v19550_v50 }
 0x256   : > { %19553 = vmatpush3.bf16.msra.mxu0 %v19550_v50 }
 0x257   : > { %v19530_v54 = vpack.c.bf16 %v20717_v52, %v20716_v53  ;;  %v2512_v55 = vpop.permute.xlu0 %2511 }
 0x258   : > { %v2730_v56 = vpop.permute.xlu1 %2729 }
 0x259   : > { %19531 = vmatprep.subr.bf16.mxu1 %v19530_v54  ;;  %18952 = vmatprep.mubr.msk.f32.mxu0 %vm26264_vm8, %v2730_v56 }
 0x25a   : > { %19533 = vmatpush3.bf16.msra.mxu1 %v19530_v54 }
 0x25b   : > { %19535 = vmatprep.subr.bf16.mxu1 %v19526_v12  ;;  %v2514_v15 = vpop.permute.xlu0 %2513 }
 0x25c   : > { %v20720_v17 = vpop.permute.xlu1 %20719 }
 0x25d   : > { %v20722_v19 = vunpack.i.h.bf16 %v20720_v17  ;;  %v20721_v20 = vunpack.i.l.bf16 %v20720_v17  ;;  %18911 = vmatmul.mubr.msk.f32.vlgmr.msra.gmra.mrb[8].mxu1 %vm26264_vm8, %v22163_v0 }
 0x25e   : > { %18913 = vmatprep.mubr.msk.f32.mxu1 %vm26264_vm8, %v2387_v39  ;;  %19537 = vmatpush3.bf16.msra.mxu1 %v19526_v12 }
 0x25f   : > { %19539 = vmatprep.subr.bf16.mxu1 %v19530_v54  ;;  %v19554_v21 = vpack.c.bf16 %v20722_v19, %v20721_v20  ;;  %v2516_v28 = vpop.permute.xlu0 %2515 }
 0x260   : > { %v2732_v23 = vpop.permute.xlu1 %2731 }
 0x261   : > { %18914 = vmatmul.mubr.msk.f32.gmra.mrb[10].mxu1 %vm26264_vm8, %v2389_v46  ;;  %19555 = vmatprep.subr.bf16.mxu0 %v19554_v21 }
 0x262   : > { %19541 = vmatpush3.bf16.msra.mxu1 %v19530_v54  ;;  %18924 = vmatprep.mubr.msk.f32.mxu1 %vm26264_vm8, %v2512_v55 }
 0x263   : > { %19557 = vmatpush3.bf16.msra.mxu0 %v19554_v21  ;;  %19558 = vmatprep.subr.bf16.mxu1 %v21537_v29  ;;  %v2518_v32 = vpop.permute.xlu0 %2517 }
 0x264   : > { %v2734_v30 = vpop.permute.xlu1 %2733 }
 0x265   : > { %18925 = vmatmul.mubr.msk.f32.vlgmr.msra.gmra.mrb[12].mxu1 %vm26264_vm8, %v2514_v15 }
 0x266   : > { %18953 = vmatmul.mubr.msk.f32.vlgmr.msra.gmra.mrb[8].mxu0 %vm26264_vm8, %v2732_v23  ;;  %18927 = vmatprep.mubr.msk.f32.mxu1 %vm26264_vm8, %v2516_v28  ;;  %v21540_v28 = vmov 0  }
 0x267   : > { %18955 = vmatprep.mubr.msk.f32.mxu0 %vm26264_vm8, %v2734_v30  ;;  %19560 = vmatpush3.bf16.msra.mxu1 %v22147_v24  ;;  %v2855_v27 = vpop.permute.xlu0 %2854  ;;  %v3004_v30 = vld [vmem:[#allocation2 + $0x8] sm:$0xff] }
 0x268   : > { %v2736_v13 = vpop.permute.xlu1 %2735  ;;  %19561 = vmatprep.subr.bf16.mxu1 %v21537_v29  ;;  %20723 = vset.pattern.permute.xlu1 %v21540_v28 }
 0x269   : > { %18928 = vmatmul.mubr.msk.f32.gmra.mrb[14].mxu1 %vm26264_vm8, %v2518_v32  ;;  %v3007_v32 = vld [vmem:[#allocation2 + $0xa0] sm:$0x7] }
 0x26a   : > { %18956 = vmatmul.mubr.msk.f32.gmra.mrb[10].mxu0 %vm26264_vm8, %v2736_v13  ;;  %18974 = vmatprep.mubr.msk.f32.mxu1 %vm21538_vm11, %v22278_v40  ;;  %v20724_v13 = vpack.i.bf16 %v3004_v30, %v22278_v40  ;;  %4923 = vst [vmem:[#allocation2 + $0xa0] sm:$0x7] %v22278_v40 }
 0x26b   : > { %19563 = vmatpush3.bf16.msra.mxu1 %v22165_v5  ;;  %v2859_v47 = vpop.permute.xlu0 %2858 }
 0x26c   : > { %19564 = vmatprep.subr.bf16.mxu1 %v21537_v29  ;;  %v2857_v11 = vpop.permute.xlu1 %2856  ;;  %20725 = vrot.lane.b32.xlu0 %v20724_v13, %s26215_s30 }
 0x26f   : > { %v2891_v19 = vpop.permute.xlu0 %2890 }
 0x270   : > { %v2861_v7 = vpop.permute.xlu1 %2860  ;;  %3031 = vrot.lane.b32.xlu0 %v3007_v32, %s26215_s30 }
 0x274   : > { %v2893_v20 = vpop.permute.xlu1 %2892 }
 0x275   : > { %v2894_v23 = vsel %vm753_vm6, %v2891_v19, %v2893_v20 }
 0x2b9   : > { %v18870_v34 = vpop.f32.mrb[4].mxu1 }
 0x2ba   : > { %v2153_v35 = vpop.f32.mrb[5].mxu1  ;;  %v2177_v41 = vmul.f32 0.0, %v18870_v34  ;;  %v22303_v34 = vld [vmem:[%s26316_s4] sm:$0xff] }
 0x2bb   : > { %v2176_v18 = vmul.f32 0.0, %v2153_v35  ;;  %v3006_v35 = vld [vmem:[#allocation2 + $0x58] sm:$0xff]  ;;  %3013 = vrot.lane.b32.xlu0 %v22303_v34, %s26209_s29 }
 0x2bd   : > { %v18873_v36 = vpop.f32.mrb[6].mxu1 }
 0x2be   : > { %v2163_v38 = vpop.f32.mrb[7].mxu1  ;;  %v2179_v24 = vmul.f32 0.0, %v18873_v36  ;;  %v20739_v36 = vpack.i.bf16 %v3006_v35, %v22278_v40 }
 0x2bf   : > { %v2178_v59 = vmul.f32 0.0, %v2163_v38  ;;  %v22310_v38 = vpack.i.bf16 %v3006_v35, %v3004_v30 }
 0x2c0   : > { %20740 = vrot.lane.b32.xlu0 %v20739_v36, %s26213_s20 }
 0x2c4   : > { %3130 = vrot.lane.b32.xlu0 %v3007_v32, %s26213_s20 }
 0x2c8   : > { %20745 = vrot.lane.b32.xlu0 %v22310_v38, %s26199_s1  ;;  %s26317_s1 = smov 127  }
 0x2cc   : > { %3229 = vrot.lane.b32.xlu0 %v22303_v34, %s26207_s23 }
 0x330   : > { %v18912_v37 = vpop.f32.mrb[8].mxu1 }
 0x331   : > { %v2504_v42 = vadd.f32 %v18912_v37, %v2177_v41  ;;  %v2480_v25 = vpop.f32.mrb[9].mxu1  ;;  %v22320_v41 = vld [vmem:[%s26316_s4 + $0x18] sm:$0xff] }
 0x332   : > { %v2503_v57 = vadd.f32 %v2480_v25, %v2176_v18  ;;  %3233 = vrot.lane.b32.xlu0 %v22320_v41, %s26207_s23  ;;  %v2896_v18 = vpop.permute.xlu0 %2895 }
 0x334   : > { %v18915_v60 = vpop.f32.mrb[10].mxu1 }
 0x335   : > { %v2506_v61 = vadd.f32 %v18915_v60, %v2179_v24  ;;  %v2490_v63 = vpop.f32.mrb[11].mxu1  ;;  %v19582_v24 = vpack.c.bf16 %v3006_v35, %v3004_v30 }
 0x336   : > { %v2505_v6 = vadd.f32 %v2490_v63, %v2178_v59  ;;  %3333 = vrot.lane.b32.xlu0 %v22303_v34, %s26193_s0  ;;  %v22341_v59 = vld [vmem:[%s26316_s4 + $0x8] sm:$0xff]  ;;  %v20726_v60 = vpop.permute.xlu0 %20725 }
 0x338   : > { %v18926_v8 = vpop.f32.mrb[12].mxu1 }
 0x339   : > { %v18954_v0 = vpop.f32.mrb[8].mxu0  ;;  %v2593_v3 = vpop.f32.mrb[13].mxu1 }
 0x33a   : > { %v20330_v4 = vadd.f32 %v18954_v0, %v18926_v8  ;;  %v2823_v5 = vpop.f32.mrb[9].mxu0  ;;  %20755 = vrot.lane.b32.xlu0 %v20739_v36, %s21521_s19 }
 0x33b   : > { %v20331_v10 = vadd.f32 %v2823_v5, %v2593_v3 }
 0x33c   : > { %v2847_v26 = vmul.f32 0.0, %v20330_v4  ;;  %v18929_v14 = vpop.f32.mrb[14].mxu1 }
 0x33d   : > { %v2846_v44 = vmul.f32 0.0, %v20331_v10  ;;  %v18957_v45 = vpop.f32.mrb[10].mxu0  ;;  %v2603_v31 = vpop.f32.mrb[15].mxu1 }
 0x33e   : > { %v2851_v22 = vadd.f32 %v2847_v26, %v2504_v42  ;;  %v20332_v2 = vadd.f32 %v18957_v45, %v18929_v14  ;;  %v2833_v33 = vpop.f32.mrb[11].mxu0  ;;  %3335 = vrot.lane.b32.xlu0 %v22320_v41, %s26193_s0  ;;  %s26205_s0 = smov 33   ;;  %v20728_v26 = vunpack.i.h.bf16 %v20726_v60  ;;  %v20727_v14 = vunpack.i.l.bf16 %v20726_v60 }
 0x33f   : > { %v2850_v39 = vadd.f32 %v2846_v44, %v2503_v57  ;;  %v20333_v43 = vadd.f32 %v2833_v33, %v2603_v31 }
 0x340   : > { %v2849_v58 = vmul.f32 0.0, %v20332_v2  ;;  %v2867_v62 = vadd.f32 %v2857_v11, %v2851_v22  ;;  %v3035_v45 = vsel %vm671_vm1, %v20727_v14, %v20728_v26 }
 0x341   : > { %v2848_v1 = vmul.f32 0.0, %v20333_v43  ;;  %v2866_v12 = vadd.f32 %v2855_v27, %v2850_v39 }
 0x342   : > { %v2853_v16 = vadd.f32 %v2849_v58, %v2506_v61  ;;  %v2871_v46 = vmax.f32 %v2867_v62, 0.0  ;;  %3430 = vrot.lane.b32.xlu0 %v3007_v32, %s21521_s19  ;;  %v22360_v61 = vpop.permute.xlu0 %3031 }
 0x343   : > { %v2852_v48 = vadd.f32 %v2848_v1, %v2505_v6  ;;  %v2870_v49 = vmax.f32 %v2866_v12, 0.0 }
 0x344   : > { %2875 = vst.msk [vmem:[#allocation2 + $0x198] sm:$0xff] %vm671_vm1, %v2871_v46  ;;  %v2869_v50 = vadd.f32 %v2861_v7, %v2853_v16 }
 0x345   : > { %2874 = vst.msk [vmem:[#allocation2 + $0x148] sm:$0xff] %vm671_vm1, %v2870_v49  ;;  %v2868_v51 = vadd.f32 %v2859_v47, %v2852_v48 }
 0x346   : > { %v2873_v52 = vmax.f32 %v2869_v50, 0.0  ;;  %3418 = vrot.lane.b32.xlu0 %v22303_v34, %s26195_s26  ;;  %v3014_v63 = vpop.permute.xlu0 %3013 }
 0x347   : > { %v2872_v53 = vmax.f32 %v2868_v51, 0.0  ;;  %18983 = vmatprep.mubr.msk.f32.mxu0 %vm3040_vm0, %v3014_v63 }
 0x348   : > { %2877 = vst.msk [vmem:[#allocation2 + $0x238] sm:$0xff] %vm671_vm1, %v2873_v52 }
 0x349   : > { %2876 = vst.msk [vmem:[#allocation2 + $0x1e8] sm:$0xff] %vm671_vm1, %v2872_v53  ;;  %v21550_v53 = vmov 43  }
 0x34a   : > { %3420 = vrot.lane.b32.xlu0 %v22320_v41, %s26195_s26  ;;  %s26201_s26 = smov 123   ;;  %v22363_v6 = vpop.permute.xlu0 %20740 }
 0x34b   : > { %v2885_v54 = vld [vmem:[#allocation2 + $0x198] sm:$0xff]  ;;  %20769 = vset.pattern.permute.xlu0 %v21550_v53 }
 0x34c   : > { %v2884_v55 = vld [vmem:[#allocation2 + $0x148] sm:$0xff] }
 0x34d   : > { %v19565_v56 = vpack.c.bf16 %v2885_v54, %v2884_v55  ;;  %v20743_v55 = vunpack.i.h.bf16 %v22363_v6 }
 0x34e   : > { %3703 = vrot.lane.b32.xlu0 %v22320_v41, %s26203_s18  ;;  %v22365_v8 = vpop.permute.xlu0 %3130 }
 0x34f   : > { %19566 = vmatpush3.bf16.msra.mxu1 %v19565_v56  ;;  %v2887_v15 = vld [vmem:[#allocation2 + $0x238] sm:$0xff]  ;;  %v20742_v56 = vunpack.i.l.bf16 %v22363_v6 }
 0x350   : > { %19567 = vmatprep.subr.bf16.mxu1 %v21537_v29  ;;  %v2886_v17 = vld [vmem:[#allocation2 + $0x1e8] sm:$0xff] }
 0x351   : > { %v19568_v21 = vpack.c.bf16 %v2887_v15, %v2886_v17  ;;  %v3136_v20 = vsel %vm3134_vm3, %v20742_v56, %v20743_v55 }
 0x352   : > { %3521 = vrot.lane.b32.xlu0 %v22341_v59, %s26201_s26  ;;  %v22367_v0 = vpop.permute.xlu0 %20745 }
 0x353   : > { %19569 = vmatpush3.bf16.msra.mxu1 %v19568_v21  ;;  %v20748_v32 = vunpack.i.h.bf16 %v22367_v0 }
 0x354   : > { %19583 = vmatprep.subr.bf16.mxu1 %v19582_v24 }
 0x356   : > { %18975 = vmatmul.mubr.msk.f32.vlgmr.msra.gmra.mrb[16].mxu1 %vm2898_vm13, %v2894_v23  ;;  %v22369_v3 = vpop.permute.xlu0 %3229 }
 0x357   : > { %19585 = vmatpush3.bf16.msra.mxu1 %v19582_v24 }
 0x3a4   : > { %v22371_v4 = vpop.permute.xlu0 %3233 }
 0x3a8   : > { %v3334_v5 = vpop.permute.xlu0 %3333 }
 0x3a9   : > { %19010 = vmatprep.mubr.msk.f32.mxu1 %vm3040_vm0, %v3334_v5 }
 0x3ac   : > { %v20756_v10 = vpop.permute.xlu0 %20755 }
 0x3ad   : > { %v20758_v16 = vunpack.i.h.bf16 %v20756_v10  ;;  %v20757_v46 = vunpack.i.l.bf16 %v20756_v10 }
 0x3af   : > { %v3436_v50 = vsel %vm3434_vm2, %v20757_v46, %v20758_v16 }
 0x3b0   : > { %v3336_v27 = vpop.permute.xlu0 %3335 }
 0x3b4   : > { %v22380_v33 = vpop.permute.xlu0 %3430 }
 0x3b8   : > { %v3419_v1 = vpop.permute.xlu0 %3418 }
 0x429   : > { %v2967_v37 = vpop.f32.mrb[16].mxu1 }
 0x42a   : > { %v2968_v42 = vadd.f32 %v2967_v37, %v2896_v18  ;;  %v18976_v25 = vpop.f32.mrb[17].mxu1 }
 0x42c   : > { %v2971_v57 = vadd.f32 %v2968_v42, %v21747_v9  ;;  %v22353_v9 = vld [vmem:[%s26316_s4 + $0x20] sm:$0xff] }
 0x42e   : > { %2974 = vperm.xlu1 %20723, %v2971_v57  }
 0x432   : > { %20730 = vrot.lane.b32.xlu1 %v20739_v36, %s26215_s30 }
 0x433   : > { %20770 = vset.pattern.permute.xlu1 %v21550_v53 }
 0x436   : > { %20735 = vrot.lane.b32.xlu1 %v20724_v13, %s26213_s20 }
 0x43a   : > { %3015 = vrot.lane.b32.xlu1 %v22320_v41, %s26209_s29  ;;  %s26320_s29 = smov 116  }
 0x43e   : > { %3231 = vrot.lane.b32.xlu1 %v22341_v59, %s26207_s23 }
 0x442   : > { %3235 = vrot.lane.b32.xlu1 %v22353_v9, %s26207_s23  ;;  %s26220_s23 = smov 20  }
 0x446   : > { %20750 = vrot.lane.b32.xlu1 %v20724_v13, %s21521_s19  ;;  %v20747_v13 = vunpack.i.l.bf16 %v22367_v0 }
 0x44a   : > { %3618 = vrot.lane.b32.xlu1 %v22303_v34, %s26205_s0 }
 0x4ad   : > { %v22374_v11 = vpop.permute.xlu1 %2974 }
 0x4ae   : > { %3002 = vst.msk [vmem:[#allocation2 + $0xa8] sm:$0x7] %vm2996_vm15, %v22374_v11  ;;  %vm4840_vm15 = vcmask 1043456  }
 0x4b1   : > { %v20731_v44 = vpop.permute.xlu1 %20730 }
 0x4b2   : > { %v20733_v31 = vunpack.i.h.bf16 %v20731_v44  ;;  %v20732_v22 = vunpack.i.l.bf16 %v20731_v44 }
 0x4b4   : > { %v3036_v2 = vsel %vm671_vm1, %v20732_v22, %v20733_v31 }
 0x4b5   : > { %v3008_v39 = vld [vmem:[#allocation2 + $0xa8] sm:$0x7]  ;;  %v20736_v43 = vpop.permute.xlu1 %20735  ;;  %v22382_v58 = vpack.c.bf16 %v3036_v2, %v3035_v45 }
 0x4b6   : > { %3529 = vrot.lane.b32.xlu0 %v3008_v39, %s26219_s22  ;;  %3033 = vrot.lane.b32.xlu1 %v3008_v39, %s26215_s30  ;;  %v20738_v15 = vunpack.i.h.bf16 %v20736_v43  ;;  %v20737_v17 = vunpack.i.l.bf16 %v20736_v43  ;;  %v22480_v45 = vld [vmem:[%s26316_s4 + $0x28] sm:$0xff] }
 0x4b7   : > { %19008 = vmatprep.subr.msk.mxu1 %vm762_vm4, %v3008_v39  ;;  %19571 = vmatprep.subr.bf16.mxu0 %v22382_v58 }
 0x4b8   : > { %19009 = vmatpush3.msk.msra.mxu1 %vm762_vm4, %v3008_v39  ;;  %19573 = vmatpush3.bf16.msra.mxu0 %v22382_v58  ;;  %v3135_v19 = vsel %vm3134_vm3, %v20737_v17, %v20738_v15 }
 0x4b9   : > { %v3016_v62 = vpop.permute.xlu1 %3015  ;;  %19011 = vmatmul.mubr.msk.f32.vlgmr.msra.gmra.mrb[18].mxu1 %vm3040_vm0, %v3336_v27  ;;  %v19574_v28 = vpack.c.bf16 %v3136_v20, %v3135_v19 }
 0x4ba   : > { %3620 = vrot.lane.b32.xlu1 %v22320_v41, %s26205_s0  ;;  %3523 = vrot.lane.b32.xlu0 %v22353_v9, %s26201_s26  ;;  %s26319_s26 = smov 36   ;;  %s26323_s0 = smov 68  }
 0x4bb   : > { %19019 = vmatprep.mubr.msk.f32.mxu1 %vm3040_vm0, %v3419_v1 }
 0x4bd   : > { %v3232_v12 = vpop.permute.xlu1 %3231 }
 0x4be   : > { %3132 = vrot.lane.b32.xlu1 %v3008_v39, %s26213_s20  ;;  %3884 = vperm.xlu0 %20769, %v22341_v59   ;;  %v3238_v18 = vsel %vm3237_vm5, %v22369_v3, %v3232_v12 }
 0x4c1   : > { %v22397_v7 = vpop.permute.xlu1 %3235 }
 0x4c2   : > { %3701 = vrot.lane.b32.xlu1 %v22303_v34, %s26203_s18  ;;  %3905 = vrot.lane.b32.xlu0 %v22353_v9, %s26319_s26  ;;  %v3239_v25 = vsel %vm3237_vm5, %v22371_v4, %v22397_v7  ;;  %s26211_s18 = smov 84  }
 0x4c5   : > { %v20751_v47 = vpop.permute.xlu1 %20750 }
 0x4c6   : > { %3244 = vrot.lane.b32.xlu1 %v3008_v39, %s26317_s1  ;;  %v20753_v48 = vunpack.i.h.bf16 %v20751_v47  ;;  %v20752_v49 = vunpack.i.l.bf16 %v20751_v47  ;;  %4005 = vrot.lane.b32.xlu0 %v22353_v9, %s26211_s18 }
 0x4c8   : > { %v3435_v51 = vsel %vm3434_vm2, %v20752_v49, %v20753_v48 }
 0x4c9   : > { %v19586_v52 = vpack.c.bf16 %v3436_v50, %v3435_v51  ;;  %v3619_v54 = vpop.permute.xlu1 %3618 }
 0x4ca   : > { %20760 = vrot.lane.b32.xlu1 %v22310_v38, %s26219_s22  ;;  %s643_s22 = scalar_lea.vmem %s26325_s5, %s22192_s28  ;;  %s26339_s5 = smov 123  }
 0x4cb   : > { %19587 = vmatprep.subr.bf16.mxu1 %v19586_v52 }
 0x4cc   : > { %19589 = vmatpush3.bf16.msra.mxu1 %v19586_v52 }
 0x4ce   : > { %20765 = vrot.lane.b32.xlu1 %v22310_v38, %s26217_s21  ;;  %v19578_v38 = vpack.c.bf16 %v20748_v32, %v20747_v13  ;;  %v4933_v13 = vld [vmem:[%s643_s22] sm:$0xff] }
 0x4d2   : > { %3432 = vrot.lane.b32.xlu1 %v3008_v39, %s21521_s19 }
 0x4d6   : > { %3784 = vrot.lane.b32.xlu1 %v22341_v59, %s26318_s27 }
 0x4da   : > { %3792 = vrot.lane.b32.xlu1 %v3008_v39, %s26217_s21  ;;  %s26328_s21 = smov 100  }
 0x4de   : > { %3786 = vrot.lane.b32.xlu1 %v22353_v9, %s26318_s27 }
 0x4e2   : > { %3888 = vperm.xlu1 %20770, %v22353_v9  }
 0x4e6   : > { %3903 = vrot.lane.b32.xlu1 %v22341_v59, %s26319_s26 }
 0x4ea   : > { %4003 = vrot.lane.b32.xlu1 %v22341_v59, %s26211_s18  ;;  %s26322_s18 = smov 4  }
 0x4ee   : > { %4104 = vrot.lane.b32.xlu1 %v22480_v45, %s26320_s29 }
 0x528   : > { %v3034_v21 = vpop.permute.xlu1 %3033 }
 0x529   : > { %v3037_v23 = vsel %vm671_vm1, %v22360_v61, %v3034_v21 }
 0x52a   : > { %18981 = vmatprep.subr.msk.mxu0 %vm762_vm4, %v3037_v23 }
 0x52b   : > { %18982 = vmatpush3.msk.msra.mxu0 %vm762_vm4, %v3037_v23 }
 0x52c   : > { %v3621_v30 = vpop.permute.xlu1 %3620  ;;  %18984 = vmatmul.mubr.msk.f32.vlgmr.msra.gmra.mrb[12].mxu0 %vm3040_vm0, %v3016_v62  ;;  %19575 = vmatprep.subr.bf16.mxu0 %v19574_v28 }
 0x52d   : > { %19577 = vmatpush3.bf16.msra.mxu0 %v19574_v28  ;;  %18992 = vmatprep.mubr.msk.f32.mxu0 %vm3040_vm0, %v22303_v34  ;;  %v3421_v34 = vpop.permute.xlu0 %3420 }
 0x530   : > { %v3133_v35 = vpop.permute.xlu1 %3132 }
 0x531   : > { %v3137_v36 = vsel %vm3134_vm3, %v22365_v8, %v3133_v35  ;;  %v3704_v24 = vpop.permute.xlu0 %3703  ;;  %v4934_v35 = vld [vmem:[%s643_s22 + $0x8] sm:$0xff]  ;;  %s26329_s22 = smov 84  }
 0x532   : > { %18990 = vmatprep.subr.msk.mxu0 %vm762_vm4, %v3137_v36 }
 0x533   : > { %18991 = vmatpush3.msk.msra.mxu0 %vm762_vm4, %v3137_v36  ;;  %v21553_v36 = vmov 60  }
 0x534   : > { %v3702_v37 = vpop.permute.xlu1 %3701  ;;  %18993 = vmatmul.mubr.msk.f32.vlgmr.msra.gmra.mrb[12].mxu0 %vm3040_vm0, %v22320_v41  ;;  %19579 = vmatprep.subr.bf16.mxu0 %v19578_v38 }
 0x535   : > { %19581 = vmatpush3.bf16.msra.mxu0 %v19578_v38  ;;  %19001 = vmatprep.mubr.msk.f32.mxu0 %vm3040_vm0, %v3238_v18  ;;  %v3522_v63 = vpop.permute.xlu0 %3521 }
 0x536   : > { %20817 = vset.pattern.permute.xlu1 %v21553_v36  ;;  %20816 = vset.pattern.permute.xlu0 %v21553_v36 }
 0x538   : > { %v3245_v42 = vpop.permute.xlu1 %3244 }
 0x539   : > { %18999 = vmatprep.subr.msk.mxu0 %vm762_vm4, %v3245_v42  ;;  %v3530_v26 = vpop.permute.xlu0 %3529 }
 0x53a   : > { %19000 = vmatpush3.msk.msra.mxu0 %vm762_vm4, %v3245_v42 }
 0x53b   : > { %19595 = vmatprep.subr.bf16.mxu0 %v19578_v38 }
 0x53c   : > { %v20761_v57 = vpop.permute.xlu1 %20760  ;;  %19002 = vmatmul.mubr.msk.f32.vlgmr.msra.gmra.mrb[12].mxu0 %vm3040_vm0, %v3239_v25 }
 0x53d   : > { %19597 = vmatpush3.bf16.msra.mxu0 %v19578_v38  ;;  %19037 = vmatprep.mubr.msk.f32.mxu0 %vm3040_vm0, %v3619_v54  ;;  %v20763_v6 = vunpack.i.h.bf16 %v20761_v57  ;;  %v20762_v8 = vunpack.i.l.bf16 %v20761_v57  ;;  %v3524_v27 = vpop.permute.xlu0 %3523 }
 0x53e   : > { %19035 = vmatprep.subr.msk.mxu0 %vm762_vm4, %v3245_v42 }
 0x53f   : > { %v19590_v5 = vpack.c.bf16 %v20763_v6, %v20762_v8 }
 0x540   : > { %v20766_v41 = vpop.permute.xlu1 %20765 }
 0x541   : > { %19036 = vmatpush3.msk.msra.mxu0 %vm762_vm4, %v3245_v42  ;;  %v20768_v60 = vunpack.i.h.bf16 %v20766_v41  ;;  %v20767_v61 = vunpack.i.l.bf16 %v20766_v41  ;;  %v3885_v55 = vpop.permute.xlu0 %3884 }
 0x542   : > { %19038 = vmatmul.mubr.msk.f32.vlgmr.msra.gmra.mrb[14].mxu0 %vm3040_vm0, %v3621_v30  ;;  %19599 = vmatprep.subr.bf16.mxu0 %v22382_v58  ;;  %v4098_v30 = vld [vmem:[%s26316_s4 + $0x10] sm:$0xff] }
 0x543   : > { %19601 = vmatpush3.bf16.msra.mxu0 %v22382_v58  ;;  %19046 = vmatprep.mubr.msk.f32.mxu0 %vm3040_vm0, %v3702_v37  ;;  %v19602_v4 = vpack.c.bf16 %v20768_v60, %v20767_v61 }
 0x544   : > { %19044 = vmatprep.subr.msk.mxu0 %vm762_vm4, %v3037_v23  ;;  %v3433_v0 = vpop.permute.xlu1 %3432 }
 0x545   : > { %v3437_v3 = vsel %vm3434_vm2, %v22380_v33, %v3433_v0  ;;  %v2977_v33 = vlaneseq }
 0x546   : > { %19017 = vmatprep.subr.msk.mxu1 %vm762_vm4, %v3437_v3 }
 0x547   : > { %19045 = vmatpush3.msk.msra.mxu0 %vm762_vm4, %v3037_v23  ;;  %19018 = vmatpush3.msk.msra.mxu1 %vm762_vm4, %v3437_v3  ;;  %v22485_v43 = vand.u32 127, %v2977_v33 }
 0x548   : > { %19603 = vmatprep.subr.bf16.mxu0 %v19602_v4  ;;  %v3785_v10 = vpop.permute.xlu1 %3784  ;;  %19020 = vmatmul.mubr.msk.f32.vlgmr.msra.gmra.mrb[18].mxu1 %vm3040_vm0, %v3421_v34 }
 0x549   : > { %19591 = vmatprep.subr.bf16.mxu1 %v19590_v5  ;;  %19028 = vmatprep.mubr.msk.f32.mxu1 %vm3040_vm0, %v3522_v63  ;;  %26321 = vst [vmem:[#allocation4_spill] sm:$0xff] %v22485_v43  ;;  %v2979_v58 = vand.u32 1, %v22485_v43 }
 0x54a   : > { %19593 = vmatpush3.bf16.msra.mxu1 %v19590_v5  ;;  %19047 = vmatmul.mubr.msk.f32.vlgmr.msra.gmra.mrb[14].mxu0 %vm3040_vm0, %v3704_v24 }
 0x54b   : > { %19605 = vmatpush3.bf16.msra.mxu0 %v19602_v4  ;;  %19026 = vmatprep.subr.msk.mxu1 %vm762_vm4, %v3530_v26  ;;  %vm2980_vm6 = vcmp.ne.s32.totalorder %v2979_v58, 0  ;;  %vm2983_vm10 = vcmp.ne.s32.totalorder %v2979_v58, 1 }
 0x54c   : > { %19055 = vmatprep.mubr.msk.f32.mxu0 %vm3040_vm0, %v3785_v10  ;;  %v3793_v14 = vpop.permute.xlu1 %3792  ;;  %v22489_v62 = vsel %vm2980_vm6, 1.0, %v22278_v40  ;;  %v22494_v16 = vsel %vm2983_vm10, 1.0, %v22278_v40  ;;  %vm4931_vm6 = vcmask 124928   ;;  %vm5068_vm10 = vcmask 39936  }
 0x54d   : > { %19053 = vmatprep.subr.msk.mxu0 %vm762_vm4, %v3793_v14 }
 0x54e   : > { %19027 = vmatpush3.msk.msra.mxu1 %vm762_vm4, %v3530_v26 }
 0x54f   : > { %19054 = vmatpush3.msk.msra.mxu0 %vm762_vm4, %v3793_v14 }
 0x550   : > { %v3787_v44 = vpop.permute.xlu1 %3786  ;;  %19029 = vmatmul.mubr.msk.f32.vlgmr.msra.gmra.mrb[18].mxu1 %vm3040_vm0, %v3524_v27 }
 0x552   : > { %19056 = vmatmul.mubr.msk.f32.vlgmr.msra.gmra.mrb[14].mxu0 %vm3040_vm0, %v3787_v44 }
 0x561   : > { %v3889_v31 = vpop.permute.xlu1 %3888 }
 0x565   : > { %v3904_v22 = vpop.permute.xlu1 %3903 }
 0x566   : > { %19062 = vmatprep.mubr.msk.f32.mxu1 %vm26293_vm12, %v3904_v22 }
 0x569   : > { %v4004_v38 = vpop.permute.xlu1 %4003 }
 0x56d   : > { %v4105_v37 = vpop.permute.xlu1 %4104 }
 0x60f   : > { %v19003_v2 = vpop.f32.mrb[12].mxu0 }
 0x610   : > { %v3320_v39 = vpop.f32.mrb[13].mxu0  ;;  %v3332_v1 = vmul.f32 %v19003_v2, %v22489_v62 }
 0x611   : > { %v3331_v12 = vmul.f32 %v22489_v62, %v3320_v39 }
 0x623   : > { %v19030_v7 = vpop.f32.mrb[18].mxu1 }
 0x624   : > { %v3617_v46 = vadd.f32 %v19030_v7, %v3332_v1  ;;  %v3605_v47 = vpop.f32.mrb[19].mxu1 }
 0x625   : > { %v3616_v48 = vadd.f32 %v3605_v47, %v3331_v12  ;;  %v19057_v49 = vpop.f32.mrb[14].mxu0 }
 0x626   : > { %v3880_v50 = vmul.f32 %v19057_v49, %v22494_v16  ;;  %v3868_v51 = vpop.f32.mrb[15].mxu0 }
 0x627   : > { %v3879_v52 = vmul.f32 %v22494_v16, %v3868_v51 }
 0x628   : > { %v3882_v54 = vadd.f32 %v3880_v50, %v3617_v46 }
 0x629   : > { %v3881_v56 = vadd.f32 %v3879_v52, %v3616_v48 }
 0x62a   : > { %v3892_v15 = vadd.f32 %v3889_v31, %v3882_v54 }
 0x62b   : > { %v3891_v17 = vadd.f32 %v3885_v55, %v3881_v56 }
 0x62c   : > { %3894 = vst.msk [vmem:[#allocation2 + $0x58] sm:$0xff] %vm2074_vm9, %v3892_v15 }
 0x62d   : > { %3893 = vst.msk [vmem:[#allocation2 + $0x8] sm:$0xff] %vm2074_vm9, %v3891_v17 }
 0x633   : > { %v3898_v19 = vld [vmem:[#allocation2 + $0x58] sm:$0xff] }
 0x634   : > { %v20771_v20 = vpack.i.bf16 %v3898_v19, %v22278_v40  ;;  %v3896_v21 = vld [vmem:[#allocation2 + $0x8] sm:$0xff]  ;;  %4927 = vst.msk [vmem:[#allocation2 + $0x58] sm:$0xff] %vm4924_vm14, %v22278_v40 }
 0x635   : > { %v20781_v23 = vpack.i.bf16 %v3896_v21, %v22278_v40  ;;  %v22502_v28 = vpack.c.bf16 %v3898_v19, %v3896_v21  ;;  %v20791_v32 = vpack.i.bf16 %v3898_v19, %v3896_v21  ;;  %4925 = vst.msk [vmem:[#allocation2 + $0x8] sm:$0xff] %vm4924_vm14, %v22278_v40  ;;  %vm6899_vm14 = vcmask 1048064  }
 0x636   : > { %20772 = vrot.lane.b32.xlu0 %v20771_v20, %s26215_s30  ;;  %4935 = vst.msk [vmem:[#allocation2 + $0x8] sm:$0xff] %vm26293_vm12, %v4933_v13  ;;  %4936 = vst.msk [vmem:[#allocation2 + $0x58] sm:$0xff] %vm26293_vm12, %v4934_v35 }
 0x637   : > { %20782 = vrot.lane.b32.xlu1 %v20781_v23, %s26215_s30  ;;  %19619 = vmatprep.subr.bf16.mxu0 %v22502_v28  ;;  %s26326_s30 = smov 126  }
 0x638   : > { %19621 = vmatpush3.bf16.msra.mxu0 %v22502_v28 }
 0x63a   : > { %4102 = vrot.lane.b32.xlu0 %v4098_v30, %s26320_s29 }
 0x63b   : > { %4472 = vrot.lane.b32.xlu1 %v4098_v30, %s26322_s18 }
 0x63e   : > { %20777 = vrot.lane.b32.xlu0 %v20771_v20, %s26213_s20 }
 0x63f   : > { %20787 = vrot.lane.b32.xlu1 %v20781_v23, %s26213_s20  ;;  %s26324_s20 = smov 52  }
 0x642   : > { %4470 = vrot.lane.b32.xlu0 %v22341_v59, %s26322_s18 }
 0x643   : > { %4474 = vrot.lane.b32.xlu1 %v22353_v9, %s26322_s18 }
 0x646   : > { %4195 = vrot.lane.b32.xlu0 %v22341_v59, %s26220_s23 }
 0x647   : > { %20792 = vrot.lane.b32.xlu1 %v20791_v32, %s26317_s1 }
 0x64a   : > { %4476 = vrot.lane.b32.xlu0 %v22480_v45, %s26322_s18 }
 0x64b   : > { %4197 = vrot.lane.b32.xlu1 %v22353_v9, %s26220_s23  ;;  %s21556_s23 = smov 5  }
 0x64e   : > { %4278 = vrot.lane.b32.xlu0 %v22341_v59, %s26323_s0 }
 0x64f   : > { %20797 = vrot.lane.b32.xlu1 %v20771_v20, %s21521_s19 }
 0x652   : > { %20802 = vrot.lane.b32.xlu0 %v20781_v23, %s21521_s19  ;;  %s26327_s19 = smov 125  }
 0x653   : > { %4559 = vrot.lane.b32.xlu1 %v22341_v59, %s26324_s20  ;;  %v22558_v59 = vld [vmem:[%s26316_s4 + $0x10] sm:$0x7]  ;;  %s26338_s4 = smov 109  }
 0x656   : > { %4280 = vrot.lane.b32.xlu0 %v22353_v9, %s26323_s0 }
 0x657   : > { %4561 = vrot.lane.b32.xlu1 %v22353_v9, %s26324_s20  ;;  %v3906_v9 = vpop.permute.xlu0 %3905 }
 0x65a   : > { %20807 = vrot.lane.b32.xlu0 %v20791_v32, %s26326_s30  ;;  %s26222_s30 = smov 67  }
 0x65b   : > { %20812 = vrot.lane.b32.xlu1 %v20791_v32, %s26327_s19  ;;  %v4006_v18 = vpop.permute.xlu0 %4005 }
 0x65e   : > { %4373 = vrot.lane.b32.xlu0 %v4098_v30, %s26328_s21 }
 0x65f   : > { %4642 = vrot.lane.b32.xlu1 %v4098_v30, %s26329_s22 }
 0x662   : > { %4375 = vrot.lane.b32.xlu0 %v22480_v45, %s26328_s21 }
 0x663   : > { %4644 = vrot.lane.b32.xlu1 %v22480_v45, %s26329_s22 }
 0x666   : > { %4738 = vperm.xlu0 %20816, %v4098_v30  }
 0x667   : > { %4742 = vperm.xlu1 %20817, %v22480_v45  }
 0x66b   : > { %4761 = vrot.lane.b32.xlu1 %v22558_v59, %s26222_s30  ;;  %s26331_s30 = smov 1  }
 0x66c   : > { %20880 = vset.pattern.permute.xlu1 %v21550_v53 }
 0x6a8   : > { %v20773_v34 = vpop.permute.xlu0 %20772 }
 0x6a9   : > { %v20775_v42 = vunpack.i.h.bf16 %v20773_v34  ;;  %v20774_v25 = vunpack.i.l.bf16 %v20773_v34  ;;  %v20783_v57 = vpop.permute.xlu1 %20782 }
 0x6aa   : > { %v20785_v24 = vunpack.i.h.bf16 %v20783_v57  ;;  %v20784_v41 = vunpack.i.l.bf16 %v20783_v57 }
 0x6ab   : > { %v3920_v60 = vsel %vm671_vm1, %v20774_v25, %v20775_v42  ;;  %v21555_v25 = vmov 93  }
 0x6ac   : > { %v3919_v61 = vsel %vm671_vm1, %v20784_v41, %v20785_v24  ;;  %v4103_v63 = vpop.permute.xlu0 %4102  ;;  %20818 = vset.pattern.permute.xlu0 %v21555_v25 }
 0x6ad   : > { %v4473_v6 = vpop.permute.xlu1 %4472  ;;  %v19606_v8 = vpack.c.bf16 %v3920_v60, %v3919_v61  ;;  %4758 = vperm.xlu0 %20818, %v22558_v59  }
 0x6af   : > { %19607 = vmatprep.subr.bf16.mxu1 %v19606_v8 }
 0x6b0   : > { %v20778_v0 = vpop.permute.xlu0 %20777  ;;  %19609 = vmatpush3.bf16.msra.mxu1 %v19606_v8 }
 0x6b1   : > { %v20780_v3 = vunpack.i.h.bf16 %v20778_v0  ;;  %v20779_v4 = vunpack.i.l.bf16 %v20778_v0  ;;  %v20788_v5 = vpop.permute.xlu1 %20787  ;;  %20879 = vset.pattern.permute.xlu0 %v21550_v53 }
 0x6b2   : > { %v20790_v10 = vunpack.i.h.bf16 %v20788_v5  ;;  %v20789_v26 = vunpack.i.l.bf16 %v20788_v5 }
 0x6b3   : > { %19063 = vmatmul.mubr.msk.f32.vlgmr.msra.gmra.mrb[20].mxu1 %vm26293_vm12, %v3906_v9  ;;  %v4016_v14 = vsel %vm3134_vm3, %v20779_v4, %v20780_v3 }
 0x6b4   : > { %v4471_v27 = vpop.permute.xlu0 %4470  ;;  %19069 = vmatprep.mubr.msk.f32.mxu1 %vm26293_vm12, %v4004_v38  ;;  %v4015_v44 = vsel %vm3134_vm3, %v20789_v26, %v20790_v10 }
 0x6b5   : > { %v4475_v45 = vpop.permute.xlu1 %4474  ;;  %v19610_v31 = vpack.c.bf16 %v4016_v14, %v4015_v44  ;;  %v4478_v47 = vsel %vm2074_vm9, %v4471_v27, %v4473_v6 }
 0x6b7   : > { %19611 = vmatprep.subr.bf16.mxu1 %v19610_v31 }
 0x6b8   : > { %v4196_v22 = vpop.permute.xlu0 %4195  ;;  %19613 = vmatpush3.bf16.msra.mxu1 %v19610_v31 }
 0x6b9   : > { %v20793_v2 = vpop.permute.xlu1 %20792  ;;  %19083 = vmatprep.mubr.msk.f32.mxu0 %vm26293_vm12, %v4196_v22  ;;  %v4942_v22 = vld [vmem:[#allocation2 + $0xa0] sm:$0x7] }
 0x6ba   : > { %v20795_v33 = vunpack.i.h.bf16 %v20793_v2  ;;  %v20794_v39 = vunpack.i.l.bf16 %v20793_v2  ;;  %4966 = vrot.lane.b32.xlu0 %v4942_v22, %s26331_s30  ;;  %v22613_v2 = vld [vmem:[%s26332_s6 + $0x18] sm:$0xff] }
 0x6bb   : > { %19070 = vmatmul.mubr.msk.f32.vlgmr.msra.gmra.mrb[20].mxu1 %vm26293_vm12, %v4006_v18  ;;  %4950 = vrot.lane.b32.xlu1 %v22613_v2, %s26333_s15 }
 0x6bc   : > { %v19614_v58 = vpack.c.bf16 %v20795_v33, %v20794_v39  ;;  %v4477_v1 = vpop.permute.xlu0 %4476  ;;  %19076 = vmatprep.mubr.msk.f32.mxu1 %vm26293_vm12, %v4103_v63  ;;  %v22618_v33 = vld [vmem:[%s26332_s6] sm:$0xff]  ;;  %v22630_v39 = vld [vmem:[%s26332_s6 + $0x8] sm:$0xff] }
 0x6bd   : > { %v4198_v12 = vpop.permute.xlu1 %4197  ;;  %v4479_v55 = vsel %vm2074_vm9, %v4475_v45, %v4477_v1  ;;  %v4941_v1 = vld [vmem:[#allocation2 + $0x58] sm:$0xff] }
 0x6be   : > { %19615 = vmatprep.subr.bf16.mxu1 %v19614_v58  ;;  %19084 = vmatmul.mubr.msk.f32.vlgmr.msra.gmra.mrb[16].mxu0 %vm26293_vm12, %v4198_v12  ;;  %v22647_v12 = vld [vmem:[#allocation2 + $0xf0] sm:$0xff] }
 0x6bf   : > { %19617 = vmatpush3.bf16.msra.mxu1 %v19614_v58  ;;  %4948 = vrot.lane.b32.xlu0 %v22618_v33, %s26333_s15  ;;  %s26335_s15 = smov 33  }
 0x6c0   : > { %v4279_v7 = vpop.permute.xlu0 %4278  ;;  %19631 = vmatprep.subr.bf16.mxu1 %v19614_v58  ;;  %5163 = vrot.lane.b32.xlu1 %v22618_v33, %s26334_s2 }
 0x6c1   : > { %v20798_v46 = vpop.permute.xlu1 %20797  ;;  %19090 = vmatprep.mubr.msk.f32.mxu0 %vm26293_vm12, %v4279_v7  ;;  %v20824_v7 = vpack.i.bf16 %v4941_v1, %v22647_v12 }
 0x6c2   : > { %v20800_v48 = vunpack.i.h.bf16 %v20798_v46  ;;  %v20799_v49 = vunpack.i.l.bf16 %v20798_v46  ;;  %v4939_v46 = vld [vmem:[#allocation2 + $0x8] sm:$0xff] }
 0x6c3   : > { %19077 = vmatmul.mubr.msk.f32.vlgmr.msra.gmra.mrb[20].mxu1 %vm26293_vm12, %v4105_v37  ;;  %5064 = vrot.lane.b32.xlu0 %v4942_v22, %s21556_s23 }
 0x6c4   : > { %19633 = vmatpush3.bf16.msra.mxu1 %v19614_v58  ;;  %v20803_v50 = vpop.permute.xlu0 %20802  ;;  %19104 = vmatprep.mubr.msk.f32.mxu1 %vm26293_vm12, %v4478_v47  ;;  %v4291_v15 = vsel %vm3434_vm2, %v20799_v49, %v20800_v48  ;;  %v22639_v58 = vld [vmem:[%s26332_s6 + $0x20] sm:$0xff]  ;;  %v20839_v47 = vpack.i.bf16 %v4939_v46, %v22647_v12  ;;  %v22665_v48 = vpack.i.bf16 %v4941_v1, %v4939_v46 }
 0x6c5   : > { %v20805_v51 = vunpack.i.h.bf16 %v20803_v50  ;;  %v20804_v52 = vunpack.i.l.bf16 %v20803_v50  ;;  %19635 = vmatprep.subr.bf16.mxu1 %v19606_v8  ;;  %v4560_v54 = vpop.permute.xlu1 %4559  ;;  %5167 = vrot.lane.b32.xlu1 %v22613_v2, %s26334_s2 }
 0x6c7   : > { %19105 = vmatmul.mubr.msk.f32.vlgmr.msra.gmra.mrb[22].mxu1 %vm26293_vm12, %v4479_v55  ;;  %v4290_v56 = vsel %vm3434_vm2, %v20804_v52, %v20805_v51  ;;  %5165 = vrot.lane.b32.xlu0 %v22630_v39, %s26334_s2  ;;  %vm4929_vm2 = vcmask 1042560   ;;  %v19660_v55 = vpack.c.bf16 %v4941_v1, %v4939_v46 }
 0x6c8   : > { %19637 = vmatpush3.bf16.msra.mxu1 %v19606_v8  ;;  %v4281_v17 = vpop.permute.xlu0 %4280  ;;  %19111 = vmatprep.mubr.msk.f32.mxu1 %vm26293_vm12, %v4560_v54  ;;  %v19622_v19 = vpack.c.bf16 %v4291_v15, %v4290_v56 }
 0x6c9   : > { %v4562_v20 = vpop.permute.xlu1 %4561  ;;  %5550 = vrot.lane.b32.xlu1 %v22618_v33, %s26335_s15 }
 0x6ca   : > { %19623 = vmatprep.subr.bf16.mxu0 %v19622_v19 }
 0x6cb   : > { %19625 = vmatpush3.bf16.msra.mxu0 %v19622_v19  ;;  %5169 = vrot.lane.b32.xlu0 %v22639_v58, %s26334_s2  ;;  %s26337_s2 = smov 90  }
 0x6cc   : > { %v20808_v21 = vpop.permute.xlu0 %20807 }
 0x6cd   : > { %v20810_v23 = vunpack.i.h.bf16 %v20808_v21  ;;  %v20809_v30 = vunpack.i.l.bf16 %v20808_v21  ;;  %v20813_v32 = vpop.permute.xlu1 %20812  ;;  %5552 = vrot.lane.b32.xlu1 %v22613_v2, %s26335_s15 }
 0x6ce   : > { %v20815_v13 = vunpack.i.h.bf16 %v20813_v32  ;;  %v20814_v35 = vunpack.i.l.bf16 %v20813_v32  ;;  %19091 = vmatmul.mubr.msk.f32.vlgmr.msra.gmra.mrb[16].mxu0 %vm26293_vm12, %v4281_v17 }
 0x6cf   : > { %19112 = vmatmul.mubr.msk.f32.vlgmr.msra.gmra.mrb[22].mxu1 %vm26293_vm12, %v4562_v20  ;;  %v19626_v9 = vpack.c.bf16 %v20810_v23, %v20809_v30  ;;  %5266 = vrot.lane.b32.xlu0 %v22618_v33, %s26324_s20 }
 0x6d0   : > { %v4374_v38 = vpop.permute.xlu0 %4373  ;;  %v19638_v18 = vpack.c.bf16 %v20815_v13, %v20814_v35 }
 0x6d1   : > { %19627 = vmatprep.subr.bf16.mxu0 %v19626_v9  ;;  %v4643_v37 = vpop.permute.xlu1 %4642  ;;  %19097 = vmatprep.mubr.msk.f32.mxu0 %vm26293_vm12, %v4374_v38 }
 0x6d2   : > { %19629 = vmatpush3.bf16.msra.mxu0 %v19626_v9  ;;  %19639 = vmatprep.subr.bf16.mxu1 %v19638_v18 }
 0x6d3   : > { %19641 = vmatpush3.bf16.msra.mxu1 %v19638_v18  ;;  %19118 = vmatprep.mubr.msk.f32.mxu1 %vm26293_vm12, %v4643_v37 }
 0x6d4   : > { %v4376_v34 = vpop.permute.xlu0 %4375  ;;  %19642 = vmatprep.subr.bf16.mxu0 %v21537_v29  ;;  %19132 = vmatprep.subr.mxu1 %v22278_v40 }
 0x6d5   : > { %v4645_v42 = vpop.permute.xlu1 %4644  ;;  %20820 = vrot.lane.b32.xlu1 %v20824_v7, %s26331_s30  ;;  %5268 = vrot.lane.b32.xlu0 %v22613_v2, %s26324_s20 }
 0x6d6   : > { %19098 = vmatmul.mubr.msk.f32.vlgmr.msra.gmra.mrb[16].mxu0 %vm26293_vm12, %v4376_v34 }
 0x6d7   : > { %19644 = vmatpush3.bf16.msra.mxu0 %v22502_v28  ;;  %19119 = vmatmul.mubr.msk.f32.vlgmr.msra.gmra.mrb[22].mxu1 %vm26293_vm12, %v4645_v42 }
 0x6d8   : > { %19645 = vmatprep.subr.bf16.mxu0 %v21537_v29  ;;  %19129 = vmatprep.mubr.msk.f32.mxu0 %vm21538_vm11, %v22278_v40 }
 0x6d9   : > { %19134 = vmatprep.mubr.msk.f32.mxu1 %vm21538_vm11, %v22278_v40  ;;  %20835 = vrot.lane.b32.xlu1 %v20824_v7, %s26336_s3 }
 0x6da   : > { %5363 = vrot.lane.b32.xlu0 %v4942_v22, %s26322_s18 }
 0x6dd   : > { %20840 = vrot.lane.b32.xlu1 %v20839_v47, %s26331_s30 }
 0x6de   : > { %5655 = vrot.lane.b32.xlu0 %v4942_v22, %s26336_s3 }
 0x6e1   : > { %20845 = vrot.lane.b32.xlu1 %v20839_v47, %s21556_s23 }
 0x6e2   : > { %20825 = vrot.lane.b32.xlu0 %v20824_v7, %s21556_s23 }
 0x6e5   : > { %v4739_v5 = vpop.permute.xlu0 %4738  ;;  %5643 = vrot.lane.b32.xlu1 %v22618_v33, %s26337_s2 }
 0x6e6   : > { %v4743_v4 = vpop.permute.xlu1 %4742  ;;  %20830 = vrot.lane.b32.xlu0 %v20824_v7, %s26322_s18 }
 0x6e9   : > { %20860 = vrot.lane.b32.xlu1 %v20839_v47, %s26322_s18 }
 0x6ea   : > { %v4762_v31 = vpop.permute.xlu1 %4761  ;;  %20850 = vrot.lane.b32.xlu0 %v22665_v48, %s26327_s19 }
 0x6ee   : > { %5351 = vrot.lane.b32.xlu0 %v22618_v33, %s26338_s4 }
 0x6f2   : > { %20855 = vrot.lane.b32.xlu0 %v22665_v48, %s26317_s1 }
 0x6f6   : > { %20865 = vrot.lane.b32.xlu0 %v20839_v47, %s26336_s3 }
 0x6fa   : > { %5353 = vrot.lane.b32.xlu0 %v22613_v2, %s26338_s4  ;;  %s26229_s4 = smov 95  }
 0x6fe   : > { %5645 = vrot.lane.b32.xlu0 %v22613_v2, %s26337_s2 }
 0x702   : > { %5453 = vrot.lane.b32.xlu0 %v22630_v39, %s26339_s5 }
 0x72c   : > { %v4759_v49 = vpop.permute.xlu0 %4758 }
 0x72d   : > { %v22686_v17 = vpop.permute.xlu1 %4950 }
 0x730   : > { %v22684_v56 = vpop.permute.xlu0 %4966 }
 0x732   : > { %v22691_v20 = vpop.permute.xlu1 %5163 }
 0x734   : > { %v4949_v15 = vpop.permute.xlu0 %4948 }
 0x737   : > { %v22695_v21 = vpop.permute.xlu1 %5167 }
 0x738   : > { %v22689_v19 = vpop.permute.xlu0 %5064 }
 0x73b   : > { %v22699_v30 = vpop.permute.xlu1 %5550 }
 0x73f   : > { %v22701_v13 = vpop.permute.xlu1 %5552 }
 0x747   : > { %v20821_v35 = vpop.permute.xlu1 %20820 }
 0x748   : > { %v20823_v38 = vunpack.i.h.bf16 %v20821_v35  ;;  %v20822_v18 = vunpack.i.l.bf16 %v20821_v35 }
 0x74b   : > { %v22704_v9 = vpop.permute.xlu1 %20835 }
 0x74f   : > { %v20841_v37 = vpop.permute.xlu1 %20840 }
 0x750   : > { %v20843_v34 = vunpack.i.h.bf16 %v20841_v37  ;;  %v20842_v42 = vunpack.i.l.bf16 %v20841_v37  ;;  %v20838_v37 = vunpack.i.h.bf16 %v22704_v9 }
 0x796   : > { %v19078_v57 = vpop.f32.mrb[20].mxu1 }
 0x797   : > { %v4182_v24 = vpop.f32.mrb[21].mxu1  ;;  %v4194_v28 = vmul.f32 %v19078_v57, %v22489_v62  ;;  %v4971_v57 = vsel %vm671_vm1, %v20822_v18, %v20823_v38 }
 0x798   : > { %v4193_v41 = vmul.f32 %v22489_v62, %v4182_v24  ;;  %v4970_v24 = vsel %vm671_vm1, %v20842_v42, %v20843_v34  ;;  %v20837_v34 = vunpack.i.l.bf16 %v22704_v9 }
 0x7a9   : > { %v19099_v60 = vpop.f32.mrb[16].mxu0 }
 0x7aa   : > { %v4465_v61 = vadd.f32 %v19099_v60, %v4194_v28  ;;  %v4453_v63 = vpop.f32.mrb[17].mxu0  ;;  %v19120_v6 = vpop.f32.mrb[22].mxu1  ;;  %v19648_v28 = vpack.c.bf16 %v4971_v57, %v4970_v24  ;;  %v5660_v24 = vsel %vm3134_vm3, %v20837_v34, %v20838_v37 }
 0x7ab   : > { %v4464_v8 = vadd.f32 %v4453_v63, %v4193_v41  ;;  %v4734_v40 = vmul.f32 %v19120_v6, %v22494_v16  ;;  %v4722_v0 = vpop.f32.mrb[23].mxu1 }
 0x7ac   : > { %v4733_v3 = vmul.f32 %v22494_v16, %v4722_v0  ;;  %v4836_v16 = vld [vmem:[%s26330_s7] sm:$0xf]  ;;  %s26262_s7 = smov 17  }
 0x7ad   : > { %v4736_v59 = vadd.f32 %v4734_v40, %v4465_v61  ;;  %19133 = vmatpush3.msk.msra.mxu1 %vm4840_vm15, %v4836_v16  ;;  %v20846_v61 = vpop.permute.xlu1 %20845  ;;  %vm6904_vm15 = vcmask 518144  }
 0x7ae   : > { %v4735_v53 = vadd.f32 %v4733_v3, %v4464_v8  ;;  %19649 = vmatprep.subr.bf16.mxu1 %v19648_v28  ;;  %v20848_v22 = vunpack.i.h.bf16 %v20846_v61  ;;  %v20847_v1 = vunpack.i.l.bf16 %v20846_v61  ;;  %6905 = vst.msk [vmem:[#allocation2 + $0x60] sm:$0x7] %vm6904_vm15, %v22647_v12 }
 0x7af   : > { %v4746_v10 = vadd.f32 %v4743_v4, %v4736_v59 }
 0x7b0   : > { %v4745_v26 = vadd.f32 %v4739_v5, %v4735_v53  ;;  %v5069_v7 = vsel %vm5068_vm10, %v20847_v1, %v20848_v22 }
 0x7b1   : > { %v4748_v14 = vmax.f32 %v4746_v10, 0.0  ;;  %v22712_v6 = vpop.permute.xlu1 %5643 }
 0x7b2   : > { %v4747_v27 = vmax.f32 %v4745_v26, 0.0 }
 0x7b3   : > { %4750 = vst.msk [vmem:[#allocation2 + $0xf8] sm:$0xff] %vm2074_vm9, %v4748_v14 }
 0x7b4   : > { %4749 = vst.msk [vmem:[#allocation2 + $0xa8] sm:$0xff] %vm2074_vm9, %v4747_v27 }
 0x7b5   : > { %v20861_v40 = vpop.permute.xlu1 %20860 }
 0x7b6   : > { %v20863_v53 = vunpack.i.h.bf16 %v20861_v40  ;;  %v20862_v10 = vunpack.i.l.bf16 %v20861_v40 }
 0x7b8   : > { %v5367_v26 = vsel %vm2074_vm9, %v20862_v10, %v20863_v53  ;;  %v22813_v10 = vld [vmem:[%s26332_s6 + $0x28] sm:$0xff] }
 0x7ba   : > { %v4755_v62 = vld [vmem:[#allocation2 + $0xf8] sm:$0xff] }
 0x7bb   : > { %v4754_v44 = vld [vmem:[#allocation2 + $0xa8] sm:$0xff] }
 0x7bc   : > { %v19646_v45 = vpack.c.bf16 %v4755_v62, %v4754_v44  ;;  %4930 = vst.msk [vmem:[#allocation2 + $0xa8] sm:$0x7] %vm4929_vm2, %v22647_v12  ;;  %vm21559_vm2 = vmmov 1  }
 0x7be   : > { %19647 = vmatpush3.bf16.msra.mxu0 %v19646_v45 }
 0x7bf   : > { %19661 = vmatprep.subr.bf16.mxu0 %v19660_v55 }
 0x7c1   : > { %19130 = vmatmul.mubr.msk.f32.vlgmr.msra.gmra.mrb[18].mxu0 %vm26264_vm8, %v4762_v31 }
 0x7c2   : > { %19663 = vmatpush3.bf16.msra.mxu0 %v19660_v55 }
 0x894   : > { %v4831_v50 = vpop.f32.mrb[18].mxu0 }
 0x895   : > { %v4832_v51 = vadd.f32 %v4831_v50, %v4759_v49  ;;  %v19131_v52 = vpop.f32.mrb[19].mxu0 }
 0x897   : > { %v4835_v54 = vadd.f32 %v4832_v51, %v22374_v11  ;;  %v22693_v11 = vpop.permute.xlu0 %5165 }
 0x899   : > { %19135 = vmatmul.mubr.msk.f32.vlgmr.msra.gmra.mrb[24].mxu1 %vm2074_vm9, %v4835_v54 }
 0x89a   : > { %19143 = vmatprep.mubr.msk.f32.mxu1 %vm3040_vm0, %v4949_v15  ;;  %19651 = vmatpush3.bf16.msra.mxu1 %v19648_v28 }
 0x89b   : > { %v22697_v23 = vpop.permute.xlu0 %5169 }
 0x89f   : > { %v5267_v32 = vpop.permute.xlu0 %5266 }
 0x8a0   : > { %19170 = vmatprep.mubr.msk.f32.mxu0 %vm3040_vm0, %v5267_v32 }
 0x8a3   : > { %v5269_v41 = vpop.permute.xlu0 %5268 }
 0x8a7   : > { %v22708_v60 = vpop.permute.xlu0 %5363 }
 0x8ab   : > { %v22710_v63 = vpop.permute.xlu0 %5655 }
 0x8af   : > { %v20826_v8 = vpop.permute.xlu0 %20825 }
 0x8b0   : > { %v20828_v31 = vunpack.i.h.bf16 %v20826_v8  ;;  %v20827_v16 = vunpack.i.l.bf16 %v20826_v8 }
 0x8b2   : > { %v5070_v46 = vsel %vm5068_vm10, %v20827_v16, %v20828_v31  ;;  %v4914_v31 = vand.u32 3, %v22485_v43 }
 0x8b3   : > { %v20831_v3 = vpop.permute.xlu0 %20830 }
 0x8b4   : > { %v20833_v59 = vunpack.i.h.bf16 %v20831_v3  ;;  %v20832_v5 = vunpack.i.l.bf16 %v20831_v3 }
 0x8b6   : > { %v5368_v14 = vsel %vm2074_vm9, %v20832_v5, %v20833_v59 }
 0x8b7   : > { %v20851_v27 = vpop.permute.xlu0 %20850  ;;  %v19664_v44 = vpack.c.bf16 %v5368_v14, %v5367_v26  ;;  %v22820_v26 = vld [vmem:[%s26332_s6 + $0x10] sm:$0xff] }
 0x8b8   : > { %v20853_v50 = vunpack.i.h.bf16 %v20851_v27  ;;  %v20852_v51 = vunpack.i.l.bf16 %v20851_v27 }
 0x8bb   : > { %v5352_v45 = vpop.permute.xlu0 %5351 }
 0x8bf   : > { %v20856_v49 = vpop.permute.xlu0 %20855 }
 0x8c0   : > { %v20858_v32 = vunpack.i.h.bf16 %v20856_v49  ;;  %v20857_v35 = vunpack.i.l.bf16 %v20856_v49 }
 0x8c3   : > { %v20866_v54 = vpop.permute.xlu0 %20865 }
 0x8c4   : > { %v20868_v42 = vunpack.i.h.bf16 %v20866_v54  ;;  %v20867_v57 = vunpack.i.l.bf16 %v20866_v54 }
 0x8c6   : > { %v5659_v9 = vsel %vm3134_vm3, %v20867_v57, %v20868_v42 }
 0x8c7   : > { %v5354_v38 = vpop.permute.xlu0 %5353  ;;  %v19676_v40 = vpack.c.bf16 %v5660_v24, %v5659_v9 }
 0x96c   : > { %v22714_v0 = vpop.f32.mrb[24].mxu1 }
 0x96d   : > { %4937 = vst.msk [vmem:[#allocation2 + $0xa8] sm:$0x7] %vm4931_vm6, %v22714_v0  ;;  %v19136_v4 = vpop.f32.mrb[25].mxu1 }
 0x974   : > { %v4943_v62 = vld [vmem:[#allocation2 + $0xa8] sm:$0x7] }
 0x975   : > { %5461 = vrot.lane.b32.xlu0 %v4943_v62, %s26231_s24  ;;  %4968 = vrot.lane.b32.xlu1 %v4943_v62, %s26331_s30 }
 0x976   : > { %19168 = vmatprep.subr.msk.mxu0 %vm762_vm4, %v4943_v62 }
 0x977   : > { %19169 = vmatpush3.msk.msra.mxu0 %vm762_vm4, %v4943_v62 }
 0x978   : > { %19171 = vmatmul.mubr.msk.f32.vlgmr.msra.gmra.mrb[20].mxu0 %vm3040_vm0, %v5269_v41  ;;  %19665 = vmatprep.subr.bf16.mxu0 %v19664_v44 }
 0x979   : > { %20870 = vrot.lane.b32.xlu1 %v22665_v48, %s26231_s24  ;;  %5455 = vrot.lane.b32.xlu0 %v22639_v58, %s26339_s5 }
 0x97a   : > { %19667 = vmatpush3.bf16.msra.mxu0 %v19664_v44  ;;  %19179 = vmatprep.mubr.msk.f32.mxu0 %vm3040_vm0, %v5352_v45 }
 0x97d   : > { %5066 = vrot.lane.b32.xlu1 %v4943_v62, %s21556_s23  ;;  %5845 = vperm.xlu0 %20879, %v22630_v39  }
 0x981   : > { %20875 = vrot.lane.b32.xlu1 %v22665_v48, %s26339_s5  ;;  %5866 = vrot.lane.b32.xlu0 %v22639_v58, %s26319_s26 }
 0x982   : > { %20942 = vset.pattern.permute.xlu0 %v21553_v36 }
 0x985   : > { %5177 = vrot.lane.b32.xlu1 %v4943_v62, %s26327_s19  ;;  %5965 = vrot.lane.b32.xlu0 %v22639_v58, %s26329_s22 }
 0x989   : > { %5558 = vrot.lane.b32.xlu1 %v4943_v62, %s26317_s1  ;;  %6064 = vrot.lane.b32.xlu0 %v22813_v10, %s26320_s29 }
 0x98d   : > { %5365 = vrot.lane.b32.xlu1 %v4943_v62, %s26322_s18  ;;  %6432 = vrot.lane.b32.xlu0 %v22820_v26, %s26322_s18 }
 0x991   : > { %5657 = vrot.lane.b32.xlu1 %v4943_v62, %s26336_s3 }
 0x995   : > { %5745 = vrot.lane.b32.xlu1 %v22630_v39, %s26318_s27 }
 0x999   : > { %5753 = vrot.lane.b32.xlu1 %v4943_v62, %s26339_s5 }
 0x99d   : > { %5747 = vrot.lane.b32.xlu1 %v22639_v58, %s26318_s27  ;;  %s20562_s27 = smul.u32 48, %s26455_s25 }
 0x9a1   : > { %5849 = vperm.xlu1 %20880, %v22639_v58  }
 0x9a5   : > { %5864 = vrot.lane.b32.xlu1 %v22630_v39, %s26319_s26  ;;  %s26340_s26 = smov 20  }
 0x9a6   : > { %20941 = vset.pattern.permute.xlu1 %v21553_v36  ;;  %v19652_v36 = vpack.c.bf16 %v5070_v46, %v5069_v7 }
 0x9a9   : > { %5963 = vrot.lane.b32.xlu1 %v22630_v39, %s26329_s22 }
 0x9ad   : > { %6062 = vrot.lane.b32.xlu1 %v22820_v26, %s26320_s29 }
 0x9b1   : > { %6430 = vrot.lane.b32.xlu1 %v22630_v39, %s26322_s18 }
 0x9e7   : > { %v4969_v47 = vpop.permute.xlu1 %4968 }
 0x9e8   : > { %v4972_v48 = vsel %vm671_vm1, %v22684_v56, %v4969_v47  ;;  %v19656_v56 = vpack.c.bf16 %v20853_v50, %v20852_v51 }
 0x9e9   : > { %19141 = vmatprep.subr.msk.mxu1 %vm762_vm4, %v4972_v48 }
 0x9ea   : > { %19142 = vmatpush3.msk.msra.mxu1 %vm762_vm4, %v4972_v48 }
 0x9eb   : > { %19144 = vmatmul.mubr.msk.f32.vlgmr.msra.gmra.mrb[26].mxu1 %vm3040_vm0, %v22686_v17  ;;  %19653 = vmatprep.subr.bf16.mxu1 %v19652_v36  ;;  %v20871_v52 = vpop.permute.xlu1 %20870  ;;  %v5171_v17 = vsel %vm3237_vm5, %v22691_v20, %v22693_v11  ;;  %v5646_v20 = vpop.permute.xlu0 %5645 }
 0x9ec   : > { %19655 = vmatpush3.bf16.msra.mxu1 %v19652_v36  ;;  %19152 = vmatprep.mubr.msk.f32.mxu1 %vm3040_vm0, %v22618_v33  ;;  %v20873_v28 = vunpack.i.h.bf16 %v20871_v52  ;;  %v20872_v41 = vunpack.i.l.bf16 %v20871_v52 }
 0x9ef   : > { %v5067_v55 = vpop.permute.xlu1 %5066  ;;  %v5454_v61 = vpop.permute.xlu0 %5453 }
 0x9f0   : > { %v5071_v15 = vsel %vm5068_vm10, %v22689_v19, %v5067_v55  ;;  %v19672_v19 = vpack.c.bf16 %v20858_v32, %v20857_v35 }
 0x9f1   : > { %19150 = vmatprep.subr.msk.mxu1 %vm762_vm4, %v5071_v15 }
 0x9f2   : > { %19151 = vmatpush3.msk.msra.mxu1 %vm762_vm4, %v5071_v15 }
 0x9f3   : > { %19153 = vmatmul.mubr.msk.f32.vlgmr.msra.gmra.mrb[26].mxu1 %vm3040_vm0, %v22613_v2  ;;  %19657 = vmatprep.subr.bf16.mxu1 %v19656_v56  ;;  %v20876_v33 = vpop.permute.xlu1 %20875  ;;  %v5172_v2 = vsel %vm3237_vm5, %v22695_v21, %v22697_v23  ;;  %vm4918_vm5 = vcmp.ne.s32.totalorder %v4914_v31, 3 }
 0x9f4   : > { %19659 = vmatpush3.bf16.msra.mxu1 %v19656_v56  ;;  %19161 = vmatprep.mubr.msk.f32.mxu1 %vm3040_vm0, %v5171_v17  ;;  %v20878_v23 = vunpack.i.h.bf16 %v20876_v33  ;;  %v20877_v3 = vunpack.i.l.bf16 %v20876_v33  ;;  %v22846_v54 = vsel %vm4918_vm5, 1.0, %v22647_v12 }
 0x9f7   : > { %v5178_v18 = vpop.permute.xlu1 %5177 }
 0x9f8   : > { %19159 = vmatprep.subr.msk.mxu1 %vm762_vm4, %v5178_v18 }
 0x9f9   : > { %19160 = vmatpush3.msk.msra.mxu1 %vm762_vm4, %v5178_v18 }
 0x9fa   : > { %19673 = vmatprep.subr.bf16.mxu1 %v19672_v19 }
 0x9fb   : > { %19162 = vmatmul.mubr.msk.f32.vlgmr.msra.gmra.mrb[26].mxu1 %vm3040_vm0, %v5172_v2  ;;  %v5559_v11 = vpop.permute.xlu1 %5558 }
 0x9fc   : > { %19675 = vmatpush3.bf16.msra.mxu1 %v19672_v19  ;;  %19197 = vmatprep.mubr.msk.f32.mxu1 %vm3040_vm0, %v22699_v30  ;;  %v19668_v30 = vpack.c.bf16 %v20873_v28, %v20872_v41 }
 0x9fd   : > { %19195 = vmatprep.subr.msk.mxu1 %vm762_vm4, %v5559_v11 }
 0x9ff   : > { %v5366_v8 = vpop.permute.xlu1 %5365 }
 0xa00   : > { %19196 = vmatpush3.msk.msra.mxu1 %vm762_vm4, %v5559_v11  ;;  %v5369_v21 = vsel %vm2074_vm9, %v22708_v60, %v5366_v8  ;;  %v5462_v60 = vpop.permute.xlu0 %5461 }
 0xa01   : > { %19198 = vmatmul.mubr.msk.f32.vlgmr.msra.gmra.mrb[28].mxu1 %vm3040_vm0, %v22701_v13  ;;  %19677 = vmatprep.subr.bf16.mxu1 %v19676_v40  ;;  %v19680_v13 = vpack.c.bf16 %v20878_v23, %v20877_v3 }
 0xa02   : > { %19177 = vmatprep.subr.msk.mxu0 %vm762_vm4, %v5369_v21  ;;  %19679 = vmatpush3.bf16.msra.mxu1 %v19676_v40 }
 0xa03   : > { %19206 = vmatprep.mubr.msk.f32.mxu1 %vm3040_vm0, %v22712_v6  ;;  %19178 = vmatpush3.msk.msra.mxu0 %vm762_vm4, %v5369_v21  ;;  %v5658_v4 = vpop.permute.xlu1 %5657 }
 0xa04   : > { %v5661_v59 = vsel %vm3134_vm3, %v22710_v63, %v5658_v4  ;;  %19180 = vmatmul.mubr.msk.f32.vlgmr.msra.gmra.mrb[20].mxu0 %vm3040_vm0, %v5354_v38  ;;  %19669 = vmatprep.subr.bf16.mxu0 %v19668_v30  ;;  %v5456_v63 = vpop.permute.xlu0 %5455 }
 0xa05   : > { %19671 = vmatpush3.bf16.msra.mxu0 %v19668_v30  ;;  %19204 = vmatprep.subr.msk.mxu1 %vm762_vm4, %v5661_v59 }
 0xa06   : > { %19186 = vmatprep.subr.msk.mxu0 %vm762_vm4, %v5462_v60  ;;  %19205 = vmatpush3.msk.msra.mxu1 %vm762_vm4, %v5661_v59 }
 0xa07   : > { %v5746_v5 = vpop.permute.xlu1 %5745  ;;  %19681 = vmatprep.subr.bf16.mxu1 %v19680_v13  ;;  %19188 = vmatprep.mubr.msk.f32.mxu0 %vm3040_vm0, %v5454_v61 }
 0xa08   : > { %v5846_v45 = vpop.permute.xlu0 %5845 }
 0xa09   : > { %19187 = vmatpush3.msk.msra.mxu0 %vm762_vm4, %v5462_v60  ;;  %19207 = vmatmul.mubr.msk.f32.vlgmr.msra.gmra.mrb[28].mxu1 %vm3040_vm0, %v5646_v20 }
 0xa0a   : > { %19683 = vmatpush3.bf16.msra.mxu1 %v19680_v13  ;;  %19215 = vmatprep.mubr.msk.f32.mxu1 %vm3040_vm0, %v5746_v5 }
 0xa0b   : > { %v5754_v6 = vpop.permute.xlu1 %5753 }
 0xa0c   : > { %19189 = vmatmul.mubr.msk.f32.vlgmr.msra.gmra.mrb[20].mxu0 %vm3040_vm0, %v5456_v63  ;;  %19213 = vmatprep.subr.msk.mxu1 %vm762_vm4, %v5754_v6  ;;  %v22830_v16 = vpop.permute.xlu0 %5866 }
 0xa0e   : > { %19214 = vmatpush3.msk.msra.mxu1 %vm762_vm4, %v5754_v6 }
 0xa0f   : > { %v5748_v53 = vpop.permute.xlu1 %5747 }
 0xa10   : > { %v22832_v22 = vpop.permute.xlu0 %5965 }
 0xa11   : > { %19216 = vmatmul.mubr.msk.f32.vlgmr.msra.gmra.mrb[28].mxu1 %vm3040_vm0, %v5748_v53  ;;  %vm4915_vm0 = vcmp.ne.s32.totalorder %v4914_v31, 0 }
 0xa12   : > { %v22835_v1 = vsel %vm4915_vm0, 1.0, %v22647_v12  ;;  %vm7513_vm0 = vcmask 56320  }
 0xa14   : > { %v22841_v50 = vpop.permute.xlu0 %6064 }
 0xa18   : > { %v6433_v56 = vpop.permute.xlu0 %6432 }
 0xa20   : > { %v5850_v14 = vpop.permute.xlu1 %5849 }
 0xa24   : > { %v5865_v27 = vpop.permute.xlu1 %5864 }
 0xa25   : > { %19222 = vmatprep.mubr.msk.f32.mxu0 %vm26293_vm12, %v5865_v27 }
 0xa28   : > { %v22837_v7 = vpop.permute.xlu1 %5963 }
 0xa2c   : > { %v22843_v52 = vpop.permute.xlu1 %6062 }
 0xa30   : > { %v6431_v35 = vpop.permute.xlu1 %6430 }
 0xa31   : > { %v6438_v38 = vsel %vm2074_vm9, %v6431_v35, %v6433_v56 }
 0xa32   : > { %19264 = vmatprep.mubr.msk.f32.mxu1 %vm26293_vm12, %v6438_v38 }
 0xace   : > { %v19163_v62 = vpop.f32.mrb[26].mxu1 }
 0xacf   : > { %v5253_v44 = vpop.f32.mrb[27].mxu1  ;;  %v5265_v46 = vmul.f32 %v19163_v62, %v22835_v1 }
 0xad0   : > { %v5264_v47 = vmul.f32 %v22835_v1, %v5253_v44 }
 0xadf   : > { %v19190_v48 = vpop.f32.mrb[20].mxu0 }
 0xae0   : > { %v5549_v49 = vadd.f32 %v19190_v48, %v5265_v46  ;;  %v5537_v36 = vpop.f32.mrb[21].mxu0 }
 0xae1   : > { %v5548_v51 = vadd.f32 %v5537_v36, %v5264_v47 }
 0xae4   : > { %v19217_v55 = vpop.f32.mrb[28].mxu1 }
 0xae5   : > { %v5841_v15 = vmul.f32 %v19217_v55, %v22846_v54  ;;  %v5829_v32 = vpop.f32.mrb[29].mxu1 }
 0xae6   : > { %v5840_v17 = vmul.f32 %v22846_v54, %v5829_v32 }
 0xae7   : > { %v5843_v33 = vadd.f32 %v5841_v15, %v5549_v49 }
 0xae8   : > { %v5842_v19 = vadd.f32 %v5840_v17, %v5548_v51 }
 0xae9   : > { %v5853_v18 = vadd.f32 %v5850_v14, %v5843_v33 }
 0xaea   : > { %v5852_v37 = vadd.f32 %v5846_v45, %v5842_v19 }
 0xaeb   : > { %5855 = vst.msk [vmem:[#allocation2 + $0x58] sm:$0xff] %vm26293_vm12, %v5853_v18 }
 0xaec   : > { %5854 = vst.msk [vmem:[#allocation2 + $0x8] sm:$0xff] %vm26293_vm12, %v5852_v37 }
 0xaf2   : > { %v22854_v34 = vld [vmem:[#allocation2 + $0x58] sm:$0xff] }
 0xaf3   : > { %v20881_v42 = vpack.i.bf16 %v22854_v34, %v22647_v12  ;;  %v22858_v57 = vld [vmem:[#allocation2 + $0x8] sm:$0xff] }
 0xaf4   : > { %v20891_v20 = vpack.i.bf16 %v22858_v57, %v22647_v12  ;;  %v20906_v2 = vpack.i.bf16 %v22854_v34, %v22858_v57  ;;  %6900 = vst.msk [vmem:[#allocation2 + $0x8] sm:$0xff] %vm6899_vm14, %v22647_v12  ;;  %v19696_v46 = vpack.c.bf16 %v22854_v34, %v22858_v57 }
 0xaf5   : > { %20882 = vrot.lane.b32.xlu0 %v20881_v42, %s26331_s30 }
 0xaf6   : > { %20892 = vrot.lane.b32.xlu1 %v20891_v20, %s26331_s30 }
 0xaf9   : > { %20887 = vrot.lane.b32.xlu0 %v20881_v42, %s21556_s23 }
 0xafa   : > { %6155 = vrot.lane.b32.xlu1 %v22630_v39, %s26340_s26 }
 0xafd   : > { %6434 = vrot.lane.b32.xlu0 %v22639_v58, %s26322_s18 }
 0xafe   : > { %20897 = vrot.lane.b32.xlu1 %v20891_v20, %s21556_s23  ;;  %s26225_s23 = smov 73  }
 0xb01   : > { %6157 = vrot.lane.b32.xlu0 %v22639_v58, %s26340_s26 }
 0xb02   : > { %6436 = vrot.lane.b32.xlu1 %v22813_v10, %s26322_s18 }
 0xb05   : > { %20902 = vrot.lane.b32.xlu0 %v20881_v42, %s26322_s18 }
 0xb06   : > { %20907 = vrot.lane.b32.xlu1 %v20906_v2, %s26327_s19  ;;  %s17871_s19 = sshll.u32 %s26455_s25, 3 }
 0xb07   : > { %s647_s2 = scalar_lea.vmem %s26341_s8, %s17871_s19  ;;  %s21560_s19 = smov 9  }
 0xb08   : > { %v6906_v11 = vld [vmem:[%s647_s2] sm:$0xff]  ;;  %s21563_s2 = smov 7   ;;  %s26362_s8 = smov 108  }
 0xb09   : > { %20912 = vrot.lane.b32.xlu0 %v20906_v2, %s26317_s1  ;;  %6907 = vst.msk [vmem:[#allocation2 + $0x8] sm:$0xff] %vm2898_vm13, %v6906_v11 }
 0xb0a   : > { %6238 = vrot.lane.b32.xlu1 %v22630_v39, %s26323_s0 }
 0xb0d   : > { %20917 = vrot.lane.b32.xlu0 %v20881_v42, %s26336_s3 }
 0xb0e   : > { %20922 = vrot.lane.b32.xlu1 %v20891_v20, %s26322_s18 }
 0xb11   : > { %6525 = vrot.lane.b32.xlu0 %v22630_v39, %s26324_s20  ;;  %v6729_v39 = vld [vmem:[%s26332_s6 + $0x10] sm:$0x7]  ;;  %s26353_s6 = smov 95  }
 0xb12   : > { %20927 = vrot.lane.b32.xlu1 %v20891_v20, %s26336_s3  ;;  %s26342_s3 = smov 67  }
 0xb15   : > { %6527 = vrot.lane.b32.xlu0 %v22639_v58, %s26324_s20  ;;  %s21564_s20 = smov 121  }
 0xb16   : > { %6240 = vrot.lane.b32.xlu1 %v22639_v58, %s26323_s0  ;;  %s22973_s0 = scalar_lea.vmem %s26344_s17, %s20562_s27  ;;  %s26227_s27 = smov 62  }
 0xb19   : > { %20937 = vrot.lane.b32.xlu0 %v20906_v2, %s26339_s5  ;;  %s26233_s5 = smov 106  }
 0xb1a   : > { %20932 = vrot.lane.b32.xlu1 %v20906_v2, %s26231_s24  ;;  %s26241_s24 = smov 119  }
 0xb1d   : > { %6620 = vrot.lane.b32.xlu0 %v22820_v26, %s26329_s22 }
 0xb1e   : > { %6333 = vrot.lane.b32.xlu1 %v22820_v26, %s26328_s21 }
 0xb21   : > { %6622 = vrot.lane.b32.xlu0 %v22813_v10, %s26329_s22 }
 0xb22   : > { %6335 = vrot.lane.b32.xlu1 %v22813_v10, %s26328_s21 }
 0xb25   : > { %6720 = vperm.xlu0 %20942, %v22813_v10  }
 0xb26   : > { %6716 = vperm.xlu1 %20941, %v22820_v26  }
 0xb2a   : > { %6739 = vrot.lane.b32.xlu1 %v6729_v39, %s26342_s3  ;;  %s21565_s3 = smov 8  }
 0xb2b   : > { %20943 = vset.pattern.permute.xlu1 %v21555_v25 }
 0xb2e   : > { %6736 = vperm.xlu1 %20943, %v6729_v39  }
 0xb67   : > { %v20883_v58 = vpop.permute.xlu0 %20882 }
 0xb68   : > { %v20885_v9 = vunpack.i.h.bf16 %v20883_v58  ;;  %v20884_v24 = vunpack.i.l.bf16 %v20883_v58  ;;  %v20893_v28 = vpop.permute.xlu1 %20892 }
 0xb69   : > { %v20895_v41 = vunpack.i.h.bf16 %v20893_v28  ;;  %v20894_v61 = vunpack.i.l.bf16 %v20893_v28 }
 0xb6a   : > { %v5881_v8 = vsel %vm671_vm1, %v20884_v24, %v20885_v9 }
 0xb6b   : > { %v20888_v40 = vpop.permute.xlu0 %20887  ;;  %v5880_v21 = vsel %vm671_vm1, %v20894_v61, %v20895_v41 }
 0xb6c   : > { %v6156_v23 = vpop.permute.xlu1 %6155  ;;  %v19684_v3 = vpack.c.bf16 %v5881_v8, %v5880_v21  ;;  %v20890_v30 = vunpack.i.h.bf16 %v20888_v40  ;;  %v20889_v4 = vunpack.i.l.bf16 %v20888_v40 }
 0xb6e   : > { %19685 = vmatprep.subr.bf16.mxu0 %v19684_v3  ;;  %v5976_v6 = vsel %vm5068_vm10, %v20889_v4, %v20890_v30 }
 0xb6f   : > { %v6435_v59 = vpop.permute.xlu0 %6434  ;;  %19687 = vmatpush3.bf16.msra.mxu0 %v19684_v3 }
 0xb70   : > { %v20898_v25 = vpop.permute.xlu1 %20897 }
 0xb71   : > { %v20900_v60 = vunpack.i.h.bf16 %v20898_v25  ;;  %v20899_v13 = vunpack.i.l.bf16 %v20898_v25 }
 0xb72   : > { %19223 = vmatmul.mubr.msk.f32.vlgmr.msra.gmra.mrb[22].mxu0 %vm26293_vm12, %v22830_v16 }
 0xb73   : > { %v6158_v5 = vpop.permute.xlu0 %6157  ;;  %19229 = vmatprep.mubr.msk.f32.mxu0 %vm26293_vm12, %v22837_v7  ;;  %v5975_v63 = vsel %vm5068_vm10, %v20899_v13, %v20900_v60  ;;  %vm7261_vm10 = vcmask 64512  }
 0xb74   : > { %v6437_v53 = vpop.permute.xlu1 %6436  ;;  %v19688_v10 = vpack.c.bf16 %v5976_v6, %v5975_v63 }
 0xb76   : > { %19689 = vmatprep.subr.bf16.mxu0 %v19688_v10 }
 0xb77   : > { %v20903_v26 = vpop.permute.xlu0 %20902  ;;  %19691 = vmatpush3.bf16.msra.mxu0 %v19688_v10 }
 0xb78   : > { %v20908_v14 = vpop.permute.xlu1 %20907  ;;  %v20905_v48 = vunpack.i.h.bf16 %v20903_v26  ;;  %v20904_v49 = vunpack.i.l.bf16 %v20903_v26 }
 0xb79   : > { %v20910_v27 = vunpack.i.h.bf16 %v20908_v14  ;;  %v20909_v62 = vunpack.i.l.bf16 %v20908_v14 }
 0xb7a   : > { %19230 = vmatmul.mubr.msk.f32.vlgmr.msra.gmra.mrb[22].mxu0 %vm26293_vm12, %v22832_v22  ;;  %v6251_v17 = vsel %vm2074_vm9, %v20904_v49, %v20905_v48 }
 0xb7b   : > { %v20913_v44 = vpop.permute.xlu0 %20912  ;;  %19236 = vmatprep.mubr.msk.f32.mxu0 %vm26293_vm12, %v22843_v52  ;;  %v19692_v45 = vpack.c.bf16 %v20910_v27, %v20909_v62  ;;  %v6439_v52 = vsel %vm2074_vm9, %v6435_v59, %v6437_v53 }
 0xb7c   : > { %v20915_v31 = vunpack.i.h.bf16 %v20913_v44  ;;  %v20914_v16 = vunpack.i.l.bf16 %v20913_v44  ;;  %v6239_v7 = vpop.permute.xlu1 %6238 }
 0xb7d   : > { %19693 = vmatprep.subr.bf16.mxu0 %v19692_v45 }
 0xb7e   : > { %19695 = vmatpush3.bf16.msra.mxu0 %v19692_v45  ;;  %v19708_v47 = vpack.c.bf16 %v20915_v31, %v20914_v16 }
 0xb7f   : > { %v20918_v36 = vpop.permute.xlu0 %20917  ;;  %19697 = vmatprep.subr.bf16.mxu0 %v19696_v46 }
 0xb80   : > { %19709 = vmatprep.subr.bf16.mxu1 %v19708_v47  ;;  %v20923_v22 = vpop.permute.xlu1 %20922  ;;  %v20920_v56 = vunpack.i.h.bf16 %v20918_v36  ;;  %v20919_v15 = vunpack.i.l.bf16 %v20918_v36 }
 0xb81   : > { %v20925_v51 = vunpack.i.h.bf16 %v20923_v22  ;;  %v20924_v55 = vunpack.i.l.bf16 %v20923_v22  ;;  %19711 = vmatpush3.bf16.msra.mxu1 %v19708_v47 }
 0xb82   : > { %19237 = vmatmul.mubr.msk.f32.vlgmr.msra.gmra.mrb[22].mxu0 %vm26293_vm12, %v22841_v50  ;;  %v6538_v34 = vsel %vm3134_vm3, %v20919_v15, %v20920_v56 }
 0xb83   : > { %19699 = vmatpush3.bf16.msra.mxu0 %v19696_v46  ;;  %v6526_v32 = vpop.permute.xlu0 %6525  ;;  %19243 = vmatprep.mubr.msk.f32.mxu0 %vm26293_vm12, %v6156_v23  ;;  %v6250_v35 = vsel %vm2074_vm9, %v20924_v55, %v20925_v51  ;;  %v6910_v55 = vld [vmem:[#allocation2 + $0x8] sm:$0xff] }
 0xb84   : > { %19265 = vmatmul.mubr.msk.f32.vlgmr.msra.gmra.mrb[30].mxu1 %vm26293_vm12, %v6439_v52  ;;  %v20928_v38 = vpop.permute.xlu1 %20927  ;;  %v19700_v33 = vpack.c.bf16 %v6251_v17, %v6250_v35  ;;  %v6911_v52 = vld [vmem:[#allocation2 + $0x50] sm:$0x7]  ;;  %v20944_v56 = vpack.i.bf16 %v6910_v55, %v22647_v12 }
 0xb85   : > { %v20930_v19 = vunpack.i.h.bf16 %v20928_v38  ;;  %v20929_v18 = vunpack.i.l.bf16 %v20928_v38  ;;  %19271 = vmatprep.mubr.msk.f32.mxu1 %vm26293_vm12, %v6526_v32  ;;  %8598 = vst [vmem:[#allocation2 + $0x50] sm:$0x7] %v22647_v12 }
 0xb86   : > { %19244 = vmatmul.mubr.msk.f32.vlgmr.msra.gmra.mrb[24].mxu0 %vm26293_vm12, %v6158_v5  ;;  %19701 = vmatprep.subr.bf16.mxu0 %v19700_v33 }
 0xb87   : > { %v6528_v50 = vpop.permute.xlu0 %6527  ;;  %19703 = vmatpush3.bf16.msra.mxu0 %v19700_v33  ;;  %19250 = vmatprep.mubr.msk.f32.mxu0 %vm26293_vm12, %v6239_v7  ;;  %v6537_v37 = vsel %vm3134_vm3, %v20929_v18, %v20930_v19  ;;  %vm6902_vm3 = vcmask 1042944   ;;  %v21571_v18 = vmov 99  }
 0xb88   : > { %v6241_v42 = vpop.permute.xlu1 %6240  ;;  %v19712_v57 = vpack.c.bf16 %v6538_v34, %v6537_v37  ;;  %6903 = vst.msk [vmem:[#allocation2 + $0x58] sm:$0x7] %vm6902_vm3, %v22647_v12  ;;  %20945 = vrot.lane.b32.xlu0 %v20944_v56, %s26331_s30  ;;  %vm9220_vm3 = vcmask 1039360  }
 0xb89   : > { %21004 = vset.pattern.permute.xlu0 %v21571_v18 }
 0xb8a   : > { %19713 = vmatprep.subr.bf16.mxu1 %v19712_v57 }
 0xb8b   : > { %v20938_v20 = vpop.permute.xlu0 %20937  ;;  %19715 = vmatpush3.bf16.msra.mxu1 %v19712_v57 }
 0xb8c   : > { %v20940_v2 = vunpack.i.h.bf16 %v20938_v20  ;;  %v20939_v11 = vunpack.i.l.bf16 %v20938_v20  ;;  %v20933_v39 = vpop.permute.xlu1 %20932 }
 0xb8d   : > { %v20935_v58 = vunpack.i.h.bf16 %v20933_v39  ;;  %v20934_v9 = vunpack.i.l.bf16 %v20933_v39 }
 0xb8e   : > { %19251 = vmatmul.mubr.msk.f32.vlgmr.msra.gmra.mrb[24].mxu0 %vm26293_vm12, %v6241_v42  ;;  %19272 = vmatmul.mubr.msk.f32.vlgmr.msra.gmra.mrb[30].mxu1 %vm26293_vm12, %v6528_v50  ;;  %v19716_v24 = vpack.c.bf16 %v20940_v2, %v20939_v11 }
 0xb8f   : > { %v6621_v28 = vpop.permute.xlu0 %6620  ;;  %v19704_v41 = vpack.c.bf16 %v20935_v58, %v20934_v9 }
 0xb90   : > { %19717 = vmatprep.subr.bf16.mxu1 %v19716_v24  ;;  %v6334_v61 = vpop.permute.xlu1 %6333  ;;  %19278 = vmatprep.mubr.msk.f32.mxu1 %vm26293_vm12, %v6621_v28 }
 0xb91   : > { %19705 = vmatprep.subr.bf16.mxu0 %v19704_v41  ;;  %19719 = vmatpush3.bf16.msra.mxu1 %v19716_v24 }
 0xb92   : > { %19707 = vmatpush3.bf16.msra.mxu0 %v19704_v41  ;;  %19257 = vmatprep.mubr.msk.f32.mxu0 %vm26293_vm12, %v6334_v61 }
 0xb93   : > { %v6623_v8 = vpop.permute.xlu0 %6622  ;;  %19720 = vmatprep.subr.bf16.mxu0 %v21537_v29  ;;  %19726 = vmatprep.subr.bf16.mxu1 %v21537_v29 }
 0xb94   : > { %v6336_v40 = vpop.permute.xlu1 %6335 }
 0xb96   : > { %19258 = vmatmul.mubr.msk.f32.vlgmr.msra.gmra.mrb[24].mxu0 %vm26293_vm12, %v6336_v40  ;;  %19279 = vmatmul.mubr.msk.f32.vlgmr.msra.gmra.mrb[30].mxu1 %vm26293_vm12, %v6623_v8 }
 0xb97   : > { %19722 = vmatpush3.bf16.msra.mxu0 %v19696_v46  ;;  %19289 = vmatprep.mubr.msk.f32.mxu0 %vm21538_vm11, %v22647_v12  ;;  %v6816_v46 = vld [vmem:[%s26343_s10 + $0x8] sm:$0xff] }
 0xb98   : > { %19723 = vmatprep.subr.bf16.mxu0 %v21537_v29  ;;  %19296 = vmatprep.mubr.msk.f32.mxu1 %vm21538_vm11, %v22647_v12 }
 0xba4   : > { %v6721_v53 = vpop.permute.xlu0 %6720 }
 0xba5   : > { %v6717_v26 = vpop.permute.xlu1 %6716 }
 0xba9   : > { %v6740_v7 = vpop.permute.xlu1 %6739 }
 0xbad   : > { %v6737_v48 = vpop.permute.xlu1 %6736 }
 0xbfa   : > { %v20946_v50 = vpop.permute.xlu0 %20945 }
 0xbfb   : > { %v20948_v34 = vunpack.i.h.bf16 %v20946_v50  ;;  %v20947_v42 = vunpack.i.l.bf16 %v20946_v50 }
 0xbfd   : > { %v6929_v2 = vsel %vm671_vm1, %v20947_v42, %v20948_v34  ;;  %v7684_v42 = vld [vmem:[%s26345_s9 + $0x8] sm:$0xff] }
 0xc55   : > { %v19238_v21 = vpop.f32.mrb[22].mxu0 }
 0xc56   : > { %v6142_v23 = vpop.f32.mrb[23].mxu0  ;;  %v6154_v3 = vmul.f32 %v19238_v21, %v22835_v1 }
 0xc57   : > { %v6153_v30 = vmul.f32 %v22835_v1, %v6142_v23 }
 0xc69   : > { %v19259_v4 = vpop.f32.mrb[24].mxu0  ;;  %v19280_v59 = vpop.f32.mrb[30].mxu1 }
 0xc6a   : > { %v6425_v25 = vadd.f32 %v19259_v4, %v6154_v3  ;;  %v6712_v60 = vmul.f32 %v19280_v59, %v22846_v54  ;;  %v6413_v13 = vpop.f32.mrb[25].mxu0  ;;  %v6700_v5 = vpop.f32.mrb[31].mxu1  ;;  %v23049_v4 = vld [vmem:[#allocation2 + $0xf0] sm:$0xff] }
 0xc6b   : > { %v6424_v63 = vadd.f32 %v6413_v13, %v6153_v30  ;;  %v6711_v6 = vmul.f32 %v22846_v54, %v6700_v5  ;;  %v6815_v54 = vld [vmem:[%s26343_s10] sm:$0xff]  ;;  %s26366_s10 = smov 16  }
 0xc6c   : > { %v6714_v10 = vadd.f32 %v6712_v60, %v6425_v25  ;;  %v19727_v47 = vpack.c.bf16 %v6816_v46, %v6815_v54 }
 0xc6d   : > { %v6713_v14 = vadd.f32 %v6711_v6, %v6424_v63 }
 0xc6e   : > { %v6724_v27 = vadd.f32 %v6721_v53, %v6714_v10  ;;  %19728 = vmatpush3.bf16.msra.mxu1 %v19727_v47 }
 0xc6f   : > { %v6723_v62 = vadd.f32 %v6717_v26, %v6713_v14  ;;  %19741 = vmatprep.subr.bf16.mxu1 %v21537_v29 }
 0xc70   : > { %v6726_v44 = vmax.f32 %v6724_v27, 0.0 }
 0xc71   : > { %v6725_v45 = vmax.f32 %v6723_v62, 0.0 }
 0xc72   : > { %6728 = vst.msk [vmem:[#allocation2 + $0xf8] sm:$0xff] %vm26293_vm12, %v6726_v44 }
 0xc73   : > { %6727 = vst.msk [vmem:[#allocation2 + $0xa8] sm:$0xff] %vm26293_vm12, %v6725_v45 }
 0xc79   : > { %v6733_v1 = vld [vmem:[#allocation2 + $0xf8] sm:$0xff] }
 0xc7a   : > { %v6732_v31 = vld [vmem:[#allocation2 + $0xa8] sm:$0xff] }
 0xc7b   : > { %v19724_v16 = vpack.c.bf16 %v6733_v1, %v6732_v31 }
 0xc7d   : > { %19725 = vmatpush3.bf16.msra.mxu0 %v19724_v16 }
 0xc7e   : > { %19729 = vmatprep.subr.bf16.mxu0 %v21537_v29 }
 0xc80   : > { %19290 = vmatmul.mubr.msk.f32.vlgmr.msra.gmra.mrb[26].mxu0 %vm26264_vm8, %v6740_v7 }
 0xc81   : > { %19303 = vmatprep.mubr.msk.f32.mxu0 %vm21538_vm11, %v22647_v12 }
 0xd53   : > { %v6809_v49 = vpop.f32.mrb[26].mxu0 }
 0xd54   : > { %v6810_v36 = vadd.f32 %v6809_v49, %v6737_v48  ;;  %v19291_v22 = vpop.f32.mrb[27].mxu0 }
 0xd56   : > { %v6813_v51 = vadd.f32 %v6810_v36, %v22714_v0  ;;  %v22990_v0 = vld [vmem:[%s26345_s9] sm:$0xff] }
 0xd57   : > { %6915 = vrot.lane.b32.xlu0 %v22990_v0, %s26229_s4  ;;  %s26237_s4 = smov 51  }
 0xd58   : > { %6814 = vst.msk [vmem:[%s22973_s0] sm:$0x7] %vm4931_vm6, %v6813_v51  ;;  %19297 = vmatmul.mubr.msk.f32.vlgmr.msra.gmra.mrb[32].mxu1 %vm26293_vm12, %v6813_v51  ;;  %vm22999_vm6 = vmpackc.low %vm762_vm4, %vm21559_vm2  ;;  %vm7014_vm4 = vcmask 72704   ;;  %vm9118_vm2 = vcmask 916480  }
 0xd59   : > { %19324 = vmatprep.mubr.msk.f32.mxu1 %vm21538_vm11, %v22647_v12 }
 0xdc9   : > { %v6916_v37 = vpop.permute.xlu0 %6915 }
 0xe2b   : > { %v22994_v15 = vpop.f32.mrb[32].mxu1 }
 0xe2c   : > { %6908 = vst.msk [vmem:[#allocation2 + $0x58] sm:$0x7] %vm6904_vm15, %v22994_v15  ;;  %v19298_v32 = vpop.f32.mrb[33].mxu1 }
 0xe33   : > { %v6912_v35 = vld [vmem:[#allocation2 + $0x58] sm:$0x7] }
 0xe34   : > { %v20959_v17 = vpack.i.bf16 %v6912_v35, %v6911_v52  ;;  %v19742_v33 = vpack.c.bf16 %v6912_v35, %v6910_v55  ;;  %v20979_v19 = vpack.i.bf16 %v6912_v35, %v6910_v55 }
 0xe36   : > { %20960 = vrot.lane.b32.xlu0 %v20959_v17, %s21560_s19  ;;  %20950 = vrot.lane.b32.xlu1 %v20959_v17, %s26331_s30 }
 0xe37   : > { %19744 = vmatpush3.bf16.msk.msra.mxu1 %vm22999_vm6, %v19742_v33 }
 0xe38   : > { %19745 = vmatprep.subr.bf16.mxu1 %v21537_v29 }
 0xe3a   : > { %7422 = vrot.lane.b32.xlu0 %v22990_v0, %s26225_s23  ;;  %20955 = vrot.lane.b32.xlu1 %v20944_v56, %s21560_s19  ;;  %s26239_s23 = smov 117  }
 0xe3e   : > { %20980 = vrot.lane.b32.xlu0 %v20979_v19, %s26317_s1  ;;  %7092 = vrot.lane.b32.xlu1 %v22990_v0, %s26227_s27  ;;  %s21568_s27 = smov 120  }
 0xe42   : > { %20985 = vrot.lane.b32.xlu0 %v20959_v17, %s21563_s2  ;;  %20965 = vrot.lane.b32.xlu1 %v20979_v19, %s21564_s20 }
 0xe46   : > { %20990 = vrot.lane.b32.xlu0 %v20959_v17, %s21565_s3  ;;  %20970 = vrot.lane.b32.xlu1 %v20944_v56, %s21563_s2 }
 0xe4a   : > { %20975 = vrot.lane.b32.xlu1 %v20944_v56, %s21565_s3  ;;  %7503 = vrot.lane.b32.xlu0 %v22990_v0, %s26233_s5  ;;  %s26235_s5 = smov 40  }
 0xe4e   : > { %7175 = vrot.lane.b32.xlu1 %v22990_v0, %s26329_s22  ;;  %7251 = vrot.lane.b32.xlu0 %v22990_v0, %s26239_s23  ;;  %s26348_s23 = smov 119  }
 0xe52   : > { %20995 = vrot.lane.b32.xlu1 %v20979_v19, %s21568_s27  ;;  %7339 = vrot.lane.b32.xlu0 %v22990_v0, %s26237_s4  ;;  %s26246_s4 = smov 12  }
 0xe56   : > { %21000 = vrot.lane.b32.xlu1 %v20979_v19, %s26241_s24  ;;  %7676 = vperm.xlu0 %21004, %v22990_v0   ;;  %s26248_s24 = smov 108  }
 0xe5a   : > { %7591 = vrot.lane.b32.xlu1 %v22990_v0, %s26235_s5  ;;  %7687 = vrot.lane.b32.xlu0 %v22990_v0, %s26322_s18  ;;  %s26250_s5 = smov 28  }
 0xe5e   : > { %7694 = vrot.lane.b32.xlu1 %v22647_v12, %s26331_s30  ;;  %7774 = vrot.lane.b32.xlu0 %v22647_v12, %s21560_s19 }
 0xe62   : > { %7772 = vrot.lane.b32.xlu0 %v22990_v0, %s26250_s5  ;;  %s26258_s5 = smov 112  }
 0xe66   : > { %7852 = vrot.lane.b32.xlu0 %v7684_v42, %s26248_s24  ;;  %s26357_s24 = smov 106  }
 0xea8   : > { %v20961_v57 = vpop.permute.xlu0 %20960  ;;  %v20951_v20 = vpop.permute.xlu1 %20950 }
 0xea9   : > { %v20953_v11 = vunpack.i.h.bf16 %v20951_v20  ;;  %v20952_v39 = vunpack.i.l.bf16 %v20951_v20  ;;  %v20963_v58 = vunpack.i.h.bf16 %v20961_v57  ;;  %v20962_v9 = vunpack.i.l.bf16 %v20961_v57 }
 0xeab   : > { %v6930_v24 = vsel %vm671_vm1, %v20952_v39, %v20953_v11  ;;  %v7016_v40 = vsel %vm7014_vm4, %v20962_v9, %v20963_v58  ;;  %v6890_v39 = vand.u32 7, %v22485_v43 }
 0xeac   : > { %v19730_v28 = vpack.c.bf16 %v6930_v24, %v6929_v2  ;;  %v7423_v41 = vpop.permute.xlu0 %7422  ;;  %v20956_v61 = vpop.permute.xlu1 %20955 }
 0xead   : > { %v20958_v8 = vunpack.i.h.bf16 %v20956_v61  ;;  %v20957_v12 = vunpack.i.l.bf16 %v20956_v61  ;;  %vm6891_vm5 = vcmp.ne.s32.totalorder %v6890_v39, 0  ;;  %vm6894_vm14 = vcmp.ne.s32.totalorder %v6890_v39, 7 }
 0xeae   : > { %19732 = vmatpush3.bf16.msk.msra.mxu0 %vm22999_vm6, %v19730_v28  ;;  %v23109_v28 = vsel %vm6891_vm5, 1.0, %v23049_v4 }
 0xeaf   : > { %v7015_v21 = vsel %vm7014_vm4, %v20957_v12, %v20958_v8  ;;  %19733 = vmatprep.subr.bf16.mxu0 %v21537_v29 }
 0xeb0   : > { %v19734_v23 = vpack.c.bf16 %v7016_v40, %v7015_v21  ;;  %v20981_v3 = vpop.permute.xlu0 %20980  ;;  %v7093_v30 = vpop.permute.xlu1 %7092  ;;  %v23113_v21 = vsel %vm6894_vm14, 1.0, %v23049_v4 }
 0xeb1   : > { %19304 = vmatmul.mubr.msk.f32.vlgmr.msra.gmra.mrb[28].mxu0 %vm1310_vm7, %v6916_v37  ;;  %v20983_v26 = vunpack.i.h.bf16 %v20981_v3  ;;  %v20982_v14 = vunpack.i.l.bf16 %v20981_v3 }
 0xeb2   : > { %19736 = vmatpush3.bf16.msk.msra.mxu0 %vm22999_vm6, %v19734_v23  ;;  %19310 = vmatprep.mubr.msk.f32.mxu0 %vm21538_vm11, %v23049_v4 }
 0xeb3   : > { %19737 = vmatprep.subr.bf16.mxu0 %v21537_v29  ;;  %v19754_v47 = vpack.c.bf16 %v20983_v26, %v20982_v14 }
 0xeb4   : > { %v20986_v59 = vpop.permute.xlu0 %20985  ;;  %v20966_v25 = vpop.permute.xlu1 %20965 }
 0xeb5   : > { %v20968_v60 = vunpack.i.h.bf16 %v20966_v25  ;;  %v20967_v13 = vunpack.i.l.bf16 %v20966_v25  ;;  %v20988_v16 = vunpack.i.h.bf16 %v20986_v59  ;;  %v20987_v7 = vunpack.i.l.bf16 %v20986_v59 }
 0xeb7   : > { %v19738_v5 = vpack.c.bf16 %v20968_v60, %v20967_v13  ;;  %v7515_v51 = vsel %vm7513_vm0, %v20987_v7, %v20988_v16 }
 0xeb8   : > { %v20991_v63 = vpop.permute.xlu0 %20990  ;;  %v20971_v6 = vpop.permute.xlu1 %20970 }
 0xeb9   : > { %19311 = vmatmul.mubr.msk.f32.vlgmr.msra.gmra.mrb[28].mxu0 %vm1310_vm7, %v22990_v0  ;;  %v20993_v53 = vunpack.i.h.bf16 %v20991_v63  ;;  %v20992_v10 = vunpack.i.l.bf16 %v20991_v63  ;;  %v20973_v44 = vunpack.i.h.bf16 %v20971_v6  ;;  %v20972_v45 = vunpack.i.l.bf16 %v20971_v6 }
 0xeba   : > { %19740 = vmatpush3.bf16.msk.msra.mxu0 %vm22999_vm6, %v19738_v5  ;;  %19317 = vmatprep.mubr.msk.f32.mxu0 %vm21538_vm11, %v23049_v4  ;;  %v26271_v5 = vmov 44  }
 0xebb   : > { %19753 = vmatprep.subr.bf16.mxu0 %v21537_v29  ;;  %v7263_v54 = vsel %vm7261_vm10, %v20992_v10, %v20993_v53  ;;  %v7514_v36 = vsel %vm7513_vm0, %v20972_v45, %v20973_v44  ;;  %21005 = vset.pattern.permute.xlu0 %v26271_v5 }
 0xebc   : > { %v20976_v27 = vpop.permute.xlu1 %20975  ;;  %v7504_v62 = vpop.permute.xlu0 %7503  ;;  %v19758_v55 = vpack.c.bf16 %v7515_v51, %v7514_v36 }
 0xebd   : > { %v20978_v1 = vunpack.i.h.bf16 %v20976_v27  ;;  %v20977_v31 = vunpack.i.l.bf16 %v20976_v27 }
 0xebf   : > { %v7262_v46 = vsel %vm7261_vm10, %v20977_v31, %v20978_v1 }
 0xec0   : > { %v19746_v48 = vpack.c.bf16 %v7263_v54, %v7262_v46  ;;  %v7176_v49 = vpop.permute.xlu1 %7175  ;;  %v7252_v22 = vpop.permute.xlu0 %7251 }
 0xec1   : > { %19318 = vmatmul.mubr.msk.f32.vlgmr.msra.gmra.mrb[28].mxu0 %vm1310_vm7, %v7093_v30  ;;  %19325 = vmatmul.mubr.msk.f32.vlgmr.msra.gmra.mrb[34].mxu1 %vm1310_vm7, %v7176_v49 }
 0xec2   : > { %19756 = vmatpush3.bf16.msk.msra.mxu0 %vm22999_vm6, %v19754_v47  ;;  %19748 = vmatpush3.bf16.msk.msra.mxu1 %vm22999_vm6, %v19746_v48 }
 0xec3   : > { %19345 = vmatprep.mubr.msk.f32.mxu0 %vm21538_vm11, %v23049_v4  ;;  %19757 = vmatprep.subr.bf16.mxu0 %v21537_v29 }
 0xec4   : > { %v20996_v52 = vpop.permute.xlu1 %20995  ;;  %19331 = vmatprep.mubr.msk.f32.mxu1 %vm21538_vm11, %v23049_v4  ;;  %19749 = vmatprep.subr.bf16.mxu1 %v21537_v29  ;;  %v7340_v50 = vpop.permute.xlu0 %7339 }
 0xec5   : > { %v20998_v56 = vunpack.i.h.bf16 %v20996_v52  ;;  %v20997_v32 = vunpack.i.l.bf16 %v20996_v52  ;;  %19346 = vmatmul.mubr.msk.f32.vlgmr.msra.gmra.mrb[30].mxu0 %vm1310_vm7, %v7423_v41  ;;  %19332 = vmatmul.mubr.msk.f32.vlgmr.msra.gmra.mrb[36].mxu1 %vm1310_vm7, %v7252_v22 }
 0xec6   : > { %19760 = vmatpush3.bf16.msk.msra.mxu0 %vm22999_vm6, %v19758_v55  ;;  %19338 = vmatprep.mubr.msk.f32.mxu1 %vm21538_vm11, %v23049_v4 }
 0xec7   : > { %v19750_v35 = vpack.c.bf16 %v20998_v56, %v20997_v32  ;;  %19352 = vmatprep.mubr.msk.f32.mxu0 %vm21538_vm11, %v23049_v4  ;;  %19761 = vmatprep.subr.bf16.mxu0 %v21537_v29 }
 0xec8   : > { %v21001_v17 = vpop.permute.xlu1 %21000 }
 0xec9   : > { %v21003_v33 = vunpack.i.h.bf16 %v21001_v17  ;;  %v21002_v19 = vunpack.i.l.bf16 %v21001_v17  ;;  %19752 = vmatpush3.bf16.msk.msra.mxu1 %vm22999_vm6, %v19750_v35  ;;  %v26270_v17 = vmov 61  }
 0xeca   : > { %19362 = vmatprep.subr.mxu1 %v23049_v4  ;;  %21006 = vset.pattern.permute.xlu1 %v26270_v17 }
 0xecb   : > { %v19762_v37 = vpack.c.bf16 %v21003_v33, %v21002_v19 }
 0xecc   : > { %19339 = vmatmul.mubr.msk.f32.vlgmr.msra.gmra.mrb[38].mxu1 %vm1310_vm7, %v7340_v50  ;;  %v7592_v34 = vpop.permute.xlu1 %7591 }
 0xecd   : > { %19353 = vmatmul.mubr.msk.f32.vlgmr.msra.gmra.mrb[30].mxu0 %vm1310_vm7, %v7504_v62  ;;  %19364 = vmatprep.mubr.msk.f32.mxu1 %vm21538_vm11, %v23049_v4 }
 0xece   : > { %19764 = vmatpush3.bf16.msk.msra.mxu0 %vm22999_vm6, %v19762_v37  ;;  %19359 = vmatprep.mubr.msk.f32.mxu0 %vm21538_vm11, %v23049_v4 }
 0xecf   : > { %19377 = vmatprep.subr.mxu0 %v23049_v4 }
 0xed0   : > { %v7695_v53 = vpop.permute.xlu1 %7694 }
 0xed5   : > { %19360 = vmatmul.mubr.msk.f32.vlgmr.msra.gmra.mrb[30].mxu0 %vm1310_vm7, %v7592_v34  ;;  %v7677_v59 = vpop.permute.xlu0 %7676 }
 0xed6   : > { %19379 = vmatprep.mubr.msk.f32.mxu0 %vm21538_vm11, %v23049_v4 }
 0xed9   : > { %v7688_v63 = vpop.permute.xlu0 %7687 }
 0xedd   : > { %v7775_v6 = vpop.permute.xlu0 %7774 }
 0xee1   : > { %v7773_v10 = vpop.permute.xlu0 %7772 }
 0xee5   : > { %v7853_v27 = vpop.permute.xlu0 %7852 }
 0xf94   : > { %v7169_v57 = vpop.f32.mrb[28].mxu0  ;;  %v7247_v20 = vpop.f32.mrb[34].mxu1 }
 0xf95   : > { %v19319_v2 = vpop.f32.mrb[29].mxu0  ;;  %v19326_v11 = vpop.f32.mrb[35].mxu1  ;;  %v7174_v61 = vmul.f32 %v23109_v28, %v7169_v57 }
 0xf98   : > { %v7335_v58 = vpop.f32.mrb[36].mxu1 }
 0xf99   : > { %v7336_v9 = vadd.f32 %v7335_v58, %v7247_v20  ;;  %v19333_v24 = vpop.f32.mrb[37].mxu1 }
 0xf9f   : > { %v7416_v41 = vpop.f32.mrb[38].mxu1 }
 0xfa0   : > { %v7420_v8 = vadd.f32 %v7416_v41, %v7336_v9  ;;  %v19340_v12 = vpop.f32.mrb[39].mxu1 }
 0xfa2   : > { %v7421_v40 = vadd.f32 %v7420_v8, %v7174_v61 }
 0xfa8   : > { %v7668_v23 = vpop.f32.mrb[30].mxu0 }
 0xfa9   : > { %v7673_v3 = vmul.f32 %v23113_v21, %v7668_v23  ;;  %v19361_v30 = vpop.f32.mrb[31].mxu0 }
 0xfaa   : > { %v8494_v30 = vld [vmem:[%s26350_s13 + $0x10] sm:$0xff] }
 0xfab   : > { %v7674_v25 = vadd.f32 %v7673_v3, %v7421_v40  ;;  %v8493_v40 = vld [vmem:[%s26350_s13 + $0x8] sm:$0xff] }
 0xfad   : > { %v7679_v60 = vadd.f32 %v7677_v59, %v7674_v25  ;;  %v8497_v25 = vld [vmem:[%s26350_s13 + $0x28] sm:$0xff] }
 0xfaf   : > { %7680 = vst.msk [vmem:[#allocation2 + $0x8] sm:$0xff] %vm2898_vm13, %v7679_v60  ;;  %v8499_v60 = vld [vmem:[%s26350_s13 + $0x38] sm:$0xff] }
 0xfb6   : > { %v23117_v13 = vld [vmem:[#allocation2 + $0x8] sm:$0xff] }
 0xfb7   : > { %8009 = vrot.lane.b32.xlu0 %v23117_v13, %s21565_s3  ;;  %7696 = vrot.lane.b32.xlu1 %v23117_v13, %s26331_s30 }
 0xfb8   : > { %19378 = vmatpush3.msra.mxu0 %v23117_v13 }
 0xfb9   : > { %19387 = vmatprep.subr.mxu0 %v23049_v4 }
 0xfbb   : > { %8166 = vrot.lane.b32.xlu0 %v23117_v13, %s26317_s1  ;;  %7689 = vrot.lane.b32.xlu1 %v7684_v42, %s26322_s18 }
 0xfbf   : > { %8243 = vrot.lane.b32.xlu0 %v23049_v4, %s21563_s2  ;;  %7776 = vrot.lane.b32.xlu1 %v23117_v13, %s21560_s19  ;;  %s26349_s19 = smov 124  }
 0xfc3   : > { %8241 = vrot.lane.b32.xlu0 %v22990_v0, %s26246_s4  ;;  %7854 = vrot.lane.b32.xlu1 %v23117_v13, %s21564_s20  ;;  %s26355_s20 = smov 73   ;;  %s26260_s4 = smov 15  }
 0xfc7   : > { %8087 = vrot.lane.b32.xlu0 %v23117_v13, %s21568_s27  ;;  %8007 = vrot.lane.b32.xlu1 %v23049_v4, %s21565_s3  ;;  %s26244_s27 = smov 92   ;;  %s26354_s3 = smov 62  }
 0xfcb   : > { %8323 = vrot.lane.b32.xlu0 %v23117_v13, %s26348_s23  ;;  %8005 = vrot.lane.b32.xlu1 %v22990_v0, %s26340_s26  ;;  %v23155_v0 = vld [vmem:[%s26345_s9 + $0x8] sm:$0x7]  ;;  %s26242_s23 = smov 83   ;;  %s18300_s9 = sshll.u32 %s26455_s25, 6 }
 0xfcc   : > { %s26367_s25 = smov 15  }
 0xfcf   : > { %8164 = vrot.lane.b32.xlu1 %v7684_v42, %s26320_s29  ;;  %8402 = vperm.xlu0 %21005, %v7684_v42  }
 0xfd3   : > { %8245 = vrot.lane.b32.xlu1 %v23117_v13, %s21563_s2  ;;  %21127 = vset.pattern.permute.xlu0 %v21571_v18  ;;  %s26254_s2 = smov 16  }
 0xfd7   : > { %7931 = vrot.lane.b32.xlu1 %v7684_v42, %s26349_s19 }
 0xfdb   : > { %8085 = vrot.lane.b32.xlu1 %v7684_v42, %s26328_s21 }
 0xfdf   : > { %8321 = vrot.lane.b32.xlu1 %v7684_v42, %s26244_s27  ;;  %s26356_s27 = smov 117  }
 0xfe3   : > { %8416 = vrot.lane.b32.xlu1 %v23155_v0, %s26242_s23  ;;  %s652_s23 = scalar_lea.vmem %s26352_s11, %s22192_s28  ;;  %s26252_s28 = smov 113  }
 0xfe4   : > { %s26370_s11 = smov 111  }
 0xfe7   : > { %8413 = vperm.xlu1 %21006, %v23155_v0  }
0x1029   : > { %v7697_v26 = vpop.permute.xlu1 %7696  ;;  %v8010_v45 = vpop.permute.xlu0 %8009 }
0x102a   : > { %v7698_v14 = vsel %vm671_vm1, %v7695_v53, %v7697_v26  ;;  %v8496_v53 = vld [vmem:[%s26350_s13 + $0x20] sm:$0xff]  ;;  %v8503_v26 = vld [vmem:[%s26350_s13 + $0x58] sm:$0xff] }
0x102b   : > { %19363 = vmatpush3.msra.mxu1 %v7698_v14 }
0x102c   : > { %19367 = vmatprep.subr.mxu1 %v23049_v4 }
0x102d   : > { %v7690_v62 = vpop.permute.xlu1 %7689  ;;  %v8167_v7 = vpop.permute.xlu0 %8166 }
0x102e   : > { %v7691_v44 = vsel %vm2074_vm9, %v7688_v63, %v7690_v62  ;;  %v8500_v62 = vld [vmem:[%s26350_s13 + $0x40] sm:$0xff] }
0x102f   : > { %19365 = vmatmul.mubr.msk.f32.vlgmr.msra.gmra.mrb[40].mxu1 %vm7261_vm10, %v7691_v44  ;;  %v8502_v44 = vld [vmem:[%s26350_s13 + $0x50] sm:$0xff] }
0x1030   : > { %19369 = vmatprep.mubr.msk.f32.mxu1 %vm21538_vm11, %v23049_v4 }
0x1031   : > { %v7777_v1 = vpop.permute.xlu1 %7776  ;;  %v8244_v46 = vpop.permute.xlu0 %8243 }
0x1032   : > { %v7778_v31 = vsel %vm7014_vm4, %v7775_v6, %v7777_v1  ;;  %v19772_v6 = vpack.c.bf16 %v8499_v60, %v8497_v25  ;;  %v8505_v1 = vld [vmem:[%s26350_s13 + $0x68] sm:$0xff]  ;;  %vm9416_vm4 = vcmask 908288  }
0x1033   : > { %19368 = vmatpush3.msra.mxu1 %v7778_v31  ;;  %v8507_v31 = vld [vmem:[%s26350_s13 + $0x78] sm:$0xff] }
0x1034   : > { %19372 = vmatprep.subr.mxu1 %v23049_v4 }
0x1035   : > { %v7855_v16 = vpop.permute.xlu1 %7854  ;;  %v8242_v36 = vpop.permute.xlu0 %8241 }
0x1037   : > { %19370 = vmatmul.mubr.msk.f32.vlgmr.msra.gmra.mrb[40].mxu1 %vm7261_vm10, %v7773_v10  ;;  %v8501_v10 = vld [vmem:[%s26350_s13 + $0x48] sm:$0xff] }
0x1038   : > { %19373 = vmatpush3.msra.mxu1 %v7855_v16  ;;  %19374 = vmatprep.mubr.msk.f32.mxu1 %vm21538_vm11, %v23049_v4  ;;  %v19780_v16 = vpack.c.bf16 %v8507_v31, %v8505_v1 }
0x1039   : > { %v8008_v54 = vpop.permute.xlu1 %8007  ;;  %19382 = vmatprep.subr.mxu1 %v23049_v4  ;;  %v8088_v55 = vpop.permute.xlu0 %8087 }
0x103a   : > { %v8011_v48 = vsel %vm7261_vm10, %v8008_v54, %v8010_v45  ;;  %v19778_v45 = vpack.c.bf16 %v8502_v44, %v8500_v62  ;;  %v8506_v54 = vld [vmem:[%s26350_s13 + $0x70] sm:$0xff] }
0x103d   : > { %v8006_v47 = vpop.permute.xlu1 %8005  ;;  %v8324_v32 = vpop.permute.xlu0 %8323 }
0x103f   : > { %19375 = vmatmul.mubr.msk.f32.vlgmr.msra.gmra.mrb[40].mxu1 %vm7261_vm10, %v7853_v27  ;;  %v19776_v27 = vpack.c.bf16 %v8503_v26, %v8501_v10 }
0x1040   : > { %19383 = vmatpush3.msra.mxu1 %v8011_v48  ;;  %19384 = vmatprep.mubr.msk.f32.mxu1 %vm21538_vm11, %v23049_v4  ;;  %v23256_v48 = vld [vmem:[%s26351_s12] sm:$0xff] }
0x1041   : > { %v8165_v49 = vpop.permute.xlu1 %8164  ;;  %19392 = vmatprep.subr.mxu1 %v23049_v4  ;;  %8615 = vrot.lane.b32.xlu1 %v23256_v48, %s26353_s6 }
0x1043   : > { %19385 = vmatmul.mubr.msk.f32.vlgmr.msra.gmra.mrb[42].mxu1 %vm7261_vm10, %v8006_v47  ;;  %v8610_v47 = vld [vmem:[#allocation2 + $0x50] sm:$0x7] }
0x1044   : > { %19393 = vmatpush3.msra.mxu1 %v8167_v7  ;;  %19394 = vmatprep.mubr.msk.f32.mxu1 %vm21538_vm11, %v23049_v4  ;;  %v8504_v7 = vld [vmem:[%s26350_s13 + $0x60] sm:$0xff]  ;;  %11007 = vst [vmem:[#allocation2 + $0x50] sm:$0x7] %v23049_v4 }
0x1045   : > { %v8246_v22 = vpop.permute.xlu1 %8245  ;;  %19397 = vmatprep.subr.mxu1 %v23049_v4 }
0x1046   : > { %v8247_v51 = vsel %vm7513_vm0, %v8244_v46, %v8246_v22  ;;  %v19782_v46 = vpack.c.bf16 %v8506_v54, %v8504_v7 }
0x1047   : > { %19395 = vmatmul.mubr.msk.f32.vlgmr.msra.gmra.mrb[44].mxu1 %vm7261_vm10, %v8165_v49  ;;  %v21007_v49 = vpack.i.bf16 %v8610_v47, %v23049_v4 }
0x1048   : > { %19398 = vmatpush3.msra.mxu1 %v8247_v51  ;;  %19399 = vmatprep.mubr.msk.f32.mxu1 %vm21538_vm11, %v23049_v4  ;;  %v8601_v51 = vld [vmem:[%s652_s23] sm:$0xff] }
0x1049   : > { %v7932_v52 = vpop.permute.xlu1 %7931  ;;  %19402 = vmatprep.subr.mxu1 %v23049_v4  ;;  %21008 = vrot.lane.b32.xlu0 %v21007_v49, %s26331_s30 }
0x104a   : > { %19380 = vmatmul.mubr.msk.f32.vlgmr.msra.gmra.mrb[32].mxu0 %vm7261_vm10, %v7932_v52 }
0x104b   : > { %19388 = vmatpush3.msra.mxu0 %v8088_v55  ;;  %19389 = vmatprep.mubr.msk.f32.mxu0 %vm21538_vm11, %v23049_v4 }
0x104c   : > { %19765 = vmatprep.subr.bf16.mxu0 %v21537_v29 }
0x104d   : > { %v8086_v56 = vpop.permute.xlu1 %8085  ;;  %21013 = vrot.lane.b32.xlu0 %v21007_v49, %s26262_s7 }
0x104e   : > { %19390 = vmatmul.mubr.msk.f32.vlgmr.msra.gmra.mrb[34].mxu0 %vm7261_vm10, %v8086_v56  ;;  %v8403_v41 = vpop.permute.xlu0 %8402 }
0x104f   : > { %19400 = vmatmul.mubr.msk.f32.vlgmr.msra.gmra.mrb[44].mxu1 %vm7261_vm10, %v8242_v36  ;;  %19411 = vmatprep.mubr.msk.f32.mxu0 %vm21538_vm11, %v23049_v4  ;;  %v8602_v36 = vld [vmem:[%s652_s23 + $0x8] sm:$0xff]  ;;  %s26256_s23 = smov 111  }
0x1050   : > { %19403 = vmatpush3.msra.mxu1 %v8324_v32  ;;  %19404 = vmatprep.mubr.msk.f32.mxu1 %vm21538_vm11, %v23049_v4  ;;  %v21022_v22 = vpack.i.bf16 %v23049_v4, %v8602_v36  ;;  %v21027_v55 = vpack.i.bf16 %v8602_v36, %v8601_v51  ;;  %vm8730_vm11 = vcmask 138240  }
0x1051   : > { %v8322_v35 = vpop.permute.xlu1 %8321 }
0x1052   : > { %21023 = vrot.lane.b32.xlu0 %v21022_v22, %s26317_s1  ;;  %21018 = vrot.lane.b32.xlu1 %v21022_v22, %s26252_s28 }
0x1055   : > { %v8417_v0 = vpop.permute.xlu1 %8416 }
0x1056   : > { %8928 = vrot.lane.b32.xlu0 %v23256_v48, %s26329_s22  ;;  %8820 = vrot.lane.b32.xlu1 %v23256_v48, %s26354_s3 }
0x1057   : > { %19405 = vmatmul.mubr.msk.f32.vlgmr.msra.gmra.mrb[44].mxu1 %vm7261_vm10, %v8322_v35 }
0x1058   : > { %8711 = vmatprep.mubr.f32.mxu1 %v23049_v4 }
0x105a   : > { %21028 = vrot.lane.b32.xlu0 %v21027_v55, %s26331_s30 }
0x105e   : > { %21033 = vrot.lane.b32.xlu0 %v21027_v55, %s26262_s7 }
0x1066   : > { %v8414_v52 = vpop.permute.xlu1 %8413 }
0x1112   : > { %v7925_v29 = vpop.f32.mrb[40].mxu1 }
0x1113   : > { %v19376_v33 = vpop.f32.mrb[41].mxu1  ;;  %v7930_v20 = vmul.f32 %v23109_v28, %v7925_v29  ;;  %v8495_v28 = vld [vmem:[%s26350_s13 + $0x18] sm:$0xff] }
0x1114   : > { %v19768_v3 = vpack.c.bf16 %v8495_v28, %v8493_v40  ;;  %v23282_v33 = vpop.permute.xlu0 %21008 }
0x1116   : > { %v8081_v19 = vpop.f32.mrb[42].mxu1 }
0x1117   : > { %v19386_v50 = vpop.f32.mrb[43].mxu1 }
0x111d   : > { %v8001_v37 = vpop.f32.mrb[32].mxu0 }
0x111e   : > { %v8082_v34 = vadd.f32 %v8081_v19, %v8001_v37  ;;  %v19381_v42 = vpop.f32.mrb[33].mxu0 }
0x1121   : > { %v8158_v57 = vpop.f32.mrb[34].mxu0 }
0x1122   : > { %v8162_v2 = vadd.f32 %v8158_v57, %v8082_v34  ;;  %v19391_v11 = vpop.f32.mrb[35].mxu0 }
0x1124   : > { %v8163_v39 = vadd.f32 %v8162_v2, %v7930_v20 }
0x112a   : > { %v8394_v58 = vpop.f32.mrb[44].mxu1 }
0x112b   : > { %v8399_v9 = vmul.f32 %v23113_v21, %v8394_v58  ;;  %v19406_v24 = vpop.f32.mrb[45].mxu1  ;;  %v8492_v21 = vld [vmem:[%s26350_s13] sm:$0xff] }
0x112c   : > { %v19770_v63 = vpack.c.bf16 %v8494_v30, %v8492_v21  ;;  %v21010_v30 = vunpack.i.l.bf16 %v23282_v33 }
0x112d   : > { %v8400_v61 = vadd.f32 %v8399_v9, %v8163_v39  ;;  %v8819_v9 = vld [vmem:[#allocation2 + $0x68] sm:$0x7] }
0x112f   : > { %v8405_v8 = vadd.f32 %v8403_v41, %v8400_v61  ;;  %v8616_v61 = vpop.permute.xlu1 %8615 }
0x1131   : > { %v8406_v12 = vmax.f32 %v8405_v8, 0.0 }
0x1133   : > { %8407 = vst.msk [vmem:[#allocation2 + $0x58] sm:$0xff] %vm2898_vm13, %v8406_v12  ;;  %v21019_v8 = vpop.permute.xlu1 %21018 }
0x1137   : > { %v23336_v40 = vpop.permute.xlu1 %8820 }
0x113a   : > { %v8410_v23 = vld [vmem:[#allocation2 + $0x58] sm:$0xff] }
0x113b   : > { %v19766_v59 = vpack.c.bf16 %v8410_v23, %v23117_v13  ;;  %v8498_v13 = vld [vmem:[%s26350_s13 + $0x30] sm:$0xff]  ;;  %s26379_s13 = smov 31  }
0x113c   : > { %v19774_v14 = vpack.c.bf16 %v8498_v13, %v8496_v53 }
0x113d   : > { %19767 = vmatpush3.bf16.msra.mxu0 %v19766_v59 }
0x113e   : > { %19769 = vmatprep.subr.bf16.mxu0 %v19768_v3 }
0x1140   : > { %19412 = vmatmul.mubr.msk.f32.vlgmr.msra.gmra.mrb[36].mxu0 %vm26293_vm12, %v8417_v0  ;;  %v21011_v0 = vunpack.i.h.bf16 %v23282_v33 }
0x1141   : > { %19771 = vmatpush1.bf16.msra.mxu0 %v19770_v63  ;;  %8575 = vmatprep.mubr.f32.mxu0 %v23049_v4 }
0x1142   : > { %19773 = vmatprep.subr.bf16.mxu0 %v19772_v6 }
0x1145   : > { %19775 = vmatpush1.bf16.msra.mxu0 %v19774_v14 }
0x1146   : > { %19777 = vmatprep.subr.bf16.mxu0 %v19776_v27 }
0x1149   : > { %19779 = vmatpush1.bf16.msra.mxu0 %v19778_v45 }
0x114a   : > { %19781 = vmatprep.subr.bf16.mxu0 %v19780_v16 }
0x114d   : > { %19783 = vmatpush1.bf16.msra.mxu0 %v19782_v46 }
0x1213   : > { %v8486_v56 = vpop.f32.mrb[36].mxu0 }
0x1214   : > { %v8487_v32 = vadd.f32 %v8486_v56, %v8414_v52  ;;  %v19413_v35 = vpop.f32.mrb[37].mxu0 }
0x1216   : > { %v8490_v29 = vadd.f32 %v8487_v32, %v22994_v15  ;;  %v23290_v15 = vpop.permute.xlu0 %21013 }
0x1217   : > { %v21015_v45 = vunpack.i.l.bf16 %v23290_v15  ;;  %v21016_v54 = vunpack.i.h.bf16 %v23290_v15 }
0x1218   : > { %8491 = vst.msk [vmem:[%s22973_s0 + $0x4] sm:$0x7] %vm6904_vm15, %v8490_v29  ;;  %18088 = vmatmul.mubr.msk.f32.vlgmr.msra.gmra.mrb[38].mxu0 %vm2898_vm13, %v8490_v29  ;;  %vm8840_vm13 = vcmask 924672   ;;  %vm9318_vm15 = vcmask 121856  }
0x1219   : > { %9000 = vmatprep.mubr.f32.mxu0 %v23049_v4 }
0x121a   : > { %v23292_v20 = vpop.permute.xlu0 %21023 }
0x121e   : > { %v8929_v24 = vpop.permute.xlu0 %8928 }
0x1222   : > { %v21029_v12 = vpop.permute.xlu0 %21028 }
0x1223   : > { %v21031_v21 = vunpack.i.h.bf16 %v21029_v12  ;;  %v21030_v59 = vunpack.i.l.bf16 %v21029_v12 }
0x1225   : > { %v8636_v63 = vsel %vm671_vm1, %v21030_v59, %v21031_v21  ;;  %v8635_v13 = vsel %vm671_vm1, %v21010_v30, %v21030_v59 }
0x1226   : > { %v21034_v28 = vpop.permute.xlu0 %21033 }
0x1227   : > { %v21035_v1 = vunpack.i.l.bf16 %v21034_v28  ;;  %v21036_v31 = vunpack.i.h.bf16 %v21034_v28 }
0x1229   : > { %v8732_v52 = vsel %vm8730_vm11, %v21035_v1, %v21036_v31 }
0x12eb   : > { %v23284_v19 = vpop.f32.mrb[38].mxu0 }
0x12ec   : > { %8605 = vst [vmem:[#allocation2 + $0x58] sm:$0x7] %v23284_v19  ;;  %v23287_v50 = vpop.f32.mrb[39].mxu0 }
0x12ed   : > { %8606 = vst [vmem:[#allocation2 + $0x60] sm:$0x7] %v23287_v50 }
0x12f3   : > { %v8817_v37 = vld [vmem:[#allocation2 + $0x58] sm:$0x7] }
0x12f4   : > { %v8611_v34 = vld [vmem:[#allocation2 + $0x58] sm:$0x7]  ;;  %v21042_v42 = vpack.i.bf16 %v8817_v37, %v8601_v51  ;;  %v8612_v57 = vld [vmem:[#allocation2 + $0x60] sm:$0x7] }
0x12f5   : > { %v19802_v2 = vpack.c.bf16 %v8612_v57, %v8602_v36  ;;  %v19805_v11 = vpack.c.bf16 %v8611_v34, %v8601_v51  ;;  %v21047_v39 = vpack.i.bf16 %v8612_v57, %v8611_v34  ;;  %v8818_v58 = vld [vmem:[#allocation2 + $0x60] sm:$0x7]  ;;  %v21020_v36 = vunpack.i.l.bf16 %v21019_v8 }
0x12f6   : > { %21043 = vrot.lane.b32.xlu0 %v21042_v42, %s26317_s1  ;;  %21038 = vrot.lane.b32.xlu1 %v21042_v42, %s26252_s28  ;;  %v21062_v41 = vpack.i.bf16 %v8819_v9, %v8818_v58 }
0x12f7   : > { %19804 = vmatprep.subr.msk.bf16.mxu0 %vm22999_vm6, %v19802_v2 }
0x12f8   : > { %19807 = vmatpush1.bf16.msk.msra.mxu0 %vm22999_vm6, %v19805_v11 }
0x12fa   : > { %21053 = vrot.lane.b32.xlu0 %v21027_v55, %s26254_s2  ;;  %21048 = vrot.lane.b32.xlu1 %v21047_v39, %s26331_s30 }
0x12fb   : > { %18104 = vmatmul.mubr.msk.f32.vlgmr.msra.gmra.mrb[40].mxu0 %vm1310_vm7, %v8929_v24 }
0x12fc   : > { %9097 = vmatprep.mubr.f32.mxu0 %v23049_v4 }
0x12fe   : > { %21063 = vrot.lane.b32.xlu0 %v21062_v41, %s26252_s28  ;;  %9206 = vrot.lane.b32.xlu1 %v23256_v48, %s26355_s20  ;;  %s26358_s28 = smov 51  }
0x1302   : > { %21068 = vrot.lane.b32.xlu0 %v21027_v55, %s26260_s4  ;;  %21058 = vrot.lane.b32.xlu1 %v21047_v39, %s26262_s7  ;;  %v8731_v55 = vsel %vm8730_vm11, %v21015_v45, %v21035_v1 }
0x1306   : > { %21073 = vrot.lane.b32.xlu0 %v21007_v49, %s26254_s2  ;;  %21078 = vrot.lane.b32.xlu1 %v21007_v49, %s26260_s4  ;;  %v21021_v49 = vunpack.i.h.bf16 %v21019_v8 }
0x1308   : > { %v8842_v57 = vsel %vm8840_vm13, %v21020_v36, %v21021_v49 }
0x130a   : > { %9007 = vrot.lane.b32.xlu0 %v23256_v48, %s26356_s27  ;;  %9304 = vrot.lane.b32.xlu1 %v23256_v48, %s26357_s24 }
0x130e   : > { %21083 = vrot.lane.b32.xlu0 %v21022_v22, %s26258_s5  ;;  %21098 = vrot.lane.b32.xlu1 %v21062_v41, %s26317_s1 }
0x1312   : > { %21088 = vrot.lane.b32.xlu0 %v21022_v22, %s26256_s23  ;;  %21103 = vrot.lane.b32.xlu1 %v21047_v39, %s26254_s2  ;;  %s26359_s2 = smov 40  }
0x1316   : > { %21093 = vrot.lane.b32.xlu0 %v21042_v42, %s26258_s5  ;;  %21108 = vrot.lane.b32.xlu1 %v21047_v39, %s26260_s4  ;;  %s26360_s4 = smov 28  }
0x131a   : > { %21113 = vrot.lane.b32.xlu1 %v21062_v41, %s26258_s5  ;;  %9104 = vrot.lane.b32.xlu0 %v23256_v48, %s26358_s28  ;;  %s26368_s5 = smov 112  }
0x131e   : > { %21118 = vrot.lane.b32.xlu1 %v21062_v41, %s26256_s23  ;;  %9507 = vperm.xlu0 %21127, %v23256_v48   ;;  %v21026_v41 = vunpack.i.h.bf16 %v23292_v20 }
0x1322   : > { %21123 = vrot.lane.b32.xlu1 %v21042_v42, %s26256_s23  ;;  %9529 = vrot.lane.b32.xlu0 %v23049_v4, %s26331_s30  ;;  %s23478_s23 = scalar_lea.vmem %s26363_s14, %s18300_s9  ;;  %s26365_s9 = smov 17  }
0x1323   : > { %21128 = vset.pattern.permute.xlu0 %v26271_v5  ;;  %s26372_s14 = smov 83  }
0x1326   : > { %9402 = vrot.lane.b32.xlu1 %v23256_v48, %s26359_s2 }
0x132a   : > { %9521 = vrot.lane.b32.xlu1 %v23256_v48, %s26322_s18 }
0x132e   : > { %9614 = vrot.lane.b32.xlu1 %v23049_v4, %s26262_s7  ;;  %s26361_s7 = smov 113  }
0x1368   : > { %v23338_v23 = vpop.permute.xlu0 %21043  ;;  %v21039_v3 = vpop.permute.xlu1 %21038 }
0x1369   : > { %v21041_v29 = vunpack.i.h.bf16 %v21039_v3  ;;  %v21040_v33 = vunpack.i.l.bf16 %v21039_v3  ;;  %v21045_v8 = vunpack.i.l.bf16 %v23338_v23  ;;  %v21046_v3 = vunpack.i.h.bf16 %v23338_v23 }
0x136b   : > { %v8841_v39 = vsel %vm8840_vm13, %v21040_v33, %v21020_v36 }
0x136c   : > { %v23341_v25 = vpop.permute.xlu0 %21053  ;;  %v21049_v60 = vpop.permute.xlu1 %21048 }
0x136d   : > { %v21051_v6 = vunpack.i.h.bf16 %v21049_v60  ;;  %v21050_v53 = vunpack.i.l.bf16 %v21049_v60  ;;  %v21056_v60 = vunpack.i.h.bf16 %v23341_v25 }
0x136f   : > { %v8637_v10 = vsel %vm671_vm1, %v21011_v0, %v21050_v53  ;;  %v8638_v26 = vsel %vm671_vm1, %v21050_v53, %v21051_v6  ;;  %v21055_v0 = vunpack.i.l.bf16 %v23341_v25 }
0x1370   : > { %v19787_v14 = vpack.c.bf16 %v8637_v10, %v8635_v13  ;;  %v21064_v27 = vpop.permute.xlu0 %21063  ;;  %v23348_v62 = vpop.permute.xlu1 %9206  ;;  %v19784_v44 = vpack.c.bf16 %v8638_v26, %v8636_v63 }
0x1371   : > { %v21066_v16 = vunpack.i.h.bf16 %v21064_v27  ;;  %v21065_v7 = vunpack.i.l.bf16 %v21064_v27  ;;  %v9022_v45 = vsel %vm26293_vm12, %v21055_v0, %v21056_v60 }
0x1372   : > { %19786 = vmatprep.subr.msk.bf16.mxu1 %vm22999_vm6, %v19784_v44 }
0x1373   : > { %19789 = vmatpush1.bf16.msk.msra.mxu1 %vm22999_vm6, %v19787_v14  ;;  %v8844_v56 = vsel %vm8840_vm13, %v21065_v7, %v21066_v16  ;;  %v8843_v2 = vsel %vm8840_vm13, %v21041_v29, %v21065_v7 }
0x1374   : > { %v23356_v46 = vpop.permute.xlu0 %21068  ;;  %v21059_v47 = vpop.permute.xlu1 %21058  ;;  %v19796_v11 = vpack.c.bf16 %v8844_v56, %v8842_v57  ;;  %v19799_v24 = vpack.c.bf16 %v8843_v2, %v8841_v39 }
0x1375   : > { %v21061_v22 = vunpack.i.h.bf16 %v21059_v47  ;;  %v21060_v51 = vunpack.i.l.bf16 %v21059_v47  ;;  %v21071_v1 = vunpack.i.h.bf16 %v23356_v46  ;;  %v21070_v31 = vunpack.i.l.bf16 %v23356_v46 }
0x1376   : > { %18095 = vmatmul.mubr.msk.f32.vlgmr.msra.gmra.mrb[46].mxu1 %vm1310_vm7, %v8616_v61  ;;  %v21025_v61 = vunpack.i.l.bf16 %v23292_v20 }
0x1377   : > { %v8733_v32 = vsel %vm8730_vm11, %v21016_v54, %v21060_v51  ;;  %v8734_v35 = vsel %vm8730_vm11, %v21060_v51, %v21061_v22  ;;  %8807 = vmatprep.mubr.f32.mxu1 %v23049_v4 }
0x1378   : > { %v19793_v15 = vpack.c.bf16 %v8733_v32, %v8731_v55  ;;  %v21074_v37 = vpop.permute.xlu0 %21073  ;;  %v23365_v34 = vpop.permute.xlu1 %21078  ;;  %v19790_v42 = vpack.c.bf16 %v8734_v35, %v8732_v52  ;;  %v9222_v20 = vsel %vm9220_vm3, %v21025_v61, %v21026_v41  ;;  %v9221_v59 = vsel %vm9220_vm3, %v21045_v8, %v21025_v61 }
0x1379   : > { %v21076_v63 = vunpack.i.h.bf16 %v21074_v37  ;;  %v21075_v6 = vunpack.i.l.bf16 %v21074_v37  ;;  %v21080_v16 = vunpack.i.l.bf16 %v23365_v34  ;;  %v21081_v22 = vunpack.i.h.bf16 %v23365_v34 }
0x137a   : > { %19792 = vmatprep.subr.msk.bf16.mxu1 %vm22999_vm6, %v19790_v42  ;;  %v9320_v52 = vsel %vm9318_vm15, %v21070_v31, %v21071_v1 }
0x137b   : > { %19795 = vmatpush1.bf16.msk.msra.mxu1 %vm22999_vm6, %v19793_v15  ;;  %v9021_v25 = vsel %vm26293_vm12, %v21075_v6, %v21055_v0  ;;  %v9319_v32 = vsel %vm9318_vm15, %v21080_v16, %v21070_v31  ;;  %v23490_v31 = vadd.s32 128, %v22485_v43 }
0x137c   : > { %v23374_v58 = vpop.permute.xlu0 %9007  ;;  %v23376_v9 = vpop.permute.xlu1 %9304  ;;  %19798 = vmatprep.subr.msk.bf16.mxu1 %vm22999_vm6, %v19796_v11 }
0x137d   : > { %26364 = vst [vmem:[#allocation5_spill] sm:$0xff] %v23490_v31  ;;  %v8584_v16 = vand.u32 15, %v23490_v31 }
0x137e   : > { %18098 = vmatmul.mubr.msk.f32.vlgmr.msra.gmra.mrb[46].mxu1 %vm1310_vm7, %v23256_v48 }
0x137f   : > { %19801 = vmatpush1.bf16.msk.msra.mxu1 %vm22999_vm6, %v19799_v24  ;;  %8917 = vmatprep.mubr.f32.mxu1 %v23049_v4  ;;  %vm8586_vm5 = vcmp.ne.s32.totalorder %v8584_v16, 0  ;;  %vm8592_vm8 = vcmp.ne.s32.totalorder %v8584_v16, 15 }
0x1380   : > { %v23388_v12 = vpop.permute.xlu0 %21083  ;;  %v21099_v28 = vpop.permute.xlu1 %21098 }
0x1381   : > { %v21101_v21 = vunpack.i.h.bf16 %v21099_v28  ;;  %v21100_v30 = vunpack.i.l.bf16 %v21099_v28  ;;  %v21086_v46 = vunpack.i.h.bf16 %v23388_v12  ;;  %v21085_v56 = vunpack.i.l.bf16 %v23388_v12 }
0x1383   : > { %v9223_v53 = vsel %vm9220_vm3, %v21046_v3, %v21100_v30  ;;  %v9224_v13 = vsel %vm9220_vm3, %v21100_v30, %v21101_v21  ;;  %v9120_v15 = vsel %vm9118_vm2, %v21085_v56, %v21086_v46 }
0x1384   : > { %v19823_v10 = vpack.c.bf16 %v9223_v53, %v9221_v59  ;;  %v23397_v26 = vpop.permute.xlu0 %21088  ;;  %v21104_v23 = vpop.permute.xlu1 %21103  ;;  %v19820_v14 = vpack.c.bf16 %v9224_v13, %v9222_v20 }
0x1385   : > { %v21106_v27 = vunpack.i.h.bf16 %v21104_v23  ;;  %v21105_v44 = vunpack.i.l.bf16 %v21104_v23  ;;  %v21091_v37 = vunpack.i.h.bf16 %v23397_v26  ;;  %v11016_v23 = vld [vmem:[%s23478_s23 + $0x30] sm:$0xff] }
0x1386   : > { %18101 = vmatmul.mubr.msk.f32.vlgmr.msra.gmra.mrb[46].mxu1 %vm1310_vm7, %v23336_v40  ;;  %19822 = vmatprep.subr.msk.bf16.mxu1 %vm22999_vm6, %v19820_v14  ;;  %v11017_v14 = vld [vmem:[%s23478_s23 + $0x38] sm:$0xff]  ;;  %11024 = vst [vmem:[#allocation2 + $0x38] sm:$0xff] %v11016_v23 }
0x1387   : > { %v9023_v7 = vsel %vm26293_vm12, %v21076_v63, %v21105_v44  ;;  %v9024_v54 = vsel %vm26293_vm12, %v21105_v44, %v21106_v27  ;;  %19825 = vmatpush1.bf16.msk.msra.mxu1 %vm22999_vm6, %v19823_v10  ;;  %9297 = vmatprep.mubr.f32.mxu1 %v23049_v4  ;;  %v23462_v10 = vld [vmem:[%s26351_s12 + $0x8] sm:$0xff]  ;;  %11025 = vst [vmem:[#allocation2 + $0x40] sm:$0xff] %v11017_v14 }
0x1388   : > { %v19811_v40 = vpack.c.bf16 %v9023_v7, %v9021_v25  ;;  %v21094_v47 = vpop.permute.xlu0 %21093  ;;  %v21109_v49 = vpop.permute.xlu1 %21108  ;;  %v19808_v36 = vpack.c.bf16 %v9024_v54, %v9022_v45  ;;  %9523 = vrot.lane.b32.xlu0 %v23462_v10, %s26322_s18  ;;  %10041 = vrot.lane.b32.xlu1 %v23462_v10, %s26320_s29  ;;  %v23498_v54 = vld [vmem:[#allocation2 + $0xf0] sm:$0xff] }
0x1389   : > { %v21111_v51 = vunpack.i.h.bf16 %v21109_v49  ;;  %v21110_v55 = vunpack.i.l.bf16 %v21109_v49  ;;  %v21095_v35 = vunpack.i.l.bf16 %v21094_v47  ;;  %v21096_v2 = vunpack.i.h.bf16 %v21094_v47 }
0x138a   : > { %19810 = vmatprep.subr.msk.bf16.mxu0 %vm22999_vm6, %v19808_v36  ;;  %18113 = vmatmul.mubr.msk.f32.vlgmr.msra.gmra.mrb[48].mxu1 %vm1310_vm7, %v23348_v62  ;;  %v21090_v62 = vunpack.i.l.bf16 %v23397_v26  ;;  %v11012_v26 = vld [vmem:[%s23478_s23 + $0x10] sm:$0xff] }
0x138b   : > { %v9321_v29 = vsel %vm9318_vm15, %v21081_v22, %v21110_v55  ;;  %v9322_v33 = vsel %vm9318_vm15, %v21110_v55, %v21111_v51  ;;  %19813 = vmatpush1.bf16.msk.msra.mxu0 %vm22999_vm6, %v19811_v40  ;;  %9395 = vmatprep.mubr.f32.mxu1 %v23049_v4  ;;  %v9119_v24 = vsel %vm9118_vm2, %v21095_v35, %v21085_v56  ;;  %v23504_v40 = vsel %vm8586_vm5, 1.0, %v23498_v54 }
0x138c   : > { %v19829_v34 = vpack.c.bf16 %v9321_v29, %v9319_v32  ;;  %v21114_v42 = vpop.permute.xlu1 %21113  ;;  %v19826_v57 = vpack.c.bf16 %v9322_v33, %v9320_v52  ;;  %v9418_v3 = vsel %vm9416_vm4, %v21090_v62, %v21091_v37  ;;  %v9105_v20 = vpop.permute.xlu0 %9104  ;;  %9612 = vrot.lane.b32.xlu0 %v23256_v48, %s26360_s4  ;;  %11020 = vst [vmem:[#allocation2 + $0x18] sm:$0xff] %v11012_v26  ;;  %v23516_v35 = vsel %vm8592_vm8, 1.0, %v23498_v54 }
0x138d   : > { %v21116_v11 = vunpack.i.h.bf16 %v21114_v42  ;;  %v21115_v39 = vunpack.i.l.bf16 %v21114_v42  ;;  %vm11472_vm8 = vcmask 269312  }
0x138e   : > { %18107 = vmatmul.mubr.msk.f32.vlgmr.msra.gmra.mrb[40].mxu0 %vm1310_vm7, %v23374_v58  ;;  %19828 = vmatprep.subr.msk.bf16.mxu1 %vm22999_vm6, %v19826_v57 }
0x138f   : > { %v9121_v41 = vsel %vm9118_vm2, %v21096_v2, %v21115_v39  ;;  %v9122_v61 = vsel %vm9118_vm2, %v21115_v39, %v21116_v11  ;;  %19831 = vmatpush1.bf16.msk.msra.mxu1 %vm22999_vm6, %v19829_v34  ;;  %9195 = vmatprep.mubr.f32.mxu0 %v23049_v4 }
0x1390   : > { %v19817_v8 = vpack.c.bf16 %v9121_v41, %v9119_v24  ;;  %v21119_v12 = vpop.permute.xlu1 %21118  ;;  %v19814_v28 = vpack.c.bf16 %v9122_v61, %v9120_v15  ;;  %9709 = vrot.lane.b32.xlu0 %v23049_v4, %s26361_s7 }
0x1391   : > { %v21121_v58 = vunpack.i.h.bf16 %v21119_v12  ;;  %v21120_v21 = vunpack.i.l.bf16 %v21119_v12 }
0x1392   : > { %19816 = vmatprep.subr.msk.bf16.mxu0 %vm22999_vm6, %v19814_v28  ;;  %18116 = vmatmul.mubr.msk.f32.vlgmr.msra.gmra.mrb[48].mxu1 %vm1310_vm7, %v23376_v9 }
0x1393   : > { %v9420_v30 = vsel %vm9416_vm4, %v21120_v21, %v21121_v58  ;;  %19819 = vmatpush1.bf16.msk.msra.mxu0 %vm22999_vm6, %v19817_v8  ;;  %9493 = vmatprep.mubr.f32.mxu1 %v23049_v4 }
0x1394   : > { %v21124_v59 = vpop.permute.xlu1 %21123  ;;  %v19832_v60 = vpack.c.bf16 %v9420_v30, %v9418_v3  ;;  %9700 = vrot.lane.b32.xlu0 %v23462_v10, %s26362_s8 }
0x1395   : > { %v21126_v0 = vunpack.i.h.bf16 %v21124_v59  ;;  %v21125_v63 = vunpack.i.l.bf16 %v21124_v59 }
0x1396   : > { %18110 = vmatmul.mubr.msk.f32.vlgmr.msra.gmra.mrb[40].mxu0 %vm1310_vm7, %v9105_v20  ;;  %19834 = vmatprep.subr.msk.bf16.mxu1 %vm22999_vm6, %v19832_v60 }
0x1397   : > { %v9417_v9 = vsel %vm9416_vm4, %v21125_v63, %v21090_v62  ;;  %v9419_v6 = vsel %vm9416_vm4, %v21126_v0, %v21120_v21  ;;  %9605 = vmatprep.mubr.f32.mxu0 %v23049_v4 }
0x1398   : > { %v19835_v53 = vpack.c.bf16 %v9419_v6, %v9417_v9  ;;  %v9403_v13 = vpop.permute.xlu1 %9402  ;;  %10047 = vrot.lane.b32.xlu0 %v23049_v4, %s26317_s1 }
0x139a   : > { %19837 = vmatpush1.bf16.msk.msra.mxu1 %vm22999_vm6, %v19835_v53 }
0x139c   : > { %9792 = vrot.lane.b32.xlu0 %v23462_v10, %s26349_s19 }
0x139d   : > { %18119 = vmatmul.mubr.msk.f32.vlgmr.msra.gmra.mrb[48].mxu1 %vm1310_vm7, %v9403_v13  ;;  %v9508_v27 = vpop.permute.xlu0 %9507 }
0x139e   : > { %9860 = vmatprep.mubr.f32.mxu1 %v23049_v4  ;;  %v8583_v4 = vand.u32 15, %v22485_v43 }
0x13a0   : > { %vm8585_vm0 = vcmp.ne.s32.totalorder %v8583_v4, 0  ;;  %vm8591_vm14 = vcmp.ne.s32.totalorder %v8583_v4, 15 }
0x13a1   : > { %v23487_v44 = vpop.permute.xlu0 %9529  ;;  %v23501_v46 = vsel %vm8585_vm0, 1.0, %v23498_v54  ;;  %v23513_v32 = vsel %vm8591_vm14, 1.0, %v23498_v54 }
0x13fa   : > { %v23492_v25 = vpop.permute.xlu0 %9523 }
0x13fe   : > { %v23496_v7 = vpop.permute.xlu0 %9612 }
0x1402   : > { %v23506_v47 = vpop.permute.xlu0 %9709 }
0x1406   : > { %v23510_v56 = vpop.permute.xlu0 %9700 }
0x140a   : > { %v23520_v42 = vpop.permute.xlu0 %10047 }
0x140e   : > { %v9793_v11 = vpop.permute.xlu0 %9792 }
0x1459   : > { %v8919_v45 = vpop.f32.mrb[46].mxu1 }
0x145a   : > { %v8921_v1 = vpop.f32.mrb[47].mxu1  ;;  %v8926_v49 = vmul.f32 %v23501_v46, %v8919_v45 }
0x145b   : > { %v8927_v36 = vmul.f32 %v23504_v40, %v8921_v1 }
0x1469   : > { %v9197_v22 = vpop.f32.mrb[40].mxu0 }
0x146a   : > { %v9204_v51 = vadd.f32 %v9197_v22, %v8926_v49  ;;  %v9199_v55 = vpop.f32.mrb[41].mxu0 }
0x146b   : > { %v9205_v52 = vadd.f32 %v9199_v55, %v8927_v36 }
0x1470   : > { %v9495_v29 = vpop.f32.mrb[48].mxu1 }
0x1471   : > { %v9502_v33 = vmul.f32 %v23513_v32, %v9495_v29  ;;  %v9497_v15 = vpop.f32.mrb[49].mxu1 }
0x1472   : > { %v9503_v37 = vmul.f32 %v23516_v35, %v9497_v15 }
0x1473   : > { %v9504_v34 = vadd.f32 %v9502_v33, %v9204_v51 }
0x1474   : > { %v9505_v57 = vadd.f32 %v9503_v37, %v9205_v52  ;;  %v11011_v37 = vld [vmem:[%s23478_s23 + $0x8] sm:$0xff] }
0x1475   : > { %v23522_v62 = vadd.f32 %v9508_v27, %v9504_v34  ;;  %11019 = vst [vmem:[#allocation2 + $0x10] sm:$0xff] %v11011_v37  ;;  %v11010_v34 = vld [vmem:[%s23478_s23] sm:$0xff]  ;;  %v10535_v37 = vld [vmem:[%s26181_s16 + $0x418] sm:$0xff] }
0x1476   : > { %v23524_v2 = vadd.f32 %v9508_v27, %v9505_v57  ;;  %11018 = vst [vmem:[#allocation2 + $0x8] sm:$0xff] %v11010_v34  ;;  %v10415_v57 = vld [vmem:[%s26181_s16 + $0x58] sm:$0xff] }
0x1477   : > { %9531 = vrot.lane.b32.xlu1 %v23522_v62, %s26331_s30  ;;  %v10543_v34 = vld [vmem:[%s26181_s16 + $0x458] sm:$0xff] }
0x1478   : > { %9618 = vrot.lane.b32.xlu0 %v23524_v2, %s26365_s9  ;;  %9796 = vmatprep.subr.mxu1 %v23524_v2 }
0x1479   : > { %9797 = vmatpush1.msra.mxu1 %v23522_v62 }
0x147a   : > { %18123 = vmatmul.mubr.msk.f32.vlgmr.msra.gmra.mrb[50].mxu1 %vm7261_vm10, %v9793_v11 }
0x147b   : > { %9616 = vrot.lane.b32.xlu1 %v23522_v62, %s26365_s9  ;;  %9945 = vmatprep.mubr.f32.mxu1 %v23498_v54  ;;  %s26369_s9 = smov 12  }
0x147c   : > { %9871 = vrot.lane.b32.xlu0 %v23522_v62, %s26366_s10 }
0x147f   : > { %9705 = vrot.lane.b32.xlu1 %v23522_v62, %s26361_s7 }
0x1480   : > { %10130 = vrot.lane.b32.xlu0 %v23522_v62, %s26367_s25 }
0x1483   : > { %10043 = vrot.lane.b32.xlu1 %v23522_v62, %s26317_s1 }
0x1484   : > { %9869 = vrot.lane.b32.xlu0 %v23498_v54, %s26366_s10 }
0x1487   : > { %9533 = vrot.lane.b32.xlu1 %v23524_v2, %s26331_s30 }
0x1488   : > { %9867 = vrot.lane.b32.xlu0 %v23256_v48, %s26340_s26 }
0x148b   : > { %10128 = vrot.lane.b32.xlu1 %v23498_v54, %s26367_s25 }
0x148c   : > { %9954 = vrot.lane.b32.xlu0 %v23522_v62, %s26368_s5 }
0x148f   : > { %10126 = vrot.lane.b32.xlu1 %v23256_v48, %s26369_s9  ;;  %v10312_v48 = vld [vmem:[%s26351_s12 + $0x8] sm:$0x7]  ;;  %s26373_s12 = sld [smem:[#allocation36_spill]] }
0x1490   : > { %9956 = vrot.lane.b32.xlu0 %v23524_v2, %s26368_s5 }
0x1493   : > { %9958 = vrot.lane.b32.xlu1 %v23498_v54, %s26368_s5  ;;  %s21586_s5 = smov 97  }
0x1494   : > { %10215 = vrot.lane.b32.xlu0 %v23524_v2, %s26370_s11 }
0x1497   : > { %9707 = vrot.lane.b32.xlu1 %v23524_v2, %s26361_s7  ;;  %s26371_s7 = smov 92  }
0x1498   : > { %9952 = vrot.lane.b32.xlu0 %v23462_v10, %s26328_s21 }
0x149b   : > { %10045 = vrot.lane.b32.xlu1 %v23524_v2, %s26317_s1 }
0x149c   : > { %10303 = vperm.xlu0 %21128, %v23462_v10  }
0x149f   : > { %9873 = vrot.lane.b32.xlu1 %v23524_v2, %s26366_s10 }
0x14a0   : > { %21489 = vset.pattern.permute.xlu0 %v21571_v18  ;;  %v9522_v18 = vpop.permute.xlu1 %9521 }
0x14a1   : > { %v9525_v59 = vsel %vm2074_vm9, %v9522_v18, %v23492_v25  ;;  %v10414_v18 = vld [vmem:[%s26181_s16 + $0x50] sm:$0xff] }
0x14a3   : > { %10132 = vrot.lane.b32.xlu1 %v23524_v2, %s26367_s25 }
0x14a4   : > { %v9615_v39 = vpop.permute.xlu1 %9614 }
0x14a7   : > { %10217 = vrot.lane.b32.xlu1 %v23498_v54, %s26370_s11 }
0x14a8   : > { %v10042_v24 = vpop.permute.xlu1 %10041 }
0x14ab   : > { %10213 = vrot.lane.b32.xlu1 %v23522_v62, %s26370_s11  ;;  %s26378_s11 = smov 32  }
0x14af   : > { %10211 = vrot.lane.b32.xlu1 %v23462_v10, %s26371_s7 }
0x14b3   : > { %10322 = vrot.lane.b32.xlu1 %v10312_v48, %s26372_s14 }
0x14b7   : > { %10319 = vperm.xlu1 %21006, %v10312_v48   ;;  %v10406_v48 = vld [vmem:[%s26181_s16 + $0x10] sm:$0xff] }
0x14e9   : > { %v9532_v41 = vpop.permute.xlu1 %9531 }
0x14ea   : > { %v9619_v61 = vpop.permute.xlu0 %9618  ;;  %v9535_v20 = vsel %vm671_vm1, %v23487_v44, %v9532_v41 }
0x14ed   : > { %v9617_v8 = vpop.permute.xlu1 %9616 }
0x14ee   : > { %v9872_v28 = vpop.permute.xlu0 %9871  ;;  %v9621_v60 = vsel %vm8730_vm11, %v9617_v8, %v9619_v61  ;;  %v9620_v63 = vsel %vm8730_vm11, %v9615_v39, %v9617_v8  ;;  %v19908_v39 = vpack.c.bf16 %v10414_v18, %v10406_v48  ;;  %v10422_v8 = vld [vmem:[%s26181_s16 + $0x90] sm:$0xff]  ;;  %v10551_v18 = vld [vmem:[%s26181_s16 + $0x498] sm:$0xff]  ;;  %vm11873_vm11 = vcmask 793600  }
0x14f1   : > { %v9706_v12 = vpop.permute.xlu1 %9705 }
0x14f2   : > { %v10131_v58 = vpop.permute.xlu0 %10130 }
0x14f5   : > { %v10044_v3 = vpop.permute.xlu1 %10043 }
0x14f6   : > { %v9870_v9 = vpop.permute.xlu0 %9869 }
0x14f7   : > { %v9875_v16 = vsel %vm26293_vm12, %v9870_v9, %v9872_v28  ;;  %v10454_v9 = vld [vmem:[%s26181_s16 + $0x190] sm:$0xff] }
0x14f9   : > { %v9534_v21 = vpop.permute.xlu1 %9533 }
0x14fa   : > { %v9536_v30 = vsel %vm671_vm1, %v9532_v41, %v9534_v21  ;;  %v9868_v53 = vpop.permute.xlu0 %9867  ;;  %v10431_v41 = vld [vmem:[%s26181_s16 + $0xd8] sm:$0xff] }
0x14fb   : > { %9541 = vmatprep.subr.mxu0 %v9536_v30  ;;  %v10438_v30 = vld [vmem:[%s26181_s16 + $0x110] sm:$0xff] }
0x14fc   : > { %9542 = vmatpush1.msra.mxu0 %v9535_v20  ;;  %v10446_v20 = vld [vmem:[%s26181_s16 + $0x150] sm:$0xff] }
0x14fd   : > { %18120 = vmatmul.mubr.msk.f32.vlgmr.msra.gmra.mrb[42].mxu0 %vm7261_vm10, %v9525_v59  ;;  %9626 = vmatprep.subr.mxu0 %v9621_v60  ;;  %v10129_v0 = vpop.permute.xlu1 %10128  ;;  %v19916_v59 = vpack.c.bf16 %v10446_v20, %v10438_v30  ;;  %v10455_v60 = vld [vmem:[%s26181_s16 + $0x198] sm:$0xff] }
0x14fe   : > { %9627 = vmatpush1.msra.mxu0 %v9620_v63  ;;  %9690 = vmatprep.mubr.f32.mxu0 %v23498_v54  ;;  %v9955_v26 = vpop.permute.xlu0 %9954  ;;  %v10134_v51 = vsel %vm9318_vm15, %v10129_v0, %v10131_v58  ;;  %v10463_v0 = vld [vmem:[%s26181_s16 + $0x1d8] sm:$0xff] }
0x14ff   : > { %v19918_v63 = vpack.c.bf16 %v10463_v0, %v10455_v60  ;;  %v10583_v20 = vld [vmem:[%s26181_s16 + $0x598] sm:$0xff]  ;;  %v10582_v0 = vld [vmem:[%s26181_s16 + $0x590] sm:$0xff] }
0x1501   : > { %v10127_v6 = vpop.permute.xlu1 %10126 }
0x1502   : > { %v9957_v1 = vpop.permute.xlu0 %9956 }
0x1503   : > { %v9960_v49 = vsel %vm9118_vm2, %v9955_v26, %v9957_v1 }
0x1505   : > { %18121 = vmatmul.mubr.msk.f32.vlgmr.msra.gmra.mrb[42].mxu0 %vm7261_vm10, %v23496_v7  ;;  %v9959_v13 = vpop.permute.xlu1 %9958 }
0x1506   : > { %9781 = vmatprep.mubr.f32.mxu0 %v23498_v54  ;;  %v9961_v7 = vsel %vm9118_vm2, %v9957_v1, %v9959_v13  ;;  %v10216_v36 = vpop.permute.xlu0 %10215  ;;  %v10471_v13 = vld [vmem:[%s26181_s16 + $0x218] sm:$0xff]  ;;  %vm13667_vm2 = vcmask 252928  }
0x1509   : > { %v9708_v10 = vpop.permute.xlu1 %9707 }
0x150a   : > { %v9712_v23 = vsel %vm8840_vm13, %v9708_v10, %v23506_v47  ;;  %v9711_v14 = vsel %vm8840_vm13, %v9706_v12, %v9708_v10  ;;  %v10430_v12 = vld [vmem:[%s26181_s16 + $0xd0] sm:$0xff]  ;;  %v10479_v10 = vld [vmem:[%s26181_s16 + $0x258] sm:$0xff]  ;;  %vm26403_vm13 = vcmask 261120  }
0x150b   : > { %9717 = vmatprep.subr.mxu0 %v9712_v23  ;;  %v19922_v26 = vpack.c.bf16 %v10479_v10, %v10471_v13  ;;  %v10470_v23 = vld [vmem:[%s26181_s16 + $0x210] sm:$0xff] }
0x150c   : > { %9718 = vmatpush1.msra.mxu0 %v9711_v14  ;;  %v10478_v14 = vld [vmem:[%s26181_s16 + $0x250] sm:$0xff] }
0x150d   : > { %18122 = vmatmul.mubr.msk.f32.vlgmr.msra.gmra.mrb[42].mxu0 %vm7261_vm10, %v23510_v56  ;;  %v10046_v27 = vpop.permute.xlu1 %10045  ;;  %v9953_v56 = vpop.permute.xlu0 %9952  ;;  %v10598_v10 = vld [vmem:[%s26181_s16 + $0x610] sm:$0xff] }
0x150e   : > { %v10050_v44 = vsel %vm9220_vm3, %v10046_v27, %v23520_v42  ;;  %v10049_v45 = vsel %vm9220_vm3, %v10044_v3, %v10046_v27  ;;  %10119 = vmatprep.mubr.f32.mxu0 %v23498_v54  ;;  %v10407_v42 = vld [vmem:[%s26181_s16 + $0x18] sm:$0xff]  ;;  %v19924_v27 = vpack.c.bf16 %v10478_v14, %v10470_v23 }
0x150f   : > { %10055 = vmatprep.subr.mxu0 %v10050_v44  ;;  %v19906_v11 = vpack.c.bf16 %v10415_v57, %v10407_v42  ;;  %v10439_v3 = vld [vmem:[%s26181_s16 + $0x118] sm:$0xff]  ;;  %v19938_v42 = vpack.c.bf16 %v10543_v34, %v10535_v37  ;;  %v10534_v57 = vld [vmem:[%s26181_s16 + $0x410] sm:$0xff] }
0x1510   : > { %10056 = vmatpush1.msra.mxu0 %v10049_v45  ;;  %v10487_v44 = vld [vmem:[%s26181_s16 + $0x298] sm:$0xff] }
0x1511   : > { %18126 = vmatmul.mubr.msk.f32.vlgmr.msra.gmra.mrb[44].mxu0 %vm7261_vm10, %v10042_v24  ;;  %v9874_v25 = vpop.permute.xlu1 %9873  ;;  %v10423_v24 = vld [vmem:[%s26181_s16 + $0x98] sm:$0xff] }
0x1512   : > { %v9876_v4 = vsel %vm26293_vm12, %v9872_v28, %v9874_v25  ;;  %10204 = vmatprep.mubr.f32.mxu0 %v23498_v54  ;;  %v19910_v61 = vpack.c.bf16 %v10431_v41, %v10423_v24  ;;  %v19912_v28 = vpack.c.bf16 %v10430_v12, %v10422_v8  ;;  %v10495_v45 = vld [vmem:[%s26181_s16 + $0x2d8] sm:$0xff]  ;;  %v10486_v25 = vld [vmem:[%s26181_s16 + $0x290] sm:$0xff] }
0x1513   : > { %9881 = vmatprep.subr.mxu1 %v9876_v4  ;;  %v19926_v1 = vpack.c.bf16 %v10495_v45, %v10487_v44  ;;  %v10494_v4 = vld [vmem:[%s26181_s16 + $0x2d0] sm:$0xff]  ;;  %v10567_v12 = vld [vmem:[%s26181_s16 + $0x518] sm:$0xff] }
0x1514   : > { %9882 = vmatpush1.msra.mxu1 %v9875_v16  ;;  %v19928_v16 = vpack.c.bf16 %v10494_v4, %v10486_v25  ;;  %v10550_v41 = vld [vmem:[%s26181_s16 + $0x490] sm:$0xff]  ;;  %v10615_v14 = vld [vmem:[%s26181_s16 + $0x698] sm:$0xff] }
0x1515   : > { %v10133_v47 = vpop.permute.xlu1 %10132  ;;  %18124 = vmatmul.mubr.msk.f32.vlgmr.msra.gmra.mrb[50].mxu1 %vm7261_vm10, %v9868_v53  ;;  %9966 = vmatprep.subr.mxu1 %v9961_v7  ;;  %v10503_v7 = vld [vmem:[%s26181_s16 + $0x318] sm:$0xff]  ;;  %v10614_v45 = vld [vmem:[%s26181_s16 + $0x690] sm:$0xff] }
0x1516   : > { %9967 = vmatpush1.msra.mxu1 %v9960_v49  ;;  %v10135_v22 = vsel %vm9318_vm15, %v10131_v58, %v10133_v47  ;;  %10030 = vmatprep.mubr.f32.mxu1 %v23498_v54  ;;  %v10447_v58 = vld [vmem:[%s26181_s16 + $0x158] sm:$0xff]  ;;  %vm26404_vm15 = vmmov %vm26403_vm13 }
0x1517   : > { %10140 = vmatprep.subr.mxu0 %v10135_v22  ;;  %v19914_v21 = vpack.c.bf16 %v10447_v58, %v10439_v3  ;;  %v10511_v47 = vld [vmem:[%s26181_s16 + $0x358] sm:$0xff]  ;;  %v10510_v22 = vld [vmem:[%s26181_s16 + $0x350] sm:$0xff] }
0x1518   : > { %10141 = vmatpush1.msra.mxu0 %v10134_v51  ;;  %v19930_v49 = vpack.c.bf16 %v10511_v47, %v10503_v7  ;;  %v10566_v58 = vld [vmem:[%s26181_s16 + $0x510] sm:$0xff]  ;;  %v10631_v4 = vld [vmem:[%s26181_s16 + $0x718] sm:$0xff] }
0x1519   : > { %18127 = vmatmul.mubr.msk.f32.vlgmr.msra.gmra.mrb[44].mxu0 %vm7261_vm10, %v10127_v6  ;;  %v10218_v55 = vpop.permute.xlu1 %10217  ;;  %v10462_v6 = vld [vmem:[%s26181_s16 + $0x1d0] sm:$0xff] }
0x151a   : > { %v10220_v52 = vsel %vm9416_vm4, %v10216_v36, %v10218_v55  ;;  %10289 = vmatprep.mubr.f32.mxu0 %v23498_v54  ;;  %v19920_v53 = vpack.c.bf16 %v10462_v6, %v10454_v9  ;;  %v10519_v55 = vld [vmem:[%s26181_s16 + $0x398] sm:$0xff]  ;;  %v10630_v47 = vld [vmem:[%s26181_s16 + $0x710] sm:$0xff] }
0x151b   : > { %10225 = vmatprep.subr.mxu0 %v10220_v52  ;;  %v10527_v52 = vld [vmem:[%s26181_s16 + $0x3d8] sm:$0xff] }
0x151c   : > { %v10599_v6 = vld [vmem:[%s26181_s16 + $0x618] sm:$0xff] }
0x151d   : > { %v10214_v29 = vpop.permute.xlu1 %10213  ;;  %18125 = vmatmul.mubr.msk.f32.vlgmr.msra.gmra.mrb[50].mxu1 %vm7261_vm10, %v9953_v56  ;;  %v19934_v56 = vpack.c.bf16 %v10527_v52, %v10519_v55 }
0x151e   : > { %v10219_v33 = vsel %vm9416_vm4, %v10214_v29, %v10216_v36  ;;  %10390 = vmatprep.mubr.f32.mxu1 %v23498_v54  ;;  %v10502_v36 = vld [vmem:[%s26181_s16 + $0x310] sm:$0xff]  ;;  %vm26410_vm4 = vmmov %vm26403_vm13 }
0x151f   : > { %10226 = vmatpush1.msra.mxu0 %v10219_v33  ;;  %v19932_v51 = vpack.c.bf16 %v10510_v22, %v10502_v36  ;;  %v10518_v29 = vld [vmem:[%s26181_s16 + $0x390] sm:$0xff]  ;;  %vm26411_vm0 = vmmov %vm26410_vm4 }
0x1520   : > { %19907 = vmatprep.subr.bf16.mxu0 %v19906_v11  ;;  %v10526_v33 = vld [vmem:[%s26181_s16 + $0x3d0] sm:$0xff]  ;;  %vm26412_vm5 = vmmov %vm26411_vm0 }
0x1521   : > { %v10212_v15 = vpop.permute.xlu1 %10211  ;;  %v10542_v11 = vld [vmem:[%s26181_s16 + $0x450] sm:$0xff]  ;;  %vm26414_vm14 = vmmov %vm26411_vm0 }
0x1522   : > { %18128 = vmatmul.mubr.msk.f32.vlgmr.msra.gmra.mrb[44].mxu0 %vm7261_vm10, %v10212_v15  ;;  %v19936_v15 = vpack.c.bf16 %v10526_v33, %v10518_v29  ;;  %v19940_v48 = vpack.c.bf16 %v10542_v11, %v10534_v57  ;;  %v10304_v11 = vpop.permute.xlu0 %10303 }
0x1523   : > { %19909 = vmatpush1.bf16.msra.mxu0 %v19908_v39  ;;  %v10559_v39 = vld [vmem:[%s26181_s16 + $0x4d8] sm:$0xff] }
0x1524   : > { %19911 = vmatprep.subr.bf16.mxu0 %v19910_v61  ;;  %v19942_v24 = vpack.c.bf16 %v10559_v39, %v10551_v18  ;;  %v10558_v61 = vld [vmem:[%s26181_s16 + $0x4d0] sm:$0xff] }
0x1525   : > { %v19944_v8 = vpack.c.bf16 %v10558_v61, %v10550_v41 }
0x1527   : > { %19913 = vmatpush1.bf16.msra.mxu0 %v19912_v28  ;;  %v10575_v28 = vld [vmem:[%s26181_s16 + $0x558] sm:$0xff] }
0x1528   : > { %19915 = vmatprep.subr.bf16.mxu0 %v19914_v21  ;;  %v19946_v3 = vpack.c.bf16 %v10575_v28, %v10567_v12  ;;  %v10574_v21 = vld [vmem:[%s26181_s16 + $0x550] sm:$0xff]  ;;  %v10412_v12 = vld [vmem:[%s26181_s16 + $0x40] sm:$0xff] }
0x1529   : > { %v19948_v30 = vpack.c.bf16 %v10574_v21, %v10566_v58  ;;  %v10429_v58 = vld [vmem:[%s26181_s16 + $0xc8] sm:$0xff] }
0x152b   : > { %19917 = vmatpush1.bf16.msra.mxu0 %v19916_v59  ;;  %v10591_v59 = vld [vmem:[%s26181_s16 + $0x5d8] sm:$0xff] }
0x152c   : > { %19919 = vmatprep.subr.bf16.mxu0 %v19918_v63  ;;  %v19950_v60 = vpack.c.bf16 %v10591_v59, %v10583_v20  ;;  %v10590_v63 = vld [vmem:[%s26181_s16 + $0x5d0] sm:$0xff]  ;;  %v10323_v20 = vpop.permute.xlu1 %10322  ;;  %v10437_v59 = vld [vmem:[%s26181_s16 + $0x108] sm:$0xff] }
0x152d   : > { %v19952_v9 = vpack.c.bf16 %v10590_v63, %v10582_v0 }
0x152f   : > { %19921 = vmatpush1.bf16.msra.mxu0 %v19920_v53  ;;  %v10607_v53 = vld [vmem:[%s26181_s16 + $0x658] sm:$0xff] }
0x1530   : > { %19923 = vmatprep.subr.bf16.mxu0 %v19922_v26  ;;  %v19954_v13 = vpack.c.bf16 %v10607_v53, %v10599_v6  ;;  %v10606_v26 = vld [vmem:[%s26181_s16 + $0x650] sm:$0xff]  ;;  %v10444_v6 = vld [vmem:[%s26181_s16 + $0x140] sm:$0xff]  ;;  %v10453_v53 = vld [vmem:[%s26181_s16 + $0x188] sm:$0xff] }
0x1531   : > { %v19956_v23 = vpack.c.bf16 %v10606_v26, %v10598_v10 }
0x1533   : > { %19925 = vmatpush1.bf16.msra.mxu0 %v19924_v27  ;;  %v10623_v27 = vld [vmem:[%s26181_s16 + $0x6d8] sm:$0xff] }
0x1534   : > { %19927 = vmatprep.subr.bf16.mxu0 %v19926_v1  ;;  %v19958_v44 = vpack.c.bf16 %v10623_v27, %v10615_v14  ;;  %v10622_v1 = vld [vmem:[%s26181_s16 + $0x6d0] sm:$0xff]  ;;  %v10460_v14 = vld [vmem:[%s26181_s16 + $0x1c0] sm:$0xff]  ;;  %v10469_v27 = vld [vmem:[%s26181_s16 + $0x208] sm:$0xff] }
0x1535   : > { %v19960_v25 = vpack.c.bf16 %v10622_v1, %v10614_v45 }
0x1537   : > { %19929 = vmatpush1.bf16.msra.mxu0 %v19928_v16  ;;  %v10639_v16 = vld [vmem:[%s26181_s16 + $0x758] sm:$0xff] }
0x1538   : > { %19931 = vmatprep.subr.bf16.mxu0 %v19930_v49  ;;  %v19962_v7 = vpack.c.bf16 %v10639_v16, %v10631_v4  ;;  %v10638_v49 = vld [vmem:[%s26181_s16 + $0x750] sm:$0xff]  ;;  %v10476_v4 = vld [vmem:[%s26181_s16 + $0x240] sm:$0xff]  ;;  %v10485_v16 = vld [vmem:[%s26181_s16 + $0x288] sm:$0xff] }
0x1539   : > { %v19964_v36 = vpack.c.bf16 %v10638_v49, %v10630_v47 }
0x153b   : > { %19933 = vmatpush1.bf16.msra.mxu0 %v19932_v51 }
0x153c   : > { %19935 = vmatprep.subr.bf16.mxu0 %v19934_v56 }
0x153f   : > { %19937 = vmatpush1.bf16.msra.mxu0 %v19936_v15 }
0x1540   : > { %19939 = vmatprep.subr.bf16.mxu0 %v19938_v42 }
0x1543   : > { %19941 = vmatpush1.bf16.msra.mxu0 %v19940_v48 }
0x1544   : > { %19943 = vmatprep.subr.bf16.mxu0 %v19942_v24 }
0x1547   : > { %19945 = vmatpush1.bf16.msra.mxu0 %v19944_v8  ;;  %v10404_v8 = vld [vmem:[%s26181_s16] sm:$0xff] }
0x1548   : > { %19947 = vmatprep.subr.bf16.mxu0 %v19946_v3  ;;  %v10421_v3 = vld [vmem:[%s26181_s16 + $0x88] sm:$0xff] }
0x1549   : > { %v19846_v21 = vpack.c.bf16 %v10429_v58, %v10421_v3  ;;  %v10573_v3 = vld [vmem:[%s26181_s16 + $0x548] sm:$0xff] }
0x154b   : > { %19949 = vmatpush1.bf16.msra.mxu0 %v19948_v30  ;;  %v10420_v30 = vld [vmem:[%s26181_s16 + $0x80] sm:$0xff] }
0x154c   : > { %19951 = vmatprep.subr.bf16.mxu0 %v19950_v60  ;;  %v10445_v60 = vld [vmem:[%s26181_s16 + $0x148] sm:$0xff] }
0x154d   : > { %v19850_v63 = vpack.c.bf16 %v10445_v60, %v10437_v59 }
0x154f   : > { %19953 = vmatpush1.bf16.msra.mxu0 %v19952_v9  ;;  %v10436_v9 = vld [vmem:[%s26181_s16 + $0x100] sm:$0xff] }
0x1550   : > { %19955 = vmatprep.subr.bf16.mxu0 %v19954_v13  ;;  %v10461_v13 = vld [vmem:[%s26181_s16 + $0x1c8] sm:$0xff]  ;;  %v19852_v10 = vpack.c.bf16 %v10444_v6, %v10436_v9 }
0x1551   : > { %v19854_v26 = vpack.c.bf16 %v10461_v13, %v10453_v53  ;;  %v10597_v9 = vld [vmem:[%s26181_s16 + $0x608] sm:$0xff] }
0x1552   : > { %v10605_v6 = vld [vmem:[%s26181_s16 + $0x648] sm:$0xff] }
0x1553   : > { %19957 = vmatpush1.bf16.msra.mxu0 %v19956_v23  ;;  %v10452_v23 = vld [vmem:[%s26181_s16 + $0x180] sm:$0xff]  ;;  %v19890_v13 = vpack.c.bf16 %v10605_v6, %v10597_v9 }
0x1554   : > { %19959 = vmatprep.subr.bf16.mxu0 %v19958_v44  ;;  %v10477_v44 = vld [vmem:[%s26181_s16 + $0x248] sm:$0xff]  ;;  %v19856_v45 = vpack.c.bf16 %v10460_v14, %v10452_v23 }
0x1555   : > { %v19858_v1 = vpack.c.bf16 %v10477_v44, %v10469_v27  ;;  %v10613_v23 = vld [vmem:[%s26181_s16 + $0x688] sm:$0xff] }
0x1556   : > { %v10621_v14 = vld [vmem:[%s26181_s16 + $0x6c8] sm:$0xff] }
0x1557   : > { %19961 = vmatpush1.bf16.msra.mxu0 %v19960_v25  ;;  %v10468_v25 = vld [vmem:[%s26181_s16 + $0x200] sm:$0xff]  ;;  %v19894_v44 = vpack.c.bf16 %v10621_v14, %v10613_v23  ;;  %v10425_v23 = vld [vmem:[%s26181_s16 + $0xa8] sm:$0xff] }
0x1558   : > { %19963 = vmatprep.subr.bf16.mxu0 %v19962_v7  ;;  %v10493_v7 = vld [vmem:[%s26181_s16 + $0x2c8] sm:$0xff]  ;;  %v19860_v47 = vpack.c.bf16 %v10476_v4, %v10468_v25 }
0x1559   : > { %v19862_v49 = vpack.c.bf16 %v10493_v7, %v10485_v16  ;;  %v10629_v25 = vld [vmem:[%s26181_s16 + $0x708] sm:$0xff] }
0x155a   : > { %v10637_v4 = vld [vmem:[%s26181_s16 + $0x748] sm:$0xff] }
0x155b   : > { %19965 = vmatpush1.bf16.msra.mxu0 %v19964_v36  ;;  %v10484_v36 = vld [vmem:[%s26181_s16 + $0x280] sm:$0xff]  ;;  %v19898_v7 = vpack.c.bf16 %v10637_v4, %v10629_v25 }
0x15e0   : > { %v9783_v22 = vpop.f32.mrb[42].mxu0 }
0x15e1   : > { %v9785_v51 = vpop.f32.mrb[43].mxu0  ;;  %v9790_v55 = vmul.f32 %v23501_v46, %v9783_v22  ;;  %v10405_v46 = vld [vmem:[%s26181_s16 + $0x8] sm:$0xff]  ;;  %v10492_v22 = vld [vmem:[%s26181_s16 + $0x2c0] sm:$0xff] }
0x15e2   : > { %v9791_v52 = vmul.f32 %v23504_v40, %v9785_v51  ;;  %v10413_v40 = vld [vmem:[%s26181_s16 + $0x48] sm:$0xff] }
0x15e3   : > { %v10501_v51 = vld [vmem:[%s26181_s16 + $0x308] sm:$0xff] }
0x15f0   : > { %v10032_v56 = vpop.f32.mrb[50].mxu1 }
0x15f1   : > { %v10039_v29 = vadd.f32 %v10032_v56, %v9790_v55  ;;  %v10034_v33 = vpop.f32.mrb[51].mxu1  ;;  %v10509_v55 = vld [vmem:[%s26181_s16 + $0x348] sm:$0xff] }
0x15f2   : > { %v10040_v15 = vadd.f32 %v10034_v33, %v9791_v52  ;;  %v19864_v52 = vpack.c.bf16 %v10492_v22, %v10484_v36  ;;  %v19866_v56 = vpack.c.bf16 %v10509_v55, %v10501_v51  ;;  %v10508_v33 = vld [vmem:[%s26181_s16 + $0x340] sm:$0xff]  ;;  %v10645_v22 = vld [vmem:[%s26181_s16 + $0x788] sm:$0xff]  ;;  %v10647_v55 = vld [vmem:[%s26181_s16 + $0x798] sm:$0xff] }
0x15f3   : > { %v10653_v51 = vld [vmem:[%s26181_s16 + $0x7c8] sm:$0xff] }
0x15f5   : > { %v10291_v37 = vpop.f32.mrb[44].mxu0 }
0x15f6   : > { %v10298_v34 = vmul.f32 %v23513_v32, %v10291_v37  ;;  %v10293_v42 = vpop.f32.mrb[45].mxu0  ;;  %v10525_v37 = vld [vmem:[%s26181_s16 + $0x3c8] sm:$0xff] }
0x15f7   : > { %v10299_v57 = vmul.f32 %v23516_v35, %v10293_v42  ;;  %v19842_v35 = vpack.c.bf16 %v10413_v40, %v10405_v46  ;;  %v10540_v46 = vld [vmem:[%s26181_s16 + $0x440] sm:$0xff]  ;;  %v10549_v40 = vld [vmem:[%s26181_s16 + $0x488] sm:$0xff] }
0x15f8   : > { %v10300_v48 = vadd.f32 %v10298_v34, %v10039_v29  ;;  %v10500_v29 = vld [vmem:[%s26181_s16 + $0x300] sm:$0xff] }
0x15f9   : > { %v10301_v18 = vadd.f32 %v10299_v57, %v10040_v15  ;;  %v10517_v15 = vld [vmem:[%s26181_s16 + $0x388] sm:$0xff]  ;;  %v19868_v34 = vpack.c.bf16 %v10508_v33, %v10500_v29  ;;  %v10516_v57 = vld [vmem:[%s26181_s16 + $0x380] sm:$0xff] }
0x15fa   : > { %v10306_v39 = vadd.f32 %v10304_v11, %v10300_v48  ;;  %v19870_v42 = vpack.c.bf16 %v10525_v37, %v10517_v15  ;;  %v10533_v48 = vld [vmem:[%s26181_s16 + $0x408] sm:$0xff]  ;;  %v10644_v29 = vld [vmem:[%s26181_s16 + $0x780] sm:$0xff] }
0x15fb   : > { %v10307_v24 = vadd.f32 %v10304_v11, %v10301_v18  ;;  %v10524_v11 = vld [vmem:[%s26181_s16 + $0x3c0] sm:$0xff]  ;;  %v10541_v18 = vld [vmem:[%s26181_s16 + $0x448] sm:$0xff] }
0x15fc   : > { %v10308_v41 = vmax.f32 %v10306_v39, 0.0  ;;  %v19872_v39 = vpack.c.bf16 %v10524_v11, %v10516_v57  ;;  %v10652_v33 = vld [vmem:[%s26181_s16 + $0x7c0] sm:$0xff]  ;;  %v10409_v11 = vld [vmem:[%s26181_s16 + $0x28] sm:$0xff] }
0x15fd   : > { %v10309_v61 = vmax.f32 %v10307_v24, 0.0  ;;  %v19874_v24 = vpack.c.bf16 %v10541_v18, %v10533_v48  ;;  %v19904_v37 = vpack.c.bf16 %v10652_v33, %v10644_v29  ;;  %v10417_v48 = vld [vmem:[%s26181_s16 + $0x68] sm:$0xff]  ;;  %v10411_v18 = vld [vmem:[%s26181_s16 + $0x38] sm:$0xff]  ;;  %v10440_v33 = vld [vmem:[%s26181_s16 + $0x120] sm:$0xff] }
0x15fe   : > { %10310 = vst [vmem:[#allocation2 + $0x58] sm:$0xff] %v10308_v41  ;;  %v19840_v28 = vpack.c.bf16 %v10308_v41, %v23522_v62  ;;  %v10428_v62 = vld [vmem:[%s26181_s16 + $0xc0] sm:$0xff] }
0x15ff   : > { %10311 = vst [vmem:[#allocation2 + $0x60] sm:$0xff] %v10309_v61  ;;  %v19838_v32 = vpack.c.bf16 %v10309_v61, %v23524_v2  ;;  %v19844_v2 = vpack.c.bf16 %v10412_v12, %v10404_v8  ;;  %v19848_v0 = vpack.c.bf16 %v10428_v62, %v10420_v30  ;;  %v10532_v41 = vld [vmem:[%s26181_s16 + $0x400] sm:$0xff]  ;;  %v10557_v61 = vld [vmem:[%s26181_s16 + $0x4c8] sm:$0xff] }
0x1600   : > { %v10548_v8 = vld [vmem:[%s26181_s16 + $0x480] sm:$0xff]  ;;  %v10581_v62 = vld [vmem:[%s26181_s16 + $0x588] sm:$0xff] }
0x1601   : > { %19839 = vmatprep.subr.bf16.mxu1 %v19838_v32  ;;  %v19876_v32 = vpack.c.bf16 %v10540_v46, %v10532_v41  ;;  %v10556_v12 = vld [vmem:[%s26181_s16 + $0x4c0] sm:$0xff]  ;;  %v11043_v46 = vld [vmem:[#allocation2 + $0x50] sm:$0x7] }
0x1602   : > { %19841 = vmatpush1.bf16.msra.mxu1 %v19840_v28  ;;  %v10565_v28 = vld [vmem:[%s26181_s16 + $0x508] sm:$0xff]  ;;  %v19880_v58 = vpack.c.bf16 %v10556_v12, %v10548_v8  ;;  %v10572_v30 = vld [vmem:[%s26181_s16 + $0x540] sm:$0xff]  ;;  %v24029_v8 = vld [vmem:[#allocation2 + $0x18] sm:$0xff] }
0x1603   : > { %19843 = vmatprep.subr.bf16.mxu1 %v19842_v35  ;;  %v19878_v35 = vpack.c.bf16 %v10557_v61, %v10549_v40  ;;  %v11041_v40 = vld [vmem:[#allocation2 + $0x38] sm:$0xff]  ;;  %v11042_v61 = vld [vmem:[#allocation2 + $0x40] sm:$0xff] }
0x1605   : > { %18129 = vmatmul.mubr.msk.f32.vlgmr.msra.gmra.mrb[52].mxu1 %vm26293_vm12, %v10323_v20  ;;  %v10589_v20 = vld [vmem:[%s26181_s16 + $0x5c8] sm:$0xff] }
0x1606   : > { %19845 = vmatpush1.bf16.msra.mxu1 %v19844_v2  ;;  %v19882_v2 = vpack.c.bf16 %v10573_v3, %v10565_v28  ;;  %v19886_v60 = vpack.c.bf16 %v10589_v20, %v10581_v62  ;;  %v24035_v28 = vpack.i.bf16 %v11042_v61, %v11041_v40  ;;  %v24038_v3 = vld [vmem:[%s23478_s23 + $0x20] sm:$0xff]  ;;  %v24084_v20 = vld [vmem:[#allocation2 + $0x10] sm:$0xff] }
0x1607   : > { %19847 = vmatprep.subr.bf16.mxu1 %v19846_v21  ;;  %v10564_v21 = vld [vmem:[%s26181_s16 + $0x500] sm:$0xff] }
0x1608   : > { %v19884_v59 = vpack.c.bf16 %v10572_v30, %v10564_v21  ;;  %v24060_v21 = vpack.i.bf16 %v23498_v54, %v11042_v61  ;;  %v24067_v30 = vld [vmem:[%s23478_s23 + $0x28] sm:$0xff] }
0x1609   : > { %v24072_v62 = vpack.i.bf16 %v11041_v40, %v24067_v30  ;;  %v10464_v40 = vld [vmem:[%s26181_s16 + $0x1e0] sm:$0xff] }
0x160a   : > { %19849 = vmatpush1.bf16.msra.mxu1 %v19848_v0  ;;  %v10580_v0 = vld [vmem:[%s26181_s16 + $0x580] sm:$0xff] }
0x160b   : > { %19851 = vmatprep.subr.bf16.mxu1 %v19850_v63  ;;  %v10588_v63 = vld [vmem:[%s26181_s16 + $0x5c0] sm:$0xff] }
0x160c   : > { %v19888_v53 = vpack.c.bf16 %v10588_v63, %v10580_v0  ;;  %v10408_v63 = vld [vmem:[%s26181_s16 + $0x20] sm:$0xff] }
0x160e   : > { %19853 = vmatpush1.bf16.msra.mxu1 %v19852_v10  ;;  %v10596_v10 = vld [vmem:[%s26181_s16 + $0x600] sm:$0xff] }
0x160f   : > { %19855 = vmatprep.subr.bf16.mxu1 %v19854_v26  ;;  %v10604_v26 = vld [vmem:[%s26181_s16 + $0x640] sm:$0xff] }
0x1610   : > { %v19892_v27 = vpack.c.bf16 %v10604_v26, %v10596_v10  ;;  %v10418_v10 = vld [vmem:[%s26181_s16 + $0x70] sm:$0xff] }
0x1612   : > { %19857 = vmatpush1.bf16.msra.mxu1 %v19856_v45  ;;  %v10612_v45 = vld [vmem:[%s26181_s16 + $0x680] sm:$0xff] }
0x1613   : > { %19859 = vmatprep.subr.bf16.mxu1 %v19858_v1  ;;  %v10620_v1 = vld [vmem:[%s26181_s16 + $0x6c0] sm:$0xff] }
0x1614   : > { %v19896_v16 = vpack.c.bf16 %v10620_v1, %v10612_v45  ;;  %v10435_v45 = vld [vmem:[%s26181_s16 + $0xf8] sm:$0xff] }
0x1616   : > { %19861 = vmatpush1.bf16.msra.mxu1 %v19860_v47  ;;  %v10628_v47 = vld [vmem:[%s26181_s16 + $0x700] sm:$0xff] }
0x1617   : > { %19863 = vmatprep.subr.bf16.mxu1 %v19862_v49  ;;  %v10636_v49 = vld [vmem:[%s26181_s16 + $0x740] sm:$0xff] }
0x1618   : > { %v19900_v36 = vpack.c.bf16 %v10636_v49, %v10628_v47  ;;  %v10434_v47 = vld [vmem:[%s26181_s16 + $0xf0] sm:$0xff] }
0x161a   : > { %19865 = vmatpush1.bf16.msra.mxu1 %v19864_v52  ;;  %v19902_v52 = vpack.c.bf16 %v10653_v51, %v10645_v22  ;;  %v10449_v51 = vld [vmem:[%s26181_s16 + $0x168] sm:$0xff] }
0x161b   : > { %19867 = vmatprep.subr.bf16.mxu1 %v19866_v56  ;;  %v10655_v56 = vld [vmem:[%s26181_s16 + $0x7d8] sm:$0xff] }
0x161c   : > { %v19966_v15 = vpack.c.bf16 %v10655_v56, %v10647_v55  ;;  %v10443_v55 = vld [vmem:[%s26181_s16 + $0x138] sm:$0xff] }
0x161e   : > { %19869 = vmatpush1.bf16.msra.mxu1 %v19868_v34  ;;  %v10646_v34 = vld [vmem:[%s26181_s16 + $0x790] sm:$0xff]  ;;  %19967 = vmatprep.subr.bf16.mxu0 %v19966_v15  ;;  %v10448_v15 = vld [vmem:[%s26181_s16 + $0x160] sm:$0xff] }
0x161f   : > { %19871 = vmatprep.subr.bf16.mxu1 %v19870_v42  ;;  %v10654_v42 = vld [vmem:[%s26181_s16 + $0x7d0] sm:$0xff] }
0x1620   : > { %v19968_v57 = vpack.c.bf16 %v10654_v42, %v10646_v34  ;;  %v10442_v42 = vld [vmem:[%s26181_s16 + $0x130] sm:$0xff] }
0x1622   : > { %19873 = vmatpush1.bf16.msra.mxu1 %v19872_v39  ;;  %19969 = vmatpush1.bf16.msra.mxu0 %v19968_v57  ;;  %v19970_v39 = vpack.c.bf16 %v10417_v48, %v10409_v11  ;;  %v10450_v57 = vld [vmem:[%s26181_s16 + $0x170] sm:$0xff]  ;;  %v10457_v11 = vld [vmem:[%s26181_s16 + $0x1a8] sm:$0xff] }
0x1623   : > { %19875 = vmatprep.subr.bf16.mxu1 %v19874_v24  ;;  %v10419_v24 = vld [vmem:[%s26181_s16 + $0x78] sm:$0xff]  ;;  %v10465_v48 = vld [vmem:[%s26181_s16 + $0x1e8] sm:$0xff] }
0x1624   : > { %v20034_v41 = vpack.c.bf16 %v10419_v24, %v10411_v18  ;;  %v10459_v18 = vld [vmem:[%s26181_s16 + $0x1b8] sm:$0xff]  ;;  %v19980_v24 = vpack.c.bf16 %v10448_v15, %v10440_v33  ;;  %v19982_v61 = vpack.c.bf16 %v10465_v48, %v10457_v11  ;;  %v10504_v15 = vld [vmem:[%s26181_s16 + $0x320] sm:$0xff]  ;;  %v10514_v11 = vld [vmem:[%s26181_s16 + $0x370] sm:$0xff] }
0x1625   : > { %v10521_v48 = vld [vmem:[%s26181_s16 + $0x3a8] sm:$0xff] }
0x1626   : > { %19877 = vmatpush1.bf16.msra.mxu1 %v19876_v32  ;;  %20035 = vmatprep.subr.bf16.mxu0 %v20034_v41  ;;  %v21129_v32 = vpack.i.bf16 %v11043_v46, %v23498_v54  ;;  %v24082_v54 = vld [vmem:[#allocation2 + $0x8] sm:$0xff]  ;;  %v20044_v41 = vpack.c.bf16 %v10450_v57, %v10442_v42  ;;  %v10456_v46 = vld [vmem:[%s26181_s16 + $0x1a0] sm:$0xff]  ;;  %v10506_v57 = vld [vmem:[%s26181_s16 + $0x330] sm:$0xff] }
0x1627   : > { %19879 = vmatprep.subr.bf16.mxu1 %v19878_v35  ;;  %v11013_v35 = vld [vmem:[%s23478_s23 + $0x18] sm:$0xff] }
0x1628   : > { %v24032_v12 = vpack.i.bf16 %v11013_v35, %v24029_v8  ;;  %21130 = vrot.lane.b32.xlu0 %v21129_v32, %s26331_s30 }
0x162a   : > { %19881 = vmatpush1.bf16.msra.mxu1 %v19880_v58  ;;  %21135 = vrot.lane.b32.xlu1 %v24032_v12, %s26331_s30  ;;  %v24045_v58 = vpack.i.bf16 %v24038_v3, %v11013_v35  ;;  %v10458_v35 = vld [vmem:[%s26181_s16 + $0x1b0] sm:$0xff] }
0x162b   : > { %19883 = vmatprep.subr.bf16.mxu1 %v19882_v2  ;;  %v24050_v2 = vld [vmem:[%s26373_s12] sm:$0xff] }
0x162c   : > { %21140 = vrot.lane.b32.xlu0 %v24035_v28, %s26331_s30 }
0x162e   : > { %19885 = vmatpush1.bf16.msra.mxu1 %v19884_v59  ;;  %11054 = vrot.lane.b32.xlu1 %v24050_v2, %s26353_s6  ;;  %v21209_v59 = vpack.i.bf16 %v24084_v20, %v24082_v54 }
0x162f   : > { %19887 = vmatprep.subr.bf16.mxu1 %v19886_v60  ;;  %v10320_v60 = vpop.permute.xlu1 %10319 }
0x1630   : > { %21160 = vrot.lane.b32.xlu0 %v24045_v58, %s21586_s5 }
0x1632   : > { %19889 = vmatpush1.bf16.msra.mxu1 %v19888_v53  ;;  %21145 = vrot.lane.b32.xlu1 %v21129_v32, %s26335_s15  ;;  %v10416_v53 = vld [vmem:[%s26181_s16 + $0x60] sm:$0xff] }
0x1633   : > { %19891 = vmatprep.subr.bf16.mxu1 %v19890_v13  ;;  %v10410_v13 = vld [vmem:[%s26181_s16 + $0x30] sm:$0xff]  ;;  %v19972_v25 = vpack.c.bf16 %v10416_v53, %v10408_v63  ;;  %v10475_v63 = vld [vmem:[%s26181_s16 + $0x238] sm:$0xff] }
0x1634   : > { %11817 = vrot.lane.b32.xlu0 %v24050_v2, %s26354_s3  ;;  %s26266_s3 = smov 31   ;;  %v20036_v4 = vpack.c.bf16 %v10418_v10, %v10410_v13  ;;  %v10472_v13 = vld [vmem:[%s26181_s16 + $0x220] sm:$0xff] }
0x1635   : > { %v10480_v10 = vld [vmem:[%s26181_s16 + $0x260] sm:$0xff] }
0x1636   : > { %19893 = vmatpush1.bf16.msra.mxu1 %v19892_v27  ;;  %21150 = vrot.lane.b32.xlu1 %v24032_v12, %s26335_s15  ;;  %v10433_v27 = vld [vmem:[%s26181_s16 + $0xe8] sm:$0xff] }
0x1637   : > { %19895 = vmatprep.subr.bf16.mxu1 %v19894_v44  ;;  %v10427_v44 = vld [vmem:[%s26181_s16 + $0xb8] sm:$0xff] }
0x1638   : > { %21170 = vrot.lane.b32.xlu0 %v24060_v21, %s21586_s5  ;;  %v20038_v22 = vpack.c.bf16 %v10435_v45, %v10427_v44  ;;  %v10482_v44 = vld [vmem:[%s26181_s16 + $0x270] sm:$0xff]  ;;  %v10489_v45 = vld [vmem:[%s26181_s16 + $0x2a8] sm:$0xff] }
0x163a   : > { %19897 = vmatpush1.bf16.msra.mxu1 %v19896_v16  ;;  %21155 = vrot.lane.b32.xlu1 %v24035_v28, %s26335_s15  ;;  %v10432_v16 = vld [vmem:[%s26181_s16 + $0xe0] sm:$0xff] }
0x163b   : > { %19899 = vmatprep.subr.bf16.mxu1 %v19898_v7  ;;  %v10426_v7 = vld [vmem:[%s26181_s16 + $0xb0] sm:$0xff] }
0x163c   : > { %21175 = vrot.lane.b32.xlu0 %v24045_v58, %s26317_s1  ;;  %v20040_v29 = vpack.c.bf16 %v10434_v47, %v10426_v7  ;;  %v10488_v7 = vld [vmem:[%s26181_s16 + $0x2a0] sm:$0xff] }
0x163d   : > { %v10496_v47 = vld [vmem:[%s26181_s16 + $0x2e0] sm:$0xff] }
0x163e   : > { %19901 = vmatpush1.bf16.msra.mxu1 %v19900_v36  ;;  %21165 = vrot.lane.b32.xlu1 %v24072_v62, %s21586_s5  ;;  %v19974_v36 = vpack.c.bf16 %v10433_v27, %v10425_v23  ;;  %v10474_v27 = vld [vmem:[%s26181_s16 + $0x230] sm:$0xff] }
0x163f   : > { %19903 = vmatprep.subr.bf16.mxu1 %v19902_v52  ;;  %v10451_v52 = vld [vmem:[%s26181_s16 + $0x178] sm:$0xff] }
0x1640   : > { %12216 = vrot.lane.b32.xlu0 %v24050_v2, %s26329_s22  ;;  %s26268_s22 = smov 32   ;;  %v20042_v34 = vpack.c.bf16 %v10451_v52, %v10443_v55  ;;  %v10513_v55 = vld [vmem:[%s26181_s16 + $0x368] sm:$0xff]  ;;  %v10507_v52 = vld [vmem:[%s26181_s16 + $0x338] sm:$0xff] }
0x1642   : > { %19905 = vmatpush1.bf16.msra.mxu1 %v19904_v37  ;;  %13265 = vrot.lane.b32.xlu1 %v24050_v2, %s26355_s20 }
0x1643   : > { %19971 = vmatprep.subr.bf16.mxu1 %v19970_v39  ;;  %v10467_v39 = vld [vmem:[%s26181_s16 + $0x1f8] sm:$0xff] }
0x1644   : > { %21180 = vrot.lane.b32.xlu0 %v24072_v62, %s26317_s1 }
0x1646   : > { %21195 = vrot.lane.b32.xlu1 %v21129_v32, %s26266_s3 }
0x1648   : > { %21185 = vrot.lane.b32.xlu0 %v24060_v21, %s26317_s1 }
0x164a   : > { %21210 = vrot.lane.b32.xlu1 %v21209_v59, %s26335_s15 }
0x164c   : > { %21190 = vrot.lane.b32.xlu0 %v21129_v32, %s26268_s22  ;;  %v20046_v32 = vpack.c.bf16 %v10467_v39, %v10459_v18  ;;  %v10529_v18 = vld [vmem:[%s26181_s16 + $0x3e8] sm:$0xff]  ;;  %v10523_v39 = vld [vmem:[%s26181_s16 + $0x3b8] sm:$0xff] }
0x1650   : > { %21200 = vrot.lane.b32.xlu0 %v24032_v12, %s26268_s22 }
0x1654   : > { %21205 = vrot.lane.b32.xlu0 %v21209_v59, %s26331_s30 }
0x1658   : > { %21225 = vrot.lane.b32.xlu0 %v21209_v59, %s26268_s22  ;;  %s26433_s22 = smov 83  }
0x165c   : > { %21230 = vrot.lane.b32.xlu0 %v21209_v59, %s26266_s3  ;;  %v10466_v59 = vld [vmem:[%s26181_s16 + $0x1f0] sm:$0xff] }
0x165d   : > { %v20048_v53 = vpack.c.bf16 %v10466_v59, %v10458_v35  ;;  %v10522_v59 = vld [vmem:[%s26181_s16 + $0x3b0] sm:$0xff] }
0x16d8   : > { %v10392_v0 = vpop.f32.mrb[52].mxu1 }
0x16d9   : > { %v10393_v9 = vadd.f32 %v10392_v0, %v10320_v60  ;;  %v10394_v6 = vpop.f32.mrb[53].mxu1  ;;  %v10481_v0 = vld [vmem:[%s26181_s16 + $0x268] sm:$0xff] }
0x16da   : > { %v10395_v26 = vadd.f32 %v10394_v6, %v10320_v60  ;;  %v10473_v60 = vld [vmem:[%s26181_s16 + $0x228] sm:$0xff]  ;;  %v19984_v6 = vpack.c.bf16 %v10464_v40, %v10456_v46  ;;  %v20060_v46 = vpack.c.bf16 %v10514_v11, %v10506_v57  ;;  %v10520_v40 = vld [vmem:[%s26181_s16 + $0x3a0] sm:$0xff]  ;;  %v10570_v11 = vld [vmem:[%s26181_s16 + $0x530] sm:$0xff] }
0x16db   : > { %v24116_v14 = vadd.f32 %v10393_v9, %v23284_v19  ;;  %v10424_v19 = vld [vmem:[%s26181_s16 + $0xa0] sm:$0xff]  ;;  %v10483_v9 = vld [vmem:[%s26181_s16 + $0x278] sm:$0xff] }
0x16dc   : > { %v10398_v1 = vadd.f32 %v10395_v26, %v23287_v50  ;;  %v10441_v50 = vld [vmem:[%s26181_s16 + $0x128] sm:$0xff]  ;;  %v19976_v56 = vpack.c.bf16 %v10432_v16, %v10424_v19  ;;  %v19986_v26 = vpack.c.bf16 %v10481_v0, %v10473_v60  ;;  %v20050_v23 = vpack.c.bf16 %v10483_v9, %v10475_v63  ;;  %v10530_v60 = vld [vmem:[%s26181_s16 + $0x3f0] sm:$0xff]  ;;  %v10539_v9 = vld [vmem:[%s26181_s16 + $0x438] sm:$0xff] }
0x16dd   : > { %v19978_v37 = vpack.c.bf16 %v10449_v51, %v10441_v50  ;;  %v19988_v19 = vpack.c.bf16 %v10480_v10, %v10472_v13  ;;  %v20052_v16 = vpack.c.bf16 %v10482_v44, %v10474_v27  ;;  %v10505_v51 = vld [vmem:[%s26181_s16 + $0x328] sm:$0xff]  ;;  %v20064_v13 = vpack.c.bf16 %v10530_v60, %v10522_v59  ;;  %v10536_v10 = vld [vmem:[%s26181_s16 + $0x420] sm:$0xff]  ;;  %v10538_v44 = vld [vmem:[%s26181_s16 + $0x430] sm:$0xff] }
0x16de   : > { %v10401_v49 = vcombine.low %v24116_v14, %v10398_v1  ;;  %10724 = vmatprep.mubr.f32.mxu1 %v10398_v1  ;;  %10795 = vmatprep.mubr.f32.mxu0 %v10398_v1  ;;  %v10537_v0 = vld [vmem:[%s26181_s16 + $0x428] sm:$0xff]  ;;  %v10586_v60 = vld [vmem:[%s26181_s16 + $0x5b0] sm:$0xff] }
0x16df   : > { %10725 = vmatmul.mubr.f32.vlgmr.msra.gmra.mrb[54].mxu1 %v24116_v14  ;;  %10796 = vmatmul.mubr.f32.vlgmr.msra.gmra.mrb[46].mxu0 %v24116_v14  ;;  %v10545_v63 = vld [vmem:[%s26181_s16 + $0x468] sm:$0xff] }
0x16e0   : > { %10403 = vst [vmem:[%s22973_s0 + $0x8] sm:$0x77] %v10401_v49  ;;  %19973 = vmatpush1.bf16.msra.mxu1 %v19972_v25  ;;  %20037 = vmatpush1.bf16.msra.mxu0 %v20036_v4  ;;  %v10491_v25 = vld [vmem:[%s26181_s16 + $0x2b8] sm:$0xff] }
0x16e1   : > { %10866 = vmatprep.mubr.f32.mxu1 %v10398_v1  ;;  %10937 = vmatprep.mubr.f32.mxu0 %v10398_v1  ;;  %v10497_v1 = vld [vmem:[%s26181_s16 + $0x2e8] sm:$0xff]  ;;  %v10499_v4 = vld [vmem:[%s26181_s16 + $0x2f8] sm:$0xff] }
0x16e2   : > { %19975 = vmatprep.subr.bf16.mxu1 %v19974_v36  ;;  %20039 = vmatprep.subr.bf16.mxu0 %v20038_v22  ;;  %v19990_v50 = vpack.c.bf16 %v10497_v1, %v10489_v45  ;;  %v20054_v49 = vpack.c.bf16 %v10499_v4, %v10491_v25  ;;  %v10490_v36 = vld [vmem:[%s26181_s16 + $0x2b0] sm:$0xff]  ;;  %v10553_v1 = vld [vmem:[%s26181_s16 + $0x4a8] sm:$0xff]  ;;  %v10555_v4 = vld [vmem:[%s26181_s16 + $0x4b8] sm:$0xff] }
0x16e3   : > { %v10498_v22 = vld [vmem:[%s26181_s16 + $0x2f0] sm:$0xff]  ;;  %v10561_v25 = vld [vmem:[%s26181_s16 + $0x4e8] sm:$0xff] }
0x16e4   : > { %19977 = vmatpush1.bf16.msra.mxu1 %v19976_v56  ;;  %20041 = vmatpush1.bf16.msra.mxu0 %v20040_v29  ;;  %v10515_v56 = vld [vmem:[%s26181_s16 + $0x378] sm:$0xff]  ;;  %v19992_v29 = vpack.c.bf16 %v10496_v47, %v10488_v7  ;;  %v20056_v33 = vpack.c.bf16 %v10498_v22, %v10490_v36  ;;  %v10546_v45 = vld [vmem:[%s26181_s16 + $0x470] sm:$0xff]  ;;  %v10552_v47 = vld [vmem:[%s26181_s16 + $0x4a0] sm:$0xff] }
0x16e5   : > { %19979 = vmatprep.subr.bf16.mxu1 %v19978_v37  ;;  %20043 = vmatprep.subr.bf16.mxu0 %v20042_v34  ;;  %v10512_v37 = vld [vmem:[%s26181_s16 + $0x360] sm:$0xff]  ;;  %v19994_v34 = vpack.c.bf16 %v10513_v55, %v10505_v51  ;;  %v20058_v42 = vpack.c.bf16 %v10515_v56, %v10507_v52  ;;  %v20068_v7 = vpack.c.bf16 %v10546_v45, %v10538_v44  ;;  %v10554_v22 = vld [vmem:[%s26181_s16 + $0x4b0] sm:$0xff]  ;;  %v10569_v55 = vld [vmem:[%s26181_s16 + $0x528] sm:$0xff] }
0x16e6   : > { %v10562_v51 = vld [vmem:[%s26181_s16 + $0x4f0] sm:$0xff]  ;;  %v10577_v52 = vld [vmem:[%s26181_s16 + $0x568] sm:$0xff]  ;;  %v10571_v56 = vld [vmem:[%s26181_s16 + $0x538] sm:$0xff] }
0x16e7   : > { %v10602_v45 = vld [vmem:[%s26181_s16 + $0x630] sm:$0xff] }
0x16e8   : > { %19981 = vmatpush1.bf16.msra.mxu1 %v19980_v24  ;;  %20045 = vmatpush1.bf16.msra.mxu0 %v20044_v41  ;;  %v10531_v24 = vld [vmem:[%s26181_s16 + $0x3f8] sm:$0xff]  ;;  %v19996_v41 = vpack.c.bf16 %v10512_v37, %v10504_v15  ;;  %v20072_v15 = vpack.c.bf16 %v10562_v51, %v10554_v22  ;;  %v10568_v37 = vld [vmem:[%s26181_s16 + $0x520] sm:$0xff]  ;;  %v10618_v51 = vld [vmem:[%s26181_s16 + $0x6b0] sm:$0xff] }
0x16e9   : > { %19983 = vmatprep.subr.bf16.mxu1 %v19982_v61  ;;  %20047 = vmatprep.subr.bf16.mxu0 %v20046_v32  ;;  %v10528_v61 = vld [vmem:[%s26181_s16 + $0x3e0] sm:$0xff]  ;;  %v19998_v32 = vpack.c.bf16 %v10529_v18, %v10521_v48  ;;  %v20062_v35 = vpack.c.bf16 %v10531_v24, %v10523_v39  ;;  %v10578_v48 = vld [vmem:[%s26181_s16 + $0x570] sm:$0xff]  ;;  %v10585_v18 = vld [vmem:[%s26181_s16 + $0x5a8] sm:$0xff] }
0x16ea   : > { %v10593_v39 = vld [vmem:[%s26181_s16 + $0x5e8] sm:$0xff]  ;;  %v10587_v24 = vld [vmem:[%s26181_s16 + $0x5b8] sm:$0xff] }
0x16ec   : > { %19985 = vmatpush1.bf16.msra.mxu1 %v19984_v6  ;;  %20049 = vmatpush1.bf16.msra.mxu0 %v20048_v53  ;;  %v10547_v6 = vld [vmem:[%s26181_s16 + $0x478] sm:$0xff]  ;;  %v20000_v53 = vpack.c.bf16 %v10528_v61, %v10520_v40  ;;  %v20076_v40 = vpack.c.bf16 %v10578_v48, %v10570_v11  ;;  %v10584_v61 = vld [vmem:[%s26181_s16 + $0x5a0] sm:$0xff]  ;;  %v10634_v48 = vld [vmem:[%s26181_s16 + $0x730] sm:$0xff] }
0x16ed   : > { %19987 = vmatprep.subr.bf16.mxu1 %v19986_v26  ;;  %20051 = vmatprep.subr.bf16.mxu0 %v20050_v23  ;;  %v10544_v26 = vld [vmem:[%s26181_s16 + $0x460] sm:$0xff]  ;;  %v20002_v23 = vpack.c.bf16 %v10545_v63, %v10537_v0  ;;  %v20066_v27 = vpack.c.bf16 %v10547_v6, %v10539_v9  ;;  %v10594_v0 = vld [vmem:[%s26181_s16 + $0x5f0] sm:$0xff]  ;;  %v10601_v63 = vld [vmem:[%s26181_s16 + $0x628] sm:$0xff] }
0x16ee   : > { %v10609_v9 = vld [vmem:[%s26181_s16 + $0x668] sm:$0xff]  ;;  %v10603_v6 = vld [vmem:[%s26181_s16 + $0x638] sm:$0xff] }
0x16f0   : > { %19989 = vmatpush1.bf16.msra.mxu1 %v19988_v19  ;;  %20053 = vmatpush1.bf16.msra.mxu0 %v20052_v16  ;;  %v10563_v19 = vld [vmem:[%s26181_s16 + $0x4f8] sm:$0xff]  ;;  %v20004_v16 = vpack.c.bf16 %v10544_v26, %v10536_v10  ;;  %v20080_v10 = vpack.c.bf16 %v10594_v0, %v10586_v60  ;;  %v10600_v26 = vld [vmem:[%s26181_s16 + $0x620] sm:$0xff]  ;;  %v10650_v0 = vld [vmem:[%s26181_s16 + $0x7b0] sm:$0xff] }
0x16f1   : > { %19991 = vmatprep.subr.bf16.mxu1 %v19990_v50  ;;  %20055 = vmatprep.subr.bf16.mxu0 %v20054_v49  ;;  %v10560_v50 = vld [vmem:[%s26181_s16 + $0x4e0] sm:$0xff]  ;;  %v20006_v49 = vpack.c.bf16 %v10561_v25, %v10553_v1  ;;  %v20070_v36 = vpack.c.bf16 %v10563_v19, %v10555_v4  ;;  %v10610_v1 = vld [vmem:[%s26181_s16 + $0x670] sm:$0xff]  ;;  %v10617_v25 = vld [vmem:[%s26181_s16 + $0x6a8] sm:$0xff] }
0x16f2   : > { %v10625_v4 = vld [vmem:[%s26181_s16 + $0x6e8] sm:$0xff]  ;;  %v10619_v19 = vld [vmem:[%s26181_s16 + $0x6b8] sm:$0xff]  ;;  %v10656_v60 = vld [vmem:[%s26181_s16 + $0x7e0] sm:$0xff] }
0x16f4   : > { %19993 = vmatpush1.bf16.msra.mxu1 %v19992_v29  ;;  %20057 = vmatpush1.bf16.msra.mxu0 %v20056_v33  ;;  %v10579_v29 = vld [vmem:[%s26181_s16 + $0x578] sm:$0xff]  ;;  %v20008_v33 = vpack.c.bf16 %v10560_v50, %v10552_v47  ;;  %v20084_v47 = vpack.c.bf16 %v10610_v1, %v10602_v45  ;;  %v10616_v50 = vld [vmem:[%s26181_s16 + $0x6a0] sm:$0xff] }
0x16f5   : > { %19995 = vmatprep.subr.bf16.mxu1 %v19994_v34  ;;  %20059 = vmatprep.subr.bf16.mxu0 %v20058_v42  ;;  %v10576_v34 = vld [vmem:[%s26181_s16 + $0x560] sm:$0xff]  ;;  %v20010_v42 = vpack.c.bf16 %v10577_v52, %v10569_v55  ;;  %v20074_v57 = vpack.c.bf16 %v10579_v29, %v10571_v56  ;;  %v10626_v55 = vld [vmem:[%s26181_s16 + $0x6f0] sm:$0xff]  ;;  %v10633_v52 = vld [vmem:[%s26181_s16 + $0x728] sm:$0xff] }
0x16f6   : > { %v10641_v56 = vld [vmem:[%s26181_s16 + $0x768] sm:$0xff]  ;;  %v10635_v29 = vld [vmem:[%s26181_s16 + $0x738] sm:$0xff] }
0x16f8   : > { %19997 = vmatpush1.bf16.msra.mxu1 %v19996_v41  ;;  %20061 = vmatpush1.bf16.msra.mxu0 %v20060_v46  ;;  %v10595_v41 = vld [vmem:[%s26181_s16 + $0x5f8] sm:$0xff]  ;;  %v20012_v46 = vpack.c.bf16 %v10576_v34, %v10568_v37  ;;  %v20088_v37 = vpack.c.bf16 %v10626_v55, %v10618_v51  ;;  %v10632_v34 = vld [vmem:[%s26181_s16 + $0x720] sm:$0xff] }
0x16f9   : > { %19999 = vmatprep.subr.bf16.mxu1 %v19998_v32  ;;  %20063 = vmatprep.subr.bf16.mxu0 %v20062_v35  ;;  %v10592_v32 = vld [vmem:[%s26181_s16 + $0x5e0] sm:$0xff]  ;;  %v20014_v35 = vpack.c.bf16 %v10593_v39, %v10585_v18  ;;  %v20078_v59 = vpack.c.bf16 %v10595_v41, %v10587_v24  ;;  %v10642_v18 = vld [vmem:[%s26181_s16 + $0x770] sm:$0xff]  ;;  %v10649_v39 = vld [vmem:[%s26181_s16 + $0x7a8] sm:$0xff] }
0x16fa   : > { %v10657_v24 = vld [vmem:[%s26181_s16 + $0x7e8] sm:$0xff]  ;;  %v10651_v41 = vld [vmem:[%s26181_s16 + $0x7b8] sm:$0xff] }
0x16fc   : > { %20001 = vmatpush1.bf16.msra.mxu1 %v20000_v53  ;;  %20065 = vmatpush1.bf16.msra.mxu0 %v20064_v13  ;;  %v10611_v53 = vld [vmem:[%s26181_s16 + $0x678] sm:$0xff]  ;;  %v20016_v13 = vpack.c.bf16 %v10592_v32, %v10584_v61  ;;  %v20092_v61 = vpack.c.bf16 %v10642_v18, %v10634_v48  ;;  %v10648_v32 = vld [vmem:[%s26181_s16 + $0x7a0] sm:$0xff] }
0x16fd   : > { %20003 = vmatprep.subr.bf16.mxu1 %v20002_v23  ;;  %20067 = vmatprep.subr.bf16.mxu0 %v20066_v27  ;;  %v10608_v23 = vld [vmem:[%s26181_s16 + $0x660] sm:$0xff]  ;;  %v20018_v27 = vpack.c.bf16 %v10609_v9, %v10601_v63  ;;  %v20082_v44 = vpack.c.bf16 %v10611_v53, %v10603_v6  ;;  %v10658_v63 = vld [vmem:[%s26181_s16 + $0x7f0] sm:$0xff]  ;;  %v20032_v9 = vpack.c.bf16 %v10656_v60, %v10648_v32 }
0x16fe   : > { %v20096_v6 = vpack.c.bf16 %v10658_v63, %v10650_v0  ;;  %v24482_v53 = vld [vmem:[#allocation2 + $0xf0] sm:$0xff] }
0x1700   : > { %20005 = vmatpush1.bf16.msra.mxu1 %v20004_v16  ;;  %20069 = vmatpush1.bf16.msra.mxu0 %v20068_v7  ;;  %v10627_v16 = vld [vmem:[%s26181_s16 + $0x6f8] sm:$0xff]  ;;  %v20020_v7 = vpack.c.bf16 %v10608_v23, %v10600_v26 }
0x1701   : > { %20007 = vmatprep.subr.bf16.mxu1 %v20006_v49  ;;  %20071 = vmatprep.subr.bf16.mxu0 %v20070_v36  ;;  %v10624_v49 = vld [vmem:[%s26181_s16 + $0x6e0] sm:$0xff]  ;;  %v20022_v36 = vpack.c.bf16 %v10625_v4, %v10617_v25  ;;  %v20086_v22 = vpack.c.bf16 %v10627_v16, %v10619_v19 }
0x1704   : > { %20009 = vmatpush1.bf16.msra.mxu1 %v20008_v33  ;;  %20073 = vmatpush1.bf16.msra.mxu0 %v20072_v15  ;;  %v10643_v33 = vld [vmem:[%s26181_s16 + $0x778] sm:$0xff]  ;;  %v20024_v15 = vpack.c.bf16 %v10624_v49, %v10616_v50  ;;  %v24544_v49 = vpop.permute.xlu1 %21135 }
0x1705   : > { %20011 = vmatprep.subr.bf16.mxu1 %v20010_v42  ;;  %20075 = vmatprep.subr.bf16.mxu0 %v20074_v57  ;;  %v10640_v42 = vld [vmem:[%s26181_s16 + $0x760] sm:$0xff]  ;;  %v20026_v57 = vpack.c.bf16 %v10641_v56, %v10633_v52  ;;  %v20090_v11 = vpack.c.bf16 %v10643_v33, %v10635_v29 }
0x1708   : > { %20013 = vmatpush1.bf16.msra.mxu1 %v20012_v46  ;;  %20077 = vmatpush1.bf16.msra.mxu0 %v20076_v40  ;;  %v10659_v46 = vld [vmem:[%s26181_s16 + $0x7f8] sm:$0xff]  ;;  %v20028_v40 = vpack.c.bf16 %v10640_v42, %v10632_v34 }
0x1709   : > { %20015 = vmatprep.subr.bf16.mxu1 %v20014_v35  ;;  %20079 = vmatprep.subr.bf16.mxu0 %v20078_v59  ;;  %v20030_v35 = vpack.c.bf16 %v10657_v24, %v10649_v39  ;;  %v20094_v59 = vpack.c.bf16 %v10659_v46, %v10651_v41 }
0x170c   : > { %20017 = vmatpush1.bf16.msra.mxu1 %v20016_v13  ;;  %20081 = vmatpush1.bf16.msra.mxu0 %v20080_v10  ;;  %v24488_v13 = vpack.i.bf16 %v24029_v8, %v24084_v20 }
0x170d   : > { %20019 = vmatprep.subr.bf16.mxu1 %v20018_v27  ;;  %20083 = vmatprep.subr.bf16.mxu0 %v20082_v44 }
0x170e   : > { %21215 = vrot.lane.b32.xlu1 %v24488_v13, %s21586_s5 }
0x1710   : > { %20021 = vmatpush1.bf16.msra.mxu1 %v20020_v7  ;;  %20085 = vmatpush1.bf16.msra.mxu0 %v20084_v47  ;;  %v24538_v7 = vpop.permute.xlu0 %21130 }
0x1711   : > { %20023 = vmatprep.subr.bf16.mxu1 %v20022_v36  ;;  %20087 = vmatprep.subr.bf16.mxu0 %v20086_v22  ;;  %v24548_v22 = vpop.permute.xlu1 %11054  ;;  %v21133_v17 = vunpack.i.h.bf16 %v24538_v7 }
0x1712   : > { %21220 = vrot.lane.b32.xlu1 %v24488_v13, %s26317_s1 }
0x1714   : > { %20025 = vmatpush1.bf16.msra.mxu1 %v20024_v15  ;;  %20089 = vmatpush1.bf16.msra.mxu0 %v20088_v37  ;;  %v24540_v47 = vpop.permute.xlu0 %21140 }
0x1715   : > { %20027 = vmatprep.subr.bf16.mxu1 %v20026_v57  ;;  %20091 = vmatprep.subr.bf16.mxu0 %v20090_v11  ;;  %v24564_v33 = vpop.permute.xlu1 %21145 }
0x1718   : > { %20029 = vmatpush1.bf16.msra.mxu1 %v20028_v40  ;;  %20093 = vmatpush1.bf16.msra.mxu0 %v20092_v61  ;;  %v24542_v50 = vpop.permute.xlu0 %21160 }
0x1719   : > { %20031 = vmatprep.subr.bf16.mxu1 %v20030_v35  ;;  %20095 = vmatprep.subr.bf16.mxu0 %v20094_v59  ;;  %v24574_v48 = vpop.permute.xlu1 %21150 }
0x171c   : > { %20033 = vmatpush1.bf16.msra.mxu1 %v20032_v9  ;;  %20097 = vmatpush1.bf16.msra.mxu0 %v20096_v6  ;;  %v24546_v36 = vpop.permute.xlu0 %11817 }
0x171d   : > { %v24595_v61 = vpop.permute.xlu1 %21155 }
0x171f   : > { %10867 = vmatmul.mubr.f32.vlgmr.msra.gmra.mrb[56].mxu1 %v24116_v14  ;;  %10938 = vmatmul.mubr.f32.vlgmr.msra.gmra.mrb[48].mxu0 %v24116_v14 }
0x1720   : > { %11216 = vmatprep.mubr.f32.mxu1 %v24482_v53  ;;  %11358 = vmatprep.mubr.f32.mxu0 %v24482_v53  ;;  %v24562_v29 = vpop.permute.xlu0 %21170 }
0x1721   : > { %v24602_v35 = vpop.permute.xlu1 %21165 }
0x1724   : > { %v24572_v11 = vpop.permute.xlu0 %21175 }
0x1725   : > { %v24615_v63 = vpop.permute.xlu1 %13265 }
0x1726   : > { %26387 = vst [vmem:[#allocation17_spill] sm:$0xff] %v24615_v63  ;;  %v26395_v63 = vunpack.i.h.bf16 %v24544_v49 }
0x1728   : > { %v24590_v40 = vpop.permute.xlu0 %12216 }
0x172c   : > { %v24600_v32 = vpop.permute.xlu0 %21180 }
0x1730   : > { %v24608_v0 = vpop.permute.xlu0 %21185 }
0x1734   : > { %v24622_v6 = vpop.permute.xlu0 %21190 }
0x17b2   : > { %v24494_v10 = vpop.f32.mrb[54].mxu1  ;;  %v24496_v26 = vpop.f32.mrb[46].mxu0 }
0x17b3   : > { %26374 = vst [vmem:[#allocation6_spill] sm:$0xff] %v24494_v10  ;;  %26375 = vst [vmem:[#allocation7_spill] sm:$0xff] %v24496_v26  ;;  %v24500_v14 = vpop.f32.mrb[55].mxu1  ;;  %v24502_v23 = vpop.f32.mrb[47].mxu0 }
0x17b4   : > { %11026 = vst [vmem:[#allocation2 + $0x58] sm:$0x7] %v24494_v10  ;;  %11028 = vst [vmem:[#allocation2 + $0x68] sm:$0x7] %v24496_v26 }
0x17b5   : > { %26376 = vst [vmem:[#allocation8_spill] sm:$0xff] %v24500_v14  ;;  %26377 = vst [vmem:[#allocation9_spill] sm:$0xff] %v24502_v23 }
0x17b6   : > { %11027 = vst [vmem:[#allocation2 + $0x60] sm:$0x7] %v24500_v14  ;;  %11029 = vst [vmem:[#allocation2 + $0x70] sm:$0x7] %v24502_v23  ;;  %v26390_v14 = vunpack.i.h.bf16 %v24544_v49 }
0x17bb   : > { %v11808_v8 = vld [vmem:[#allocation2 + $0x58] sm:$0x7]  ;;  %v24506_v20 = vld [vmem:[#allocation2 + $0x68] sm:$0x7] }
0x17bc   : > { %v24509_v27 = vpack.i.bf16 %v11808_v8, %v24082_v54  ;;  %v24517_v1 = vld [vmem:[#allocation2 + $0x58] sm:$0x7]  ;;  %v11810_v19 = vld [vmem:[#allocation2 + $0x68] sm:$0x7]  ;;  %v24624_v8 = vpop.permute.xlu1 %21195 }
0x17bd   : > { %v24511_v44 = vld [vmem:[#allocation2 + $0x70] sm:$0x7]  ;;  %v24519_v25 = vld [vmem:[#allocation2 + $0x60] sm:$0x7] }
0x17be   : > { %v21249_v45 = vpack.i.bf16 %v24511_v44, %v24506_v20  ;;  %21235 = vrot.lane.b32.xlu1 %v24509_v27, %s21586_s5  ;;  %v21254_v4 = vpack.i.bf16 %v24519_v25, %v24517_v1  ;;  %v11809_v54 = vld [vmem:[#allocation2 + $0x60] sm:$0x7]  ;;  %v11811_v15 = vld [vmem:[#allocation2 + $0x70] sm:$0x7] }
0x17bf   : > { %v24529_v16 = vpack.i.bf16 %v11810_v19, %v11809_v54 }
0x17c0   : > { %21250 = vrot.lane.b32.xlu0 %v21249_v45, %s26331_s30  ;;  %v24637_v54 = vpop.permute.xlu1 %21210 }
0x17c2   : > { %21240 = vrot.lane.b32.xlu1 %v24509_v27, %s26317_s1 }
0x17c4   : > { %21255 = vrot.lane.b32.xlu0 %v21254_v4, %s26335_s15 }
0x17c6   : > { %21245 = vrot.lane.b32.xlu1 %v21254_v4, %s26331_s30 }
0x17c8   : > { %21260 = vrot.lane.b32.xlu0 %v21249_v45, %s26335_s15 }
0x17ca   : > { %21275 = vrot.lane.b32.xlu1 %v21254_v4, %s26378_s11 }
0x17cc   : > { %21265 = vrot.lane.b32.xlu0 %v24529_v16, %s21586_s5 }
0x17ce   : > { %21280 = vrot.lane.b32.xlu1 %v21254_v4, %s26379_s13  ;;  %v11816_v4 = vld [vmem:[#allocation2 + $0x98] sm:$0x7] }
0x17d0   : > { %21270 = vrot.lane.b32.xlu0 %v24529_v16, %s26317_s1 }
0x17d2   : > { %21285 = vrot.lane.b32.xlu1 %v21249_v45, %s26378_s11 }
0x17f2   : > { %v24550_v51 = vpop.f32.mrb[56].mxu1  ;;  %v24552_v55 = vpop.f32.mrb[48].mxu0 }
0x17f3   : > { %26380 = vst [vmem:[#allocation10_spill] sm:$0xff] %v24550_v51  ;;  %26381 = vst [vmem:[#allocation11_spill] sm:$0xff] %v24552_v55  ;;  %v24556_v52 = vpop.f32.mrb[57].mxu1  ;;  %v24558_v56 = vpop.f32.mrb[49].mxu0 }
0x17f4   : > { %11030 = vst [vmem:[#allocation2 + $0x78] sm:$0x7] %v24550_v51  ;;  %11032 = vst [vmem:[#allocation2 + $0x88] sm:$0x7] %v24552_v55 }
0x17f5   : > { %26382 = vst [vmem:[#allocation12_spill] sm:$0xff] %v24556_v52  ;;  %26383 = vst [vmem:[#allocation13_spill] sm:$0xff] %v24558_v56 }
0x17f6   : > { %11031 = vst [vmem:[#allocation2 + $0x80] sm:$0x7] %v24556_v52  ;;  %11033 = vst [vmem:[#allocation2 + $0x90] sm:$0x7] %v24558_v56  ;;  %v21137_v52 = vunpack.i.l.bf16 %v24544_v49 }
0x17f8   : > { %v11113_v10 = vsel %vm671_vm1, %v21137_v52, %v26390_v14 }
0x17fb   : > { %v11812_v37 = vld [vmem:[#allocation2 + $0x78] sm:$0x7]  ;;  %v24576_v18 = vld [vmem:[#allocation2 + $0x88] sm:$0x7] }
0x17fc   : > { %v24566_v34 = vld [vmem:[#allocation2 + $0x78] sm:$0x7]  ;;  %v21299_v42 = vpack.i.bf16 %v11812_v37, %v11811_v15  ;;  %26385 = vst [vmem:[#allocation15_spill] sm:$0xff] %v24576_v18  ;;  %v11814_v60 = vld [vmem:[#allocation2 + $0x88] sm:$0x7]  ;;  %v24643_v15 = vpop.permute.xlu1 %21215 }
0x17fd   : > { %26384 = vst [vmem:[#allocation14_spill] sm:$0xff] %v24566_v34  ;;  %v21289_v57 = vpack.i.bf16 %v24566_v34, %v24038_v3  ;;  %v24578_v39 = vld [vmem:[#allocation2 + $0x90] sm:$0x7]  ;;  %v24580_v24 = vld [vmem:[#allocation2 + $0x80] sm:$0x7] }
0x17fe   : > { %21300 = vrot.lane.b32.xlu1 %v21299_v42, %s21586_s5  ;;  %26386 = vst [vmem:[#allocation16_spill] sm:$0xff] %v24578_v39  ;;  %v24586_v41 = vpack.i.bf16 %v24578_v39, %v24576_v18  ;;  %v21314_v46 = vpack.i.bf16 %v24580_v24, %v24067_v30  ;;  %v11813_v59 = vld [vmem:[#allocation2 + $0x80] sm:$0x7] }
0x17ff   : > { %21290 = vrot.lane.b32.xlu0 %v21289_v57, %s26331_s30  ;;  %v24617_v9 = vpack.i.bf16 %v11814_v60, %v11813_v59 }
0x1800   : > { %v24653_v37 = vpop.permute.xlu1 %21220 }
0x1802   : > { %21305 = vrot.lane.b32.xlu1 %v21299_v42, %s26317_s1 }
0x1803   : > { %21295 = vrot.lane.b32.xlu0 %v21289_v57, %s26335_s15 }
0x1806   : > { %21310 = vrot.lane.b32.xlu1 %v24586_v41, %s26331_s30 }
0x1807   : > { %21315 = vrot.lane.b32.xlu0 %v21314_v46, %s26331_s30 }
0x180a   : > { %21325 = vrot.lane.b32.xlu1 %v21249_v45, %s26379_s13  ;;  %v11815_v45 = vld [vmem:[#allocation2 + $0x90] sm:$0x7] }
0x180b   : > { %21320 = vrot.lane.b32.xlu0 %v24032_v12, %s26379_s13  ;;  %v21334_v12 = vpack.i.bf16 %v24067_v30, %v24038_v3  ;;  %v24629_v3 = vpack.i.bf16 %v11816_v4, %v11815_v45  ;;  %v24631_v30 = vpop.permute.xlu0 %21200 }
0x180e   : > { %13629 = vrot.lane.b32.xlu1 %v24050_v2, %s26357_s24 }
0x180f   : > { %12520 = vrot.lane.b32.xlu0 %v24050_v2, %s26356_s27  ;;  %s21589_s27 = smov 96   ;;  %v21206_v19 = vpop.permute.xlu0 %21205 }
0x1810   : > { %v21207_v59 = vunpack.i.l.bf16 %v21206_v19  ;;  %v21208_v60 = vunpack.i.h.bf16 %v21206_v19 }
0x1812   : > { %21345 = vrot.lane.b32.xlu1 %v21314_v46, %s26335_s15  ;;  %v11111_v51 = vsel %vm671_vm1, %v21207_v59, %v21208_v60 }
0x1813   : > { %21330 = vrot.lane.b32.xlu0 %v24586_v41, %s26335_s15 }
0x1816   : > { %21350 = vrot.lane.b32.xlu1 %v24617_v9, %s21586_s5 }
0x1817   : > { %21335 = vrot.lane.b32.xlu0 %v21334_v12, %s26378_s11 }
0x181a   : > { %21375 = vrot.lane.b32.xlu1 %v24529_v16, %s21589_s27 }
0x181b   : > { %21340 = vrot.lane.b32.xlu0 %v21334_v12, %s26379_s13 }
0x181e   : > { %21385 = vrot.lane.b32.xlu1 %v24529_v16, %s26353_s6  ;;  %v24648_v16 = vpop.permute.xlu0 %21225 }
0x181f   : > { %21355 = vrot.lane.b32.xlu0 %v24629_v3, %s21586_s5 }
0x1822   : > { %21395 = vrot.lane.b32.xlu1 %v24509_v27, %s26353_s6  ;;  %v24659_v57 = vpop.permute.xlu0 %21230 }
0x1823   : > { %21360 = vrot.lane.b32.xlu0 %v24035_v28, %s26378_s11  ;;  %26388 = vst [vmem:[#allocation18_spill] sm:$0xff] %v24659_v57 }
0x1826   : > { %21405 = vrot.lane.b32.xlu1 %v21299_v42, %s21589_s27 }
0x1827   : > { %21365 = vrot.lane.b32.xlu0 %v24035_v28, %s26379_s13 }
0x182a   : > { %21415 = vrot.lane.b32.xlu1 %v21299_v42, %s26353_s6 }
0x182b   : > { %21370 = vrot.lane.b32.xlu0 %v24488_v13, %s21589_s27 }
0x182e   : > { %13994 = vrot.lane.b32.xlu1 %v24050_v2, %s26359_s2 }
0x182f   : > { %21380 = vrot.lane.b32.xlu0 %v24488_v13, %s26353_s6  ;;  %v21132_v13 = vunpack.i.l.bf16 %v24538_v7 }
0x1830   : > { %v24661_v46 = vpop.permute.xlu1 %21235 }
0x1831   : > { %v11110_v19 = vsel %vm671_vm1, %v21132_v13, %v21207_v59  ;;  %v21142_v13 = vunpack.i.l.bf16 %v24540_v47  ;;  %v26285_v59 = vunpack.i.h.bf16 %v24637_v54 }
0x1832   : > { %21440 = vrot.lane.b32.xlu1 %v24617_v9, %s26317_s1  ;;  %v24669_v42 = vpop.permute.xlu0 %21250 }
0x1833   : > { %21390 = vrot.lane.b32.xlu0 %v24509_v27, %s21589_s27  ;;  %v21252_v45 = vunpack.i.l.bf16 %v24669_v42  ;;  %v21449_v27 = vpack.i.bf16 %v24580_v24, %v24566_v34  ;;  %v26389_v7 = vunpack.i.h.bf16 %v24669_v42 }
0x1834   : > { %v24667_v28 = vpop.permute.xlu1 %21240 }
0x1836   : > { %21445 = vrot.lane.b32.xlu1 %v24629_v3, %s26317_s1 }
0x1837   : > { %21400 = vrot.lane.b32.xlu0 %v24045_v58, %s21589_s27 }
0x1838   : > { %v21246_v4 = vpop.permute.xlu1 %21245 }
0x1839   : > { %v21248_v5 = vunpack.i.h.bf16 %v21246_v4  ;;  %v21247_v56 = vunpack.i.l.bf16 %v21246_v4  ;;  %v11121_v4 = vsel %vm671_vm1, %v21252_v45, %v26389_v7 }
0x183a   : > { %21450 = vrot.lane.b32.xlu1 %v21449_v27, %s26378_s11 }
0x183b   : > { %21410 = vrot.lane.b32.xlu0 %v24045_v58, %s26353_s6  ;;  %v11118_v12 = vsel %vm671_vm1, %v21133_v17, %v21247_v56  ;;  %v11119_v23 = vsel %vm671_vm1, %v21247_v56, %v21248_v5  ;;  %v11120_v58 = vsel %vm671_vm1, %v21248_v5, %v21252_v45  ;;  %v20104_v17 = vpack.c.bf16 %v11121_v4, %v11113_v10  ;;  %v14413_v5 = vld [vmem:[%s26373_s12 + $0x8] sm:$0xff]  ;;  %v24745_v10 = vpop.permute.xlu0 %21255 }
0x183c   : > { %v20101_v55 = vpack.c.bf16 %v11118_v12, %v11110_v19  ;;  %v20098_v26 = vpack.c.bf16 %v11119_v23, %v11111_v51  ;;  %v11112_v23 = vsel %vm671_vm1, %v21208_v60, %v21137_v52  ;;  %v21258_v60 = vunpack.i.h.bf16 %v24745_v10 }
0x183d   : > { %v20107_v14 = vpack.c.bf16 %v11120_v58, %v11112_v23  ;;  %v21257_v12 = vunpack.i.l.bf16 %v24745_v10  ;;  %v21212_v19 = vunpack.i.l.bf16 %v24637_v54 }
0x183e   : > { %21455 = vrot.lane.b32.xlu1 %v21449_v27, %s26379_s13  ;;  %20100 = vmatprep.subr.msk.bf16.mxu1 %vm22999_vm6, %v20098_v26  ;;  %v24754_v26 = vpop.permute.xlu1 %21275 }
0x183f   : > { %12884 = vrot.lane.b32.xlu0 %v24050_v2, %s26358_s28  ;;  %20103 = vmatpush1.bf16.msk.msra.mxu1 %vm22999_vm6, %v20101_v55 }
0x1840   : > { %20106 = vmatprep.subr.msk.bf16.mxu1 %vm22999_vm6, %v20104_v17  ;;  %v21148_v17 = vunpack.i.h.bf16 %v24564_v33 }
0x1842   : > { %21460 = vrot.lane.b32.xlu1 %v24586_v41, %s26378_s11  ;;  %18148 = vmatmul.mubr.msk.f32.vlgmr.msra.gmra.mrb[58].mxu1 %vm1310_vm7, %v24548_v22  ;;  %v24760_v55 = vpop.permute.xlu1 %21280 }
0x1843   : > { %21420 = vrot.lane.b32.xlu0 %v24072_v62, %s21589_s27  ;;  %20109 = vmatpush1.bf16.msk.msra.mxu1 %vm22999_vm6, %v20107_v14  ;;  %26392 = vst [vmem:[#allocation19_spill] sm:$0xff] %v24760_v55  ;;  %v11474_v14 = vsel %vm11472_vm8, %v21212_v19, %v26285_v59 }
0x1844   : > { %11287 = vmatprep.mubr.f32.mxu1 %v24482_v53 }
0x1846   : > { %21465 = vrot.lane.b32.xlu1 %v24586_v41, %s26379_s13  ;;  %18151 = vmatmul.mubr.msk.f32.vlgmr.msra.gmra.mrb[60].mxu1 %vm1310_vm7, %v24548_v22  ;;  %v24769_v56 = vpop.permute.xlu1 %21285 }
0x1847   : > { %21425 = vrot.lane.b32.xlu0 %v24072_v62, %s26353_s6  ;;  %11429 = vmatprep.mubr.f32.mxu1 %v24482_v53  ;;  %v26391_v62 = vmov 44   ;;  %26393 = vst [vmem:[#allocation20_spill] sm:$0xff] %v24769_v56 }
0x184a   : > { %21470 = vrot.lane.b32.xlu1 %v24617_v9, %s21589_s27 }
0x184b   : > { %21430 = vrot.lane.b32.xlu0 %v24060_v21, %s21589_s27 }
0x184e   : > { %21475 = vrot.lane.b32.xlu1 %v24617_v9, %s26353_s6 }
0x184f   : > { %21435 = vrot.lane.b32.xlu0 %v24060_v21, %s26353_s6  ;;  %v14412_v21 = vld [vmem:[%s26373_s12] sm:$0xff] }
0x1852   : > { %21480 = vrot.lane.b32.xlu1 %v24629_v3, %s21589_s27 }
0x1853   : > { %14384 = vperm.xlu0 %21489, %v24050_v2   ;;  %v24752_v2 = vpop.permute.xlu0 %21260 }
0x1854   : > { %v21262_v18 = vunpack.i.l.bf16 %v24752_v2 }
0x1856   : > { %21485 = vrot.lane.b32.xlu1 %v24629_v3, %s26353_s6  ;;  %v21143_v3 = vunpack.i.h.bf16 %v24540_v47  ;;  %v21147_v47 = vunpack.i.l.bf16 %v24564_v33  ;;  %v26394_v33 = vunpack.i.h.bf16 %v24669_v42 }
0x1857   : > { %14430 = vrot.lane.b32.xlu0 %v24482_v53, %s26331_s30  ;;  %v24758_v51 = vpop.permute.xlu0 %21265 }
0x1858   : > { %21490 = vset.pattern.permute.xlu0 %v26391_v62  ;;  %v11117_v58 = vsel %vm671_vm1, %v21142_v13, %v21143_v3  ;;  %v21152_v3 = vunpack.i.l.bf16 %v24574_v48 }
0x185a   : > { %14416 = vrot.lane.b32.xlu1 %v14412_v21, %s26322_s18 }
0x185b   : > { %14418 = vrot.lane.b32.xlu0 %v14413_v5, %s26322_s18  ;;  %v24767_v52 = vpop.permute.xlu0 %21270 }
0x185e   : > { %14752 = vrot.lane.b32.xlu1 %v24482_v53, %s26335_s15 }
0x185f   : > { %14750 = vrot.lane.b32.xlu0 %v14412_v21, %s26360_s4  ;;  %s26429_s4 = smov 100  }
0x1862   : > { %16376 = vrot.lane.b32.xlu1 %v14413_v5, %s26320_s29 }
0x1863   : > { %15081 = vrot.lane.b32.xlu0 %v14413_v5, %s26362_s8 }
0x1866   : > { %16394 = vrot.lane.b32.xlu1 %v24482_v53, %s26317_s1 }
0x1867   : > { %15108 = vrot.lane.b32.xlu0 %v24482_v53, %s21586_s5 }
0x186b   : > { %15428 = vrot.lane.b32.xlu0 %v14413_v5, %s26349_s19  ;;  %v11482_v5 = vsel %vm11472_vm8, %v21257_v12, %v21258_v60 }
0x1870   : > { %v24771_v41 = vpop.permute.xlu1 %21300 }
0x1871   : > { %v21291_v9 = vpop.permute.xlu0 %21290 }
0x1872   : > { %v21293_v7 = vunpack.i.h.bf16 %v21291_v9  ;;  %v21292_v4 = vunpack.i.l.bf16 %v21291_v9 }
0x1874   : > { %v24778_v45 = vpop.permute.xlu1 %21305  ;;  %v11122_v23 = vsel %vm671_vm1, %v26394_v33, %v21293_v7  ;;  %v11114_v59 = vsel %vm671_vm1, %v26395_v63, %v21292_v4 }
0x1875   : > { %v24780_v27 = vpop.permute.xlu0 %21295  ;;  %v20113_v56 = vpack.c.bf16 %v11122_v23, %v11114_v59  ;;  %v26397_v59 = vunpack.i.h.bf16 %v24574_v48 }
0x1878   : > { %v21311_v62 = vpop.permute.xlu1 %21310 }
0x1879   : > { %v21316_v21 = vpop.permute.xlu0 %21315  ;;  %v21313_v10 = vunpack.i.h.bf16 %v21311_v62  ;;  %v21312_v31 = vunpack.i.l.bf16 %v21311_v62 }
0x187a   : > { %v21318_v9 = vunpack.i.h.bf16 %v21316_v21  ;;  %v21317_v43 = vunpack.i.l.bf16 %v21316_v21 }
0x187b   : > { %v11125_v39 = vsel %vm671_vm1, %v21312_v31, %v21313_v10  ;;  %v11481_v10 = vsel %vm11472_vm8, %v21148_v17, %v21257_v12  ;;  %v11476_v12 = vsel %vm11472_vm8, %v21152_v3, %v26397_v59  ;;  %v21238_v59 = vunpack.i.h.bf16 %v24661_v46 }
0x187c   : > { %v11123_v55 = vsel %vm671_vm1, %v21293_v7, %v21318_v9  ;;  %v11124_v62 = vsel %vm671_vm1, %v21318_v9, %v21312_v31  ;;  %v11115_v21 = vsel %vm671_vm1, %v21292_v4, %v21317_v43  ;;  %v11116_v34 = vsel %vm671_vm1, %v21317_v43, %v21142_v13  ;;  %v24805_v57 = vpop.permute.xlu1 %21325 }
0x187d   : > { %v24807_v42 = vpop.permute.xlu0 %21320  ;;  %v20110_v33 = vpack.c.bf16 %v11123_v55, %v11115_v21  ;;  %v20116_v49 = vpack.c.bf16 %v11125_v39, %v11117_v58  ;;  %v20119_v63 = vpack.c.bf16 %v11124_v62, %v11116_v34  ;;  %v20122_v31 = vpack.c.bf16 %v11482_v5, %v11474_v14 }
0x187e   : > { %v21163_v43 = vunpack.i.h.bf16 %v24542_v50  ;;  %v21158_v13 = vunpack.i.h.bf16 %v24595_v61  ;;  %v21157_v7 = vunpack.i.l.bf16 %v24595_v61  ;;  %v26396_v39 = vunpack.i.h.bf16 %v24752_v2 }
0x187f   : > { %20112 = vmatprep.subr.msk.bf16.mxu0 %vm22999_vm6, %v20110_v33  ;;  %20118 = vmatprep.subr.msk.bf16.mxu1 %vm22999_vm6, %v20116_v49  ;;  %v21162_v55 = vunpack.i.l.bf16 %v24542_v50  ;;  %v11473_v4 = vsel %vm11472_vm8, %v21147_v47, %v21212_v19  ;;  %v26291_v61 = vunpack.i.h.bf16 %v24643_v15  ;;  %v11483_v14 = vsel %vm11472_vm8, %v21258_v60, %v21262_v18 }
0x1880   : > { %v11484_v34 = vsel %vm11472_vm8, %v21262_v18, %v26396_v39  ;;  %20115 = vmatpush1.bf16.msk.msra.mxu0 %vm22999_vm6, %v20113_v56  ;;  %20121 = vmatpush1.bf16.msk.msra.mxu1 %vm22999_vm6, %v20119_v63  ;;  %v24830_v58 = vpop.permute.xlu1 %13629  ;;  %v21217_v56 = vunpack.i.l.bf16 %v24643_v15  ;;  %v20125_v23 = vpack.c.bf16 %v11481_v10, %v11473_v4  ;;  %v26292_v5 = vunpack.i.h.bf16 %v24758_v51 }
0x1881   : > { %v24832_v17 = vpop.permute.xlu0 %12520  ;;  %20124 = vmatprep.subr.msk.bf16.mxu1 %vm22999_vm6, %v20122_v31  ;;  %v21267_v9 = vunpack.i.l.bf16 %v24758_v51  ;;  %v21298_v19 = vunpack.i.h.bf16 %v24780_v27  ;;  %v21297_v47 = vunpack.i.l.bf16 %v24780_v27  ;;  %v20128_v62 = vpack.c.bf16 %v11484_v34, %v11476_v12 }
0x1882   : > { %v21173_v21 = vunpack.i.h.bf16 %v24562_v29  ;;  %v21172_v33 = vunpack.i.l.bf16 %v24562_v29  ;;  %v11480_v18 = vsel %vm11472_vm8, %v21157_v7, %v21158_v13  ;;  %v26398_v60 = vunpack.i.h.bf16 %v24637_v54 }
0x1883   : > { %18154 = vmatmul.mubr.msk.f32.vlgmr.msra.gmra.mrb[50].mxu0 %vm1310_vm7, %v24548_v22  ;;  %18157 = vmatmul.mubr.msk.f32.vlgmr.msra.gmra.mrb[62].mxu1 %vm1310_vm7, %v24548_v22  ;;  %v21168_v27 = vunpack.i.h.bf16 %v24602_v35  ;;  %v21167_v22 = vunpack.i.l.bf16 %v24602_v35  ;;  %v11875_v63 = vsel %vm11873_vm11, %v21217_v56, %v26291_v61  ;;  %v11883_v12 = vsel %vm11873_vm11, %v21267_v9, %v26292_v5 }
0x1884   : > { %v11475_v49 = vsel %vm11472_vm8, %v26398_v60, %v21152_v3  ;;  %20127 = vmatpush1.bf16.msk.msra.mxu1 %vm22999_vm6, %v20125_v23  ;;  %11579 = vmatprep.mubr.f32.mxu1 %v24482_v53  ;;  %v21346_v31 = vpop.permute.xlu1 %21345  ;;  %v26399_v4 = vunpack.i.h.bf16 %v24752_v2  ;;  %v21497_v60 = vld [vmem:[%s26373_s12] sm:$0xff] }
0x1885   : > { %v20131_v10 = vpack.c.bf16 %v11483_v14, %v11475_v49  ;;  %v21331_v54 = vpop.permute.xlu0 %21330  ;;  %20130 = vmatprep.subr.msk.bf16.mxu1 %vm22999_vm6, %v20128_v62  ;;  %11721 = vmatprep.mubr.f32.mxu0 %v24482_v53  ;;  %v21348_v3 = vunpack.i.h.bf16 %v21346_v31  ;;  %v21347_v13 = vunpack.i.l.bf16 %v21346_v31  ;;  %v26400_v14 = vunpack.i.h.bf16 %v24574_v48 }
0x1886   : > { %v21333_v39 = vunpack.i.h.bf16 %v21331_v54  ;;  %v21332_v34 = vunpack.i.l.bf16 %v21331_v54  ;;  %v11485_v23 = vsel %vm11472_vm8, %v26399_v4, %v21298_v19  ;;  %v21303_v48 = vunpack.i.h.bf16 %v24771_v41 }
0x1887   : > { %v11477_v62 = vsel %vm11472_vm8, %v26400_v14, %v21297_v47  ;;  %18160 = vmatmul.mubr.msk.f32.vlgmr.msra.gmra.mrb[58].mxu1 %vm1310_vm7, %v21497_v60  ;;  %v11486_v49 = vsel %vm11472_vm8, %v21298_v19, %v21348_v3  ;;  %v11478_v31 = vsel %vm11472_vm8, %v21297_v47, %v21347_v13  ;;  %v11479_v54 = vsel %vm11472_vm8, %v21347_v13, %v21157_v7 }
0x1888   : > { %v11487_v2 = vsel %vm11472_vm8, %v21348_v3, %v21332_v34  ;;  %20133 = vmatpush1.bf16.msk.msra.mxu1 %vm22999_vm6, %v20131_v10  ;;  %v21302_v4 = vunpack.i.l.bf16 %v24771_v41  ;;  %v11488_v14 = vsel %vm11472_vm8, %v21332_v34, %v21333_v39  ;;  %v24888_v61 = vpop.permute.xlu1 %21350  ;;  %11650 = vmatprep.mubr.f32.mxu1 %v24482_v53  ;;  %v20134_v19 = vpack.c.bf16 %v11486_v49, %v11478_v31 }
0x1889   : > { %v24890_v5 = vpop.permute.xlu0 %21335  ;;  %v20137_v47 = vpack.c.bf16 %v11485_v23, %v11477_v62  ;;  %v20143_v7 = vpack.c.bf16 %v11487_v2, %v11479_v54  ;;  %v21353_v3 = vunpack.i.h.bf16 %v24888_v61  ;;  %v21352_v13 = vunpack.i.l.bf16 %v24888_v61 }
0x188a   : > { %v21178_v10 = vunpack.i.h.bf16 %v24572_v11  ;;  %v11878_v41 = vsel %vm11873_vm11, %v21163_v43, %v21167_v22  ;;  %v21237_v39 = vunpack.i.l.bf16 %v24661_v46  ;;  %20136 = vmatprep.subr.msk.bf16.mxu0 %vm22999_vm6, %v20134_v19  ;;  %v20140_v34 = vpack.c.bf16 %v11488_v14, %v11480_v18 }
0x188b   : > { %18163 = vmatmul.mubr.msk.f32.vlgmr.msra.gmra.mrb[60].mxu1 %vm1310_vm7, %v21497_v60  ;;  %v11879_v23 = vsel %vm11873_vm11, %v21167_v22, %v21168_v27  ;;  %v11882_v61 = vsel %vm11873_vm11, %v21238_v59, %v21267_v9  ;;  %v11886_v62 = vsel %vm11873_vm11, %v21303_v48, %v21352_v13  ;;  %v11887_v49 = vsel %vm11873_vm11, %v21352_v13, %v21353_v3 }
0x188c   : > { %20139 = vmatpush1.bf16.msk.msra.mxu0 %vm22999_vm6, %v20137_v47  ;;  %v21177_v46 = vunpack.i.l.bf16 %v24572_v11  ;;  %v20161_v31 = vpack.c.bf16 %v11886_v62, %v11878_v41  ;;  %20142 = vmatprep.subr.msk.bf16.mxu1 %vm22999_vm6, %v20140_v34  ;;  %v24914_v18 = vpop.permute.xlu1 %21375  ;;  %v20146_v22 = vpack.c.bf16 %v11883_v12, %v11875_v63  ;;  %v20158_v9 = vpack.c.bf16 %v11887_v49, %v11879_v23 }
0x188d   : > { %v24916_v54 = vpop.permute.xlu0 %21340  ;;  %11792 = vmatprep.mubr.f32.mxu1 %v24482_v53  ;;  %v11885_v59 = vsel %vm11873_vm11, %v21302_v4, %v21303_v48  ;;  %20145 = vmatpush1.bf16.msk.msra.mxu1 %vm22999_vm6, %v20143_v7  ;;  %v11877_v2 = vsel %vm11873_vm11, %v21162_v55, %v21163_v43  ;;  %v11874_v14 = vsel %vm11873_vm11, %v21237_v39, %v21217_v56  ;;  %v21498_v43 = vld [vmem:[#allocation2 + $0x10] sm:$0xff]  ;;  %v21183_v19 = vunpack.i.h.bf16 %v24600_v32 }
0x188e   : > { %20148 = vmatprep.subr.msk.bf16.mxu1 %vm22999_vm6, %v20146_v22  ;;  %v11881_v63 = vsel %vm11873_vm11, %v21172_v33, %v21173_v21  ;;  %v20149_v12 = vpack.c.bf16 %v11882_v61, %v11874_v14  ;;  %20160 = vmatprep.subr.msk.bf16.mxu0 %vm22999_vm6, %v20158_v9  ;;  %v20170_v48 = vpack.c.bf16 %v24519_v25, %v21498_v43  ;;  %v26401_v21 = vunpack.i.h.bf16 %v24758_v51 }
0x188f   : > { %18166 = vmatmul.mubr.msk.f32.vlgmr.msra.gmra.mrb[50].mxu0 %vm1310_vm7, %v21497_v60  ;;  %v24947_v56 = vsel %vm9220_vm3, %v21177_v46, %v21178_v10  ;;  %v20152_v13 = vpack.c.bf16 %v11885_v59, %v11877_v2  ;;  %v21273_v41 = vunpack.i.h.bf16 %v24767_v52  ;;  %v21272_v39 = vunpack.i.l.bf16 %v24767_v52  ;;  %v21499_v59 = vld [vmem:[#allocation2 + $0x8] sm:$0xff] }
0x1890   : > { %12122 = vmatprep.mubr.f32.mxu0 %v24482_v53  ;;  %v11884_v47 = vsel %vm11873_vm11, %v26401_v21, %v21302_v4  ;;  %18169 = vmatmul.mubr.msk.f32.vlgmr.msra.gmra.mrb[62].mxu1 %vm1310_vm7, %v21497_v60  ;;  %v24956_v25 = vpop.permute.xlu1 %21385  ;;  %v21182_v60 = vunpack.i.l.bf16 %v24600_v32  ;;  %v26402_v4 = vunpack.i.h.bf16 %v24643_v15  ;;  %v21223_v61 = vunpack.i.h.bf16 %v24653_v37 }
0x1891   : > { %20163 = vmatpush1.bf16.msk.msra.mxu0 %vm22999_vm6, %v20161_v31  ;;  %v21356_v7 = vpop.permute.xlu0 %21355  ;;  %20151 = vmatpush1.bf16.msk.msra.mxu1 %vm22999_vm6, %v20149_v12  ;;  %v21222_v62 = vunpack.i.l.bf16 %v24653_v37  ;;  %v21187_v49 = vunpack.i.l.bf16 %v24608_v0  ;;  %v11880_v15 = vsel %vm11873_vm11, %v21168_v27, %v21172_v33  ;;  %v20173_v29 = vpack.c.bf16 %v24517_v1, %v21499_v59  ;;  %v21500_v12 = vld [vmem:[%s23478_s23 + $0x18] sm:$0xff]  ;;  %v21504_v37 = vld [vmem:[#allocation2 + $0x40] sm:$0xff] }
0x1892   : > { %v21358_v34 = vunpack.i.h.bf16 %v21356_v7  ;;  %v21357_v51 = vunpack.i.l.bf16 %v21356_v7  ;;  %20172 = vmatprep.subr.msk.bf16.mxu0 %vm22999_vm6, %v20170_v48  ;;  %v11876_v23 = vsel %vm11873_vm11, %v26402_v4, %v21162_v55  ;;  %20154 = vmatprep.subr.msk.bf16.mxu1 %vm22999_vm6, %v20152_v13  ;;  %v13312_v35 = vsel %vm9220_vm3, %v21272_v39, %v21273_v41 }
0x1893   : > { %11980 = vmatprep.mubr.f32.mxu1 %v24482_v53  ;;  %v20155_v31 = vpack.c.bf16 %v11884_v47, %v11876_v23  ;;  %v13304_v55 = vsel %vm9220_vm3, %v21222_v62, %v21223_v61  ;;  %v21308_v33 = vunpack.i.h.bf16 %v24778_v45  ;;  %v21307_v27 = vunpack.i.l.bf16 %v24778_v45 }
0x1894   : > { %v11888_v32 = vsel %vm11873_vm11, %v21353_v3, %v21357_v51  ;;  %v11889_v50 = vsel %vm11873_vm11, %v21357_v51, %v21358_v34  ;;  %18172 = vmatmul.mubr.msk.f32.vlgmr.msra.gmra.mrb[58].mxu1 %vm1310_vm7, %v24546_v36  ;;  %v24988_v22 = vpop.permute.xlu1 %21395  ;;  %v21188_v14 = vunpack.i.h.bf16 %v24608_v0  ;;  %v21242_v1 = vunpack.i.l.bf16 %v24667_v28  ;;  %v21501_v51 = vld [vmem:[#allocation2 + $0x18] sm:$0xff] }
0x1895   : > { %v24990_v9 = vpop.permute.xlu0 %21360  ;;  %v20164_v3 = vpack.c.bf16 %v11889_v50, %v11881_v63  ;;  %v20167_v2 = vpack.c.bf16 %v11888_v32, %v11880_v15  ;;  %20157 = vmatpush1.bf16.msk.msra.mxu1 %vm22999_vm6, %v20155_v31  ;;  %12051 = vmatprep.mubr.f32.mxu1 %v24482_v53  ;;  %v21243_v63 = vunpack.i.h.bf16 %v24667_v28  ;;  %v20176_v43 = vpack.c.bf16 %v24511_v44, %v21500_v12  ;;  %v21502_v32 = vld [vmem:[%s23478_s23 + $0x28] sm:$0xff] }
0x1896   : > { %v25013_v48 = vsel %vm9220_vm3, %v21178_v10, %v21182_v60  ;;  %v25016_v0 = vsel %vm9220_vm3, %v21182_v60, %v21183_v19  ;;  %v25019_v21 = vsel %vm9220_vm3, %v21183_v19, %v21187_v49  ;;  %v21192_v28 = vunpack.i.l.bf16 %v24622_v6 }
0x1897   : > { %18178 = vmatmul.mubr.msk.f32.vlgmr.msra.gmra.mrb[50].mxu0 %vm1310_vm7, %v24546_v36  ;;  %20166 = vmatprep.subr.msk.bf16.mxu1 %vm22999_vm6, %v20164_v3  ;;  %v21203_v44 = vunpack.i.h.bf16 %v24631_v30  ;;  %v13311_v47 = vsel %vm9220_vm3, %v21243_v63, %v21272_v39  ;;  %v20242_v7 = vpack.c.bf16 %v13312_v35, %v13304_v55  ;;  %v21202_v13 = vunpack.i.l.bf16 %v24631_v30 }
0x1898   : > { %20175 = vmatpush1.bf16.msk.msra.mxu0 %vm22999_vm6, %v20173_v29  ;;  %12300 = vmatprep.mubr.f32.mxu0 %v24482_v53  ;;  %v25031_v10 = vpop.permute.xlu1 %21405  ;;  %v21227_v34 = vunpack.i.l.bf16 %v24648_v16  ;;  %v13314_v39 = vsel %vm9220_vm3, %v21307_v27, %v21308_v33  ;;  %v20179_v60 = vpack.c.bf16 %v24506_v20, %v21501_v51  ;;  %v25045_v4 = vsel %vm9220_vm3, %v21187_v49, %v21188_v14  ;;  %v26406_v29 = vld [vmem:[#allocation18_spill] sm:$0xff] }
0x1899   : > { %18175 = vmatmul.mubr.msk.f32.vlgmr.msra.gmra.mrb[60].mxu1 %vm1310_vm7, %v24546_v36  ;;  %20178 = vmatprep.subr.msk.bf16.mxu0 %vm22999_vm6, %v20176_v43  ;;  %v25033_v19 = vpop.permute.xlu0 %21365  ;;  %v21193_v23 = vunpack.i.h.bf16 %v24622_v6  ;;  %v13303_v31 = vsel %vm9220_vm3, %v21242_v1, %v21222_v62  ;;  %v20182_v50 = vpack.c.bf16 %v24580_v24, %v21502_v32  ;;  %v21198_v15 = vunpack.i.h.bf16 %v24624_v8  ;;  %v26408_v1 = vld [vmem:[#allocation19_spill] sm:$0xff] }
0x189a   : > { %20169 = vmatpush1.bf16.msk.msra.mxu1 %vm22999_vm6, %v20167_v2  ;;  %12193 = vmatprep.mubr.f32.mxu1 %v24482_v53  ;;  %v21197_v20 = vunpack.i.l.bf16 %v24624_v8  ;;  %v21228_v49 = vunpack.i.h.bf16 %v24648_v16  ;;  %v20245_v55 = vpack.c.bf16 %v13311_v47, %v13303_v31  ;;  %v21278_v6 = vunpack.i.h.bf16 %v24754_v26  ;;  %v26407_v2 = vld [vmem:[#allocation14_spill] sm:$0xff] }
0x189b   : > { %20244 = vmatprep.subr.msk.bf16.mxu1 %vm22999_vm6, %v20242_v7  ;;  %18184 = vmatmul.mubr.msk.f32.vlgmr.msra.gmra.mrb[52].mxu0 %vm1310_vm7, %v24590_v40  ;;  %v21277_v62 = vunpack.i.l.bf16 %v24754_v26  ;;  %v13313_v3 = vsel %vm9220_vm3, %v21273_v41, %v21307_v27  ;;  %v20248_v16 = vpack.c.bf16 %v13314_v39, %v24947_v56  ;;  %v25077_v26 = vsel %vm26403_vm13, %v21202_v13, %v21203_v44  ;;  %v26405_v41 = vld [vmem:[#allocation20_spill] sm:$0xff]  ;;  %v26413_v39 = vld [vmem:[#allocation17_spill] sm:$0xff]  ;;  %vm26415_vm13 = vmmov %vm26411_vm0 }
0x189c   : > { %20181 = vmatpush1.bf16.msk.msra.mxu0 %vm22999_vm6, %v20179_v60  ;;  %v25069_v24 = vpop.permute.xlu1 %21415  ;;  %v25080_v52 = vsel %vm26404_vm15, %v21192_v28, %v21227_v34  ;;  %v21287_v59 = vunpack.i.l.bf16 %v26405_v41  ;;  %12371 = vmatprep.mubr.f32.mxu0 %v24482_v53  ;;  %v13305_v56 = vsel %vm9220_vm3, %v21223_v61, %v21177_v46  ;;  %v21232_v35 = vunpack.i.l.bf16 %v26406_v29  ;;  %v21503_v27 = vld [vmem:[%s23478_s23 + $0x20] sm:$0xff]  ;;  %vm26417_vm15 = vmmov %vm26411_vm0 }
0x189d   : > { %18181 = vmatmul.mubr.msk.f32.vlgmr.msra.gmra.mrb[62].mxu1 %vm1310_vm7, %v24546_v36  ;;  %20184 = vmatprep.subr.msk.bf16.mxu0 %vm22999_vm6, %v20182_v50  ;;  %v25071_v8 = vpop.permute.xlu0 %21370  ;;  %v21288_v36 = vunpack.i.h.bf16 %v26405_v41  ;;  %v20185_v14 = vpack.c.bf16 %v26407_v2, %v21503_v27  ;;  %v21233_v63 = vunpack.i.h.bf16 %v26406_v29  ;;  %v21282_v12 = vunpack.i.l.bf16 %v26408_v1  ;;  %v26409_v46 = vld [vmem:[#allocation16_spill] sm:$0xff] }
0x189e   : > { %20247 = vmatpush1.bf16.msk.msra.mxu1 %vm22999_vm6, %v20245_v55  ;;  %13409 = vmatprep.mubr.f32.mxu1 %v24482_v53  ;;  %v20251_v11 = vpack.c.bf16 %v13313_v3, %v13305_v56  ;;  %v20188_v61 = vpack.c.bf16 %v26409_v46, %v21504_v37  ;;  %v12559_v43 = vsel %vm26410_vm4, %v21227_v34, %v21228_v49  ;;  %v21283_v7 = vunpack.i.h.bf16 %v26408_v1  ;;  %v21505_v55 = vld [vmem:[#allocation2 + $0x38] sm:$0xff] }
0x189f   : > { %20250 = vmatprep.subr.msk.bf16.mxu1 %vm22999_vm6, %v20248_v16  ;;  %18187 = vmatmul.mubr.msk.f32.vlgmr.msra.gmra.mrb[54].mxu0 %vm1310_vm7, %v24590_v40  ;;  %v12566_v28 = vsel %vm26411_vm0, %v21193_v23, %v21277_v62  ;;  %v12567_v47 = vsel %vm26412_vm5, %v21277_v62, %v21278_v6  ;;  %v25116_v31 = vsel %vm26414_vm14, %v21228_v49, %v21202_v13  ;;  %v21328_v23 = vunpack.i.h.bf16 %v24805_v57  ;;  %v26416_v62 = vld [vmem:[#allocation15_spill] sm:$0xff]  ;;  %vm26418_vm14 = vmmov %vm26412_vm5 }
0x18a0   : > { %20187 = vmatpush1.bf16.msk.msra.mxu0 %vm22999_vm6, %v20185_v14  ;;  %v25111_v51 = vpop.permute.xlu1 %13994  ;;  %v12569_v34 = vsel %vm26415_vm13, %v21287_v59, %v21288_v36  ;;  %v21327_v32 = vunpack.i.l.bf16 %v24805_v57  ;;  %v25128_v50 = vsel %vm13667_vm2, %v21197_v20, %v21232_v35  ;;  %v21323_v13 = vunpack.i.h.bf16 %v24807_v42  ;;  %12442 = vmatprep.mubr.f32.mxu0 %v24482_v53  ;;  %vm26419_vm13 = vmmov %vm26412_vm5 }
0x18a1   : > { %18220 = vmatmul.mubr.msk.f32.vlgmr.msra.gmra.mrb[64].mxu1 %vm1310_vm7, %v26413_v39  ;;  %v25113_v60 = vpop.permute.xlu0 %21380  ;;  %20190 = vmatprep.subr.msk.bf16.mxu0 %vm22999_vm6, %v20188_v61  ;;  %v21322_v49 = vunpack.i.l.bf16 %v24807_v42  ;;  %v20191_v3 = vpack.c.bf16 %v26416_v62, %v21505_v55  ;;  %v25136_v16 = vsel %vm13667_vm2, %v21232_v35, %v21233_v63  ;;  %v20197_v56 = vpack.c.bf16 %v12566_v28, %v25080_v52 }
0x18a2   : > { %20253 = vmatpush1.bf16.msk.msra.mxu1 %vm22999_vm6, %v20251_v11  ;;  %13480 = vmatprep.mubr.f32.mxu1 %v24482_v53  ;;  %v25140_v29 = vsel %vm13667_vm2, %v21198_v15, %v21282_v12  ;;  %v20194_v20 = vpack.c.bf16 %v12567_v47, %v12559_v43  ;;  %v25145_v42 = vsel %vm13667_vm2, %v21282_v12, %v21283_v7  ;;  %vm12922_vm4 = vcmask 785408  }
0x18a3   : > { %18190 = vmatmul.mubr.msk.f32.vlgmr.msra.gmra.mrb[56].mxu0 %vm1310_vm7, %v24590_v40  ;;  %v12568_v27 = vsel %vm26417_vm15, %v21278_v6, %v21287_v59  ;;  %v20200_v15 = vpack.c.bf16 %v12569_v34, %v25077_v26  ;;  %v25156_v2 = vsel %vm13667_vm2, %v21283_v7, %v21327_v32  ;;  %v25161_v14 = vsel %vm13667_vm2, %v21327_v32, %v21328_v23  ;;  %vm26420_vm15 = vmmov %vm26412_vm5 }
0x18a4   : > { %20193 = vmatpush1.bf16.msk.msra.mxu0 %vm22999_vm6, %v20191_v3  ;;  %v21441_v52 = vpop.permute.xlu1 %21440  ;;  %12513 = vmatprep.mubr.f32.mxu0 %v24482_v53  ;;  %v25167_v1 = vsel %vm13667_vm2, %v21233_v63, %v21322_v49  ;;  %v25170_v26 = vsel %vm13667_vm2, %v21322_v49, %v21323_v13  ;;  %v21338_v12 = vunpack.i.h.bf16 %v24890_v5  ;;  %v21337_v11 = vunpack.i.l.bf16 %v24890_v5 }
0x18a5   : > { %18223 = vmatmul.mubr.msk.f32.vlgmr.msra.gmra.mrb[66].mxu1 %vm1310_vm7, %v26413_v39  ;;  %v25152_v35 = vpop.permute.xlu0 %21390  ;;  %20196 = vmatprep.subr.msk.bf16.mxu0 %vm22999_vm6, %v20194_v20  ;;  %v21443_v6 = vunpack.i.h.bf16 %v21441_v52  ;;  %v21442_v59 = vunpack.i.l.bf16 %v21441_v52  ;;  %v21378_v37 = vunpack.i.h.bf16 %v24914_v18  ;;  %v21377_v46 = vunpack.i.l.bf16 %v24914_v18 }
0x18a6   : > { %13551 = vmatprep.mubr.f32.mxu1 %v24482_v53  ;;  %vm14032_vm0 = vcmask 777216   ;;  %v20269_v43 = vpack.c.bf16 %v25140_v29, %v25128_v50  ;;  %v21342_v28 = vunpack.i.l.bf16 %v24916_v54  ;;  %v20275_v49 = vpack.c.bf16 %v25156_v2, %v25167_v1 }
0x18a7   : > { %v13315_v61 = vsel %vm9220_vm3, %v21308_v33, %v21442_v59  ;;  %v13316_v63 = vsel %vm9220_vm3, %v21442_v59, %v21443_v6  ;;  %18193 = vmatmul.mubr.msk.f32.vlgmr.msra.gmra.mrb[58].mxu0 %vm1310_vm7, %v24590_v40  ;;  %v20203_v33 = vpack.c.bf16 %v12568_v27, %v25116_v31  ;;  %v12562_v55 = vsel %vm26412_vm5, %v21203_v44, %v21337_v11 }
0x18a8   : > { %v20257_v47 = vpack.c.bf16 %v13315_v61, %v25013_v48  ;;  %20199 = vmatpush1.bf16.msk.msra.mxu0 %vm22999_vm6, %v20197_v56  ;;  %v21446_v7 = vpop.permute.xlu1 %21445  ;;  %12664 = vmatprep.mubr.f32.mxu0 %v24482_v53  ;;  %v20254_v45 = vpack.c.bf16 %v13316_v63, %v25016_v0  ;;  %v20266_v48 = vpack.c.bf16 %v25145_v42, %v25136_v16  ;;  %v21343_v30 = vunpack.i.h.bf16 %v24916_v54 }
0x18a9   : > { %v25189_v34 = vpop.permute.xlu0 %21400  ;;  %20202 = vmatprep.subr.msk.bf16.mxu0 %vm22999_vm6, %v20200_v15  ;;  %v21448_v40 = vunpack.i.h.bf16 %v21446_v7  ;;  %v21447_v32 = vunpack.i.l.bf16 %v21446_v7  ;;  %v12563_v53 = vsel %vm26418_vm14, %v21337_v11, %v21338_v12  ;;  %v20272_v0 = vpack.c.bf16 %v25161_v14, %v25170_v26  ;;  %v25240_v15 = vld [vmem:[#allocation2 + $0xf0] sm:$0xff]  ;;  %vm26421_vm14 = vmmov %vm26412_vm5 }
0x18aa   : > { %20256 = vmatprep.subr.msk.bf16.mxu1 %vm22999_vm6, %v20254_v45  ;;  %v25215_v31 = vsel %vm12922_vm4, %v21377_v46, %v21378_v37  ;;  %v25223_v3 = vsel %vm13667_vm2, %v21323_v13, %v21342_v28  ;;  %v21388_v16 = vunpack.i.h.bf16 %v24956_v25  ;;  %v21387_v56 = vunpack.i.l.bf16 %v24956_v25 }
0x18ab   : > { %v13317_v44 = vsel %vm9220_vm3, %v21443_v6, %v21447_v32  ;;  %v13318_v62 = vsel %vm9220_vm3, %v21447_v32, %v21448_v40  ;;  %18196 = vmatmul.mubr.msk.f32.vlgmr.msra.gmra.mrb[52].mxu0 %vm1310_vm7, %v24832_v17  ;;  %v21398_v20 = vunpack.i.h.bf16 %v24988_v22  ;;  %20259 = vmatpush1.bf16.msk.msra.mxu1 %vm22999_vm6, %v20257_v47  ;;  %v21363_v27 = vunpack.i.h.bf16 %v24990_v9 }
0x18ac   : > { %20205 = vmatpush1.bf16.msk.msra.mxu0 %vm22999_vm6, %v20203_v33  ;;  %v25232_v54 = vpop.permute.xlu1 %21450  ;;  %v20263_v13 = vpack.c.bf16 %v13317_v44, %v25019_v21  ;;  %12735 = vmatprep.mubr.f32.mxu0 %v25240_v15  ;;  %v21362_v6 = vunpack.i.l.bf16 %v24990_v9  ;;  %v21408_v59 = vunpack.i.h.bf16 %v25031_v10  ;;  %v21407_v11 = vunpack.i.l.bf16 %v25031_v10 }
0x18ad   : > { %v25234_v42 = vpop.permute.xlu0 %21410  ;;  %v21453_v52 = vunpack.i.h.bf16 %v25232_v54  ;;  %v21452_v25 = vunpack.i.l.bf16 %v25232_v54  ;;  %v20260_v61 = vpack.c.bf16 %v13318_v62, %v25045_v4  ;;  %v21368_v63 = vunpack.i.h.bf16 %v25033_v19 }
0x18ae   : > { %v21367_v21 = vunpack.i.l.bf16 %v25033_v19  ;;  %v21417_v9 = vunpack.i.l.bf16 %v25069_v24  ;;  %v21373_v45 = vunpack.i.h.bf16 %v25071_v8  ;;  %v21372_v33 = vunpack.i.l.bf16 %v25071_v8  ;;  %18226 = vmatmul.mubr.msk.f32.vlgmr.msra.gmra.mrb[68].mxu1 %vm1310_vm7, %v26413_v39 }
0x18af   : > { %v12570_v47 = vsel %vm26419_vm13, %v21288_v36, %v21452_v25  ;;  %v12571_v7 = vsel %vm26420_vm15, %v21452_v25, %v21453_v52  ;;  %18199 = vmatmul.mubr.msk.f32.vlgmr.msra.gmra.mrb[54].mxu0 %vm1310_vm7, %v24832_v17  ;;  %20262 = vmatprep.subr.msk.bf16.mxu1 %vm22999_vm6, %v20260_v61  ;;  %v13673_v36 = vsel %vm13667_vm2, %v21342_v28, %v21343_v30  ;;  %v21403_v61 = vunpack.i.h.bf16 %v25189_v34  ;;  %vm26422_vm13 = vmmov %vm26412_vm5 }
0x18b0   : > { %v20209_v4 = vpack.c.bf16 %v12570_v47, %v12562_v55  ;;  %v25262_v19 = vpop.permute.xlu1 %21455  ;;  %20265 = vmatpush1.bf16.msk.msra.mxu1 %vm22999_vm6, %v20263_v13  ;;  %13622 = vmatprep.mubr.f32.mxu1 %v25240_v15  ;;  %v20206_v55 = vpack.c.bf16 %v12571_v7, %v12563_v53  ;;  %v25273_v44 = vsel %vm14032_vm0, %v21387_v56, %v21388_v16  ;;  %v21392_v13 = vunpack.i.l.bf16 %v25152_v35  ;;  %vm26423_vm15 = vmmov %vm26412_vm5 }
0x18b1   : > { %v25264_v41 = vpop.permute.xlu0 %12884  ;;  %v21458_v40 = vunpack.i.h.bf16 %v25262_v19  ;;  %v21457_v32 = vunpack.i.l.bf16 %v25262_v19  ;;  %v25276_v62 = vsel %vm14032_vm0, %v21398_v20, %v21387_v56  ;;  %v12564_v28 = vsel %vm26412_vm5, %v21338_v12, %v21362_v6  ;;  %20268 = vmatprep.subr.msk.bf16.mxu1 %vm22999_vm6, %v20266_v48  ;;  %12806 = vmatprep.mubr.f32.mxu0 %v25240_v15 }
0x18b2   : > { %v12565_v54 = vsel %vm26421_vm14, %v21362_v6, %v21363_v27  ;;  %v25288_v53 = vsel %vm12922_vm4, %v21378_v37, %v21407_v11  ;;  %v25293_v56 = vsel %vm12922_vm4, %v21407_v11, %v21408_v59  ;;  %v25296_v5 = vsel %vm13667_vm2, %v21343_v30, %v21367_v21  ;;  %20208 = vmatprep.subr.msk.bf16.mxu0 %vm22999_vm6, %v20206_v55 }
0x18b3   : > { %v25301_v12 = vsel %vm13667_vm2, %v21367_v21, %v21368_v63  ;;  %v25306_v48 = vsel %vm14032_vm0, %v21388_v16, %v21417_v9  ;;  %v12924_v37 = vsel %vm12922_vm4, %v21372_v33, %v21373_v45  ;;  %v21393_v20 = vunpack.i.h.bf16 %v25152_v35  ;;  %18229 = vmatmul.mubr.msk.f32.vlgmr.msra.gmra.mrb[70].mxu1 %vm1310_vm7, %v26413_v39  ;;  %20211 = vmatpush1.bf16.msk.msra.mxu0 %vm22999_vm6, %v20209_v4 }
0x18b4   : > { %v21461_v30 = vpop.permute.xlu1 %21460  ;;  %v13681_v16 = vsel %vm13667_vm2, %v21457_v32, %v21458_v40  ;;  %20271 = vmatpush1.bf16.msk.msra.mxu1 %vm22999_vm6, %v20269_v43  ;;  %13774 = vmatprep.mubr.f32.mxu1 %v25240_v15  ;;  %v21383_v39 = vunpack.i.h.bf16 %v25113_v60  ;;  %v21382_v11 = vunpack.i.l.bf16 %v25113_v60  ;;  %v21402_v35 = vunpack.i.l.bf16 %v25189_v34 }
0x18b5   : > { %v25316_v27 = vpop.permute.xlu0 %21420  ;;  %v21463_v25 = vunpack.i.h.bf16 %v21461_v30  ;;  %v21462_v6 = vunpack.i.l.bf16 %v21461_v30  ;;  %20274 = vmatprep.subr.msk.bf16.mxu1 %vm22999_vm6, %v20272_v0  ;;  %v13680_v50 = vsel %vm13667_vm2, %v21328_v23, %v21457_v32  ;;  %v20218_v63 = vpack.c.bf16 %v25215_v31, %v12924_v37 }
0x18b6   : > { %18202 = vmatmul.mubr.msk.f32.vlgmr.msra.gmra.mrb[56].mxu0 %vm1310_vm7, %v24832_v17  ;;  %v20278_v26 = vpack.c.bf16 %v13681_v16, %v13673_v36  ;;  %v12931_v23 = vsel %vm12922_vm4, %v21393_v20, %v21377_v46  ;;  %v21397_v7 = vunpack.i.l.bf16 %v24988_v22  ;;  %v14034_v18 = vsel %vm14032_vm0, %v21382_v11, %v21383_v39 }
0x18b7   : > { %v12572_v29 = vsel %vm26422_vm13, %v21453_v52, %v21462_v6  ;;  %v12573_v43 = vsel %vm26423_vm15, %v21462_v6, %v21463_v25  ;;  %18232 = vmatmul.mubr.msk.f32.vlgmr.msra.gmra.mrb[64].mxu1 %vm1310_vm7, %v24830_v58  ;;  %12877 = vmatprep.mubr.f32.mxu0 %v25240_v15  ;;  %v12923_v52 = vsel %vm12922_vm4, %v21392_v13, %v21372_v33  ;;  %v21423_v1 = vunpack.i.h.bf16 %v25316_v27 }
0x18b8   : > { %v20215_v21 = vpack.c.bf16 %v12572_v29, %v12564_v28  ;;  %v21466_v14 = vpop.permute.xlu1 %21465  ;;  %v20212_v0 = vpack.c.bf16 %v12573_v43, %v12565_v54  ;;  %20277 = vmatpush1.bf16.msk.msra.mxu1 %vm22999_vm6, %v20275_v49  ;;  %13845 = vmatprep.mubr.f32.mxu1 %v25240_v15  ;;  %v12926_v46 = vsel %vm12922_vm4, %v21402_v35, %v21403_v61  ;;  %v21422_v49 = vunpack.i.l.bf16 %v25316_v27 }
0x18b9   : > { %v25346_v57 = vpop.permute.xlu0 %21425  ;;  %v21468_v31 = vunpack.i.h.bf16 %v21466_v14  ;;  %v21467_v47 = vunpack.i.l.bf16 %v21466_v14  ;;  %v20281_v33 = vpack.c.bf16 %v13680_v50, %v25223_v3  ;;  %20280 = vmatprep.subr.msk.bf16.mxu1 %vm22999_vm6, %v20278_v26  ;;  %v20221_v4 = vpack.c.bf16 %v12931_v23, %v12923_v52 }
0x18ba   : > { %20214 = vmatprep.subr.msk.bf16.mxu0 %vm22999_vm6, %v20212_v0  ;;  %v21413_v3 = vunpack.i.h.bf16 %v25234_v42  ;;  %v21412_v19 = vunpack.i.l.bf16 %v25234_v42  ;;  %v12925_v55 = vsel %vm12922_vm4, %v21373_v45, %v21402_v35  ;;  %v21418_v37 = vunpack.i.h.bf16 %v25069_v24 }
0x18bb   : > { %v13682_v2 = vsel %vm13667_vm2, %v21458_v40, %v21467_v47  ;;  %v13683_v22 = vsel %vm13667_vm2, %v21467_v47, %v21468_v31  ;;  %20217 = vmatpush1.bf16.msk.msra.mxu0 %vm22999_vm6, %v20215_v21  ;;  %18235 = vmatmul.mubr.msk.f32.vlgmr.msra.gmra.mrb[66].mxu1 %vm1310_vm7, %v24830_v58  ;;  %v14033_v20 = vsel %vm14032_vm0, %v21397_v7, %v21382_v11  ;;  %v21428_v27 = vunpack.i.h.bf16 %v25346_v57 }
0x18bc   : > { %v20284_v36 = vpack.c.bf16 %v13683_v22, %v25301_v12  ;;  %v25381_v40 = vpop.permute.xlu1 %21470  ;;  %20220 = vmatprep.subr.msk.bf16.mxu0 %vm22999_vm6, %v20218_v63  ;;  %v20287_v28 = vpack.c.bf16 %v13682_v2, %v25296_v5  ;;  %20283 = vmatpush1.bf16.msk.msra.mxu1 %vm22999_vm6, %v20281_v33  ;;  %v20224_v30 = vpack.c.bf16 %v25293_v56, %v12926_v46  ;;  %v21427_v13 = vunpack.i.l.bf16 %v25346_v57 }
0x18bd   : > { %v21431_v32 = vpop.permute.xlu0 %21430  ;;  %v21473_v54 = vunpack.i.h.bf16 %v25381_v40  ;;  %v21472_v12 = vunpack.i.l.bf16 %v25381_v40  ;;  %13916 = vmatprep.mubr.f32.mxu1 %v25240_v15  ;;  %v20290_v8 = vpack.c.bf16 %v25273_v44, %v14034_v18  ;;  %v12928_v5 = vsel %vm12922_vm4, %v21422_v49, %v21423_v1 }
0x18be   : > { %18205 = vmatmul.mubr.msk.f32.vlgmr.msra.gmra.mrb[58].mxu0 %vm1310_vm7, %v24832_v17  ;;  %20286 = vmatprep.subr.msk.bf16.mxu1 %vm22999_vm6, %v20284_v36  ;;  %v20227_v17 = vpack.c.bf16 %v25288_v53, %v12925_v55  ;;  %v14036_v56 = vsel %vm14032_vm0, %v21412_v19, %v21413_v3  ;;  %v21433_v16 = vunpack.i.h.bf16 %v21431_v32  ;;  %v21432_v25 = vunpack.i.l.bf16 %v21431_v32 }
0x18bf   : > { %v12936_v45 = vsel %vm12922_vm4, %v21472_v12, %v21473_v54  ;;  %20223 = vmatpush1.bf16.msk.msra.mxu0 %vm22999_vm6, %v20221_v4  ;;  %13029 = vmatprep.mubr.f32.mxu0 %v25240_v15  ;;  %v12935_v6 = vsel %vm12922_vm4, %v21408_v59, %v21472_v12  ;;  %v12927_v53 = vsel %vm12922_vm4, %v21403_v61, %v21422_v49  ;;  %v26424_v12 = vld [vmem:[#allocation4_spill] sm:$0xff] }
0x18c0   : > { %18238 = vmatmul.mubr.msk.f32.vlgmr.msra.gmra.mrb[68].mxu1 %vm1310_vm7, %v24830_v58  ;;  %v21476_v44 = vpop.permute.xlu1 %21475  ;;  %20226 = vmatprep.subr.msk.bf16.mxu0 %vm22999_vm6, %v20224_v30  ;;  %v14044_v29 = vsel %vm14032_vm0, %v21417_v9, %v21418_v37  ;;  %v20293_v10 = vpack.c.bf16 %v25276_v62, %v14033_v20  ;;  %v20230_v43 = vpack.c.bf16 %v12936_v45, %v12928_v5  ;;  %v26425_v30 = vld [vmem:[#allocation5_spill] sm:$0xff]  ;;  %v10945_v45 = vadd.s32 384, %v26424_v12 }
0x18c1   : > { %20289 = vmatpush1.bf16.msk.msra.mxu1 %vm22999_vm6, %v20287_v28  ;;  %v21478_v11 = vunpack.i.h.bf16 %v21476_v44  ;;  %v21477_v35 = vunpack.i.l.bf16 %v21476_v44  ;;  %13987 = vmatprep.mubr.f32.mxu1 %v25240_v15  ;;  %v21436_v50 = vpop.permute.xlu0 %21435  ;;  %v14035_v34 = vsel %vm14032_vm0, %v21383_v39, %v21412_v19  ;;  %v20296_v59 = vpack.c.bf16 %v14044_v29, %v14036_v56 }
0x18c2   : > { %20292 = vmatprep.subr.msk.bf16.mxu1 %vm22999_vm6, %v20290_v8  ;;  %18208 = vmatmul.mubr.msk.f32.vlgmr.msra.gmra.mrb[52].mxu0 %vm1310_vm7, %v25264_v41  ;;  %v14038_v61 = vsel %vm14032_vm0, %v21427_v13, %v21428_v27  ;;  %v20233_v24 = vpack.c.bf16 %v12935_v6, %v12927_v53  ;;  %v12929_v62 = vsel %vm12922_vm4, %v21423_v1, %v21432_v25  ;;  %v21438_v60 = vunpack.i.h.bf16 %v21436_v50 }
0x18c3   : > { %20229 = vmatpush1.bf16.msk.msra.mxu0 %vm22999_vm6, %v20227_v17  ;;  %13100 = vmatprep.mubr.f32.mxu0 %v25240_v15  ;;  %v12930_v63 = vsel %vm12922_vm4, %v21432_v25, %v21433_v16  ;;  %v14046_v39 = vsel %vm14032_vm0, %v21477_v35, %v21478_v11  ;;  %v21437_v26 = vunpack.i.l.bf16 %v21436_v50  ;;  %v14037_v0 = vsel %vm14032_vm0, %v21413_v3, %v21427_v13 }
0x18c4   : > { %18241 = vmatmul.mubr.msk.f32.vlgmr.msra.gmra.mrb[70].mxu1 %vm1310_vm7, %v24830_v58  ;;  %v21481_v9 = vpop.permute.xlu1 %21480  ;;  %20232 = vmatprep.subr.msk.bf16.mxu0 %vm22999_vm6, %v20230_v43  ;;  %v20299_v58 = vpack.c.bf16 %v25306_v48, %v14035_v34  ;;  %v14045_v48 = vsel %vm14032_vm0, %v21418_v37, %v21477_v35  ;;  %v20302_v52 = vpack.c.bf16 %v14046_v39, %v14038_v61  ;;  %v10950_v37 = vand.u32 31, %v26424_v12 }
0x18c5   : > { %20295 = vmatpush1.bf16.msk.msra.mxu1 %vm22999_vm6, %v20293_v10  ;;  %v21483_v21 = vunpack.i.h.bf16 %v21481_v9  ;;  %v21482_v14 = vunpack.i.l.bf16 %v21481_v9  ;;  %14139 = vmatprep.mubr.f32.mxu1 %v25240_v15  ;;  %v14040_v46 = vsel %vm14032_vm0, %v21437_v26, %v21438_v60  ;;  %v14039_v33 = vsel %vm14032_vm0, %v21428_v27, %v21437_v26 }
0x18c6   : > { %20298 = vmatprep.subr.msk.bf16.mxu1 %vm22999_vm6, %v20296_v59  ;;  %18211 = vmatmul.mubr.msk.f32.vlgmr.msra.gmra.mrb[54].mxu0 %vm1310_vm7, %v25264_v41  ;;  %v20305_v2 = vpack.c.bf16 %v14045_v48, %v14037_v0  ;;  %v10951_v8 = vand.u32 31, %v26425_v30  ;;  %v10946_v5 = vadd.s32 512, %v26424_v12  ;;  %v10947_v27 = vadd.s32 640, %v26424_v12 }
0x18c7   : > { %v12937_v57 = vsel %vm12922_vm4, %v21473_v54, %v21482_v14  ;;  %v12938_v23 = vsel %vm12922_vm4, %v21482_v14, %v21483_v21  ;;  %20235 = vmatpush1.bf16.msk.msra.mxu0 %vm22999_vm6, %v20233_v24  ;;  %13171 = vmatprep.mubr.f32.mxu0 %v25240_v15  ;;  %v10953_v17 = vand.u32 31, %v10945_v45  ;;  %v25526_v53 = vadd.s32 768, %v26424_v12 }
0x18c8   : > { %v20236_v31 = vpack.c.bf16 %v12938_v23, %v12930_v63  ;;  %v20239_v47 = vpack.c.bf16 %v12937_v57, %v12929_v62  ;;  %18244 = vmatmul.mubr.msk.f32.vlgmr.msra.gmra.mrb[64].mxu1 %vm1310_vm7, %v25111_v51  ;;  %v21486_v42 = vpop.permute.xlu1 %21485  ;;  %v10954_v16 = vand.u32 31, %v10946_v5  ;;  %v10955_v25 = vand.u32 31, %v10947_v27 }
0x18c9   : > { %20301 = vmatpush1.bf16.msk.msra.mxu1 %vm22999_vm6, %v20299_v58  ;;  %v21488_v7 = vunpack.i.h.bf16 %v21486_v42  ;;  %v21487_v18 = vunpack.i.l.bf16 %v21486_v42  ;;  %14210 = vmatprep.mubr.f32.mxu1 %v25240_v15  ;;  %vm10961_vm14 = vcmp.ne.s32.totalorder %v10953_v17, 0  ;;  %v25530_v35 = vadd.s32 896, %v26424_v12 }
0x18ca   : > { %20304 = vmatprep.subr.msk.bf16.mxu1 %vm22999_vm6, %v20302_v52  ;;  %18214 = vmatmul.mubr.msk.f32.vlgmr.msra.gmra.mrb[56].mxu0 %vm1310_vm7, %v25264_v41  ;;  %vm10962_vm13 = vcmp.ne.s32.totalorder %v10954_v16, 0  ;;  %vm10963_vm15 = vcmp.ne.s32.totalorder %v10955_v25, 0  ;;  %v25537_v43 = vsel %vm10961_vm14, 1.0, %v25240_v15  ;;  %v10956_v34 = vand.u32 31, %v25526_v53 }
0x18cb   : > { %v14047_v22 = vsel %vm14032_vm0, %v21478_v11, %v21487_v18  ;;  %v14048_v1 = vsel %vm14032_vm0, %v21487_v18, %v21488_v7  ;;  %20238 = vmatprep.subr.msk.bf16.mxu0 %vm22999_vm6, %v20236_v31  ;;  %13242 = vmatprep.mubr.f32.mxu0 %v25240_v15  ;;  %v10957_v63 = vand.u32 31, %v25530_v35  ;;  %v25545_v60 = vsel %vm10962_vm13, 1.0, %v25240_v15 }
0x18cc   : > { %v20308_v49 = vpack.c.bf16 %v14048_v1, %v14040_v46  ;;  %18247 = vmatmul.mubr.msk.f32.vlgmr.msra.gmra.mrb[66].mxu1 %vm1310_vm7, %v25111_v51  ;;  %20241 = vmatpush1.bf16.msk.msra.mxu0 %vm22999_vm6, %v20239_v47  ;;  %v20311_v4 = vpack.c.bf16 %v14047_v22, %v14039_v33  ;;  %v25549_v21 = vsel %vm10963_vm15, 1.0, %v25240_v15  ;;  %vm10985_vm13 = vcmp.ne.s32.totalorder %v10953_v17, 31 }
0x18cd   : > { %20307 = vmatpush1.bf16.msk.msra.mxu1 %vm22999_vm6, %v20305_v2  ;;  %14281 = vmatprep.mubr.f32.mxu1 %v25240_v15  ;;  %vm10965_vm12 = vcmp.ne.s32.totalorder %v10957_v63, 0  ;;  %vm10986_vm15 = vcmp.ne.s32.totalorder %v10954_v16, 31 }
0x18ce   : > { %20310 = vmatprep.subr.msk.bf16.mxu1 %vm22999_vm6, %v20308_v49 }
0x18cf   : > { %18217 = vmatmul.mubr.msk.f32.vlgmr.msra.gmra.mrb[58].mxu0 %vm1310_vm7, %v25264_v41 }
0x18d0   : > { %18250 = vmatmul.mubr.msk.f32.vlgmr.msra.gmra.mrb[68].mxu1 %vm1310_vm7, %v25111_v51  ;;  %14530 = vmatprep.mubr.f32.mxu0 %v25240_v15 }
0x18d1   : > { %20313 = vmatpush1.bf16.msk.msra.mxu1 %vm22999_vm6, %v20311_v4  ;;  %14352 = vmatprep.mubr.f32.mxu1 %v25240_v15  ;;  %vm10959_vm6 = vcmp.ne.s32.totalorder %v10951_v8, 0  ;;  %v25570_v4 = vsel %vm10985_vm13, 1.0, %v25240_v15 }
0x18d2   : > { %v25505_v54 = vpop.permute.xlu0 %14384  ;;  %v25523_v6 = vsel %vm10959_vm6, 1.0, %v25240_v15  ;;  %vm10983_vm6 = vcmp.ne.s32.totalorder %v10951_v8, 31  ;;  %v25586_v8 = vsel %vm10986_vm15, 1.0, %v25240_v15 }
0x18d3   : > { %v25555_v57 = vsel %vm10983_vm6, 1.0, %v25240_v15  ;;  %vm10989_vm6 = vcmp.ne.s32.totalorder %v10957_v63, 31 }
0x18d4   : > { %18253 = vmatmul.mubr.msk.f32.vlgmr.msra.gmra.mrb[70].mxu1 %vm1310_vm7, %v25111_v51  ;;  %v10944_v51 = vadd.s32 256, %v26424_v12  ;;  %vm10958_vm7 = vcmp.ne.s32.totalorder %v10950_v37, 0 }
0x18d5   : > { %15496 = vmatprep.mubr.f32.mxu1 %v25240_v15  ;;  %v25520_v44 = vsel %vm10958_vm7, 1.0, %v25240_v15  ;;  %vm10982_vm7 = vcmp.ne.s32.totalorder %v10950_v37, 31 }
0x18d6   : > { %v25507_v38 = vpop.permute.xlu0 %14430  ;;  %v10952_v13 = vand.u32 31, %v10944_v51  ;;  %v25552_v26 = vsel %vm10982_vm7, 1.0, %v25240_v15  ;;  %vm10987_vm7 = vcmp.ne.s32.totalorder %v10955_v25, 31 }
0x18d8   : > { %vm10960_vm5 = vcmp.ne.s32.totalorder %v10952_v13, 0  ;;  %vm10984_vm14 = vcmp.ne.s32.totalorder %v10952_v13, 31  ;;  %v25592_v13 = vsel %vm10987_vm7, 1.0, %v25240_v15 }
0x18d9   : > { %v25534_v29 = vsel %vm10960_vm5, 1.0, %v25240_v15  ;;  %vm10964_vm5 = vcmp.ne.s32.totalorder %v10956_v34, 0  ;;  %v25567_v2 = vsel %vm10984_vm14, 1.0, %v25240_v15 }
0x18da   : > { %v25511_v20 = vpop.permute.xlu0 %14418  ;;  %v25563_v18 = vsel %vm10964_vm5, 1.0, %v25240_v15 }
0x18de   : > { %v25517_v56 = vpop.permute.xlu0 %14750 }
0x18e2   : > { %v25540_v24 = vpop.permute.xlu0 %15081 }
0x18e6   : > { %v25559_v42 = vpop.permute.xlu0 %15108 }
0x18ea   : > { %v15429_v17 = vpop.permute.xlu0 %15428 }
0x1967   : > { %v11982_v3 = vpop.f32.mrb[58].mxu1 }
0x1968   : > { %v11984_v19 = vpop.f32.mrb[59].mxu1  ;;  %v12208_v11 = vmul.f32 %v25520_v44, %v11982_v3  ;;  %v25573_v3 = vsel %vm10965_vm12, 1.0, %v25240_v15  ;;  %vm25594_vm12 = vcmp.ne.s32.totalorder %v10956_v34, 31 }
0x1969   : > { %v12209_v50 = vmul.f32 %v25523_v6, %v11984_v19 }
0x196a   : > { %v12124_v36 = vpop.f32.mrb[50].mxu0 }
0x196b   : > { %v12126_v40 = vpop.f32.mrb[51].mxu0  ;;  %v12212_v52 = vmul.f32 %v25545_v60, %v12124_v36 }
0x196c   : > { %v12053_v41 = vpop.f32.mrb[60].mxu1  ;;  %v12213_v7 = vmul.f32 %v25549_v21, %v12126_v40 }
0x196d   : > { %v12055_v32 = vpop.f32.mrb[61].mxu1  ;;  %v12210_v62 = vmul.f32 %v25534_v29, %v12053_v41 }
0x196e   : > { %v12211_v39 = vmul.f32 %v25537_v43, %v12055_v32 }
0x1970   : > { %v25501_v55 = vpop.f32.mrb[62].mxu1 }
0x1971   : > { %v25503_v28 = vpop.f32.mrb[63].mxu1  ;;  %v12214_v37 = vmul.f32 %v25563_v18, %v25501_v55 }
0x1972   : > { %v12215_v45 = vmul.f32 %v25573_v3, %v25503_v28 }
0x1995   : > { %v13031_v10 = vpop.f32.mrb[52].mxu0 }
0x1996   : > { %v13257_v59 = vadd.f32 %v13031_v10, %v12208_v11  ;;  %v13033_v61 = vpop.f32.mrb[53].mxu0 }
0x1997   : > { %v13258_v9 = vadd.f32 %v13033_v61, %v12209_v50  ;;  %v25616_v61 = vsel %vm25594_vm12, 1.0, %v25240_v15 }
0x1999   : > { %v13102_v14 = vpop.f32.mrb[54].mxu0 }
0x199a   : > { %v13259_v58 = vadd.f32 %v13102_v14, %v12210_v62  ;;  %v13104_v0 = vpop.f32.mrb[55].mxu0  ;;  %v25621_v62 = vsel %vm10989_vm6, 1.0, %v25240_v15 }
0x199b   : > { %v14141_v23 = vpop.f32.mrb[64].mxu1  ;;  %v13260_v48 = vadd.f32 %v13104_v0, %v12211_v39 }
0x199c   : > { %v14367_v31 = vmul.f32 %v25552_v26, %v14141_v23  ;;  %v14143_v47 = vpop.f32.mrb[65].mxu1 }
0x199d   : > { %v14368_v46 = vmul.f32 %v25555_v57, %v14143_v47  ;;  %v13173_v33 = vpop.f32.mrb[56].mxu0 }
0x199e   : > { %v14375_v22 = vadd.f32 %v14367_v31, %v13257_v59  ;;  %v13261_v1 = vadd.f32 %v13173_v33, %v12212_v52  ;;  %v13175_v49 = vpop.f32.mrb[57].mxu0 }
0x199f   : > { %v14376_v19 = vadd.f32 %v14368_v46, %v13258_v9  ;;  %v14212_v36 = vpop.f32.mrb[66].mxu1  ;;  %v13262_v40 = vadd.f32 %v13175_v49, %v12213_v7  ;;  %v14417_v46 = vpop.permute.xlu1 %14416 }
0x19a0   : > { %v25576_v41 = vadd.f32 %v25505_v54, %v14375_v22  ;;  %v14369_v32 = vmul.f32 %v25567_v2, %v14212_v36  ;;  %v14214_v12 = vpop.f32.mrb[67].mxu1  ;;  %v25808_v55 = vsel %vm2074_vm9, %v14417_v46, %v25511_v20  ;;  %vm26432_vm9 = vcmask 261120  }
0x19a1   : > { %v25582_v51 = vadd.f32 %v25505_v54, %v14376_v19  ;;  %v14370_v30 = vmul.f32 %v25570_v4, %v14214_v12  ;;  %vm26434_vm5 = vmmov %vm26432_vm9 }
0x19a2   : > { %14395 = vst [vmem:[#allocation2 + $0x8] sm:$0xff] %v25576_v41  ;;  %v14377_v5 = vadd.f32 %v14369_v32, %v13259_v58  ;;  %v13244_v27 = vpop.f32.mrb[58].mxu0  ;;  %15720 = vrot.lane.b32.xlu0 %v25576_v41, %s26378_s11  ;;  %14432 = vrot.lane.b32.xlu1 %v25576_v41, %s26331_s30 }
0x19a3   : > { %14396 = vst [vmem:[#allocation2 + $0x10] sm:$0xff] %v25582_v51  ;;  %v14378_v28 = vadd.f32 %v14370_v30, %v13260_v48  ;;  %v13263_v16 = vadd.f32 %v13244_v27, %v12214_v37  ;;  %v14283_v25 = vpop.f32.mrb[68].mxu1  ;;  %v13246_v53 = vpop.f32.mrb[59].mxu0  ;;  %15432 = vmatprep.subr.mxu1 %v25582_v51 }
0x19a4   : > { %v25605_v11 = vadd.f32 %v25505_v54, %v14377_v5  ;;  %v14371_v35 = vmul.f32 %v25586_v8, %v14283_v25  ;;  %v13264_v50 = vadd.f32 %v13246_v53, %v12215_v45  ;;  %v14285_v10 = vpop.f32.mrb[69].mxu1  ;;  %15433 = vmatpush1.msra.mxu1 %v25576_v41  ;;  %v25750_v33 = vpop.permute.xlu1 %14752  ;;  %v26431_v53 = vmov 61  }
0x19a5   : > { %v25610_v34 = vadd.f32 %v25505_v54, %v14378_v28  ;;  %v14372_v59 = vmul.f32 %v25592_v13, %v14285_v10  ;;  %18266 = vmatmul.mubr.msk.f32.vlgmr.msra.gmra.mrb[72].mxu1 %vm7261_vm10, %v15429_v17 }
0x19a6   : > { %14397 = vst [vmem:[#allocation2 + $0x18] sm:$0xff] %v25605_v11  ;;  %v14379_v9 = vadd.f32 %v14371_v35, %v13261_v1  ;;  %16702 = vrot.lane.b32.xlu0 %v25576_v41, %s26379_s13  ;;  %14754 = vrot.lane.b32.xlu1 %v25576_v41, %s26335_s15  ;;  %v21508_v1 = vld [vmem:[%s26373_s12 + $0x8] sm:$0xff] }
0x19a7   : > { %v14380_v63 = vadd.f32 %v14372_v59, %v13262_v40  ;;  %v14354_v39 = vpop.f32.mrb[70].mxu1  ;;  %15503 = vmatprep.subr.mxu1 %v25610_v34  ;;  %15567 = vmatprep.mubr.f32.mxu1 %v25240_v15 }
0x19a8   : > { %v25630_v14 = vadd.f32 %v25505_v54, %v14379_v9  ;;  %v14373_v58 = vmul.f32 %v25616_v61, %v14354_v39  ;;  %v14356_v0 = vpop.f32.mrb[71].mxu1  ;;  %15504 = vmatpush1.msra.mxu1 %v25605_v11  ;;  %v25756_v22 = vpop.permute.xlu1 %16376 }
0x19a9   : > { %v25635_v23 = vadd.f32 %v25505_v54, %v14380_v63  ;;  %v14374_v48 = vmul.f32 %v25621_v62, %v14356_v0  ;;  %18267 = vmatmul.mubr.msk.f32.vlgmr.msra.gmra.mrb[74].mxu1 %vm7261_vm10, %v15429_v17  ;;  %v17394_v63 = vld [vmem:[%s26373_s12 + $0x8] sm:$0x7] }
0x19aa   : > { %14399 = vst [vmem:[#allocation2 + $0x28] sm:$0xff] %v25630_v14  ;;  %v14381_v52 = vadd.f32 %v14373_v58, %v13263_v16  ;;  %15092 = vrot.lane.b32.xlu1 %v25576_v41, %s21586_s5  ;;  %14756 = vrot.lane.b32.xlu0 %v25582_v51, %s26335_s15 }
0x19ab   : > { %v14382_v31 = vadd.f32 %v14374_v48, %v13264_v50  ;;  %15574 = vmatprep.subr.mxu1 %v25635_v23  ;;  %15638 = vmatprep.mubr.f32.mxu1 %v25240_v15 }
0x19ac   : > { %v25647_v47 = vadd.f32 %v25505_v54, %v14381_v52  ;;  %15575 = vmatpush1.msra.mxu1 %v25630_v14  ;;  %v25768_v49 = vpop.permute.xlu1 %16394 }
0x19ad   : > { %v25651_v7 = vadd.f32 %v25505_v54, %v14382_v31  ;;  %18268 = vmatmul.mubr.msk.f32.vlgmr.msra.gmra.mrb[76].mxu1 %vm7261_vm10, %v15429_v17  ;;  %v21507_v54 = vld [vmem:[%s26373_s12] sm:$0xff] }
0x19ae   : > { %14401 = vst [vmem:[#allocation2 + $0x38] sm:$0xff] %v25647_v47  ;;  %16378 = vrot.lane.b32.xlu1 %v25576_v41, %s26317_s1  ;;  %15096 = vrot.lane.b32.xlu0 %v25605_v11, %s21586_s5 }
0x19af   : > { %14402 = vst [vmem:[#allocation2 + $0x40] sm:$0xff] %v25651_v7  ;;  %15645 = vmatprep.subr.mxu1 %v25651_v7  ;;  %15709 = vmatprep.mubr.f32.mxu1 %v25240_v15 }
0x19b0   : > { %15646 = vmatpush1.msra.mxu1 %v25647_v47 }
0x19b1   : > { %18269 = vmatmul.mubr.msk.f32.vlgmr.msra.gmra.mrb[78].mxu1 %vm7261_vm10, %v15429_v17 }
0x19b2   : > { %14434 = vrot.lane.b32.xlu1 %v25582_v51, %s26331_s30  ;;  %16382 = vrot.lane.b32.xlu0 %v25605_v11, %s26317_s1 }
0x19b3   : > { %15818 = vmatprep.mubr.f32.mxu1 %v25240_v15 }
0x19b6   : > { %15094 = vrot.lane.b32.xlu1 %v25582_v51, %s21586_s5  ;;  %14438 = vrot.lane.b32.xlu0 %v25610_v34, %s26331_s30 }
0x19ba   : > { %16380 = vrot.lane.b32.xlu1 %v25582_v51, %s26317_s1  ;;  %14760 = vrot.lane.b32.xlu0 %v25610_v34, %s26335_s15 }
0x19be   : > { %15722 = vrot.lane.b32.xlu1 %v25582_v51, %s26378_s11  ;;  %16384 = vrot.lane.b32.xlu0 %v25610_v34, %s26317_s1 }
0x19c2   : > { %16704 = vrot.lane.b32.xlu1 %v25582_v51, %s26379_s13  ;;  %15100 = vrot.lane.b32.xlu0 %v25630_v14, %s21586_s5 }
0x19c6   : > { %14436 = vrot.lane.b32.xlu1 %v25605_v11, %s26331_s30  ;;  %14442 = vrot.lane.b32.xlu0 %v25635_v23, %s26331_s30 }
0x19ca   : > { %14758 = vrot.lane.b32.xlu1 %v25605_v11, %s26335_s15  ;;  %14764 = vrot.lane.b32.xlu0 %v25635_v23, %s26335_s15 }
0x19ce   : > { %15098 = vrot.lane.b32.xlu1 %v25610_v34, %s21586_s5  ;;  %16388 = vrot.lane.b32.xlu0 %v25635_v23, %s26317_s1 }
0x19d2   : > { %14440 = vrot.lane.b32.xlu1 %v25630_v14, %s26331_s30  ;;  %15104 = vrot.lane.b32.xlu0 %v25647_v47, %s21586_s5 }
0x19d6   : > { %14762 = vrot.lane.b32.xlu1 %v25630_v14, %s26335_s15  ;;  %14446 = vrot.lane.b32.xlu0 %v25651_v7, %s26331_s30 }
0x19da   : > { %16386 = vrot.lane.b32.xlu1 %v25630_v14, %s26317_s1  ;;  %15718 = vrot.lane.b32.xlu0 %v25240_v15, %s26378_s11 }
0x19de   : > { %15102 = vrot.lane.b32.xlu1 %v25635_v23, %s21586_s5  ;;  %15716 = vrot.lane.b32.xlu0 %v21507_v54, %s26340_s26 }
0x19e2   : > { %14444 = vrot.lane.b32.xlu1 %v25647_v47, %s26331_s30  ;;  %15724 = vrot.lane.b32.xlu0 %v25605_v11, %s26378_s11  ;;  %s26428_s30 = smov 12  }
0x19e6   : > { %14766 = vrot.lane.b32.xlu1 %v25647_v47, %s26335_s15  ;;  %14768 = vrot.lane.b32.xlu0 %v25651_v7, %s26335_s15 }
0x19ea   : > { %16390 = vrot.lane.b32.xlu1 %v25647_v47, %s26317_s1  ;;  %16706 = vrot.lane.b32.xlu0 %v25605_v11, %s26379_s13 }
0x19ee   : > { %16700 = vrot.lane.b32.xlu1 %v25240_v15, %s26379_s13  ;;  %15728 = vrot.lane.b32.xlu0 %v25630_v14, %s26378_s11 }
0x19f2   : > { %16698 = vrot.lane.b32.xlu1 %v21507_v54, %s26428_s30  ;;  %16710 = vrot.lane.b32.xlu0 %v25630_v14, %s26379_s13 }
0x19f6   : > { %15726 = vrot.lane.b32.xlu1 %v25610_v34, %s26378_s11  ;;  %15732 = vrot.lane.b32.xlu0 %v25647_v47, %s26378_s11 }
0x19fa   : > { %16708 = vrot.lane.b32.xlu1 %v25610_v34, %s26379_s13  ;;  %16714 = vrot.lane.b32.xlu0 %v25647_v47, %s26379_s13 }
0x19fe   : > { %15730 = vrot.lane.b32.xlu1 %v25635_v23, %s26378_s11  ;;  %16042 = vrot.lane.b32.xlu0 %v25582_v51, %s21589_s27 }
0x1a02   : > { %16712 = vrot.lane.b32.xlu1 %v25635_v23, %s26379_s13  ;;  %17024 = vrot.lane.b32.xlu0 %v25582_v51, %s26353_s6 }
0x1a06   : > { %15106 = vrot.lane.b32.xlu1 %v25651_v7, %s21586_s5  ;;  %16392 = vrot.lane.b32.xlu0 %v25651_v7, %s26317_s1  ;;  %s26430_s1 = smov 92  }
0x1a0a   : > { %16044 = vrot.lane.b32.xlu1 %v25605_v11, %s21589_s27  ;;  %16040 = vrot.lane.b32.xlu0 %v25576_v41, %s21589_s27 }
0x1a0e   : > { %17026 = vrot.lane.b32.xlu1 %v25605_v11, %s26353_s6  ;;  %16038 = vrot.lane.b32.xlu0 %v21508_v1, %s26429_s4 }
0x1a12   : > { %17022 = vrot.lane.b32.xlu1 %v25576_v41, %s26353_s6  ;;  %16046 = vrot.lane.b32.xlu0 %v25610_v34, %s21589_s27 }
0x1a14   : > { %v25774_v19 = vpop.permute.xlu0 %15720  ;;  %v14433_v36 = vpop.permute.xlu1 %14432 }
0x1a15   : > { %v14448_v27 = vsel %vm671_vm1, %v25507_v38, %v14433_v36 }
0x1a16   : > { %17020 = vrot.lane.b32.xlu1 %v21508_v1, %s26430_s1  ;;  %17028 = vrot.lane.b32.xlu0 %v25610_v34, %s26353_s6 }
0x1a18   : > { %v25779_v40 = vpop.permute.xlu0 %16702  ;;  %v25781_v32 = vpop.permute.xlu1 %14754 }
0x1a1a   : > { %16048 = vrot.lane.b32.xlu1 %v25630_v14, %s21589_s27  ;;  %16050 = vrot.lane.b32.xlu0 %v25635_v23, %s21589_s27 }
0x1a1c   : > { %v25787_v41 = vpop.permute.xlu1 %15092  ;;  %v25789_v12 = vpop.permute.xlu0 %14756 }
0x1a1e   : > { %17030 = vrot.lane.b32.xlu1 %v25630_v14, %s26353_s6  ;;  %17032 = vrot.lane.b32.xlu0 %v25635_v23, %s26353_s6 }
0x1a20   : > { %v16379_v37 = vpop.permute.xlu1 %16378  ;;  %v25795_v51 = vpop.permute.xlu0 %15096 }
0x1a22   : > { %15734 = vrot.lane.b32.xlu1 %v25651_v7, %s26378_s11  ;;  %16054 = vrot.lane.b32.xlu0 %v25651_v7, %s21589_s27 }
0x1a24   : > { %v14435_v30 = vpop.permute.xlu1 %14434  ;;  %v16383_v45 = vpop.permute.xlu0 %16382 }
0x1a25   : > { %v14449_v5 = vsel %vm671_vm1, %v14433_v36, %v14435_v30 }
0x1a26   : > { %14466 = vmatprep.subr.mxu0 %v14449_v5  ;;  %16716 = vrot.lane.b32.xlu1 %v25651_v7, %s26379_s13 }
0x1a27   : > { %17036 = vrot.lane.b32.xlu0 %v25651_v7, %s26353_s6  ;;  %14467 = vmatpush1.msra.mxu0 %v14448_v27 }
0x1a28   : > { %18254 = vmatmul.mubr.msk.f32.vlgmr.msra.gmra.mrb[60].mxu0 %vm7261_vm10, %v25808_v55  ;;  %v25814_v17 = vpop.permute.xlu1 %15094  ;;  %v14439_v28 = vpop.permute.xlu0 %14438 }
0x1a29   : > { %14601 = vmatprep.mubr.f32.mxu0 %v25240_v15 }
0x1a2a   : > { %16052 = vrot.lane.b32.xlu1 %v25647_v47, %s21589_s27 }
0x1a2b   : > { %17367 = vperm.xlu0 %21490, %v21508_v1  }
0x1a2c   : > { %v16381_v38 = vpop.permute.xlu1 %16380  ;;  %v25819_v16 = vpop.permute.xlu0 %14760 }
0x1a2d   : > { %v25822_v20 = vsel %vm9220_vm3, %v16379_v37, %v16381_v38  ;;  %v25825_v25 = vsel %vm9220_vm3, %v16381_v38, %v16383_v45 }
0x1a2e   : > { %17034 = vrot.lane.b32.xlu1 %v25647_v47, %s26353_s6 }
0x1a2f   : > { %21491 = vset.pattern.permute.xlu0 %v26431_v53 }
0x1a30   : > { %v25830_v11 = vpop.permute.xlu1 %15722  ;;  %v25832_v35 = vpop.permute.xlu0 %16384 }
0x1a31   : > { %v25836_v50 = vsel %vm9220_vm3, %v16383_v45, %v25832_v35  ;;  %v15737_v10 = vsel %vm26432_vm9, %v25774_v19, %v25830_v11 }
0x1a32   : > { %16056 = vrot.lane.b32.xlu1 %v25240_v15, %s21589_s27  ;;  %15754 = vmatprep.subr.mxu1 %v15737_v10 }
0x1a34   : > { %v25843_v59 = vpop.permute.xlu1 %16704  ;;  %v25845_v9 = vpop.permute.xlu0 %15100 }
0x1a36   : > { %17038 = vrot.lane.b32.xlu1 %v25240_v15, %s26353_s6 }
0x1a38   : > { %v14437_v39 = vpop.permute.xlu1 %14436  ;;  %v14443_v14 = vpop.permute.xlu0 %14442 }
0x1a39   : > { %v14450_v58 = vsel %vm671_vm1, %v14435_v30, %v14437_v39  ;;  %v14451_v0 = vsel %vm671_vm1, %v14437_v39, %v14439_v28 }
0x1a3a   : > { %14537 = vmatprep.subr.mxu0 %v14451_v0  ;;  %17416 = vrot.lane.b32.xlu1 %v17394_v63, %s26433_s22  ;;  %v14770_v0 = vsel %vm11472_vm8, %v25750_v33, %v25781_v32 }
0x1a3b   : > { %14538 = vmatpush1.msra.mxu0 %v14450_v58 }
0x1a3c   : > { %v14759_v48 = vpop.permute.xlu1 %14758  ;;  %18255 = vmatmul.mubr.msk.f32.vlgmr.msra.gmra.mrb[62].mxu0 %vm7261_vm10, %v25808_v55  ;;  %v14765_v52 = vpop.permute.xlu0 %14764 }
0x1a3d   : > { %14672 = vmatprep.mubr.f32.mxu0 %v25240_v15 }
0x1a3e   : > { %17413 = vperm.xlu1 %21006, %v17394_v63  }
0x1a40   : > { %v25858_v31 = vpop.permute.xlu1 %15098  ;;  %v25860_v54 = vpop.permute.xlu0 %16388 }
0x1a44   : > { %v14441_v46 = vpop.permute.xlu1 %14440  ;;  %v25862_v1 = vpop.permute.xlu0 %15104 }
0x1a45   : > { %v14452_v36 = vsel %vm671_vm1, %v14439_v28, %v14441_v46  ;;  %v14453_v37 = vsel %vm671_vm1, %v14441_v46, %v14443_v14 }
0x1a46   : > { %14608 = vmatprep.subr.mxu0 %v14453_v37  ;;  %v14772_v37 = vsel %vm11472_vm8, %v25789_v12, %v14759_v48 }
0x1a47   : > { %14609 = vmatpush1.msra.mxu0 %v14452_v36 }
0x1a48   : > { %v14763_v30 = vpop.permute.xlu1 %14762  ;;  %18256 = vmatmul.mubr.msk.f32.vlgmr.msra.gmra.mrb[64].mxu0 %vm7261_vm10, %v25808_v55  ;;  %v14447_v45 = vpop.permute.xlu0 %14446 }
0x1a49   : > { %14743 = vmatprep.mubr.f32.mxu0 %v25240_v15 }
0x1a4c   : > { %v25869_v5 = vpop.permute.xlu1 %16386  ;;  %v15719_v27 = vpop.permute.xlu0 %15718 }
0x1a4d   : > { %v15736_v38 = vsel %vm26434_vm5, %v15719_v27, %v25774_v19  ;;  %v14771_v19 = vsel %vm11472_vm8, %v25781_v32, %v25789_v12  ;;  %v14775_v32 = vsel %vm11472_vm8, %v14763_v30, %v14765_v52 }
0x1a4e   : > { %15755 = vmatpush1.msra.mxu1 %v15736_v38 }
0x1a50   : > { %v25873_v53 = vpop.permute.xlu1 %15102  ;;  %v25875_v28 = vpop.permute.xlu0 %15716 }
0x1a51   : > { %18270 = vmatmul.mubr.msk.f32.vlgmr.msra.gmra.mrb[72].mxu1 %vm7261_vm10, %v25875_v28 }
0x1a52   : > { %15889 = vmatprep.mubr.f32.mxu1 %v25240_v15 }
0x1a54   : > { %v14445_v10 = vpop.permute.xlu1 %14444  ;;  %v15725_v63 = vpop.permute.xlu0 %15724 }
0x1a55   : > { %v14454_v39 = vsel %vm671_vm1, %v14443_v14, %v14445_v10  ;;  %v14455_v58 = vsel %vm671_vm1, %v14445_v10, %v14447_v45  ;;  %v14773_v14 = vsel %vm11472_vm8, %v14759_v48, %v25819_v16  ;;  %vm26435_vm1 = vmmov %vm26434_vm5 }
0x1a56   : > { %14679 = vmatprep.subr.mxu0 %v14455_v58  ;;  %vm26437_vm14 = vmmov %vm26435_vm1 }
0x1a57   : > { %14680 = vmatpush1.msra.mxu0 %v14454_v39  ;;  %v15110_v39 = vsel %vm11873_vm11, %v25787_v41, %v25814_v17  ;;  %vm26438_vm13 = vmmov %vm26435_vm1 }
0x1a58   : > { %v14767_v46 = vpop.permute.xlu1 %14766  ;;  %18257 = vmatmul.mubr.msk.f32.vlgmr.msra.gmra.mrb[66].mxu0 %vm7261_vm10, %v25808_v55  ;;  %14788 = vmatprep.subr.mxu0 %v14771_v19  ;;  %v14769_v36 = vpop.permute.xlu0 %14768  ;;  %v14774_v55 = vsel %vm11472_vm8, %v25819_v16, %v14763_v30  ;;  %v15111_v30 = vsel %vm11873_vm11, %v25814_v17, %v25795_v51  ;;  %v15113_v19 = vsel %vm11873_vm11, %v25858_v31, %v25845_v9 }
0x1a59   : > { %14789 = vmatpush1.msra.mxu0 %v14770_v0  ;;  %14852 = vmatprep.mubr.f32.mxu0 %v25240_v15  ;;  %v14777_v48 = vsel %vm11472_vm8, %v14767_v46, %v14769_v36  ;;  %v14776_v38 = vsel %vm11472_vm8, %v14765_v52, %v14767_v46  ;;  %v25933_v46 = vld [vmem:[#allocation2 + $0xf0] sm:$0xff]  ;;  %vm26436_vm8 = vmmov %vm26435_vm1 }
0x1a5a   : > { %14859 = vmatprep.subr.mxu0 %v14773_v14 }
0x1a5c   : > { %v25895_v45 = vpop.permute.xlu1 %16390  ;;  %18258 = vmatmul.mubr.msk.f32.vlgmr.msra.gmra.mrb[60].mxu0 %vm7261_vm10, %v25517_v56  ;;  %v25899_v33 = vpop.permute.xlu0 %16706 }
0x1a5d   : > { %14860 = vmatpush1.msra.mxu0 %v14772_v37  ;;  %14923 = vmatprep.mubr.f32.mxu0 %v25240_v15 }
0x1a5e   : > { %14930 = vmatprep.subr.mxu0 %v14775_v32 }
0x1a60   : > { %v25905_v27 = vpop.permute.xlu1 %16700  ;;  %18259 = vmatmul.mubr.msk.f32.vlgmr.msra.gmra.mrb[62].mxu0 %vm7261_vm10, %v25517_v56  ;;  %v15729_v12 = vpop.permute.xlu0 %15728 }
0x1a61   : > { %14931 = vmatpush1.msra.mxu0 %v14774_v55  ;;  %14994 = vmatprep.mubr.f32.mxu0 %v25240_v15 }
0x1a62   : > { %15001 = vmatprep.subr.mxu0 %v14777_v48 }
0x1a64   : > { %v25912_v10 = vpop.permute.xlu1 %16698  ;;  %18260 = vmatmul.mubr.msk.f32.vlgmr.msra.gmra.mrb[64].mxu0 %vm7261_vm10, %v25517_v56  ;;  %v25916_v16 = vpop.permute.xlu0 %16710 }
0x1a65   : > { %15002 = vmatpush1.msra.mxu0 %v14776_v38  ;;  %15065 = vmatprep.mubr.f32.mxu0 %v25240_v15  ;;  %v15738_v15 = vsel %vm26436_vm8, %v25830_v11, %v15725_v63  ;;  %v15115_v11 = vsel %vm11873_vm11, %v25873_v53, %v25862_v1  ;;  %v16399_v38 = vsel %vm9220_vm3, %v25832_v35, %v25869_v5 }
0x1a66   : > { %15128 = vmatprep.subr.mxu0 %v15111_v30 }
0x1a68   : > { %v15727_v52 = vpop.permute.xlu1 %15726  ;;  %18261 = vmatmul.mubr.msk.f32.vlgmr.msra.gmra.mrb[66].mxu0 %vm7261_vm10, %v25517_v56  ;;  %v25927_v58 = vpop.permute.xlu0 %15732  ;;  %v15112_v56 = vsel %vm11873_vm11, %v25795_v51, %v25858_v31  ;;  %v15114_v51 = vsel %vm11873_vm11, %v25845_v9, %v25873_v53 }
0x1a69   : > { %15129 = vmatpush1.msra.mxu0 %v15110_v39  ;;  %v15739_v0 = vsel %vm26435_vm1, %v15725_v63, %v15727_v52  ;;  %15192 = vmatprep.mubr.f32.mxu0 %v25933_v46  ;;  %v15740_v14 = vsel %vm26438_vm13, %v15727_v52, %v15729_v12 }
0x1a6a   : > { %15199 = vmatprep.subr.mxu0 %v15113_v19  ;;  %15825 = vmatprep.subr.mxu1 %v15739_v0  ;;  %v16720_v19 = vsel %vm13667_vm2, %v25843_v59, %v25899_v33 }
0x1a6b   : > { %15826 = vmatpush1.msra.mxu1 %v15738_v15 }
0x1a6c   : > { %v25941_v41 = vpop.permute.xlu1 %16708  ;;  %18262 = vmatmul.mubr.msk.f32.vlgmr.msra.gmra.mrb[60].mxu0 %vm7261_vm10, %v25540_v24  ;;  %v25945_v17 = vpop.permute.xlu0 %16714  ;;  %18271 = vmatmul.mubr.msk.f32.vlgmr.msra.gmra.mrb[74].mxu1 %vm7261_vm10, %v25875_v28 }
0x1a6d   : > { %15200 = vmatpush1.msra.mxu0 %v15112_v56  ;;  %15263 = vmatprep.mubr.f32.mxu0 %v25933_v46 }
0x1a6e   : > { %15270 = vmatprep.subr.mxu0 %v15115_v11  ;;  %15960 = vmatprep.mubr.f32.mxu1 %v25933_v46 }
0x1a70   : > { %v25957_v31 = vpop.permute.xlu1 %15730  ;;  %18263 = vmatmul.mubr.msk.f32.vlgmr.msra.gmra.mrb[62].mxu0 %vm7261_vm10, %v25540_v24  ;;  %v25961_v63 = vpop.permute.xlu0 %16042 }
0x1a71   : > { %15271 = vmatpush1.msra.mxu0 %v15114_v51  ;;  %v15741_v36 = vsel %vm26437_vm14, %v15729_v12, %v25957_v31  ;;  %15334 = vmatprep.mubr.f32.mxu0 %v25933_v46 }
0x1a72   : > { %15896 = vmatprep.subr.mxu1 %v15741_v36 }
0x1a73   : > { %15897 = vmatpush1.msra.mxu1 %v15740_v14 }
0x1a74   : > { %v25967_v37 = vpop.permute.xlu1 %16712  ;;  %18264 = vmatmul.mubr.msk.f32.vlgmr.msra.gmra.mrb[64].mxu0 %vm7261_vm10, %v25540_v24  ;;  %v25971_v9 = vpop.permute.xlu0 %17024  ;;  %18272 = vmatmul.mubr.msk.f32.vlgmr.msra.gmra.mrb[76].mxu1 %vm7261_vm10, %v25875_v28 }
0x1a75   : > { %15405 = vmatprep.mubr.f32.mxu0 %v25933_v46  ;;  %16031 = vmatprep.mubr.f32.mxu1 %v25933_v46  ;;  %v16724_v51 = vsel %vm13667_vm2, %v25967_v37, %v25945_v17 }
0x1a78   : > { %v15107_v53 = vpop.permute.xlu1 %15106  ;;  %v16393_v32 = vpop.permute.xlu0 %16392 }
0x1a79   : > { %v15116_v55 = vsel %vm11873_vm11, %v25862_v1, %v15107_v53  ;;  %v15117_v12 = vsel %vm11873_vm11, %v15107_v53, %v25559_v42  ;;  %v16402_v30 = vsel %vm9220_vm3, %v25895_v45, %v16393_v32  ;;  %vm26440_vm11 = vmmov %vm26435_vm1 }
0x1a7a   : > { %15341 = vmatprep.subr.mxu0 %v15117_v12 }
0x1a7b   : > { %15342 = vmatpush1.msra.mxu0 %v15116_v55 }
0x1a7c   : > { %v25981_v48 = vpop.permute.xlu1 %16044  ;;  %18265 = vmatmul.mubr.msk.f32.vlgmr.msra.gmra.mrb[66].mxu0 %vm7261_vm10, %v25540_v24  ;;  %16414 = vmatprep.subr.mxu0 %v25825_v25  ;;  %v16041_v1 = vpop.permute.xlu0 %16040  ;;  %v16401_v24 = vsel %vm9220_vm3, %v25860_v54, %v25895_v45  ;;  %v16721_v45 = vsel %vm13667_vm2, %v25899_v33, %v25941_v41  ;;  %v15742_v33 = vsel %vm26440_vm11, %v25957_v31, %v25927_v58 }
0x1a7d   : > { %16415 = vmatpush1.msra.mxu0 %v25822_v20  ;;  %16478 = vmatprep.mubr.f32.mxu0 %v25933_v46  ;;  %v16400_v20 = vsel %vm9220_vm3, %v25869_v5, %v25860_v54  ;;  %v16719_v54 = vsel %vm13667_vm2, %v25779_v40, %v25843_v59 }
0x1a7e   : > { %16485 = vmatprep.subr.mxu0 %v16399_v38 }
0x1a80   : > { %v25991_v42 = vpop.permute.xlu1 %17026  ;;  %18278 = vmatmul.mubr.msk.f32.vlgmr.msra.gmra.mrb[68].mxu0 %vm7261_vm10, %v25756_v22  ;;  %v26003_v25 = vpop.permute.xlu0 %16038 }
0x1a81   : > { %16486 = vmatpush1.msra.mxu0 %v25836_v50  ;;  %16549 = vmatprep.mubr.f32.mxu0 %v25933_v46  ;;  %v16403_v50 = vsel %vm9220_vm3, %v16393_v32, %v25768_v49  ;;  %v16718_v49 = vsel %vm13667_vm2, %v25905_v27, %v25779_v40  ;;  %v16722_v40 = vsel %vm13667_vm2, %v25941_v41, %v25916_v16  ;;  %vm26439_vm3 = vmmov %vm26435_vm1 }
0x1a82   : > { %16556 = vmatprep.subr.mxu0 %v16401_v24  ;;  %v16058_v41 = vsel %vm12922_vm4, %v16041_v1, %v25961_v63 }
0x1a84   : > { %v26005_v35 = vpop.permute.xlu1 %17022  ;;  %18279 = vmatmul.mubr.msk.f32.vlgmr.msra.gmra.mrb[70].mxu0 %vm7261_vm10, %v25756_v22  ;;  %v16047_v5 = vpop.permute.xlu0 %16046 }
0x1a85   : > { %16557 = vmatpush1.msra.mxu0 %v16400_v20  ;;  %16620 = vmatprep.mubr.f32.mxu0 %v25933_v46  ;;  %v16060_v31 = vsel %vm12922_vm4, %v25981_v48, %v16047_v5 }
0x1a86   : > { %16627 = vmatprep.subr.mxu0 %v16403_v50 }
0x1a88   : > { %v26014_v39 = vpop.permute.xlu1 %17020  ;;  %18280 = vmatmul.mubr.msk.f32.vlgmr.msra.gmra.mrb[72].mxu0 %vm7261_vm10, %v25756_v22  ;;  %v17029_v0 = vpop.permute.xlu0 %17028 }
0x1a89   : > { %16628 = vmatpush1.msra.mxu0 %v16402_v30  ;;  %16691 = vmatprep.mubr.f32.mxu0 %v25933_v46  ;;  %v17042_v32 = vsel %vm14032_vm0, %v25991_v42, %v17029_v0 }
0x1a8a   : > { %16736 = vmatprep.subr.mxu0 %v16719_v54 }
0x1a8c   : > { %v16049_v52 = vpop.permute.xlu1 %16048  ;;  %18281 = vmatmul.mubr.msk.f32.vlgmr.msra.gmra.mrb[74].mxu0 %vm7261_vm10, %v25756_v22  ;;  %v16723_v22 = vsel %vm13667_vm2, %v25916_v16, %v25967_v37  ;;  %v16051_v56 = vpop.permute.xlu0 %16050  ;;  %v16059_v16 = vsel %vm12922_vm4, %v25961_v63, %v25981_v48  ;;  %v17040_v37 = vsel %vm14032_vm0, %v26005_v35, %v25971_v9 }
0x1a8d   : > { %16737 = vmatpush1.msra.mxu0 %v16718_v49  ;;  %16800 = vmatprep.mubr.f32.mxu0 %v25933_v46  ;;  %v16062_v55 = vsel %vm12922_vm4, %v16049_v52, %v16051_v56 }
0x1a8e   : > { %16807 = vmatprep.subr.mxu0 %v16721_v45 }
0x1a90   : > { %v17031_v15 = vpop.permute.xlu1 %17030  ;;  %18282 = vmatmul.mubr.msk.f32.vlgmr.msra.gmra.mrb[68].mxu0 %vm7261_vm10, %v25912_v10  ;;  %v17033_v63 = vpop.permute.xlu0 %17032 }
0x1a91   : > { %16808 = vmatpush1.msra.mxu0 %v16720_v19  ;;  %16871 = vmatprep.mubr.f32.mxu0 %v25933_v46  ;;  %v17043_v53 = vsel %vm14032_vm0, %v17029_v0, %v17031_v15  ;;  %v17044_v38 = vsel %vm14032_vm0, %v17031_v15, %v17033_v63 }
0x1a92   : > { %16878 = vmatprep.subr.mxu0 %v16723_v22 }
0x1a94   : > { %v15735_v27 = vpop.permute.xlu1 %15734  ;;  %18283 = vmatmul.mubr.msk.f32.vlgmr.msra.gmra.mrb[70].mxu0 %vm7261_vm10, %v25912_v10  ;;  %v16055_v12 = vpop.permute.xlu0 %16054 }
0x1a95   : > { %16879 = vmatpush1.msra.mxu0 %v16722_v40  ;;  %v15743_v59 = vsel %vm26439_vm3, %v25927_v58, %v15735_v27  ;;  %16942 = vmatprep.mubr.f32.mxu0 %v25933_v46 }
0x1a96   : > { %15967 = vmatprep.subr.mxu1 %v15743_v59 }
0x1a97   : > { %15968 = vmatpush1.msra.mxu1 %v15742_v33 }
0x1a98   : > { %v16717_v11 = vpop.permute.xlu1 %16716  ;;  %18284 = vmatmul.mubr.msk.f32.vlgmr.msra.gmra.mrb[72].mxu0 %vm7261_vm10, %v25912_v10  ;;  %18273 = vmatmul.mubr.msk.f32.vlgmr.msra.gmra.mrb[78].mxu1 %vm7261_vm10, %v25875_v28  ;;  %v16061_v28 = vsel %vm12922_vm4, %v16047_v5, %v16049_v52 }
0x1a99   : > { %16076 = vmatprep.subr.mxu1 %v16059_v16  ;;  %v16725_v58 = vsel %vm13667_vm2, %v25945_v17, %v16717_v11  ;;  %16140 = vmatprep.mubr.f32.mxu1 %v25933_v46  ;;  %v17041_v17 = vsel %vm14032_vm0, %v25971_v9, %v25991_v42  ;;  %v17037_v24 = vpop.permute.xlu0 %17036 }
0x1a9a   : > { %16077 = vmatpush1.msra.mxu1 %v16058_v41  ;;  %16949 = vmatprep.subr.mxu0 %v16725_v58 }
0x1a9b   : > { %16147 = vmatprep.subr.mxu1 %v16061_v28  ;;  %16950 = vmatpush1.msra.mxu0 %v16724_v51 }
0x1a9c   : > { %17013 = vmatprep.mubr.f32.mxu0 %v25933_v46  ;;  %v16053_v36 = vpop.permute.xlu1 %16052  ;;  %18274 = vmatmul.mubr.msk.f32.vlgmr.msra.gmra.mrb[72].mxu1 %vm7261_vm10, %v26003_v25 }
0x1a9d   : > { %16148 = vmatpush1.msra.mxu1 %v16060_v31  ;;  %18285 = vmatmul.mubr.msk.f32.vlgmr.msra.gmra.mrb[74].mxu0 %vm7261_vm10, %v25912_v10  ;;  %v16063_v14 = vsel %vm12922_vm4, %v16051_v56, %v16053_v36  ;;  %v16064_v42 = vsel %vm12922_vm4, %v16053_v36, %v16055_v12 }
0x1a9e   : > { %17058 = vmatprep.subr.mxu0 %v17041_v17  ;;  %16218 = vmatprep.subr.mxu1 %v16063_v14 }
0x1a9f   : > { %17059 = vmatpush1.msra.mxu0 %v17040_v37  ;;  %16211 = vmatprep.mubr.f32.mxu1 %v25933_v46 }
0x1aa0   : > { %17129 = vmatprep.subr.mxu0 %v17043_v53  ;;  %17122 = vmatprep.mubr.f32.mxu0 %v25933_v46  ;;  %v17035_v10 = vpop.permute.xlu1 %17034 }
0x1aa1   : > { %18275 = vmatmul.mubr.msk.f32.vlgmr.msra.gmra.mrb[74].mxu1 %vm7261_vm10, %v26003_v25  ;;  %18286 = vmatmul.mubr.msk.f32.vlgmr.msra.gmra.mrb[68].mxu0 %vm7261_vm10, %v26014_v39  ;;  %v17045_v9 = vsel %vm14032_vm0, %v17033_v63, %v17035_v10  ;;  %v17046_v50 = vsel %vm14032_vm0, %v17035_v10, %v17037_v24 }
0x1aa2   : > { %16219 = vmatpush1.msra.mxu1 %v16062_v55  ;;  %17130 = vmatpush1.msra.mxu0 %v17042_v32 }
0x1aa3   : > { %17200 = vmatprep.subr.mxu0 %v17045_v9  ;;  %16282 = vmatprep.mubr.f32.mxu1 %v25933_v46 }
0x1aa4   : > { %17193 = vmatprep.mubr.f32.mxu0 %v25933_v46  ;;  %v16057_v48 = vpop.permute.xlu1 %16056 }
0x1aa5   : > { %18276 = vmatmul.mubr.msk.f32.vlgmr.msra.gmra.mrb[76].mxu1 %vm7261_vm10, %v26003_v25  ;;  %18287 = vmatmul.mubr.msk.f32.vlgmr.msra.gmra.mrb[70].mxu0 %vm7261_vm10, %v26014_v39  ;;  %v16065_v1 = vsel %vm12922_vm4, %v16055_v12, %v16057_v48 }
0x1aa6   : > { %17201 = vmatpush1.msra.mxu0 %v17044_v38  ;;  %16289 = vmatprep.subr.mxu1 %v16065_v1 }
0x1aa7   : > { %16290 = vmatpush1.msra.mxu1 %v16064_v42  ;;  %16353 = vmatprep.mubr.f32.mxu1 %v25933_v46 }
0x1aa8   : > { %17264 = vmatprep.mubr.f32.mxu0 %v25933_v46  ;;  %v17039_v20 = vpop.permute.xlu1 %17038 }
0x1aa9   : > { %18277 = vmatmul.mubr.msk.f32.vlgmr.msra.gmra.mrb[78].mxu1 %vm7261_vm10, %v26003_v25  ;;  %18288 = vmatmul.mubr.msk.f32.vlgmr.msra.gmra.mrb[72].mxu0 %vm7261_vm10, %v26014_v39  ;;  %v17047_v35 = vsel %vm14032_vm0, %v17037_v24, %v17039_v20 }
0x1aaa   : > { %17271 = vmatprep.subr.mxu0 %v17047_v35  ;;  %17335 = vmatprep.mubr.f32.mxu0 %v25933_v46  ;;  %v26119_v31 = vpop.permute.xlu0 %17367 }
0x1aab   : > { %17272 = vmatpush1.msra.mxu0 %v17046_v50  ;;  %17484 = vmatprep.mubr.f32.mxu1 %v25933_v46 }
0x1aad   : > { %18289 = vmatmul.mubr.msk.f32.vlgmr.msra.gmra.mrb[74].mxu0 %vm7261_vm10, %v26014_v39  ;;  %vm26441_vm10 = vcmask 130048  }
0x1aae   : > { %vm26442_vm2 = vmmov %vm26441_vm10 }
0x1aaf   : > { %vm26443_vm4 = vmmov %vm26442_vm2 }
0x1ab0   : > { %vm26444_vm0 = vmmov %vm26442_vm2 }
0x1b3f   : > { %v15194_v30 = vpop.f32.mrb[60].mxu0 }
0x1b40   : > { %v15196_v54 = vpop.f32.mrb[61].mxu0  ;;  %v15420_v0 = vmul.f32 %v25520_v44, %v15194_v30  ;;  %v17396_v30 = vld [vmem:[#allocation2 + $0x10] sm:$0xff] }
0x1b41   : > { %v15421_v15 = vmul.f32 %v25523_v6, %v15196_v54 }
0x1b43   : > { %v15265_v5 = vpop.f32.mrb[62].mxu0 }
0x1b44   : > { %v15267_v25 = vpop.f32.mrb[63].mxu0  ;;  %v15422_v33 = vmul.f32 %v25534_v29, %v15265_v5  ;;  %v17395_v5 = vld [vmem:[#allocation2 + $0x8] sm:$0xff] }
0x1b45   : > { %v15423_v39 = vmul.f32 %v25537_v43, %v15267_v25 }
0x1b47   : > { %v15336_v49 = vpop.f32.mrb[64].mxu0 }
0x1b48   : > { %v15338_v52 = vpop.f32.mrb[65].mxu0  ;;  %v15424_v6 = vmul.f32 %v25545_v60, %v15336_v49 }
0x1b49   : > { %v15425_v36 = vmul.f32 %v25549_v21, %v15338_v52 }
0x1b4f   : > { %v15407_v45 = vpop.f32.mrb[66].mxu0 }
0x1b50   : > { %v15409_v19 = vpop.f32.mrb[67].mxu0  ;;  %v15426_v60 = vmul.f32 %v25563_v18, %v15407_v45 }
0x1b51   : > { %v15427_v21 = vmul.f32 %v25573_v3, %v15409_v19 }
0x1b6f   : > { %v16142_v22 = vpop.f32.mrb[72].mxu1 }
0x1b70   : > { %v16368_v40 = vadd.f32 %v16142_v22, %v15420_v0  ;;  %v16144_v27 = vpop.f32.mrb[73].mxu1 }
0x1b71   : > { %v16369_v59 = vadd.f32 %v16144_v27, %v15421_v15 }
0x1b74   : > { %v16213_v56 = vpop.f32.mrb[74].mxu1  ;;  %v17124_v11 = vpop.f32.mrb[68].mxu0 }
0x1b75   : > { %v16370_v16 = vadd.f32 %v16213_v56, %v15422_v33  ;;  %v17350_v41 = vmul.f32 %v25552_v26, %v17124_v11  ;;  %v16215_v58 = vpop.f32.mrb[75].mxu1  ;;  %v17126_v51 = vpop.f32.mrb[69].mxu0 }
0x1b76   : > { %v16371_v28 = vadd.f32 %v16215_v58, %v15423_v39  ;;  %v17351_v44 = vmul.f32 %v25555_v57, %v17126_v51  ;;  %v17417_v33 = vpop.permute.xlu1 %17416  ;;  %v17399_v58 = vld [vmem:[#allocation2 + $0x28] sm:$0xff] }
0x1b77   : > { %v17358_v63 = vadd.f32 %v17350_v41, %v16368_v40 }
0x1b78   : > { %v17359_v29 = vadd.f32 %v17351_v44, %v16369_v59  ;;  %v17195_v17 = vpop.f32.mrb[70].mxu0  ;;  %v16284_v43 = vpop.f32.mrb[76].mxu1  ;;  %v17397_v59 = vld [vmem:[#allocation2 + $0x18] sm:$0xff] }
0x1b79   : > { %v17352_v14 = vmul.f32 %v25567_v2, %v17195_v17  ;;  %v17370_v37 = vadd.f32 %v26119_v31, %v17358_v63  ;;  %v16372_v26 = vadd.f32 %v16284_v43, %v15424_v6  ;;  %v16286_v53 = vpop.f32.mrb[77].mxu1  ;;  %v17197_v10 = vpop.f32.mrb[71].mxu0  ;;  %v26445_v43 = vld [vmem:[#allocation6_spill] sm:$0xff] }
0x1b7a   : > { %v17371_v32 = vadd.f32 %v26119_v31, %v17359_v29  ;;  %v16373_v57 = vadd.f32 %v16286_v53, %v15425_v36  ;;  %v17353_v55 = vmul.f32 %v25570_v4, %v17197_v10 }
0x1b7b   : > { %v17360_v9 = vadd.f32 %v17352_v14, %v16370_v16  ;;  %v17378_v12 = vmax.f32 %v17370_v37, 0.0  ;;  %v26446_v37 = vld [vmem:[#allocation8_spill] sm:$0xff] }
0x1b7c   : > { %v17379_v48 = vmax.f32 %v17371_v32, 0.0  ;;  %v17361_v38 = vadd.f32 %v17353_v55, %v16371_v28  ;;  %v16355_v1 = vpop.f32.mrb[78].mxu1  ;;  %v17266_v2 = vpop.f32.mrb[72].mxu0 }
0x1b7d   : > { %v17372_v42 = vadd.f32 %v26119_v31, %v17360_v9  ;;  %17386 = vst [vmem:[#allocation2 + $0x58] sm:$0xff] %v17378_v12  ;;  %v16374_v24 = vadd.f32 %v16355_v1, %v15426_v60  ;;  %v17354_v20 = vmul.f32 %v25586_v8, %v17266_v2  ;;  %v16357_v35 = vpop.f32.mrb[79].mxu1  ;;  %v17268_v50 = vpop.f32.mrb[73].mxu0  ;;  %v20316_v52 = vpack.c.bf16 %v17378_v12, %v17395_v5  ;;  %v26449_v1 = vld [vmem:[#allocation10_spill] sm:$0xff] }
0x1b7e   : > { %17387 = vst [vmem:[#allocation2 + $0x60] sm:$0xff] %v17379_v48  ;;  %v17373_v18 = vadd.f32 %v26119_v31, %v17361_v38  ;;  %v16375_v4 = vadd.f32 %v16357_v35, %v15427_v21  ;;  %v17355_v54 = vmul.f32 %v25592_v13, %v17268_v50  ;;  %v20314_v3 = vpack.c.bf16 %v17379_v48, %v17396_v30 }
0x1b7f   : > { %v17380_v25 = vmax.f32 %v17372_v42, 0.0  ;;  %v17362_v49 = vadd.f32 %v17354_v20, %v16372_v26  ;;  %v26450_v42 = vld [vmem:[#allocation12_spill] sm:$0xff] }
0x1b80   : > { %v17381_v45 = vmax.f32 %v17373_v18, 0.0  ;;  %v17363_v19 = vadd.f32 %v17355_v54, %v16373_v57  ;;  %v17337_v0 = vpop.f32.mrb[74].mxu0  ;;  %20315 = vmatprep.subr.bf16.mxu1 %v20314_v3  ;;  %v26447_v57 = vld [vmem:[#allocation7_spill] sm:$0xff]  ;;  %v26452_v3 = vld [vmem:[#allocation13_spill] sm:$0xff] }
0x1b81   : > { %17388 = vst [vmem:[#allocation2 + $0x68] sm:$0xff] %v17380_v25  ;;  %v17374_v8 = vadd.f32 %v26119_v31, %v17362_v49  ;;  %v17356_v15 = vmul.f32 %v25616_v61, %v17337_v0  ;;  %v17339_v22 = vpop.f32.mrb[75].mxu0  ;;  %20317 = vmatpush1.bf16.msra.mxu1 %v20316_v52  ;;  %v20320_v11 = vpack.c.bf16 %v17380_v25, %v17397_v59 }
0x1b82   : > { %17389 = vst [vmem:[#allocation2 + $0x70] sm:$0xff] %v17381_v45  ;;  %v17375_v40 = vadd.f32 %v26119_v31, %v17363_v19  ;;  %v17357_v13 = vmul.f32 %v25621_v62, %v17339_v22  ;;  %v20318_v27 = vpack.c.bf16 %v17381_v45, %v25610_v34 }
0x1b83   : > { %v17382_v39 = vmax.f32 %v17374_v8, 0.0  ;;  %v17364_v56 = vadd.f32 %v17356_v15, %v16374_v24 }
0x1b84   : > { %v17383_v16 = vmax.f32 %v17375_v40, 0.0  ;;  %v17365_v41 = vadd.f32 %v17357_v13, %v16375_v4  ;;  %18290 = vmatmul.mubr.msk.f32.vlgmr.msra.gmra.mrb[80].mxu1 %vm26441_vm10, %v17417_v33  ;;  %20319 = vmatprep.subr.bf16.mxu1 %v20318_v27  ;;  %v26451_v4 = vld [vmem:[#allocation11_spill] sm:$0xff] }
0x1b85   : > { %17390 = vst [vmem:[#allocation2 + $0x78] sm:$0xff] %v17382_v39  ;;  %v17376_v61 = vadd.f32 %v26119_v31, %v17364_v56  ;;  %20321 = vmatpush1.bf16.msra.mxu1 %v20320_v11  ;;  %17555 = vmatprep.mubr.f32.mxu1 %v25933_v46  ;;  %v20324_v28 = vpack.c.bf16 %v17382_v39, %v17399_v58 }
0x1b86   : > { %17391 = vst [vmem:[#allocation2 + $0x80] sm:$0xff] %v17383_v16  ;;  %v17377_v62 = vadd.f32 %v26119_v31, %v17365_v41  ;;  %v20322_v34 = vpack.c.bf16 %v17383_v16, %v25635_v23  ;;  %v17414_v23 = vpop.permute.xlu1 %17413 }
0x1b87   : > { %v17384_v51 = vmax.f32 %v17376_v61, 0.0 }
0x1b88   : > { %v17385_v44 = vmax.f32 %v17377_v62, 0.0  ;;  %18291 = vmatmul.mubr.msk.f32.vlgmr.msra.gmra.mrb[82].mxu1 %vm26442_vm2, %v17417_v33  ;;  %20323 = vmatprep.subr.bf16.mxu1 %v20322_v34 }
0x1b89   : > { %17392 = vst [vmem:[#allocation2 + $0x88] sm:$0xff] %v17384_v51  ;;  %20325 = vmatpush1.bf16.msra.mxu1 %v20324_v28  ;;  %17626 = vmatprep.mubr.f32.mxu1 %v25933_v46  ;;  %v20328_v63 = vpack.c.bf16 %v17384_v51, %v25647_v47 }
0x1b8a   : > { %17393 = vst [vmem:[#allocation2 + $0x90] sm:$0xff] %v17385_v44  ;;  %v20326_v6 = vpack.c.bf16 %v17385_v44, %v25651_v7 }
0x1b8c   : > { %18292 = vmatmul.mubr.msk.f32.vlgmr.msra.gmra.mrb[84].mxu1 %vm26443_vm4, %v17417_v33  ;;  %20327 = vmatprep.subr.bf16.mxu1 %v20326_v6 }
0x1b8d   : > { %20329 = vmatpush1.bf16.msra.mxu1 %v20328_v63  ;;  %17697 = vmatprep.mubr.f32.mxu1 %v25933_v46  ;;  %v26448_v46 = vld [vmem:[#allocation9_spill] sm:$0xff] }
0x1b90   : > { %18293 = vmatmul.mubr.msk.f32.vlgmr.msra.gmra.mrb[86].mxu1 %vm26444_vm0, %v17417_v33 }
0x1c57   : > { %v17486_v31 = vpop.f32.mrb[80].mxu1 }
0x1c58   : > { %v17487_v36 = vadd.f32 %v17486_v31, %v17414_v23  ;;  %v17488_v29 = vpop.f32.mrb[81].mxu1 }
0x1c59   : > { %v17489_v17 = vadd.f32 %v17488_v29, %v17414_v23 }
0x1c5a   : > { %v17704_v14 = vadd.f32 %v17487_v36, %v26445_v43 }
0x1c5b   : > { %v17705_v7 = vadd.f32 %v17489_v17, %v26446_v37  ;;  %v17557_v47 = vpop.f32.mrb[82].mxu1 }
0x1c5c   : > { %v17558_v26 = vadd.f32 %v17557_v47, %v17414_v23  ;;  %v17559_v53 = vpop.f32.mrb[83].mxu1 }
0x1c5d   : > { %v17720_v10 = vcombine.low %v17704_v14, %v17705_v7  ;;  %v17560_v32 = vadd.f32 %v17559_v53, %v17414_v23 }
0x1c5e   : > { %v17706_v55 = vadd.f32 %v17558_v26, %v26447_v57 }
0x1c5f   : > { %17728 = vst [vmem:[%s22973_s0 + $0x10] sm:$0x77] %v17720_v10  ;;  %v17707_v60 = vadd.f32 %v17560_v32, %v26448_v46  ;;  %v17628_v9 = vpop.f32.mrb[84].mxu1 }
0x1c60   : > { %v17629_v12 = vadd.f32 %v17628_v9, %v17414_v23  ;;  %v17630_v21 = vpop.f32.mrb[85].mxu1 }
0x1c61   : > { %v17721_v48 = vcombine.low %v17706_v55, %v17707_v60  ;;  %v17631_v38 = vadd.f32 %v17630_v21, %v17414_v23 }
0x1c62   : > { %v17708_v2 = vadd.f32 %v17629_v12, %v26449_v1 }
0x1c63   : > { %17729 = vst [vmem:[%s22973_s0 + $0x18] sm:$0x77] %v17721_v48  ;;  %v17709_v24 = vadd.f32 %v17631_v38, %v26450_v42  ;;  %v17699_v20 = vpop.f32.mrb[86].mxu1 }
0x1c64   : > { %v17700_v35 = vadd.f32 %v17699_v20, %v17414_v23  ;;  %v17701_v50 = vpop.f32.mrb[87].mxu1 }
0x1c65   : > { %v17722_v30 = vcombine.low %v17708_v2, %v17709_v24  ;;  %v17702_v18 = vadd.f32 %v17701_v50, %v17414_v23 }
0x1c66   : > { %v17710_v54 = vadd.f32 %v17700_v35, %v26451_v4 }
0x1c67   : > { %17730 = vst [vmem:[%s22973_s0 + $0x20] sm:$0x77] %v17722_v30  ;;  %v17711_v5 = vadd.f32 %v17702_v18, %v26452_v3 }
0x1c69   : > { %v17723_v25 = vcombine.low %v17710_v54, %v17711_v5 }
0x1c6b   : > { %17731 = vst [vmem:[%s22973_s0 + $0x28] sm:$0x77] %v17723_v25 }
0x1c6c PF: > { %s26453_s6 = sld [smem:[#allocation3_spill]] }
0x1c72   : > { %s27_s24 = sadd.s32 1, %s26453_s6  }
0x1c73   : > { %p24_p4 = scmp.ge.s32.totalorder %s27_s24, 4  }
0x1c75   :  { %26 = sbr.rel (!%p24_p4) target bundleno = 18 (0x12), region = 136 }

</bundles_post_ra>
